<compile_context>
chip_gen: v5e
topology: v5e:2x2
jax: 0.10.0
libtpu: 0.0.40
codegen_flags: <defaults>
</compile_context>

<pallas_src>
import jax
import jax.numpy as jnp
from jax.experimental import pallas as pl
from jax.experimental.pallas import tpu as pltpu

H = 768        # roberta hidden size (fixed by module: Linear(768, 64))
D1 = 64        # l1 / l2 output
F_IN = 105     # fc1 input  (fixed by module: Linear(105, 128))
F_IN_PAD = 128 # lane-dense padded fc1 input width
F_MID = 128    # fc1 output
F_OUT = 64     # fc2 output
N_CLS = 2      # head output
N_PAD = 128    # lane-dense padded head output width
VOCAB = 100    # toy embedding-table rows
V_PAD = 128    # lane-dense padded vocab (histogram contraction dim)
LN_EPS = 1e-5


def _layernorm(x, gamma, beta):
    mu = jnp.mean(x, axis=-1, keepdims=True)
    var = jnp.mean((x - mu) ** 2, axis=-1, keepdims=True)
    return (x - mu) * jax.lax.rsqrt(var + LN_EPS) * gamma + beta


def _classifier_kernel(
    hist1_ref, hist2_ref, feats_ref,
    tab1_ref, tab2_ref,
    wp1_ref, bp1_ref, wl1_ref, bl1_ref, g1_ref, be1_ref,
    wp2_ref, bp2_ref, wl2_ref, bl2_ref, g2_ref, be2_ref,
    wfc1_ref, bfc1_ref, wfc2_ref, bfc2_ref,
    wh1_ref, wh2_ref, wh3_ref, bhead_ref,
    out_ref,
):
    def branch(hist_ref, tab_ref, wp_ref, bp_ref, wl_ref, bl_ref, g_ref, be_ref):
        # masked mean of token embeddings == histogram @ table (bf16 MXU, f32 acc)
        pooled_in = jnp.dot(hist_ref[...].astype(jnp.bfloat16), tab_ref[...],
                            preferred_element_type=jnp.float32)          # (tb, 768)
        pooled = jnp.tanh(
            jnp.dot(pooled_in.astype(jnp.bfloat16), wp_ref[...],
                    preferred_element_type=jnp.float32) + bp_ref[...])   # pooler
        h = jnp.dot(pooled, wl_ref[...],
                    preferred_element_type=jnp.float32) + bl_ref[...]    # l1 / l2
        return jnp.tanh(_layernorm(h, g_ref[...], be_ref[...]))          # bn + tanh

    h1 = branch(hist1_ref, tab1_ref, wp1_ref, bp1_ref, wl1_ref, bl1_ref,
                g1_ref, be1_ref)
    h2 = branch(hist2_ref, tab2_ref, wp2_ref, bp2_ref, wl2_ref, bl2_ref,
                g2_ref, be2_ref)

    # ---- branch 3: features -> fc1 -> relu -> fc2 -> relu -------------------
    f = feats_ref[...]                                                   # (tb, 128)
    f = jnp.maximum(
        jnp.dot(f, wfc1_ref[...], preferred_element_type=jnp.float32)
        + bfc1_ref[...], 0.0)
    f = jnp.maximum(
        jnp.dot(f, wfc2_ref[...], preferred_element_type=jnp.float32)
        + bfc2_ref[...], 0.0)                                            # (tb, 64)

    # ---- head: sum of three lane-dense (tb,64)@(64,128) dots (no concat) ----
    out_ref[...] = (
        jnp.dot(h1, wh1_ref[...], preferred_element_type=jnp.float32)
        + jnp.dot(h2, wh2_ref[...], preferred_element_type=jnp.float32)
        + jnp.dot(f, wh3_ref[...], preferred_element_type=jnp.float32)
        + bhead_ref[...])                                                # (tb, 128)


def init_params(key):
    ks = jax.random.split(key, 16)
    s = 0.02
    return {
        # branch-1 pooler (stand-in for roberta #1 pooled-output path) — bf16
        "wp1": (jax.random.normal(ks[0], (H, H), jnp.float32) * s).astype(jnp.bfloat16),
        "bp1": jnp.zeros((1, H), jnp.float32),
        "wl1": jax.random.normal(ks[1], (H, D1), jnp.float32) * s,
        "bl1": jax.random.normal(ks[2], (1, D1), jnp.float32) * s,
        "g1": jnp.ones((1, D1), jnp.float32),
        "be1": jnp.zeros((1, D1), jnp.float32),
        # branch-2 pooler (roberta #2) — bf16
        "wp2": (jax.random.normal(ks[3], (H, H), jnp.float32) * s).astype(jnp.bfloat16),
        "bp2": jnp.zeros((1, H), jnp.float32),
        "wl2": jax.random.normal(ks[4], (H, D1), jnp.float32) * s,
        "bl2": jax.random.normal(ks[5], (1, D1), jnp.float32) * s,
        "g2": jnp.ones((1, D1), jnp.float32),
        "be2": jnp.zeros((1, D1), jnp.float32),
        # feature MLP
        "wfc1": jax.random.normal(ks[6], (F_IN, F_MID), jnp.float32) * s,
        "bfc1": jax.random.normal(ks[7], (1, F_MID), jnp.float32) * s,
        "wfc2": jax.random.normal(ks[8], (F_MID, F_OUT), jnp.float32) * s,
        "bfc2": jax.random.normal(ks[9], (1, F_OUT), jnp.float32) * s,
        # classification head over concat of the three 64-dim branches
        "whead": jax.random.normal(ks[10], (3 * D1, N_CLS), jnp.float32) * s,
        "bhead": jax.random.normal(ks[11], (1, N_CLS), jnp.float32) * s,
        # token embedding tables (masked mean-pool collapses to hist @ table)
        "emb_table1": (jax.random.normal(ks[12], (VOCAB, H), jnp.float32) * s).astype(jnp.bfloat16),
        "emb_table2": (jax.random.normal(ks[13], (VOCAB, H), jnp.float32) * s).astype(jnp.bfloat16),
    }


def _pick_batch_tile(b):
    """Largest multiple of 8 that divides B, <= 128, giving >=2 grid steps
    when B permits (keeps both v7x TensorCores busy). Falls back to full B."""
    if b % 8 != 0 or b <= 8:
        return b
    cap = min(128, max(8, b // 2))
    t = (cap // 8) * 8
    while t >= 8:
        if b % t == 0:
            return t
        t -= 8
    return b


def _token_histogram(ids, mask):
    """hist[b, v] = sum over positions s with ids[b,s]==v of mask[b,s]/len(mask[b])."""
    m = mask.astype(jnp.float32)
    inv_len = 1.0 / jnp.maximum(jnp.sum(m, axis=-1, keepdims=True), 1.0)
    scale = m * inv_len                                       # (B, S)
    bsz = ids.shape[0]
    hist = jnp.zeros((bsz, V_PAD), jnp.float32)
    return hist.at[jnp.arange(bsz)[:, None], ids].add(scale)  # (B, V_PAD)


def _pad2(x, rows, cols, dtype):
    out = jnp.zeros((rows, cols), dtype)
    return out.at[: x.shape[0], : x.shape[1]].set(x.astype(dtype))


def roberta_classifier_forward(input_ids, attention_mask,
                               input_ids2, attention_mask2,
                               features, params):
    B = input_ids.shape[0]

    # Tiny per-row inputs (replace the (B,S,768) embedding stream entirely).
    hist1 = _token_histogram(input_ids, attention_mask)            # (B, 128) f32
    hist2 = _token_histogram(input_ids2, attention_mask2)          # (B, 128) f32
    feats_pad = _pad2(features, B, F_IN_PAD, jnp.float32)          # (B, 128) f32

    # Lane/sublane-friendly padded weights (zeros are mathematically inert).
    tab1_pad = _pad2(params["emb_table1"], V_PAD, H, jnp.bfloat16)
    tab2_pad = _pad2(params["emb_table2"], V_PAD, H, jnp.bfloat16)
    wfc1_pad = _pad2(params["wfc1"], F_IN_PAD, F_MID, jnp.float32)
    wh1 = _pad2(params["whead"][0 * D1:1 * D1], D1, N_PAD, jnp.float32)
    wh2 = _pad2(params["whead"][1 * D1:2 * D1], D1, N_PAD, jnp.float32)
    wh3 = _pad2(params["whead"][2 * D1:3 * D1], D1, N_PAD, jnp.float32)
    bhead_pad = _pad2(params["bhead"], 1, N_PAD, jnp.float32)

    tile_b = _pick_batch_tile(B)
    grid = (B // tile_b,)

    row_spec = pl.BlockSpec((tile_b, V_PAD), lambda b: (b, 0))
    feats_spec = pl.BlockSpec((tile_b, F_IN_PAD), lambda b: (b, 0))
    out_spec = pl.BlockSpec((tile_b, N_PAD), lambda b: (b, 0))

    def full_spec(arr):
        return pl.BlockSpec(arr.shape, lambda b: (0,) * arr.ndim)

    weight_ops = [
        tab1_pad, tab2_pad,
        params["wp1"], params["bp1"], params["wl1"], params["bl1"],
        params["g1"], params["be1"],
        params["wp2"], params["bp2"], params["wl2"], params["bl2"],
        params["g2"], params["be2"],
        wfc1_pad, params["bfc1"], params["wfc2"], params["bfc2"],
        wh1, wh2, wh3, bhead_pad,
    ]
    operands = [hist1, hist2, feats_pad] + weight_ops
    in_specs = [row_spec, row_spec, feats_spec] + [full_spec(w) for w in weight_ops]

    out_padded = pl.pallas_call(
        _classifier_kernel,
        out_shape=jax.ShapeDtypeStruct((B, N_PAD), jnp.float32),
        grid_spec=pltpu.PrefetchScalarGridSpec(
            num_scalar_prefetch=0,
            grid=grid,
            in_specs=in_specs,
            out_specs=out_spec,
        ),
        compiler_params=pltpu.CompilerParams(
            dimension_semantics=("parallel",),
            vmem_limit_bytes=32 * 1024 * 1024,   # ~3 MiB actually used; safe on v7x
        ),
    )(*operands)

    return out_padded[:, :N_CLS]


def reference_forward(input_ids, attention_mask, input_ids2, attention_mask2,
                      features, params):
    """Pure-JAX mirror of the kernel math (same bf16 casts), for checking."""
    def branch(table, ids, mask, wp, bp, wl, bl, g, be):
        hist = _token_histogram(ids, mask)[:, :VOCAB]
        pooled_in = jnp.dot(hist.astype(jnp.bfloat16), table,
                            preferred_element_type=jnp.float32)
        pooled = jnp.tanh(jnp.dot(pooled_in.astype(jnp.bfloat16), wp,
                                  preferred_element_type=jnp.float32) + bp)
        h = jnp.dot(pooled, wl, preferred_element_type=jnp.float32) + bl
        return jnp.tanh(_layernorm(h, g, be))

    h1 = branch(params["emb_table1"], input_ids, attention_mask,
                params["wp1"], params["bp1"], params["wl1"], params["bl1"],
                params["g1"], params["be1"])
    h2 = branch(params["emb_table2"], input_ids2, attention_mask2,
                params["wp2"], params["bp2"], params["wl2"], params["bl2"],
                params["g2"], params["be2"])
    f = features.astype(jnp.float32)
    f = jnp.maximum(jnp.dot(f, params["wfc1"]) + params["bfc1"], 0.0)
    f = jnp.maximum(jnp.dot(f, params["wfc2"]) + params["bfc2"], 0.0)
    cat = jnp.concatenate([h1, h2, f], axis=-1)
    return jnp.dot(cat, params["whead"]) + params["bhead"]


if __name__ == "__main__":
    key = jax.random.PRNGKey(0)
    k_par, k_id1, k_id2, k_feat = jax.random.split(key, 4)

    B, S = 2, 8  # small batch / sequence length
    params = init_params(k_par)

    input_ids = jax.random.randint(k_id1, (B, S), 0, VOCAB, dtype=jnp.int32)
    input_ids2 = jax.random.randint(k_id2, (B, S), 0, VOCAB, dtype=jnp.int32)
    attention_mask = jnp.ones((B, S), jnp.int32).at[1, S - 2:].set(0)
    attention_mask2 = jnp.ones((B, S), jnp.int32).at[0, S - 3:].set(0)
    features = jax.random.normal(k_feat, (B, F_IN), jnp.float32)

    out = roberta_classifier_forward(input_ids, attention_mask,
                                     input_ids2, attention_mask2,
                                     features, params)
    out = jax.block_until_ready(out)
    assert out.shape == (B, N_CLS), out.shape
    assert bool(jnp.all(jnp.isfinite(out))), "non-finite output"

    ref = reference_forward(input_ids, attention_mask,
                            input_ids2, attention_mask2, features, params)
    assert jnp.allclose(out, ref, atol=1e-2, rtol=1e-2), (out, ref)
    print("KERNEL_OK")
</pallas_src>

<mosaic_0001>
module attributes {stable_mosaic.version = 11 : i64} {
  func.func @_classifier_kernel(%arg0: i32, %arg1: memref<2x128xf32, #tpu.memory_space<vmem>>, %arg2: memref<2x128xf32, #tpu.memory_space<vmem>>, %arg3: memref<2x128xf32, #tpu.memory_space<vmem>>, %arg4: memref<128x768xbf16, #tpu.memory_space<vmem>>, %arg5: memref<128x768xbf16, #tpu.memory_space<vmem>>, %arg6: memref<768x768xbf16, #tpu.memory_space<vmem>>, %arg7: memref<1x768xf32, #tpu.memory_space<vmem>>, %arg8: memref<768x64xf32, #tpu.memory_space<vmem>>, %arg9: memref<1x64xf32, #tpu.memory_space<vmem>>, %arg10: memref<1x64xf32, #tpu.memory_space<vmem>>, %arg11: memref<1x64xf32, #tpu.memory_space<vmem>>, %arg12: memref<768x768xbf16, #tpu.memory_space<vmem>>, %arg13: memref<1x768xf32, #tpu.memory_space<vmem>>, %arg14: memref<768x64xf32, #tpu.memory_space<vmem>>, %arg15: memref<1x64xf32, #tpu.memory_space<vmem>>, %arg16: memref<1x64xf32, #tpu.memory_space<vmem>>, %arg17: memref<1x64xf32, #tpu.memory_space<vmem>>, %arg18: memref<128x128xf32, #tpu.memory_space<vmem>>, %arg19: memref<1x128xf32, #tpu.memory_space<vmem>>, %arg20: memref<128x64xf32, #tpu.memory_space<vmem>>, %arg21: memref<1x64xf32, #tpu.memory_space<vmem>>, %arg22: memref<64x128xf32, #tpu.memory_space<vmem>>, %arg23: memref<64x128xf32, #tpu.memory_space<vmem>>, %arg24: memref<64x128xf32, #tpu.memory_space<vmem>>, %arg25: memref<1x128xf32, #tpu.memory_space<vmem>>, %arg26: memref<2x128xf32, #tpu.memory_space<vmem>>) attributes {dimension_semantics = [#tpu.dimension_semantics<parallel>], iteration_bounds = array<i64: 1>, scalar_prefetch = 0 : i64, scratch_operands = 0 : i64, tpu.core_type = #tpu.core_type<tc>, window_params = [{transform_indices = @transform_0, window_bounds = array<i64: 2, 128>}, {transform_indices = @transform_1, window_bounds = array<i64: 2, 128>}, {transform_indices = @transform_2, window_bounds = array<i64: 2, 128>}, {pipeline_mode = #tpu.pipeline_mode<synchronous>, transform_indices = @transform_3, window_bounds = array<i64: 128, 768>}, {pipeline_mode = #tpu.pipeline_mode<synchronous>, transform_indices = @transform_4, window_bounds = array<i64: 128, 768>}, {pipeline_mode = #tpu.pipeline_mode<synchronous>, transform_indices = @transform_5, window_bounds = array<i64: 768, 768>}, {pipeline_mode = #tpu.pipeline_mode<synchronous>, transform_indices = @transform_6, window_bounds = array<i64: 1, 768>}, {pipeline_mode = #tpu.pipeline_mode<synchronous>, transform_indices = @transform_7, window_bounds = array<i64: 768, 64>}, {pipeline_mode = #tpu.pipeline_mode<synchronous>, transform_indices = @transform_8, window_bounds = array<i64: 1, 64>}, {pipeline_mode = #tpu.pipeline_mode<synchronous>, transform_indices = @transform_9, window_bounds = array<i64: 1, 64>}, {pipeline_mode = #tpu.pipeline_mode<synchronous>, transform_indices = @transform_10, window_bounds = array<i64: 1, 64>}, {pipeline_mode = #tpu.pipeline_mode<synchronous>, transform_indices = @transform_11, window_bounds = array<i64: 768, 768>}, {pipeline_mode = #tpu.pipeline_mode<synchronous>, transform_indices = @transform_12, window_bounds = array<i64: 1, 768>}, {pipeline_mode = #tpu.pipeline_mode<synchronous>, transform_indices = @transform_13, window_bounds = array<i64: 768, 64>}, {pipeline_mode = #tpu.pipeline_mode<synchronous>, transform_indices = @transform_14, window_bounds = array<i64: 1, 64>}, {pipeline_mode = #tpu.pipeline_mode<synchronous>, transform_indices = @transform_15, window_bounds = array<i64: 1, 64>}, {pipeline_mode = #tpu.pipeline_mode<synchronous>, transform_indices = @transform_16, window_bounds = array<i64: 1, 64>}, {pipeline_mode = #tpu.pipeline_mode<synchronous>, transform_indices = @transform_17, window_bounds = array<i64: 128, 128>}, {pipeline_mode = #tpu.pipeline_mode<synchronous>, transform_indices = @transform_18, window_bounds = array<i64: 1, 128>}, {pipeline_mode = #tpu.pipeline_mode<synchronous>, transform_indices = @transform_19, window_bounds = array<i64: 128, 64>}, {pipeline_mode = #tpu.pipeline_mode<synchronous>, transform_indices = @transform_20, window_bounds = array<i64: 1, 64>}, {pipeline_mode = #tpu.pipeline_mode<synchronous>, transform_indices = @transform_21, window_bounds = array<i64: 64, 128>}, {pipeline_mode = #tpu.pipeline_mode<synchronous>, transform_indices = @transform_22, window_bounds = array<i64: 64, 128>}, {pipeline_mode = #tpu.pipeline_mode<synchronous>, transform_indices = @transform_23, window_bounds = array<i64: 64, 128>}, {pipeline_mode = #tpu.pipeline_mode<synchronous>, transform_indices = @transform_24, window_bounds = array<i64: 1, 128>}, {transform_indices = @transform_25, window_bounds = array<i64: 2, 128>}]} {
    %c0 = arith.constant 0 : index
    %c0_0 = arith.constant 0 : index
    %0 = vector.load %arg1[%c0, %c0_0] : memref<2x128xf32, #tpu.memory_space<vmem>>, vector<2x128xf32>
    %1 = arith.truncf %0 : vector<2x128xf32> to vector<2x128xbf16>
    %c0_1 = arith.constant 0 : index
    %c0_2 = arith.constant 0 : index
    %2 = vector.load %arg4[%c0_1, %c0_2] : memref<128x768xbf16, #tpu.memory_space<vmem>>, vector<128x768xbf16>
    %cst = arith.constant dense<0.000000e+00> : vector<2x768xf32>
    %3 = tpu.matmul %1, %2, %cst {dimension_numbers = #tpu.dot_dimension_numbers<[1], [0], [0], [1], [0, 0, 1, 1], [], []>} : vector<2x128xbf16>, vector<128x768xbf16>, vector<2x768xf32> -> vector<2x768xf32>
    %4 = arith.truncf %3 : vector<2x768xf32> to vector<2x768xbf16>
    %c0_3 = arith.constant 0 : index
    %c0_4 = arith.constant 0 : index
    %5 = vector.load %arg6[%c0_3, %c0_4] : memref<768x768xbf16, #tpu.memory_space<vmem>>, vector<768x768xbf16>
    %cst_5 = arith.constant dense<0.000000e+00> : vector<2x768xf32>
    %6 = tpu.matmul %4, %5, %cst_5 {dimension_numbers = #tpu.dot_dimension_numbers<[1], [0], [0], [1], [0, 0, 1, 1], [], []>} : vector<2x768xbf16>, vector<768x768xbf16>, vector<2x768xf32> -> vector<2x768xf32>
    %c0_6 = arith.constant 0 : index
    %c0_7 = arith.constant 0 : index
    %7 = vector.load %arg7[%c0_6, %c0_7] : memref<1x768xf32, #tpu.memory_space<vmem>>, vector<1x768xf32>
    %8 = vector.broadcast %7 : vector<1x768xf32> to vector<2x768xf32>
    %9 = arith.addf %6, %8 : vector<2x768xf32>
    %10 = math.tanh %9 : vector<2x768xf32>
    %c0_8 = arith.constant 0 : index
    %c0_9 = arith.constant 0 : index
    %11 = vector.load %arg8[%c0_8, %c0_9] : memref<768x64xf32, #tpu.memory_space<vmem>>, vector<768x64xf32>
    %cst_10 = arith.constant dense<0.000000e+00> : vector<2x64xf32>
    %12 = tpu.matmul %10, %11, %cst_10 {dimension_numbers = #tpu.dot_dimension_numbers<[1], [0], [0], [1], [0, 0, 1, 1], [], []>} : vector<2x768xf32>, vector<768x64xf32>, vector<2x64xf32> -> vector<2x64xf32>
    %c0_11 = arith.constant 0 : index
    %c0_12 = arith.constant 0 : index
    %13 = vector.load %arg9[%c0_11, %c0_12] : memref<1x64xf32, #tpu.memory_space<vmem>>, vector<1x64xf32>
    %14 = vector.broadcast %13 : vector<1x64xf32> to vector<2x64xf32>
    %15 = arith.addf %12, %14 : vector<2x64xf32>
    %c0_13 = arith.constant 0 : index
    %c0_14 = arith.constant 0 : index
    %16 = vector.load %arg10[%c0_13, %c0_14] : memref<1x64xf32, #tpu.memory_space<vmem>>, vector<1x64xf32>
    %c0_15 = arith.constant 0 : index
    %c0_16 = arith.constant 0 : index
    %17 = vector.load %arg11[%c0_15, %c0_16] : memref<1x64xf32, #tpu.memory_space<vmem>>, vector<1x64xf32>
    %cst_17 = arith.constant dense<0.000000e+00> : vector<2xf32>
    %18 = vector.multi_reduction <add>, %15, %cst_17 [1] : vector<2x64xf32> to vector<2xf32>
    %19 = vector.shape_cast %18 : vector<2xf32> to vector<2x1xf32>
    %cst_18 = arith.constant 6.400000e+01 : f32
    %20 = vector.broadcast %cst_18 : f32 to vector<2x1xf32>
    %21 = arith.divf %19, %20 : vector<2x1xf32>
    %22 = vector.broadcast %21 : vector<2x1xf32> to vector<2x64xf32>
    %23 = arith.subf %15, %22 : vector<2x64xf32>
    %24 = arith.mulf %23, %23 : vector<2x64xf32>
    %cst_19 = arith.constant dense<0.000000e+00> : vector<2xf32>
    %25 = vector.multi_reduction <add>, %24, %cst_19 [1] : vector<2x64xf32> to vector<2xf32>
    %26 = vector.shape_cast %25 : vector<2xf32> to vector<2x1xf32>
    %cst_20 = arith.constant 6.400000e+01 : f32
    %27 = vector.broadcast %cst_20 : f32 to vector<2x1xf32>
    %28 = arith.divf %26, %27 : vector<2x1xf32>
    %29 = vector.broadcast %21 : vector<2x1xf32> to vector<2x64xf32>
    %30 = arith.subf %15, %29 : vector<2x64xf32>
    %cst_21 = arith.constant 9.99999974E-6 : f32
    %31 = vector.broadcast %cst_21 : f32 to vector<2x1xf32>
    %32 = arith.addf %28, %31 : vector<2x1xf32>
    %33 = math.rsqrt %32 : vector<2x1xf32>
    %34 = vector.broadcast %33 : vector<2x1xf32> to vector<2x64xf32>
    %35 = arith.mulf %30, %34 : vector<2x64xf32>
    %36 = vector.broadcast %16 : vector<1x64xf32> to vector<2x64xf32>
    %37 = arith.mulf %35, %36 : vector<2x64xf32>
    %38 = vector.broadcast %17 : vector<1x64xf32> to vector<2x64xf32>
    %39 = arith.addf %37, %38 : vector<2x64xf32>
    %40 = math.tanh %39 : vector<2x64xf32>
    %c0_22 = arith.constant 0 : index
    %c0_23 = arith.constant 0 : index
    %41 = vector.load %arg2[%c0_22, %c0_23] : memref<2x128xf32, #tpu.memory_space<vmem>>, vector<2x128xf32>
    %42 = arith.truncf %41 : vector<2x128xf32> to vector<2x128xbf16>
    %c0_24 = arith.constant 0 : index
    %c0_25 = arith.constant 0 : index
    %43 = vector.load %arg5[%c0_24, %c0_25] : memref<128x768xbf16, #tpu.memory_space<vmem>>, vector<128x768xbf16>
    %cst_26 = arith.constant dense<0.000000e+00> : vector<2x768xf32>
    %44 = tpu.matmul %42, %43, %cst_26 {dimension_numbers = #tpu.dot_dimension_numbers<[1], [0], [0], [1], [0, 0, 1, 1], [], []>} : vector<2x128xbf16>, vector<128x768xbf16>, vector<2x768xf32> -> vector<2x768xf32>
    %45 = arith.truncf %44 : vector<2x768xf32> to vector<2x768xbf16>
    %c0_27 = arith.constant 0 : index
    %c0_28 = arith.constant 0 : index
    %46 = vector.load %arg12[%c0_27, %c0_28] : memref<768x768xbf16, #tpu.memory_space<vmem>>, vector<768x768xbf16>
    %cst_29 = arith.constant dense<0.000000e+00> : vector<2x768xf32>
    %47 = tpu.matmul %45, %46, %cst_29 {dimension_numbers = #tpu.dot_dimension_numbers<[1], [0], [0], [1], [0, 0, 1, 1], [], []>} : vector<2x768xbf16>, vector<768x768xbf16>, vector<2x768xf32> -> vector<2x768xf32>
    %c0_30 = arith.constant 0 : index
    %c0_31 = arith.constant 0 : index
    %48 = vector.load %arg13[%c0_30, %c0_31] : memref<1x768xf32, #tpu.memory_space<vmem>>, vector<1x768xf32>
    %49 = vector.broadcast %48 : vector<1x768xf32> to vector<2x768xf32>
    %50 = arith.addf %47, %49 : vector<2x768xf32>
    %51 = math.tanh %50 : vector<2x768xf32>
    %c0_32 = arith.constant 0 : index
    %c0_33 = arith.constant 0 : index
    %52 = vector.load %arg14[%c0_32, %c0_33] : memref<768x64xf32, #tpu.memory_space<vmem>>, vector<768x64xf32>
    %cst_34 = arith.constant dense<0.000000e+00> : vector<2x64xf32>
    %53 = tpu.matmul %51, %52, %cst_34 {dimension_numbers = #tpu.dot_dimension_numbers<[1], [0], [0], [1], [0, 0, 1, 1], [], []>} : vector<2x768xf32>, vector<768x64xf32>, vector<2x64xf32> -> vector<2x64xf32>
    %c0_35 = arith.constant 0 : index
    %c0_36 = arith.constant 0 : index
    %54 = vector.load %arg15[%c0_35, %c0_36] : memref<1x64xf32, #tpu.memory_space<vmem>>, vector<1x64xf32>
    %55 = vector.broadcast %54 : vector<1x64xf32> to vector<2x64xf32>
    %56 = arith.addf %53, %55 : vector<2x64xf32>
    %c0_37 = arith.constant 0 : index
    %c0_38 = arith.constant 0 : index
    %57 = vector.load %arg16[%c0_37, %c0_38] : memref<1x64xf32, #tpu.memory_space<vmem>>, vector<1x64xf32>
    %c0_39 = arith.constant 0 : index
    %c0_40 = arith.constant 0 : index
    %58 = vector.load %arg17[%c0_39, %c0_40] : memref<1x64xf32, #tpu.memory_space<vmem>>, vector<1x64xf32>
    %cst_41 = arith.constant dense<0.000000e+00> : vector<2xf32>
    %59 = vector.multi_reduction <add>, %56, %cst_41 [1] : vector<2x64xf32> to vector<2xf32>
    %60 = vector.shape_cast %59 : vector<2xf32> to vector<2x1xf32>
    %cst_42 = arith.constant 6.400000e+01 : f32
    %61 = vector.broadcast %cst_42 : f32 to vector<2x1xf32>
    %62 = arith.divf %60, %61 : vector<2x1xf32>
    %63 = vector.broadcast %62 : vector<2x1xf32> to vector<2x64xf32>
    %64 = arith.subf %56, %63 : vector<2x64xf32>
    %65 = arith.mulf %64, %64 : vector<2x64xf32>
    %cst_43 = arith.constant dense<0.000000e+00> : vector<2xf32>
    %66 = vector.multi_reduction <add>, %65, %cst_43 [1] : vector<2x64xf32> to vector<2xf32>
    %67 = vector.shape_cast %66 : vector<2xf32> to vector<2x1xf32>
    %cst_44 = arith.constant 6.400000e+01 : f32
    %68 = vector.broadcast %cst_44 : f32 to vector<2x1xf32>
    %69 = arith.divf %67, %68 : vector<2x1xf32>
    %70 = vector.broadcast %62 : vector<2x1xf32> to vector<2x64xf32>
    %71 = arith.subf %56, %70 : vector<2x64xf32>
    %cst_45 = arith.constant 9.99999974E-6 : f32
    %72 = vector.broadcast %cst_45 : f32 to vector<2x1xf32>
    %73 = arith.addf %69, %72 : vector<2x1xf32>
    %74 = math.rsqrt %73 : vector<2x1xf32>
    %75 = vector.broadcast %74 : vector<2x1xf32> to vector<2x64xf32>
    %76 = arith.mulf %71, %75 : vector<2x64xf32>
    %77 = vector.broadcast %57 : vector<1x64xf32> to vector<2x64xf32>
    %78 = arith.mulf %76, %77 : vector<2x64xf32>
    %79 = vector.broadcast %58 : vector<1x64xf32> to vector<2x64xf32>
    %80 = arith.addf %78, %79 : vector<2x64xf32>
    %81 = math.tanh %80 : vector<2x64xf32>
    %c0_46 = arith.constant 0 : index
    %c0_47 = arith.constant 0 : index
    %82 = vector.load %arg3[%c0_46, %c0_47] : memref<2x128xf32, #tpu.memory_space<vmem>>, vector<2x128xf32>
    %c0_48 = arith.constant 0 : index
    %c0_49 = arith.constant 0 : index
    %83 = vector.load %arg18[%c0_48, %c0_49] : memref<128x128xf32, #tpu.memory_space<vmem>>, vector<128x128xf32>
    %cst_50 = arith.constant dense<0.000000e+00> : vector<2x128xf32>
    %84 = tpu.matmul %82, %83, %cst_50 {dimension_numbers = #tpu.dot_dimension_numbers<[1], [0], [0], [1], [0, 0, 1, 1], [], []>} : vector<2x128xf32>, vector<128x128xf32>, vector<2x128xf32> -> vector<2x128xf32>
    %c0_51 = arith.constant 0 : index
    %c0_52 = arith.constant 0 : index
    %85 = vector.load %arg19[%c0_51, %c0_52] : memref<1x128xf32, #tpu.memory_space<vmem>>, vector<1x128xf32>
    %86 = vector.broadcast %85 : vector<1x128xf32> to vector<2x128xf32>
    %87 = arith.addf %84, %86 : vector<2x128xf32>
    %cst_53 = arith.constant 0.000000e+00 : f32
    %88 = vector.broadcast %cst_53 : f32 to vector<2x128xf32>
    %89 = arith.maximumf %87, %88 : vector<2x128xf32>
    %c0_54 = arith.constant 0 : index
    %c0_55 = arith.constant 0 : index
    %90 = vector.load %arg20[%c0_54, %c0_55] : memref<128x64xf32, #tpu.memory_space<vmem>>, vector<128x64xf32>
    %cst_56 = arith.constant dense<0.000000e+00> : vector<2x64xf32>
    %91 = tpu.matmul %89, %90, %cst_56 {dimension_numbers = #tpu.dot_dimension_numbers<[1], [0], [0], [1], [0, 0, 1, 1], [], []>} : vector<2x128xf32>, vector<128x64xf32>, vector<2x64xf32> -> vector<2x64xf32>
    %c0_57 = arith.constant 0 : index
    %c0_58 = arith.constant 0 : index
    %92 = vector.load %arg21[%c0_57, %c0_58] : memref<1x64xf32, #tpu.memory_space<vmem>>, vector<1x64xf32>
    %93 = vector.broadcast %92 : vector<1x64xf32> to vector<2x64xf32>
    %94 = arith.addf %91, %93 : vector<2x64xf32>
    %cst_59 = arith.constant 0.000000e+00 : f32
    %95 = vector.broadcast %cst_59 : f32 to vector<2x64xf32>
    %96 = arith.maximumf %94, %95 : vector<2x64xf32>
    %c0_60 = arith.constant 0 : index
    %c0_61 = arith.constant 0 : index
    %97 = vector.load %arg22[%c0_60, %c0_61] : memref<64x128xf32, #tpu.memory_space<vmem>>, vector<64x128xf32>
    %cst_62 = arith.constant dense<0.000000e+00> : vector<2x128xf32>
    %98 = tpu.matmul %40, %97, %cst_62 {dimension_numbers = #tpu.dot_dimension_numbers<[1], [0], [0], [1], [0, 0, 1, 1], [], []>} : vector<2x64xf32>, vector<64x128xf32>, vector<2x128xf32> -> vector<2x128xf32>
    %c0_63 = arith.constant 0 : index
    %c0_64 = arith.constant 0 : index
    %99 = vector.load %arg23[%c0_63, %c0_64] : memref<64x128xf32, #tpu.memory_space<vmem>>, vector<64x128xf32>
    %cst_65 = arith.constant dense<0.000000e+00> : vector<2x128xf32>
    %100 = tpu.matmul %81, %99, %cst_65 {dimension_numbers = #tpu.dot_dimension_numbers<[1], [0], [0], [1], [0, 0, 1, 1], [], []>} : vector<2x64xf32>, vector<64x128xf32>, vector<2x128xf32> -> vector<2x128xf32>
    %101 = arith.addf %98, %100 : vector<2x128xf32>
    %c0_66 = arith.constant 0 : index
    %c0_67 = arith.constant 0 : index
    %102 = vector.load %arg24[%c0_66, %c0_67] : memref<64x128xf32, #tpu.memory_space<vmem>>, vector<64x128xf32>
    %cst_68 = arith.constant dense<0.000000e+00> : vector<2x128xf32>
    %103 = tpu.matmul %96, %102, %cst_68 {dimension_numbers = #tpu.dot_dimension_numbers<[1], [0], [0], [1], [0, 0, 1, 1], [], []>} : vector<2x64xf32>, vector<64x128xf32>, vector<2x128xf32> -> vector<2x128xf32>
    %104 = arith.addf %101, %103 : vector<2x128xf32>
    %c0_69 = arith.constant 0 : index
    %c0_70 = arith.constant 0 : index
    %105 = vector.load %arg25[%c0_69, %c0_70] : memref<1x128xf32, #tpu.memory_space<vmem>>, vector<1x128xf32>
    %106 = vector.broadcast %105 : vector<1x128xf32> to vector<2x128xf32>
    %107 = arith.addf %104, %106 : vector<2x128xf32>
    %c0_71 = arith.constant 0 : index
    %c0_72 = arith.constant 0 : index
    %108 = vector.load %arg26[%c0_71, %c0_72] : memref<2x128xf32, #tpu.memory_space<vmem>>, vector<2x128xf32>
    tpu.vector_store %arg26[%c0_71, %c0_72], %107 {strides = array<i32>} : memref<2x128xf32, #tpu.memory_space<vmem>>, vector<2x128xf32>,
    return
  }
  func.func @transform_0(%arg0: i32) -> (i32, i32) {
    %c0_i32 = arith.constant 0 : i32
    %c0_i32_0 = arith.constant 0 : i32
    return %arg0, %c0_i32 : i32, i32
  }
  func.func @transform_1(%arg0: i32) -> (i32, i32) {
    %c0_i32 = arith.constant 0 : i32
    %c0_i32_0 = arith.constant 0 : i32
    return %arg0, %c0_i32 : i32, i32
  }
  func.func @transform_2(%arg0: i32) -> (i32, i32) {
    %c0_i32 = arith.constant 0 : i32
    %c0_i32_0 = arith.constant 0 : i32
    return %arg0, %c0_i32 : i32, i32
  }
  func.func @transform_3(%arg0: i32) -> (i32, i32) {
    %c0_i32 = arith.constant 0 : i32
    %c0_i32_0 = arith.constant 0 : i32
    %c0_i32_1 = arith.constant 0 : i32
    return %c0_i32, %c0_i32_0 : i32, i32
  }
  func.func @transform_4(%arg0: i32) -> (i32, i32) {
    %c0_i32 = arith.constant 0 : i32
    %c0_i32_0 = arith.constant 0 : i32
    %c0_i32_1 = arith.constant 0 : i32
    return %c0_i32, %c0_i32_0 : i32, i32
  }
  func.func @transform_5(%arg0: i32) -> (i32, i32) {
    %c0_i32 = arith.constant 0 : i32
    %c0_i32_0 = arith.constant 0 : i32
    %c0_i32_1 = arith.constant 0 : i32
    return %c0_i32, %c0_i32_0 : i32, i32
  }
  func.func @transform_6(%arg0: i32) -> (i32, i32) {
    %c0_i32 = arith.constant 0 : i32
    %c0_i32_0 = arith.constant 0 : i32
    %c0_i32_1 = arith.constant 0 : i32
    return %c0_i32, %c0_i32_0 : i32, i32
  }
  func.func @transform_7(%arg0: i32) -> (i32, i32) {
    %c0_i32 = arith.constant 0 : i32
    %c0_i32_0 = arith.constant 0 : i32
    %c0_i32_1 = arith.constant 0 : i32
    return %c0_i32, %c0_i32_0 : i32, i32
  }
  func.func @transform_8(%arg0: i32) -> (i32, i32) {
    %c0_i32 = arith.constant 0 : i32
    %c0_i32_0 = arith.constant 0 : i32
    %c0_i32_1 = arith.constant 0 : i32
    return %c0_i32, %c0_i32_0 : i32, i32
  }
  func.func @transform_9(%arg0: i32) -> (i32, i32) {
    %c0_i32 = arith.constant 0 : i32
    %c0_i32_0 = arith.constant 0 : i32
    %c0_i32_1 = arith.constant 0 : i32
    return %c0_i32, %c0_i32_0 : i32, i32
  }
  func.func @transform_10(%arg0: i32) -> (i32, i32) {
    %c0_i32 = arith.constant 0 : i32
    %c0_i32_0 = arith.constant 0 : i32
    %c0_i32_1 = arith.constant 0 : i32
    return %c0_i32, %c0_i32_0 : i32, i32
  }
  func.func @transform_11(%arg0: i32) -> (i32, i32) {
    %c0_i32 = arith.constant 0 : i32
    %c0_i32_0 = arith.constant 0 : i32
    %c0_i32_1 = arith.constant 0 : i32
    return %c0_i32, %c0_i32_0 : i32, i32
  }
  func.func @transform_12(%arg0: i32) -> (i32, i32) {
    %c0_i32 = arith.constant 0 : i32
    %c0_i32_0 = arith.constant 0 : i32
    %c0_i32_1 = arith.constant 0 : i32
    return %c0_i32, %c0_i32_0 : i32, i32
  }
  func.func @transform_13(%arg0: i32) -> (i32, i32) {
    %c0_i32 = arith.constant 0 : i32
    %c0_i32_0 = arith.constant 0 : i32
    %c0_i32_1 = arith.constant 0 : i32
    return %c0_i32, %c0_i32_0 : i32, i32
  }
  func.func @transform_14(%arg0: i32) -> (i32, i32) {
    %c0_i32 = arith.constant 0 : i32
    %c0_i32_0 = arith.constant 0 : i32
    %c0_i32_1 = arith.constant 0 : i32
    return %c0_i32, %c0_i32_0 : i32, i32
  }
  func.func @transform_15(%arg0: i32) -> (i32, i32) {
    %c0_i32 = arith.constant 0 : i32
    %c0_i32_0 = arith.constant 0 : i32
    %c0_i32_1 = arith.constant 0 : i32
    return %c0_i32, %c0_i32_0 : i32, i32
  }
  func.func @transform_16(%arg0: i32) -> (i32, i32) {
    %c0_i32 = arith.constant 0 : i32
    %c0_i32_0 = arith.constant 0 : i32
    %c0_i32_1 = arith.constant 0 : i32
    return %c0_i32, %c0_i32_0 : i32, i32
  }
  func.func @transform_17(%arg0: i32) -> (i32, i32) {
    %c0_i32 = arith.constant 0 : i32
    %c0_i32_0 = arith.constant 0 : i32
    %c0_i32_1 = arith.constant 0 : i32
    return %c0_i32, %c0_i32_0 : i32, i32
  }
  func.func @transform_18(%arg0: i32) -> (i32, i32) {
    %c0_i32 = arith.constant 0 : i32
    %c0_i32_0 = arith.constant 0 : i32
    %c0_i32_1 = arith.constant 0 : i32
    return %c0_i32, %c0_i32_0 : i32, i32
  }
  func.func @transform_19(%arg0: i32) -> (i32, i32) {
    %c0_i32 = arith.constant 0 : i32
    %c0_i32_0 = arith.constant 0 : i32
    %c0_i32_1 = arith.constant 0 : i32
    return %c0_i32, %c0_i32_0 : i32, i32
  }
  func.func @transform_20(%arg0: i32) -> (i32, i32) {
    %c0_i32 = arith.constant 0 : i32
    %c0_i32_0 = arith.constant 0 : i32
    %c0_i32_1 = arith.constant 0 : i32
    return %c0_i32, %c0_i32_0 : i32, i32
  }
  func.func @transform_21(%arg0: i32) -> (i32, i32) {
    %c0_i32 = arith.constant 0 : i32
    %c0_i32_0 = arith.constant 0 : i32
    %c0_i32_1 = arith.constant 0 : i32
    return %c0_i32, %c0_i32_0 : i32, i32
  }
  func.func @transform_22(%arg0: i32) -> (i32, i32) {
    %c0_i32 = arith.constant 0 : i32
    %c0_i32_0 = arith.constant 0 : i32
    %c0_i32_1 = arith.constant 0 : i32
    return %c0_i32, %c0_i32_0 : i32, i32
  }
  func.func @transform_23(%arg0: i32) -> (i32, i32) {
    %c0_i32 = arith.constant 0 : i32
    %c0_i32_0 = arith.constant 0 : i32
    %c0_i32_1 = arith.constant 0 : i32
    return %c0_i32, %c0_i32_0 : i32, i32
  }
  func.func @transform_24(%arg0: i32) -> (i32, i32) {
    %c0_i32 = arith.constant 0 : i32
    %c0_i32_0 = arith.constant 0 : i32
    %c0_i32_1 = arith.constant 0 : i32
    return %c0_i32, %c0_i32_0 : i32, i32
  }
  func.func @transform_25(%arg0: i32) -> (i32, i32) {
    %c0_i32 = arith.constant 0 : i32
    %c0_i32_0 = arith.constant 0 : i32
    return %arg0, %c0_i32 : i32, i32
  }
}

</mosaic_0001>

<bundles_post_ra>
// kernel: tpu_custom_call.1
= control target key start
LH: loop header
LB: loop body
LE: loop exit
PB: predicated region body
PF: predicated region fallthrough
CT: control target
= control target key end

     0   :  { %s12812_s0 = inlined_call_operand.vmem [shape: f32[2,128], index: 0, kind: input, shape index: {}]   ;;  %s12813_s1 = inlined_call_operand.vmem [shape: f32[2,128], index: 1, kind: input, shape index: {}]   ;;  %s12814_s2 = inlined_call_operand.vmem [shape: f32[2,128], index: 2, kind: input, shape index: {}]   ;;  %s12815_s3 = inlined_call_operand.hbm [shape: bf16[128,768], index: 3, kind: input, shape index: {}]   ;;  %s12816_s4 = inlined_call_operand.hbm [shape: bf16[128,768], index: 4, kind: input, shape index: {}]   ;;  %s12817_s5 = inlined_call_operand.vmem [shape: bf16[768,768], index: 5, kind: input, shape index: {}]   ;;  %s12818_s6 = inlined_call_operand.vmem [shape: f32[1,768], index: 6, kind: input, shape index: {}]   ;;  %s12819_s7 = inlined_call_operand.vmem [shape: f32[768,64], index: 7, kind: input, shape index: {}]   ;;  %s12820_s8 = inlined_call_operand.vmem [shape: f32[1,64], index: 8, kind: input, shape index: {}]   ;;  %s12821_s9 = inlined_call_operand.vmem [shape: f32[1,64], index: 9, kind: input, shape index: {}]   ;;  %s12822_s10 = inlined_call_operand.hbm [shape: f32[1,64], index: 10, kind: input, shape index: {}]   ;;  %s12823_s11 = inlined_call_operand.hbm [shape: bf16[768,768], index: 11, kind: input, shape index: {}]   ;;  %s12824_s12 = inlined_call_operand.vmem [shape: f32[1,768], index: 12, kind: input, shape index: {}]   ;;  %s12825_s13 = inlined_call_operand.vmem [shape: f32[768,64], index: 13, kind: input, shape index: {}]   ;;  %s12826_s14 = inlined_call_operand.hbm [shape: f32[1,64], index: 14, kind: input, shape index: {}]   ;;  %s12827_s15 = inlined_call_operand.hbm [shape: f32[1,64], index: 15, kind: input, shape index: {}]   ;;  %s12828_s16 = inlined_call_operand.hbm [shape: f32[1,64], index: 16, kind: input, shape index: {}]   ;;  %s12829_s17 = inlined_call_operand.vmem [shape: f32[128,128], index: 17, kind: input, shape index: {}]   ;;  %s12830_s18 = inlined_call_operand.hbm [shape: f32[1,128], index: 18, kind: input, shape index: {}]   ;;  %s12831_s19 = inlined_call_operand.vmem [shape: f32[128,64], index: 19, kind: input, shape index: {}]   ;;  %s12832_s20 = inlined_call_operand.hbm [shape: f32[1,64], index: 20, kind: input, shape index: {}]   ;;  %s12833_s21 = inlined_call_operand.vmem [shape: f32[64,128], index: 21, kind: input, shape index: {}]   ;;  %s12834_s22 = inlined_call_operand.hbm [shape: f32[64,128], index: 22, kind: input, shape index: {}]   ;;  %s12835_s23 = inlined_call_operand.hbm [shape: f32[64,128], index: 23, kind: input, shape index: {}]   ;;  %s12836_s24 = inlined_call_operand.vmem [shape: f32[1,128], index: 24, kind: input, shape index: {}]   ;;  %s12837_s25 = inlined_call_operand.hbm [shape: f32[2,128], index: 25, kind: output, shape index: {}]  }
   0x1   :  { %12841 = sst [smem:[#allocation28_spill]] %s12812_s0 }
   0x2   :  { %12842 = sst [smem:[#allocation29_spill]] %s12813_s1 }
   0x3   :  { %12843 = sst [smem:[#allocation30_spill]] %s12814_s2 }
   0x4   :  { %12844 = sst [smem:[#allocation31_spill]] %s12815_s3 }
   0x5   :  { %12845 = sst [smem:[#allocation32_spill]] %s12816_s4 }
   0x6   :  { %12846 = sst [smem:[#allocation33_spill]] %s12817_s5 }
   0x7   :  { %12847 = sst [smem:[#allocation34_spill]] %s12818_s6 }
   0x8   :  { %12848 = sst [smem:[#allocation35_spill]] %s12819_s7 }
   0x9   :  { %12849 = sst [smem:[#allocation36_spill]] %s12820_s8 }
   0xa   :  { %12850 = sst [smem:[#allocation37_spill]] %s12821_s9 }
   0xb   :  { %30 = vsyncpa [#allocation3], 0 }
   0xc   :  { %31 = vsyncpa [#allocation6], 0 }
   0xd   :  { %32 = vsyncpa [#allocation9], 0 }
   0xe   :  { %33 = vsyncpa [#allocation12], 0 }
   0xf   :  { %34 = vsyncpa [#allocation15], 0 }
  0x10   :  { %35 = vsyncpa [#allocation18], 0 }
  0x11   :  { %36 = vsyncpa [#allocation4], 0  ;;  %s12851_s6 = sld [smem:[#allocation32_spill]]  ;;  %s9867_s7 = smov [#allocation5]  }
  0x12   :  { %s62_s3 = sshll.u32 %s9867_s7, 4  ;;  %s94_s8 = sshll.u32 %s12823_s11, 4  ;;  %s63_s3 = int_to_ptr.vmem [resolvable:$true] %s62_s3  ;;  %s95_s8 = int_to_ptr.hbm [resolvable:$true] %s94_s8 }
  0x13   :  { %s9868_s27 = smov 384   ;;  %s9869_s4 = smov 24  }
  0x14   :  { %s9870_s28 = smov [#allocation8]   ;;  %s123_s29 = sshll.u32 %s12827_s15, 4  ;;  %s124_s29 = int_to_ptr.hbm [resolvable:$true] %s123_s29 }
  0x15   :  { %s96_s9 = sshll.u32 %s9870_s28, 4  ;;  %s9871_s7 = smov [#allocation11]   ;;  %s97_s9 = int_to_ptr.vmem [resolvable:$true] %s96_s9 }
  0x16   :  { %102 = dma.hbm_to_vmem [thread:$0]  %s95_s8, 36864, %s97_s9, [#allocation9], %s9868_s27, %s9868_s27, %s9869_s4  }
  0x17   :  { %s60_s30 = sshll.u32 %s12851_s6, 4  ;;  %s147_s6 = sshll.u32 %s12830_s18, 4  ;;  %s61_s30 = int_to_ptr.hbm [resolvable:$true] %s60_s30  ;;  %s148_s6 = int_to_ptr.hbm [resolvable:$true] %s147_s6 }
  0x18   :  { %68 = dma.hbm_to_vmem [thread:$0]  %s61_s30, 6144, %s63_s3, [#allocation6], %s9868_s27, %s9868_s27, %s9869_s4  }
  0x19   :  { %s125_s26 = sshll.u32 %s9871_s7, 4  ;;  %s9872_s30 = smov [#allocation14]   ;;  %s126_s26 = int_to_ptr.vmem [resolvable:$true] %s125_s26 }
  0x1a   :  { %128 = dma.hbm_to_vmem [thread:$0]  %s124_s29, 16, %s126_s26, [#allocation12]  }
  0x1b   :  { %s149_s3 = sshll.u32 %s9872_s30, 4  ;;  %s172_s15 = sshll.u32 %s12834_s22, 4  ;;  %s150_s3 = int_to_ptr.vmem [resolvable:$true] %s149_s3  ;;  %s173_s15 = int_to_ptr.hbm [resolvable:$true] %s172_s15 }
  0x1c   :  { %152 = dma.hbm_to_vmem [thread:$0]  %s148_s6, 16, %s150_s3, [#allocation15]  }
  0x1d   :  { %s9873_s5 = smov [#allocation17]   ;;  %s12852_s18 = sld [smem:[#allocation31_spill]] }
  0x1e   :  { %s174_s8 = sshll.u32 %s9873_s5, 4  ;;  %s9874_s2 = smov 128   ;;  %s175_s8 = int_to_ptr.vmem [resolvable:$true] %s174_s8 }
  0x1f   :  { %s9875_s7 = smov 8   ;;  %s9876_s29 = smov [#allocation2]  }
  0x20   :  { %180 = dma.hbm_to_vmem [thread:$0]  %s173_s15, 1024, %s175_s8, [#allocation18], %s9874_s2, %s9874_s2, %s9875_s7  }
  0x21   :  { %s49_s26 = sshll.u32 %s9876_s29, 4  ;;  %s84_s6 = sshll.u32 %s12822_s10, 4  ;;  %s50_s26 = int_to_ptr.vmem [resolvable:$true] %s49_s26  ;;  %s85_s6 = int_to_ptr.hbm [resolvable:$true] %s84_s6 }
  0x22   :  { %s112_s28 = sshll.u32 %s12826_s14, 4  ;;  %s9877_s5 = smov [#allocation7]   ;;  %s113_s28 = int_to_ptr.hbm [resolvable:$true] %s112_s28 }
  0x23   :  { %s47_s11 = sshll.u32 %s12852_s18, 4  ;;  %s86_s9 = sshll.u32 %s9877_s5, 4  ;;  %s48_s11 = int_to_ptr.hbm [resolvable:$true] %s47_s11  ;;  %s87_s9 = int_to_ptr.vmem [resolvable:$true] %s86_s9 }
  0x24   :  { %55 = dma.hbm_to_vmem [thread:$0]  %s48_s11, 6144, %s50_s26, [#allocation3], %s9868_s27, %s9868_s27, %s9869_s4  }
  0x25   :  { %89 = dma.hbm_to_vmem [thread:$0]  %s85_s6, 16, %s87_s9, [#allocation6]  }
  0x26   :  { %s9878_s15 = smov [#allocation10]   ;;  %s134_s10 = sshll.u32 %s12828_s16, 4  ;;  %s135_s10 = int_to_ptr.hbm [resolvable:$true] %s134_s10 }
  0x27   :  { %s114_s8 = sshll.u32 %s9878_s15, 4  ;;  %s160_s4 = sshll.u32 %s12832_s20, 4  ;;  %s115_s8 = int_to_ptr.vmem [resolvable:$true] %s114_s8  ;;  %s161_s4 = int_to_ptr.hbm [resolvable:$true] %s160_s4 }
  0x28   :  { %117 = dma.hbm_to_vmem [thread:$0]  %s113_s28, 16, %s115_s8, [#allocation9]  }
  0x29   :  { %s9879_s11 = smov [#allocation13]   ;;  %s9880_s26 = smov [#allocation16]  }
  0x2a   :  { %s136_s14 = sshll.u32 %s9879_s11, 4  ;;  %s162_s22 = sshll.u32 %s9880_s26, 4  ;;  %s137_s14 = int_to_ptr.vmem [resolvable:$true] %s136_s14  ;;  %s163_s22 = int_to_ptr.vmem [resolvable:$true] %s162_s22 }
  0x2b   :  { %139 = dma.hbm_to_vmem [thread:$0]  %s135_s10, 16, %s137_s14, [#allocation12]  }
  0x2c   :  { %s185_s3 = sshll.u32 %s12835_s23, 4  ;;  %s9881_s16 = smov [#allocation19]   ;;  %s186_s3 = int_to_ptr.hbm [resolvable:$true] %s185_s3 }
  0x2d   :  { %165 = dma.hbm_to_vmem [thread:$0]  %s161_s4, 16, %s163_s22, [#allocation15]  }
  0x2e   :  { %s187_s1 = sshll.u32 %s9881_s16, 4  ;;  %s188_s1 = int_to_ptr.vmem [resolvable:$true] %s187_s1 }
  0x2f   :  { %193 = dma.hbm_to_vmem [thread:$0]  %s186_s3, 1024, %s188_s1, [#allocation18], %s9874_s2, %s9874_s2, %s9875_s7  }
  0x30   :  { %9853 = dma.done.wait [#allocation3], 6144  }
  0x31   :  { %9854 = vsyncadd [#allocation3], 4294961152 }
  0x32   :  { %9855 = dma.done.wait [#allocation6], 6160  }
  0x33   :  { %9856 = vsyncadd [#allocation6], 4294961136 }
  0x34   :  { %9857 = dma.done.wait [#allocation9], 36880  }
  0x35   :  { %9858 = vsyncadd [#allocation9], 4294930416 }
  0x36   :  { %9859 = dma.done.wait [#allocation12], 32  }
  0x37   :  { %9860 = vsyncadd [#allocation12], 4294967264 }
  0x38   :  { %9861 = dma.done.wait [#allocation15], 32  }
  0x39   :  { %9862 = vsyncadd [#allocation15], 4294967264 }
  0x3a   :  { %9863 = dma.done.wait [#allocation18], 2048  }
  0x3b   :  { %9864 = vsyncadd [#allocation18], 4294965248  ;;  %v6310_v0 = vld [vmem:[#allocation2 + $0x150] sm:$0xf]  ;;  %v8876_v1 = vld [vmem:[#allocation2 + $0x164] sm:$0xf0] }
  0x3c   :  { %v8873_v2 = vld [vmem:[#allocation2 + $0x154] sm:$0xf]  ;;  %v6311_v3 = vor.u32 %v8876_v1, %v6310_v0  ;;  %v6312_v4 = vld [vmem:[#allocation2 + $0x168] sm:$0xf0]  ;;  %v6318_v5 = vld [vmem:[#allocation2 + $0x158] sm:$0xf] }
  0x3d   :  { %v8877_v6 = vld [vmem:[#allocation2 + $0x16c] sm:$0xf0]  ;;  %v6315_v7 = vor.u32 %v8873_v2, %v6312_v4  ;;  %v8874_v9 = vld [vmem:[#allocation2 + $0x15c] sm:$0xf]  ;;  %v6320_v10 = vld [vmem:[#allocation2 + $0x170] sm:$0xf0] }
  0x3e   :  { %v6319_v8 = vor.u32 %v8877_v6, %v6318_v5  ;;  %v6286_v11 = vld [vmem:[#allocation2 + $0x120] sm:$0xf]  ;;  %530 = vmatpush.bf16.msra.mxu0 %v6311_v3  ;;  %v6323_v12 = vor.u32 %v8874_v9, %v6320_v10  ;;  %v8870_v13 = vld [vmem:[#allocation2 + $0x134] sm:$0xf0]  ;;  %v8867_v14 = vld [vmem:[#allocation2 + $0x124] sm:$0xf] }
  0x3f   :  { %v6288_v15 = vld [vmem:[#allocation2 + $0x138] sm:$0xf0]  ;;  %543 = vmatpush.bf16.msra.mxu1 %v6315_v7  ;;  %v6287_v16 = vor.u32 %v8870_v13, %v6286_v11  ;;  %v6294_v18 = vld [vmem:[#allocation2 + $0x128] sm:$0xf]  ;;  %v8871_v19 = vld [vmem:[#allocation2 + $0x13c] sm:$0xf0] }
  0x40   :  { %556 = vmatpush.bf16.msra.mxu2 %v6319_v8  ;;  %v6291_v17 = vor.u32 %v8867_v14, %v6288_v15  ;;  %v8868_v20 = vld [vmem:[#allocation2 + $0x12c] sm:$0xf]  ;;  %569 = vmatpush.bf16.msra.mxu3 %v6323_v12  ;;  %v6295_v21 = vor.u32 %v8871_v19, %v6294_v18  ;;  %v6296_v22 = vld [vmem:[#allocation2 + $0x140] sm:$0xf0]  ;;  %v6262_v23 = vld [vmem:[#allocation2 + $0xf0] sm:$0xf] }
  0x41   :  { %v8864_v24 = vld [vmem:[#allocation2 + $0x104] sm:$0xf0]  ;;  %v6299_v25 = vor.u32 %v8868_v20, %v6296_v22  ;;  %v8861_v26 = vld [vmem:[#allocation2 + $0xf4] sm:$0xf]  ;;  %v6264_v27 = vld [vmem:[#allocation2 + $0x108] sm:$0xf0] }
  0x42   :  { %v6270_v28 = vld [vmem:[#allocation2 + $0xf8] sm:$0xf]  ;;  %531 = vmatpush.bf16.msra.mxu0 %v6287_v16  ;;  %v6263_v29 = vor.u32 %v8864_v24, %v6262_v23  ;;  %v8865_v30 = vld [vmem:[#allocation2 + $0x10c] sm:$0xf0]  ;;  %v8862_v31 = vld [vmem:[#allocation2 + $0xfc] sm:$0xf]  ;;  %v6267_v33 = vor.u32 %v8861_v26, %v6264_v27 }
  0x43   :  { %v6272_v32 = vld [vmem:[#allocation2 + $0x110] sm:$0xf0]  ;;  %544 = vmatpush.bf16.msra.mxu1 %v6291_v17  ;;  %v6271_v34 = vor.u32 %v8865_v30, %v6270_v28  ;;  %v6238_v35 = vld [vmem:[#allocation2 + $0xc0] sm:$0xf]  ;;  %v8858_v36 = vld [vmem:[#allocation2 + $0xd4] sm:$0xf0] }
  0x44   :  { %557 = vmatpush.bf16.msra.mxu2 %v6295_v21  ;;  %v8855_v37 = vld [vmem:[#allocation2 + $0xc4] sm:$0xf]  ;;  %570 = vmatpush.bf16.msra.mxu3 %v6299_v25  ;;  %v6275_v38 = vor.u32 %v8862_v31, %v6272_v32  ;;  %v6240_v39 = vld [vmem:[#allocation2 + $0xd8] sm:$0xf0]  ;;  %v6246_v40 = vld [vmem:[#allocation2 + $0xc8] sm:$0xf]  ;;  %v6239_v44 = vor.u32 %v8858_v36, %v6238_v35 }
  0x45   :  { %v8859_v41 = vld [vmem:[#allocation2 + $0xdc] sm:$0xf0]  ;;  %v8856_v42 = vld [vmem:[#allocation2 + $0xcc] sm:$0xf]  ;;  %v6248_v43 = vld [vmem:[#allocation2 + $0xe0] sm:$0xf0]  ;;  %v6243_v45 = vor.u32 %v8855_v37, %v6240_v39 }
  0x46   :  { %532 = vmatpush.bf16.msra.mxu0 %v6263_v29  ;;  %v6247_v46 = vor.u32 %v8859_v41, %v6246_v40  ;;  %v6214_v47 = vld [vmem:[#allocation2 + $0x90] sm:$0xf]  ;;  %v8852_v48 = vld [vmem:[#allocation2 + $0xa4] sm:$0xf0]  ;;  %v8849_v49 = vld [vmem:[#allocation2 + $0x94] sm:$0xf]  ;;  %v6251_v50 = vor.u32 %v8856_v42, %v6248_v43 }
  0x47   :  { %545 = vmatpush.bf16.msra.mxu1 %v6267_v33  ;;  %v6216_v51 = vld [vmem:[#allocation2 + $0xa8] sm:$0xf0]  ;;  %v6222_v52 = vld [vmem:[#allocation2 + $0x98] sm:$0xf]  ;;  %v8853_v53 = vld [vmem:[#allocation2 + $0xac] sm:$0xf0]  ;;  %v6215_v56 = vor.u32 %v8852_v48, %v6214_v47 }
  0x48   :  { %558 = vmatpush.bf16.msra.mxu2 %v6271_v34  ;;  %571 = vmatpush.bf16.msra.mxu3 %v6275_v38  ;;  %v8850_v54 = vld [vmem:[#allocation2 + $0x9c] sm:$0xf]  ;;  %v6224_v55 = vld [vmem:[#allocation2 + $0xb0] sm:$0xf0]  ;;  %v6219_v57 = vor.u32 %v8849_v49, %v6216_v51  ;;  %v6223_v58 = vor.u32 %v8853_v53, %v6222_v52  ;;  %v6190_v59 = vld [vmem:[#allocation2 + $0x60] sm:$0xf] }
  0x49   :  { %v8846_v60 = vld [vmem:[#allocation2 + $0x74] sm:$0xf0]  ;;  %v8843_v61 = vld [vmem:[#allocation2 + $0x64] sm:$0xf]  ;;  %v6227_v62 = vor.u32 %v8850_v54, %v6224_v55  ;;  %v6192_v63 = vld [vmem:[#allocation2 + $0x78] sm:$0xf0] }
  0x4a   :  { %533 = vmatpush.bf16.msra.mxu0 %v6239_v44  ;;  %v6198_v0 = vld [vmem:[#allocation2 + $0x68] sm:$0xf]  ;;  %v8847_v1 = vld [vmem:[#allocation2 + $0x7c] sm:$0xf0]  ;;  %v8844_v2 = vld [vmem:[#allocation2 + $0x6c] sm:$0xf]  ;;  %v6191_v4 = vor.u32 %v8846_v60, %v6190_v59  ;;  %v6195_v5 = vor.u32 %v8843_v61, %v6192_v63 }
  0x4b   :  { %546 = vmatpush.bf16.msra.mxu1 %v6243_v45  ;;  %v6200_v3 = vld [vmem:[#allocation2 + $0x80] sm:$0xf0]  ;;  %v6199_v6 = vor.u32 %v8847_v1, %v6198_v0  ;;  %v6166_v7 = vld [vmem:[#allocation2 + $0x30] sm:$0xf]  ;;  %v8840_v8 = vld [vmem:[#allocation2 + $0x44] sm:$0xf0] }
  0x4c   :  { %559 = vmatpush.bf16.msra.mxu2 %v6247_v46  ;;  %572 = vmatpush.bf16.msra.mxu3 %v6251_v50  ;;  %v8837_v9 = vld [vmem:[#allocation2 + $0x34] sm:$0xf]  ;;  %v6203_v10 = vor.u32 %v8844_v2, %v6200_v3  ;;  %v6168_v11 = vld [vmem:[#allocation2 + $0x48] sm:$0xf0]  ;;  %v6174_v12 = vld [vmem:[#allocation2 + $0x38] sm:$0xf]  ;;  %v6167_v16 = vor.u32 %v8840_v8, %v6166_v7 }
  0x4d   :  { %v8841_v13 = vld [vmem:[#allocation2 + $0x4c] sm:$0xf0]  ;;  %v8838_v14 = vld [vmem:[#allocation2 + $0x3c] sm:$0xf]  ;;  %v6176_v15 = vld [vmem:[#allocation2 + $0x50] sm:$0xf0]  ;;  %v6171_v18 = vor.u32 %v8837_v9, %v6168_v11 }
  0x4e   :  { %534 = vmatpush.bf16.msra.mxu0 %v6215_v56  ;;  %v6142_v17 = vld [vmem:[#allocation2] sm:$0xf]  ;;  %v6175_v19 = vor.u32 %v8841_v13, %v6174_v12  ;;  %v8834_v20 = vld [vmem:[#allocation2 + $0x14] sm:$0xf0]  ;;  %v8831_v21 = vld [vmem:[#allocation2 + $0x4] sm:$0xf]  ;;  %v6179_v23 = vor.u32 %v8838_v14, %v6176_v15 }
  0x4f   :  { %547 = vmatpush.bf16.msra.mxu1 %v6219_v57  ;;  %v6144_v22 = vld [vmem:[#allocation2 + $0x18] sm:$0xf0]  ;;  %v6150_v24 = vld [vmem:[#allocation2 + $0x8] sm:$0xf]  ;;  %v8835_v25 = vld [vmem:[#allocation2 + $0x1c] sm:$0xf0]  ;;  %v6143_v30 = vor.u32 %v8834_v20, %v6142_v17 }
  0x50   :  { %560 = vmatpush.bf16.msra.mxu2 %v6223_v58  ;;  %573 = vmatpush.bf16.msra.mxu3 %v6227_v62  ;;  %v8832_v26 = vld [vmem:[#allocation2 + $0xc] sm:$0xf]  ;;  %v6152_v27 = vld [vmem:[#allocation2 + $0x20] sm:$0xf0]  ;;  %v6326_v28 = vld [vmem:[#allocation2 + $0x160] sm:$0xf]  ;;  %v6147_v34 = vor.u32 %v8831_v21, %v6144_v22  ;;  %v6151_v35 = vor.u32 %v8835_v25, %v6150_v24 }
  0x51   :  { %v8878_v29 = vld [vmem:[#allocation2 + $0x174] sm:$0xf0]  ;;  %v8875_v31 = vld [vmem:[#allocation2 + $0x164] sm:$0xf]  ;;  %v6328_v32 = vld [vmem:[#allocation2 + $0x178] sm:$0xf0]  ;;  %v6155_v36 = vor.u32 %v8832_v26, %v6152_v27 }
  0x52   :  { %535 = vmatpush.bf16.msra.mxu0 %v6191_v4  ;;  %s12853_s2 = sld [smem:[#allocation28_spill]]  ;;  %v6327_v37 = vor.u32 %v8878_v29, %v6326_v28  ;;  %v6331_v38 = vor.u32 %v8875_v31, %v6328_v32  ;;  %v6302_v40 = vld [vmem:[#allocation2 + $0x130] sm:$0xf]  ;;  %v8872_v41 = vld [vmem:[#allocation2 + $0x144] sm:$0xf0]  ;;  %vm3052_vm0 = vcmask 517120  }
  0x53   :  { %548 = vmatpush.bf16.msra.mxu1 %v6195_v5  ;;  %v8869_v42 = vld [vmem:[#allocation2 + $0x134] sm:$0xf]  ;;  %v6304_v43 = vld [vmem:[#allocation2 + $0x148] sm:$0xf0]  ;;  %v6278_v44 = vld [vmem:[#allocation2 + $0x100] sm:$0xf]  ;;  %v6303_v46 = vor.u32 %v8872_v41, %v6302_v40 }
  0x54   :  { %561 = vmatpush.bf16.msra.mxu2 %v6199_v6  ;;  %574 = vmatpush.bf16.msra.mxu3 %v6203_v10  ;;  %v8866_v45 = vld [vmem:[#allocation2 + $0x114] sm:$0xf0]  ;;  %v8863_v47 = vld [vmem:[#allocation2 + $0x104] sm:$0xf]  ;;  %s12854_s5 = sld [smem:[#allocation33_spill]]  ;;  %v6307_v51 = vor.u32 %v8869_v42, %v6304_v43  ;;  %vm6033_vm8 = vcmask 523264  }
  0x55   :  { %v6280_v56 = vld [vmem:[#allocation2 + $0x118] sm:$0xf0]  ;;  %v6279_v61 = vor.u32 %v8866_v45, %v6278_v44  ;;  %v6254_v62 = vld [vmem:[#allocation2 + $0xd0] sm:$0xf]  ;;  %v8860_v3 = vld [vmem:[#allocation2 + $0xe4] sm:$0xf0] }
  0x56   :  { %536 = vmatpush.bf16.msra.mxu0 %v6167_v16  ;;  %v6283_v2 = vor.u32 %v8863_v47, %v6280_v56  ;;  %v8857_v6 = vld [vmem:[#allocation2 + $0xd4] sm:$0xf]  ;;  %v6256_v7 = vld [vmem:[#allocation2 + $0xe8] sm:$0xf0]  ;;  %v6255_v9 = vor.u32 %v8860_v3, %v6254_v62  ;;  %v6230_v10 = vld [vmem:[#allocation2 + $0xa0] sm:$0xf] }
  0x57   :  { %549 = vmatpush.bf16.msra.mxu1 %v6171_v18  ;;  %v6259_v14 = vor.u32 %v8857_v6, %v6256_v7  ;;  %v8854_v15 = vld [vmem:[#allocation2 + $0xb4] sm:$0xf0]  ;;  %v8851_v18 = vld [vmem:[#allocation2 + $0xa4] sm:$0xf]  ;;  %v6206_v22 = vld [vmem:[#allocation2 + $0x70] sm:$0xf] }
  0x58   :  { %v240_v33 = vld [vmem:[%s12853_s2] sm:$0x3]  ;;  %562 = vmatpush.bf16.msra.mxu2 %v6175_v19  ;;  %575 = vmatpush.bf16.msra.mxu3 %v6179_v23  ;;  %v6232_v19 = vld [vmem:[#allocation2 + $0xb8] sm:$0xf0]  ;;  %v6231_v21 = vor.u32 %v8854_v15, %v6230_v10  ;;  %v8848_v27 = vld [vmem:[#allocation2 + $0x84] sm:$0xf0] }
  0x59   :  { %v10065_v39 = vpack.c.bf16 %v240_v33, %v240_v33  ;;  %v6235_v26 = vor.u32 %v8851_v18, %v6232_v19  ;;  %v6208_v31 = vld [vmem:[#allocation2 + $0x88] sm:$0xf0]  ;;  %v6182_v32 = vld [vmem:[#allocation2 + $0x40] sm:$0xf]  ;;  %v8842_v33 = vld [vmem:[#allocation2 + $0x54] sm:$0xf0] }
  0x5a   :  { %537 = vmatpush.bf16.msra.mxu0 %v6143_v30  ;;  %v6502_v48 = vld [vmem:[%s12854_s5 + $0x150] sm:$0xf]  ;;  %v8924_v49 = vld [vmem:[%s12854_s5 + $0x164] sm:$0xf0]  ;;  %v6478_v54 = vld [vmem:[%s12854_s5 + $0x120] sm:$0xf] }
  0x5b   :  { %550 = vmatpush.bf16.msra.mxu1 %v6147_v34  ;;  %v6694_v50 = vld [vmem:[%s12854_s5 + $0x2d0] sm:$0xf]  ;;  %v6503_v52 = vor.u32 %v8924_v49, %v6502_v48  ;;  %v8972_v53 = vld [vmem:[%s12854_s5 + $0x2e4] sm:$0xf0]  ;;  %v8918_v55 = vld [vmem:[%s12854_s5 + $0x134] sm:$0xf0]  ;;  %v6183_v48 = vor.u32 %v8842_v33, %v6182_v32 }
  0x5c   :  { %563 = vmatpush.bf16.msra.mxu2 %v6151_v35  ;;  %576 = vmatpush.bf16.msra.mxu3 %v6155_v36  ;;  %v6695_v57 = vor.u32 %v8972_v53, %v6694_v50  ;;  %v6670_v58 = vld [vmem:[%s12854_s5 + $0x2a0] sm:$0xf]  ;;  %v8966_v59 = vld [vmem:[%s12854_s5 + $0x2b4] sm:$0xf0]  ;;  %v6479_v60 = vor.u32 %v8918_v55, %v6478_v54  ;;  %v6454_v0 = vld [vmem:[%s12854_s5 + $0xf0] sm:$0xf]  ;;  %v6207_v35 = vor.u32 %v8848_v27, %v6206_v22 }
  0x5d   :  { %538 = vmatmul.bf16.vlgmr.msra.gmra.mxu0 %v10065_v39  ;;  %v6671_v63 = vor.u32 %v8966_v59, %v6670_v58  ;;  %v8912_v1 = vld [vmem:[%s12854_s5 + $0x104] sm:$0xf0]  ;;  %v6646_v4 = vld [vmem:[%s12854_s5 + $0x270] sm:$0xf]  ;;  %v6430_v12 = vld [vmem:[%s12854_s5 + $0xc0] sm:$0xf] }
  0x5e   :  { %582 = vmatpush.bf16.msrb.mxu0 %v6327_v37  ;;  %551 = vmatmul.bf16.vlgmr.msra.gmra.mxu1 %v10065_v39  ;;  %v8960_v5 = vld [vmem:[%s12854_s5 + $0x284] sm:$0xf0]  ;;  %v6455_v8 = vor.u32 %v8912_v1, %v6454_v0  ;;  %v8906_v13 = vld [vmem:[%s12854_s5 + $0xd4] sm:$0xf0]  ;;  %v6622_v16 = vld [vmem:[%s12854_s5 + $0x240] sm:$0xf] }
  0x5f   :  { %595 = vmatpush.bf16.msrb.mxu1 %v6331_v38  ;;  %564 = vmatmul.bf16.vlgmr.msra.gmra.mxu2 %v10065_v39  ;;  %v6647_v11 = vor.u32 %v8960_v5, %v6646_v4  ;;  %v8954_v17 = vld [vmem:[%s12854_s5 + $0x254] sm:$0xf0]  ;;  %v6431_v20 = vor.u32 %v8906_v13, %v6430_v12  ;;  %v6406_v24 = vld [vmem:[%s12854_s5 + $0x90] sm:$0xf]  ;;  %v8900_v25 = vld [vmem:[%s12854_s5 + $0xa4] sm:$0xf0] }
  0x60   :  { %577 = vmatmul.bf16.vlgmr.msra.gmra.mxu3 %v10065_v39  ;;  %2356 = vmatpush.bf16.msrb.mxu2 %v6503_v52  ;;  %v6623_v23 = vor.u32 %v8954_v17, %v6622_v16  ;;  %v6598_v28 = vld [vmem:[%s12854_s5 + $0x210] sm:$0xf]  ;;  %v8948_v29 = vld [vmem:[%s12854_s5 + $0x224] sm:$0xf0]  ;;  %v8845_v30 = vld [vmem:[#allocation2 + $0x74] sm:$0xf]  ;;  %v6407_v34 = vor.u32 %v8900_v25, %v6406_v24 }
  0x61   :  { %2369 = vmatpush.bf16.msrb.mxu3 %v6695_v57  ;;  %v6599_v36 = vor.u32 %v8948_v29, %v6598_v28  ;;  %v6382_v37 = vld [vmem:[%s12854_s5 + $0x60] sm:$0xf]  ;;  %v8894_v38 = vld [vmem:[%s12854_s5 + $0x74] sm:$0xf0]  ;;  %v6211_v40 = vor.u32 %v8845_v30, %v6208_v31  ;;  %v8839_v43 = vld [vmem:[#allocation2 + $0x44] sm:$0xf] }
  0x62   :  { %583 = vmatpush.bf16.msrb.mxu0 %v6303_v46  ;;  %v6574_v41 = vld [vmem:[%s12854_s5 + $0x1e0] sm:$0xf]  ;;  %v8942_v42 = vld [vmem:[%s12854_s5 + $0x1f4] sm:$0xf0]  ;;  %v6184_v44 = vld [vmem:[#allocation2 + $0x58] sm:$0xf0]  ;;  %v6383_v47 = vor.u32 %v8894_v38, %v6382_v37 }
  0x63   :  { %596 = vmatpush.bf16.msrb.mxu1 %v6307_v51  ;;  %v6158_v45 = vld [vmem:[#allocation2 + $0x10] sm:$0xf]  ;;  %v8836_v46 = vld [vmem:[#allocation2 + $0x24] sm:$0xf0]  ;;  %v8833_v49 = vld [vmem:[#allocation2 + $0x14] sm:$0xf]  ;;  %v6575_v50 = vor.u32 %v8942_v42, %v6574_v41  ;;  %v6187_v53 = vor.u32 %v8839_v43, %v6184_v44 }
  0x64   :  { %2357 = vmatpush.bf16.msrb.mxu2 %v6479_v60  ;;  %v6358_v51 = vld [vmem:[%s12854_s5 + $0x30] sm:$0xf]  ;;  %v8888_v52 = vld [vmem:[%s12854_s5 + $0x44] sm:$0xf0]  ;;  %v6160_v54 = vld [vmem:[#allocation2 + $0x28] sm:$0xf0]  ;;  %v6159_v0 = vor.u32 %v8836_v46, %v6158_v45 }
  0x65   :  { %2370 = vmatpush.bf16.msrb.mxu3 %v6671_v63  ;;  %v6550_v55 = vld [vmem:[%s12854_s5 + $0x1b0] sm:$0xf]  ;;  %v8936_v56 = vld [vmem:[%s12854_s5 + $0x1c4] sm:$0xf0]  ;;  %v6334_v62 = vld [vmem:[%s12854_s5] sm:$0xf]  ;;  %v6163_v4 = vor.u32 %v8833_v49, %v6160_v54 }
  0x66   :  { %584 = vmatpush.bf16.msrb.mxu0 %v6279_v61  ;;  %v6886_v57 = vld [vmem:[%s12854_s5 + $0x450] sm:$0xf]  ;;  %v9020_v58 = vld [vmem:[%s12854_s5 + $0x464] sm:$0xf0]  ;;  %v6359_v61 = vor.u32 %v8888_v52, %v6358_v51  ;;  %v8882_v63 = vld [vmem:[%s12854_s5 + $0x14] sm:$0xf0]  ;;  %v6551_v3 = vor.u32 %v8936_v56, %v6550_v55 }
  0x67   :  { %597 = vmatpush.bf16.msrb.mxu1 %v6283_v2  ;;  %v7078_v59 = vld [vmem:[%s12854_s5 + $0x5d0] sm:$0xf]  ;;  %v9068_v60 = vld [vmem:[%s12854_s5 + $0x5e4] sm:$0xf0]  ;;  %v6862_v1 = vld [vmem:[%s12854_s5 + $0x420] sm:$0xf]  ;;  %v6887_v5 = vor.u32 %v9020_v58, %v6886_v57  ;;  %v6335_v13 = vor.u32 %v8882_v63, %v6334_v62 }
  0x68   :  { %2358 = vmatpush.bf16.msrb.mxu2 %v6455_v8  ;;  %v9014_v2 = vld [vmem:[%s12854_s5 + $0x434] sm:$0xf0]  ;;  %v6526_v6 = vld [vmem:[%s12854_s5 + $0x180] sm:$0xf]  ;;  %v7079_v8 = vor.u32 %v9068_v60, %v7078_v59  ;;  %v7270_v10 = vld [vmem:[%s12854_s5 + $0x750] sm:$0xf] }
  0x69   :  { %2371 = vmatpush.bf16.msrb.mxu3 %v6647_v11  ;;  %v8930_v7 = vld [vmem:[%s12854_s5 + $0x194] sm:$0xf0]  ;;  %v9116_v11 = vld [vmem:[%s12854_s5 + $0x764] sm:$0xf0]  ;;  %v6863_v17 = vor.u32 %v9014_v2, %v6862_v1  ;;  %v6838_v18 = vld [vmem:[%s12854_s5 + $0x3f0] sm:$0xf] }
  0x6a   :  { %585 = vmatpush.bf16.msrb.mxu0 %v6255_v9  ;;  %v7054_v9 = vld [vmem:[%s12854_s5 + $0x5a0] sm:$0xf]  ;;  %v9062_v12 = vld [vmem:[%s12854_s5 + $0x5b4] sm:$0xf0]  ;;  %v9164_v15 = vld [vmem:[%s12854_s5 + $0x8e4] sm:$0xf0]  ;;  %v6527_v16 = vor.u32 %v8930_v7, %v6526_v6 }
  0x6b   :  { %598 = vmatpush.bf16.msrb.mxu1 %v6259_v14  ;;  %v7462_v14 = vld [vmem:[%s12854_s5 + $0x8d0] sm:$0xf]  ;;  %v9008_v19 = vld [vmem:[%s12854_s5 + $0x404] sm:$0xf0]  ;;  %v7246_v24 = vld [vmem:[%s12854_s5 + $0x720] sm:$0xf] }
  0x6c   :  { %2359 = vmatpush.bf16.msrb.mxu2 %v6431_v20  ;;  %v7271_v20 = vor.u32 %v9116_v11, %v7270_v10  ;;  %v7030_v22 = vld [vmem:[%s12854_s5 + $0x570] sm:$0xf]  ;;  %v9110_v25 = vld [vmem:[%s12854_s5 + $0x734] sm:$0xf0]  ;;  %v7438_v27 = vld [vmem:[%s12854_s5 + $0x8a0] sm:$0xf]  ;;  %v6839_v29 = vor.u32 %v9008_v19, %v6838_v18 }
  0x6d   :  { %2372 = vmatpush.bf16.msrb.mxu3 %v6623_v23  ;;  %v7463_v23 = vor.u32 %v9164_v15, %v7462_v14  ;;  %v9158_v28 = vld [vmem:[%s12854_s5 + $0x8b4] sm:$0xf0]  ;;  %v6814_v30 = vld [vmem:[%s12854_s5 + $0x3c0] sm:$0xf]  ;;  %v7247_v32 = vor.u32 %v9110_v25, %v7246_v24  ;;  %v7414_v38 = vld [vmem:[%s12854_s5 + $0x870] sm:$0xf] }
  0x6e   :  { %586 = vmatpush.bf16.msrb.mxu0 %v6231_v21  ;;  %v7055_v21 = vor.u32 %v9062_v12, %v7054_v9  ;;  %v9002_v31 = vld [vmem:[%s12854_s5 + $0x3d4] sm:$0xf0]  ;;  %v6790_v42 = vld [vmem:[%s12854_s5 + $0x390] sm:$0xf]  ;;  %v8996_v43 = vld [vmem:[%s12854_s5 + $0x3a4] sm:$0xf0] }
  0x6f   :  { %599 = vmatpush.bf16.msrb.mxu1 %v6235_v26  ;;  %v9056_v26 = vld [vmem:[%s12854_s5 + $0x584] sm:$0xf0]  ;;  %v9050_v37 = vld [vmem:[%s12854_s5 + $0x554] sm:$0xf0]  ;;  %v6815_v41 = vor.u32 %v9002_v31, %v6814_v30  ;;  %v6982_v46 = vld [vmem:[%s12854_s5 + $0x510] sm:$0xf] }
  0x70   :  { %2360 = vmatpush.bf16.msrb.mxu2 %v6407_v34  ;;  %v7031_v33 = vor.u32 %v9056_v26, %v7030_v22  ;;  %v7006_v34 = vld [vmem:[%s12854_s5 + $0x540] sm:$0xf]  ;;  %v9098_v49 = vld [vmem:[%s12854_s5 + $0x6d4] sm:$0xf0]  ;;  %v7174_v60 = vld [vmem:[%s12854_s5 + $0x690] sm:$0xf] }
  0x71   :  { %2373 = vmatpush.bf16.msrb.mxu3 %v6599_v36  ;;  %v9104_v36 = vld [vmem:[%s12854_s5 + $0x704] sm:$0xf0]  ;;  %v7007_v45 = vor.u32 %v9050_v37, %v7006_v34  ;;  %v7390_v51 = vld [vmem:[%s12854_s5 + $0x840] sm:$0xf]  ;;  %v9146_v52 = vld [vmem:[%s12854_s5 + $0x854] sm:$0xf0] }
  0x72   :  { %587 = vmatpush.bf16.msrb.mxu0 %v6207_v35  ;;  %v7222_v35 = vld [vmem:[%s12854_s5 + $0x6f0] sm:$0xf]  ;;  %v6766_v54 = vld [vmem:[%s12854_s5 + $0x360] sm:$0xf]  ;;  %v8990_v55 = vld [vmem:[%s12854_s5 + $0x374] sm:$0xf0]  ;;  %v7391_v59 = vor.u32 %v9146_v52, %v7390_v51 }
  0x73   :  { %600 = vmatpush.bf16.msrb.mxu1 %v6211_v40  ;;  %v9152_v40 = vld [vmem:[%s12854_s5 + $0x884] sm:$0xf0]  ;;  %v7223_v44 = vor.u32 %v9104_v36, %v7222_v35  ;;  %v6958_v58 = vld [vmem:[%s12854_s5 + $0x4e0] sm:$0xf]  ;;  %v9038_v62 = vld [vmem:[%s12854_s5 + $0x4f4] sm:$0xf0]  ;;  %v6767_v1 = vor.u32 %v8990_v55, %v6766_v54 }
  0x74   :  { %2361 = vmatpush.bf16.msrb.mxu2 %v6383_v47  ;;  %v7415_v47 = vor.u32 %v9152_v40, %v7414_v38  ;;  %v7366_v63 = vld [vmem:[%s12854_s5 + $0x810] sm:$0xf]  ;;  %v9086_v9 = vld [vmem:[%s12854_s5 + $0x674] sm:$0xf0]  ;;  %v9032_v10 = vld [vmem:[%s12854_s5 + $0x4c4] sm:$0xf0] }
  0x75   :  { %2374 = vmatpush.bf16.msrb.mxu3 %v6575_v50  ;;  %v9044_v50 = vld [vmem:[%s12854_s5 + $0x524] sm:$0xf0]  ;;  %v6742_v2 = vld [vmem:[%s12854_s5 + $0x330] sm:$0xf]  ;;  %v7342_v11 = vld [vmem:[%s12854_s5 + $0x7e0] sm:$0xf] }
  0x76   :  { %588 = vmatpush.bf16.msrb.mxu0 %v6183_v48  ;;  %v7198_v48 = vld [vmem:[%s12854_s5 + $0x6c0] sm:$0xf]  ;;  %v6983_v57 = vor.u32 %v9044_v50, %v6982_v46  ;;  %v6934_v6 = vld [vmem:[%s12854_s5 + $0x4b0] sm:$0xf]  ;;  %v9134_v12 = vld [vmem:[%s12854_s5 + $0x7f4] sm:$0xf0] }
  0x77   :  { %601 = vmatpush.bf16.msrb.mxu1 %v6187_v53  ;;  %v6791_v53 = vor.u32 %v8996_v43, %v6790_v42  ;;  %v7199_v56 = vor.u32 %v9098_v49, %v7198_v48  ;;  %v6718_v14 = vld [vmem:[%s12854_s5 + $0x300] sm:$0xf]  ;;  %v8978_v15 = vld [vmem:[%s12854_s5 + $0x314] sm:$0xf0]  ;;  %v6935_v18 = vor.u32 %v9032_v10, %v6934_v6  ;;  %v9080_v22 = vld [vmem:[%s12854_s5 + $0x644] sm:$0xf0] }
  0x78   :  { %2362 = vmatpush.bf16.msrb.mxu2 %v6359_v61  ;;  %v9092_v61 = vld [vmem:[%s12854_s5 + $0x6a4] sm:$0xf0]  ;;  %v9026_v19 = vld [vmem:[%s12854_s5 + $0x494] sm:$0xf0]  ;;  %v6504_v24 = vld [vmem:[%s12854_s5 + $0x168] sm:$0xf0] }
  0x79   :  { %2375 = vmatpush.bf16.msrb.mxu3 %v6551_v3  ;;  %v8984_v3 = vld [vmem:[%s12854_s5 + $0x344] sm:$0xf0]  ;;  %v8969_v25 = vld [vmem:[%s12854_s5 + $0x2d4] sm:$0xf]  ;;  %v6696_v26 = vld [vmem:[%s12854_s5 + $0x2e8] sm:$0xf0] }
  0x7a   :  { %589 = vmatpush.bf16.msrb.mxu0 %v6159_v0  ;;  %v9140_v0 = vld [vmem:[%s12854_s5 + $0x824] sm:$0xf0]  ;;  %v8915_v34 = vld [vmem:[%s12854_s5 + $0x124] sm:$0xf]  ;;  %v6672_v37 = vld [vmem:[%s12854_s5 + $0x2b8] sm:$0xf0] }
  0x7b   :  { %602 = vmatpush.bf16.msrb.mxu1 %v6163_v4  ;;  %v7175_v4 = vor.u32 %v9092_v61, %v7174_v60  ;;  %v7367_v7 = vor.u32 %v9140_v0, %v7366_v63  ;;  %v8963_v36 = vld [vmem:[%s12854_s5 + $0x2a4] sm:$0xf]  ;;  %v6456_v42 = vld [vmem:[%s12854_s5 + $0x108] sm:$0xf0]  ;;  %v8957_v43 = vld [vmem:[%s12854_s5 + $0x274] sm:$0xf] }
  0x7c   :  { %2363 = vmatpush.bf16.msrb.mxu2 %v6335_v13  ;;  %v6743_v13 = vor.u32 %v8984_v3, %v6742_v2  ;;  %v6675_v40 = vor.u32 %v8963_v36, %v6672_v37  ;;  %v6432_v48 = vld [vmem:[%s12854_s5 + $0xd8] sm:$0xf0]  ;;  %v8951_v49 = vld [vmem:[%s12854_s5 + $0x244] sm:$0xf]  ;;  %v6408_v54 = vld [vmem:[%s12854_s5 + $0xa8] sm:$0xf0] }
  0x7d   :  { %590 = vmatmul.bf16.vlgmr.msrb.gmra.mxu0 %v10065_v39  ;;  %2376 = vmatpush.bf16.msrb.mxu3 %v6527_v16  ;;  %v6910_v16 = vld [vmem:[%s12854_s5 + $0x480] sm:$0xf]  ;;  %v6624_v50 = vld [vmem:[%s12854_s5 + $0x258] sm:$0xf0]  ;;  %v8945_v55 = vld [vmem:[%s12854_s5 + $0x214] sm:$0xf] }
  0x7e   :  { %2382 = vmatpush.bf16.msra.mxu0 %v6887_v5  ;;  %603 = vmatmul.bf16.vlgmr.msrb.gmra.mxu1 %v10065_v39  ;;  %v7439_v39 = vor.u32 %v9158_v28, %v7438_v27  ;;  %v6959_v5 = vor.u32 %v9038_v62, %v6958_v58  ;;  %v7318_v27 = vld [vmem:[%s12854_s5 + $0x7b0] sm:$0xf]  ;;  %v9128_v28 = vld [vmem:[%s12854_s5 + $0x7c4] sm:$0xf0]  ;;  %v6911_v31 = vor.u32 %v9026_v19, %v6910_v16  ;;  %v6384_v60 = vld [vmem:[%s12854_s5 + $0x78] sm:$0xf0] }
  0x7f   :  { %2395 = vmatpush.bf16.msra.mxu1 %v7079_v8  ;;  %v7150_v8 = vld [vmem:[%s12854_s5 + $0x660] sm:$0xf]  ;;  %v7319_v35 = vor.u32 %v9128_v28, %v7318_v27  ;;  %v6627_v52 = vor.u32 %v8951_v49, %v6624_v50  ;;  %v8939_v61 = vld [vmem:[%s12854_s5 + $0x1e4] sm:$0xf]  ;;  %v6576_v63 = vld [vmem:[%s12854_s5 + $0x1f8] sm:$0xf0] }
  0x80   :  { %2408 = vmatpush.bf16.msra.mxu2 %v7271_v20  ;;  %v7343_v20 = vor.u32 %v9134_v12, %v7342_v11  ;;  %v6579_v0 = vor.u32 %v8939_v61, %v6576_v63  ;;  %v9074_v2 = vld [vmem:[%s12854_s5 + $0x614] sm:$0xf0]  ;;  %v7294_v3 = vld [vmem:[%s12854_s5 + $0x780] sm:$0xf]  ;;  %v6552_v10 = vld [vmem:[%s12854_s5 + $0x1c8] sm:$0xf0] }
  0x81   :  { %2421 = vmatpush.bf16.msra.mxu3 %v7463_v23  ;;  %v8921_v23 = vld [vmem:[%s12854_s5 + $0x154] sm:$0xf]  ;;  %v8927_v16 = vld [vmem:[%s12854_s5 + $0x184] sm:$0xf]  ;;  %v7464_v37 = vld [vmem:[%s12854_s5 + $0x8e8] sm:$0xf0] }
  0x82   :  { %2383 = vmatpush.bf16.msra.mxu0 %v6863_v17  ;;  %v7151_v17 = vor.u32 %v9086_v9, %v7150_v8  ;;  %v6360_v8 = vld [vmem:[%s12854_s5 + $0x48] sm:$0xf0]  ;;  %v8933_v9 = vld [vmem:[%s12854_s5 + $0x1b4] sm:$0xf]  ;;  %v9011_v28 = vld [vmem:[%s12854_s5 + $0x424] sm:$0xf] }
  0x83   :  { %2396 = vmatpush.bf16.msra.mxu1 %v7055_v21  ;;  %v7126_v21 = vld [vmem:[%s12854_s5 + $0x630] sm:$0xf]  ;;  %v6555_v12 = vor.u32 %v8933_v9, %v6552_v10  ;;  %v9017_v19 = vld [vmem:[%s12854_s5 + $0x454] sm:$0xf]  ;;  %v9107_v50 = vld [vmem:[%s12854_s5 + $0x724] sm:$0xf] }
  0x84   :  { %2409 = vmatpush.bf16.msra.mxu2 %v7247_v32  ;;  %v7127_v30 = vor.u32 %v9080_v22, %v7126_v21  ;;  %v6507_v32 = vor.u32 %v8921_v23, %v6504_v24  ;;  %v9065_v21 = vld [vmem:[%s12854_s5 + $0x5d4] sm:$0xf]  ;;  %v7080_v22 = vld [vmem:[%s12854_s5 + $0x5e8] sm:$0xf0]  ;;  %s12855_s3 = sld [smem:[#allocation34_spill]]  ;;  %s9883_s15 = smov [#allocation20]  }
  0x85   :  { %2422 = vmatpush.bf16.msra.mxu3 %v7439_v39  ;;  %v6480_v39 = vld [vmem:[%s12854_s5 + $0x138] sm:$0xf0]  ;;  %v7083_v27 = vor.u32 %v9065_v21, %v7080_v22  ;;  %v9035_v21 = vld [vmem:[%s12854_s5 + $0x4e4] sm:$0xf]  ;;  %s12856_s26 = sld [smem:[#allocation35_spill]]  ;;  %s6123_s8 = sshll.u32 %s9883_s15, 4  ;;  %s6124_s8 = int_to_ptr.vmem [resolvable:$true] %s6123_s8 }
  0x86   :  { %2384 = vmatpush.bf16.msra.mxu0 %v6839_v29  ;;  %v6719_v29 = vor.u32 %v8978_v15, %v6718_v14  ;;  %v6483_v38 = vor.u32 %v8915_v34, %v6480_v39  ;;  %v6336_v14 = vld [vmem:[%s12854_s5 + $0x18] sm:$0xf0]  ;;  %v9113_v34 = vld [vmem:[%s12854_s5 + $0x754] sm:$0xf]  ;;  %v7272_v39 = vld [vmem:[%s12854_s5 + $0x768] sm:$0xf0] }
  0x87   :  { %2397 = vmatpush.bf16.msra.mxu1 %v7031_v33  ;;  %v6699_v33 = vor.u32 %v8969_v25, %v6696_v26  ;;  %v6960_v22 = vld [vmem:[%s12854_s5 + $0x4f8] sm:$0xf0]  ;;  %s12857_s27 = sld [smem:[#allocation29_spill]]  ;;  %s6125_s18 = sshll.u32 %s12837_s25, 4  ;;  %s6126_s18 = int_to_ptr.hbm [resolvable:$true] %s6125_s18 }
  0x88   :  { %2410 = vmatpush.bf16.msra.mxu2 %v7223_v44  ;;  %v6648_v44 = vld [vmem:[%s12854_s5 + $0x288] sm:$0xf0]  ;;  %s12858_s23 = sld [smem:[#allocation36_spill]] }
  0x89   :  { %2423 = vmatpush.bf16.msra.mxu3 %v7415_v47  ;;  %v6651_v46 = vor.u32 %v8957_v43, %v6648_v44  ;;  %v8903_v47 = vld [vmem:[%s12854_s5 + $0xc4] sm:$0xf]  ;;  %v7275_v44 = vor.u32 %v9113_v34, %v7272_v39  ;;  %v6744_v34 = vld [vmem:[%s12854_s5 + $0x348] sm:$0xf0]  ;;  %v9029_v39 = vld [vmem:[%s12854_s5 + $0x4b4] sm:$0xf] }
  0x8a   :  { %2385 = vmatpush.bf16.msra.mxu0 %v6815_v41  ;;  %v8909_v41 = vld [vmem:[%s12854_s5 + $0xf4] sm:$0xf]  ;;  %v6435_v51 = vor.u32 %v8903_v47, %v6432_v48  ;;  %s12859_s0 = sld [smem:[#allocation30_spill]] }
  0x8b   :  { %2398 = vmatpush.bf16.msra.mxu1 %v7007_v45  ;;  %v6459_v45 = vor.u32 %v8909_v41, %v6456_v42  ;;  %v9053_v41 = vld [vmem:[%s12854_s5 + $0x574] sm:$0xf]  ;;  %v7032_v42 = vld [vmem:[%s12854_s5 + $0x588] sm:$0xf0]  ;;  %s12860_s28 = sld [smem:[#allocation37_spill]] }
  0x8c   :  { %2411 = vmatpush.bf16.msra.mxu2 %v7199_v56  ;;  %v6600_v56 = vld [vmem:[%s12854_s5 + $0x228] sm:$0xf0] }
  0x8d   :  { %2424 = vmatpush.bf16.msra.mxu3 %v7391_v59  ;;  %v6603_v58 = vor.u32 %v8945_v55, %v6600_v56  ;;  %v8891_v59 = vld [vmem:[%s12854_s5 + $0x64] sm:$0xf]  ;;  %v7035_v55 = vor.u32 %v9053_v41, %v7032_v42  ;;  %v7440_v56 = vld [vmem:[%s12854_s5 + $0x8b8] sm:$0xf0] }
  0x8e   :  { %2386 = vmatpush.bf16.msra.mxu0 %v6791_v53  ;;  %v8897_v53 = vld [vmem:[%s12854_s5 + $0x94] sm:$0xf]  ;;  %v6387_v62 = vor.u32 %v8891_v59, %v6384_v60  ;;  %v9047_v59 = vld [vmem:[%s12854_s5 + $0x544] sm:$0xf]  ;;  %v7008_v60 = vld [vmem:[%s12854_s5 + $0x558] sm:$0xf0] }
  0x8f   :  { %2399 = vmatpush.bf16.msra.mxu1 %v6983_v57  ;;  %v6411_v57 = vor.u32 %v8897_v53, %v6408_v54  ;;  %v7152_v41 = vld [vmem:[%s12854_s5 + $0x678] sm:$0xf0]  ;;  %v9131_v42 = vld [vmem:[%s12854_s5 + $0x7e4] sm:$0xf] }
  0x90   :  { %2412 = vmatpush.bf16.msra.mxu2 %v7175_v4 }
  0x91   :  { %2425 = vmatpush.bf16.msra.mxu3 %v7367_v7  ;;  %v8885_v7 = vld [vmem:[%s12854_s5 + $0x34] sm:$0xf] }
  0x92   :  { %2387 = vmatpush.bf16.msra.mxu0 %v6767_v1  ;;  %v7102_v1 = vld [vmem:[%s12854_s5 + $0x600] sm:$0xf]  ;;  %v6363_v11 = vor.u32 %v8885_v7, %v6360_v8  ;;  %v9041_v7 = vld [vmem:[%s12854_s5 + $0x514] sm:$0xf]  ;;  %v6984_v8 = vld [vmem:[%s12854_s5 + $0x528] sm:$0xf0] }
  0x93   :  { %2400 = vmatpush.bf16.msra.mxu1 %v6959_v5  ;;  %v7103_v4 = vor.u32 %v9074_v2, %v7102_v1  ;;  %v9122_v5 = vld [vmem:[%s12854_s5 + $0x794] sm:$0xf0]  ;;  %v7224_v1 = vld [vmem:[%s12854_s5 + $0x708] sm:$0xf0]  ;;  %v9149_v2 = vld [vmem:[%s12854_s5 + $0x874] sm:$0xf] }
  0x94   :  { %2413 = vmatpush.bf16.msra.mxu2 %v7151_v17  ;;  %v7295_v6 = vor.u32 %v9122_v5, %v7294_v3  ;;  %v6528_v17 = vld [vmem:[%s12854_s5 + $0x198] sm:$0xf0]  ;;  %v7011_v3 = vor.u32 %v9047_v59, %v7008_v60  ;;  %v8993_v5 = vld [vmem:[%s12854_s5 + $0x394] sm:$0xf]  ;;  %v7128_v59 = vld [vmem:[%s12854_s5 + $0x648] sm:$0xf0] }
  0x95   :  { %2426 = vmatpush.bf16.msra.mxu3 %v7343_v20  ;;  %v6888_v20 = vld [vmem:[%s12854_s5 + $0x468] sm:$0xf0] }
  0x96   :  { %2388 = vmatpush.bf16.msra.mxu0 %v6743_v13  ;;  %v8879_v13 = vld [vmem:[%s12854_s5 + $0x4] sm:$0xf]  ;;  %v6891_v24 = vor.u32 %v9017_v19, %v6888_v20  ;;  %v6768_v20 = vld [vmem:[%s12854_s5 + $0x378] sm:$0xf0] }
  0x97   :  { %2401 = vmatpush.bf16.msra.mxu1 %v6935_v18  ;;  %v6339_v15 = vor.u32 %v8879_v13, %v6336_v14  ;;  %v6531_v18 = vor.u32 %v8927_v16, %v6528_v17  ;;  %v9095_v14 = vld [vmem:[%s12854_s5 + $0x6c4] sm:$0xf]  ;;  %v6987_v17 = vor.u32 %v9041_v7, %v6984_v8  ;;  %v6678_v7 = vld [vmem:[%s12854_s5 + $0x2a8] sm:$0xf]  ;;  %v8967_v8 = vld [vmem:[%s12854_s5 + $0x2bc] sm:$0xf0] }
  0x98   :  { %2414 = vmatpush.bf16.msra.mxu2 %v7127_v30  ;;  %v9143_v16 = vld [vmem:[%s12854_s5 + $0x844] sm:$0xf] }
  0x99   :  { %2427 = vmatpush.bf16.msra.mxu3 %v7319_v35  ;;  %v9161_v35 = vld [vmem:[%s12854_s5 + $0x8d4] sm:$0xf]  ;;  %v8987_v19 = vld [vmem:[%s12854_s5 + $0x364] sm:$0xf] }
  0x9a   :  { %2389 = vmatpush.bf16.msra.mxu0 %v6719_v29  ;;  %v6864_v29 = vld [vmem:[%s12854_s5 + $0x438] sm:$0xf0]  ;;  %v7467_v48 = vor.u32 %v9161_v35, %v7464_v37  ;;  %v6936_v35 = vld [vmem:[%s12854_s5 + $0x4c8] sm:$0xf0] }
  0x9b   :  { %2402 = vmatpush.bf16.msra.mxu1 %v6911_v31  ;;  %v9059_v31 = vld [vmem:[%s12854_s5 + $0x5a4] sm:$0xf] }
  0x9c   :  { %2415 = vmatpush.bf16.msra.mxu2 %v7103_v4  ;;  %v7416_v4 = vld [vmem:[%s12854_s5 + $0x888] sm:$0xf0] }
  0x9d   :  { %2428 = vmatpush.bf16.msra.mxu3 %v7295_v6  ;;  %v6792_v6 = vld [vmem:[%s12854_s5 + $0x3a8] sm:$0xf0] }
  0x9e   :  { %2434 = vmatpush.bf16.msrb.mxu0 %v6507_v32  ;;  %v7056_v32 = vld [vmem:[%s12854_s5 + $0x5b8] sm:$0xf0]  ;;  %v6795_v13 = vor.u32 %v8993_v5, %v6792_v6  ;;  %v8919_v6 = vld [vmem:[%s12854_s5 + $0x13c] sm:$0xf0] }
  0x9f   :  { %2447 = vmatpush.bf16.msrb.mxu1 %v6699_v33  ;;  %v6867_v33 = vor.u32 %v9011_v28, %v6864_v29  ;;  %v7059_v36 = vor.u32 %v9059_v31, %v7056_v32  ;;  %v7176_v28 = vld [vmem:[%s12854_s5 + $0x6a8] sm:$0xf0]  ;;  %v9137_v29 = vld [vmem:[%s12854_s5 + $0x814] sm:$0xf]  ;;  %v6963_v31 = vor.u32 %v9035_v21, %v6960_v22  ;;  %v6462_v22 = vld [vmem:[%s12854_s5 + $0xf8] sm:$0xf] }
  0xa0   :  { %v7368_v32 = vld [vmem:[%s12854_s5 + $0x828] sm:$0xf0] }
  0xa1   :  { %v7371_v37 = vor.u32 %v9137_v29, %v7368_v32  ;;  %v9015_v32 = vld [vmem:[%s12854_s5 + $0x43c] sm:$0xf0] }
  0xa2   :  { %2435 = vmatpush.bf16.msrb.mxu0 %v6483_v38  ;;  %v9005_v38 = vld [vmem:[%s12854_s5 + $0x3f4] sm:$0xf] }
  0xa3   :  { %2448 = vmatpush.bf16.msrb.mxu1 %v6675_v40  ;;  %v6840_v40 = vld [vmem:[%s12854_s5 + $0x408] sm:$0xf0] }
  0xa4   :  { %v6843_v49 = vor.u32 %v9005_v38, %v6840_v40  ;;  %v9083_v40 = vld [vmem:[%s12854_s5 + $0x664] sm:$0xf] }
  0xa6   :  { %2436 = vmatpush.bf16.msrb.mxu0 %v6459_v45 }
  0xa7   :  { %2449 = vmatpush.bf16.msrb.mxu1 %v6651_v46 }
  0xaa   :  { %2437 = vmatpush.bf16.msrb.mxu0 %v6435_v51  ;;  %v7248_v51 = vld [vmem:[%s12854_s5 + $0x738] sm:$0xf0] }
  0xab   :  { %2450 = vmatpush.bf16.msrb.mxu1 %v6627_v52  ;;  %v9155_v52 = vld [vmem:[%s12854_s5 + $0x8a4] sm:$0xf]  ;;  %v7251_v61 = vor.u32 %v9107_v50, %v7248_v51  ;;  %v7155_v50 = vor.u32 %v9083_v40, %v7152_v41  ;;  %v6510_v51 = vld [vmem:[%s12854_s5 + $0x158] sm:$0xf]  ;;  %v8907_v40 = vld [vmem:[%s12854_s5 + $0xdc] sm:$0xf0] }
  0xae   :  { %2438 = vmatpush.bf16.msrb.mxu0 %v6411_v57  ;;  %v8999_v57 = vld [vmem:[%s12854_s5 + $0x3c4] sm:$0xf] }
  0xaf   :  { %2451 = vmatpush.bf16.msrb.mxu1 %v6603_v58  ;;  %v6816_v58 = vld [vmem:[%s12854_s5 + $0x3d8] sm:$0xf0] }
  0xb0   :  { %v6819_v63 = vor.u32 %v8999_v57, %v6816_v58  ;;  %v8973_v57 = vld [vmem:[%s12854_s5 + $0x2ec] sm:$0xf0]  ;;  %v9077_v58 = vld [vmem:[%s12854_s5 + $0x634] sm:$0xf] }
  0xb1   :  { %v7131_v5 = vor.u32 %v9077_v58, %v7128_v59  ;;  %v6822_v59 = vld [vmem:[%s12854_s5 + $0x3c8] sm:$0xf] }
  0xb2   :  { %2439 = vmatpush.bf16.msrb.mxu0 %v6387_v62  ;;  %v7443_v62 = vor.u32 %v9155_v52, %v7440_v56  ;;  %v8925_v52 = vld [vmem:[%s12854_s5 + $0x16c] sm:$0xf0] }
  0xb3   :  { %2452 = vmatpush.bf16.msrb.mxu1 %v6579_v0  ;;  %v9101_v0 = vld [vmem:[%s12854_s5 + $0x6f4] sm:$0xf] }
  0xb4   :  { %v7227_v10 = vor.u32 %v9101_v0, %v7224_v1  ;;  %v6511_v0 = vor.u32 %v8925_v52, %v6510_v51  ;;  %v6486_v1 = vld [vmem:[%s12854_s5 + $0x128] sm:$0xf]  ;;  %v6414_v52 = vld [vmem:[%s12854_s5 + $0x98] sm:$0xf] }
  0xb6   :  { %2440 = vmatpush.bf16.msrb.mxu0 %v6363_v11 }
  0xb7   :  { %2453 = vmatpush.bf16.msrb.mxu1 %v6555_v12  ;;  %v7419_v12 = vor.u32 %v9149_v2, %v7416_v4 }
  0xba   :  { %2441 = vmatpush.bf16.msrb.mxu0 %v6339_v15  ;;  %v7200_v15 = vld [vmem:[%s12854_s5 + $0x6d8] sm:$0xf0] }
  0xbb   :  { %2454 = vmatpush.bf16.msrb.mxu1 %v6531_v18  ;;  %v7392_v18 = vld [vmem:[%s12854_s5 + $0x858] sm:$0xf0] }
  0xda   :  { %v539_v23 = vpop.f32.mrf.mxu0 }
  0xdb   :  { %v10469_v25 = vpack.c.bf16 %v539_v23, %v539_v23  ;;  %v552_v26 = vpop.f32.mrf.mxu1  ;;  %v7203_v23 = vor.u32 %v9095_v14, %v7200_v15  ;;  %v7296_v14 = vld [vmem:[%s12854_s5 + $0x798] sm:$0xf0]  ;;  %v6894_v15 = vld [vmem:[%s12854_s5 + $0x458] sm:$0xf] }
  0xdc   :  { %v10477_v30 = vpack.c.bf16 %v552_v26, %v552_v26  ;;  %v6771_v26 = vor.u32 %v8987_v19, %v6768_v20  ;;  %v9069_v19 = vld [vmem:[%s12854_s5 + $0x5ec] sm:$0xf0]  ;;  %v6679_v20 = vor.u32 %v8967_v8, %v6678_v7  ;;  %v6798_v8 = vld [vmem:[%s12854_s5 + $0x398] sm:$0xf] }
  0xdd   :  { %2364 = vmatmul.bf16.vlgmr.msrb.gmra.mxu2 %v10469_v25 }
  0xde   :  { %2377 = vmatmul.bf16.vlgmr.msrb.gmra.mxu3 %v10477_v30  ;;  %2460 = vmatpush.bf16.msrb.mxu2 %v6891_v24  ;;  %v7395_v24 = vor.u32 %v9143_v16, %v7392_v18  ;;  %v9021_v16 = vld [vmem:[%s12854_s5 + $0x46c] sm:$0xf0]  ;;  %v7086_v18 = vld [vmem:[%s12854_s5 + $0x5d8] sm:$0xf] }
  0xdf   :  { %2473 = vmatpush.bf16.msrb.mxu3 %v7083_v27  ;;  %v9089_v27 = vld [vmem:[%s12854_s5 + $0x694] sm:$0xf]  ;;  %v7087_v29 = vor.u32 %v9069_v19, %v7086_v18  ;;  %v6558_v18 = vld [vmem:[%s12854_s5 + $0x1b8] sm:$0xf]  ;;  %v8937_v19 = vld [vmem:[%s12854_s5 + $0x1cc] sm:$0xf0] }
  0xe2   :  { %v565_v43 = vpop.f32.mrf.mxu2  ;;  %2461 = vmatpush.bf16.msrb.mxu2 %v6867_v33  ;;  %v541_v47 = vpop.f32.mrf.mxu0  ;;  %v8981_v33 = vld [vmem:[%s12854_s5 + $0x334] sm:$0xf] }
  0xe3   :  { %v10511_v45 = vpack.c.bf16 %v565_v43, %v565_v43  ;;  %v578_v46 = vpop.f32.mrf.mxu3  ;;  %2474 = vmatpush.bf16.msrb.mxu3 %v7059_v36  ;;  %v554_v54 = vpop.f32.mrf.mxu1  ;;  %v7179_v36 = vor.u32 %v9089_v27, %v7176_v28  ;;  %v6747_v38 = vor.u32 %v8981_v33, %v6744_v34  ;;  %v6939_v43 = vor.u32 %v9029_v39, %v6936_v35  ;;  %v6720_v47 = vld [vmem:[%s12854_s5 + $0x318] sm:$0xf0]  ;;  %v6654_v27 = vld [vmem:[%s12854_s5 + $0x278] sm:$0xf]  ;;  %v8961_v28 = vld [vmem:[%s12854_s5 + $0x28c] sm:$0xf0] }
  0xe4   :  { %v10522_v53 = vpack.c.bf16 %v578_v46, %v578_v46  ;;  %v8975_v46 = vld [vmem:[%s12854_s5 + $0x304] sm:$0xf]  ;;  %v6702_v54 = vld [vmem:[%s12854_s5 + $0x2d8] sm:$0xf]  ;;  %v7062_v39 = vld [vmem:[%s12854_s5 + $0x5a8] sm:$0xf] }
  0xe5   :  { %2390 = vmatmul.bf16.vlgmr.msra.gmra.mxu0 %v10511_v45  ;;  %v6723_v56 = vor.u32 %v8975_v46, %v6720_v47  ;;  %v6703_v4 = vor.u32 %v8973_v57, %v6702_v54  ;;  %v9063_v35 = vld [vmem:[%s12854_s5 + $0x5bc] sm:$0xf0]  ;;  %v6846_v46 = vld [vmem:[%s12854_s5 + $0x3f8] sm:$0xf]  ;;  %v9009_v47 = vld [vmem:[%s12854_s5 + $0x40c] sm:$0xf0] }
  0xe6   :  { %2403 = vmatmul.bf16.vlgmr.msra.gmra.mxu1 %v10522_v53  ;;  %2486 = vmatpush.bf16.msra.mxu0 %v7275_v44  ;;  %v7344_v44 = vld [vmem:[%s12854_s5 + $0x7f8] sm:$0xf0]  ;;  %v8901_v54 = vld [vmem:[%s12854_s5 + $0xac] sm:$0xf0] }
  0xe7   :  { %2499 = vmatpush.bf16.msra.mxu1 %v7467_v48  ;;  %2462 = vmatpush.bf16.msrb.mxu2 %v6843_v49  ;;  %v9023_v48 = vld [vmem:[%s12854_s5 + $0x484] sm:$0xf]  ;;  %v6912_v49 = vld [vmem:[%s12854_s5 + $0x498] sm:$0xf0]  ;;  %v8949_v57 = vld [vmem:[%s12854_s5 + $0x22c] sm:$0xf0] }
  0xe8   :  { %2475 = vmatpush.bf16.msrb.mxu3 %v7035_v55  ;;  %v7347_v55 = vor.u32 %v9131_v42, %v7344_v44  ;;  %v6915_v60 = vor.u32 %v9023_v48, %v6912_v49  ;;  %v6630_v42 = vld [vmem:[%s12854_s5 + $0x248] sm:$0xf]  ;;  %v7063_v44 = vor.u32 %v9063_v35, %v7062_v39  ;;  %v7038_v49 = vld [vmem:[%s12854_s5 + $0x578] sm:$0xf]  ;;  %v9117_v39 = vld [vmem:[%s12854_s5 + $0x76c] sm:$0xf0] }
  0xe9   :  { %v7470_v35 = vld [vmem:[%s12854_s5 + $0x8d8] sm:$0xf] }
  0xea   :  { %2487 = vmatpush.bf16.msra.mxu0 %v7251_v61  ;;  %v567_v9 = vpop.f32.mrf.mxu2  ;;  %v9125_v61 = vld [vmem:[%s12854_s5 + $0x7b4] sm:$0xf] }
  0xeb   :  { %2500 = vmatpush.bf16.msra.mxu1 %v7443_v62  ;;  %v580_v11 = vpop.f32.mrf.mxu3  ;;  %2463 = vmatpush.bf16.msrb.mxu2 %v6819_v63  ;;  %v7320_v62 = vld [vmem:[%s12854_s5 + $0x7c8] sm:$0xf0] }
  0xec   :  { %2476 = vmatpush.bf16.msrb.mxu3 %v7011_v3  ;;  %v9071_v11 = vld [vmem:[%s12854_s5 + $0x604] sm:$0xf] }
  0xee   :  { %2488 = vmatpush.bf16.msra.mxu0 %v7227_v10  ;;  %v7323_v10 = vor.u32 %v9125_v61, %v7320_v62  ;;  %v6415_v61 = vor.u32 %v8901_v54, %v6414_v52  ;;  %v7014_v62 = vld [vmem:[%s12854_s5 + $0x548] sm:$0xf]  ;;  %v9159_v52 = vld [vmem:[%s12854_s5 + $0x8bc] sm:$0xf0] }
  0xef   :  { %2501 = vmatpush.bf16.msra.mxu1 %v7419_v12  ;;  %2464 = vmatpush.bf16.msrb.mxu2 %v6795_v13  ;;  %v7104_v12 = vld [vmem:[%s12854_s5 + $0x618] sm:$0xf0]  ;;  %v9119_v13 = vld [vmem:[%s12854_s5 + $0x784] sm:$0xf] }
  0xf0   :  { %2477 = vmatpush.bf16.msrb.mxu3 %v6987_v17  ;;  %v6487_v17 = vor.u32 %v8919_v6, %v6486_v1  ;;  %v7107_v21 = vor.u32 %v9071_v11, %v7104_v12  ;;  %v6390_v1 = vld [vmem:[%s12854_s5 + $0x68] sm:$0xf]  ;;  %v8943_v6 = vld [vmem:[%s12854_s5 + $0x1fc] sm:$0xf0]  ;;  %v6990_v12 = vld [vmem:[%s12854_s5 + $0x518] sm:$0xf] }
  0xf2   :  { %2489 = vmatpush.bf16.msra.mxu0 %v7203_v23  ;;  %v8913_v23 = vld [vmem:[%s12854_s5 + $0x10c] sm:$0xf0] }
  0xf3   :  { %2502 = vmatpush.bf16.msra.mxu1 %v7395_v24  ;;  %2465 = vmatpush.bf16.msrb.mxu2 %v6771_v26  ;;  %v7299_v24 = vor.u32 %v9119_v13, %v7296_v14  ;;  %v6895_v26 = vor.u32 %v9021_v16, %v6894_v15  ;;  %v6463_v34 = vor.u32 %v8913_v23, %v6462_v22  ;;  %v9045_v13 = vld [vmem:[%s12854_s5 + $0x52c] sm:$0xf0]  ;;  %v6366_v15 = vld [vmem:[%s12854_s5 + $0x38] sm:$0xf]  ;;  %v8991_v22 = vld [vmem:[%s12854_s5 + $0x37c] sm:$0xf0] }
  0xf4   :  { %2478 = vmatpush.bf16.msrb.mxu3 %v6963_v31  ;;  %v6870_v31 = vld [vmem:[%s12854_s5 + $0x428] sm:$0xf]  ;;  %v8889_v16 = vld [vmem:[%s12854_s5 + $0x4c] sm:$0xf0] }
  0xf5   :  { %2442 = vmatmul.bf16.vlgmr.msrb.gmra.mxu0 %v10469_v25  ;;  %v6871_v41 = vor.u32 %v9015_v32, %v6870_v31  ;;  %v6367_v23 = vor.u32 %v8889_v16, %v6366_v15  ;;  %v6534_v31 = vld [vmem:[%s12854_s5 + $0x188] sm:$0xf]  ;;  %v8931_v32 = vld [vmem:[%s12854_s5 + $0x19c] sm:$0xf0]  ;;  %v6680_v15 = vld [vmem:[%s12854_s5 + $0x2c0] sm:$0xf0] }
  0xf6   :  { %2455 = vmatmul.bf16.vlgmr.msrb.gmra.mxu1 %v10477_v30  ;;  %2490 = vmatpush.bf16.msra.mxu0 %v7179_v36 }
  0xf7   :  { %2503 = vmatpush.bf16.msra.mxu1 %v7371_v37  ;;  %2466 = vmatpush.bf16.msrb.mxu2 %v6747_v38  ;;  %v6655_v37 = vor.u32 %v8961_v28, %v6654_v27  ;;  %v6438_v38 = vld [vmem:[%s12854_s5 + $0xc8] sm:$0xf]  ;;  %v6559_v28 = vor.u32 %v8937_v19, %v6558_v18  ;;  %v9099_v18 = vld [vmem:[%s12854_s5 + $0x6dc] sm:$0xf0] }
  0xf8   :  { %2479 = vmatpush.bf16.msrb.mxu3 %v6939_v43  ;;  %v8955_v43 = vld [vmem:[%s12854_s5 + $0x25c] sm:$0xf0]  ;;  %v6439_v48 = vor.u32 %v8907_v40, %v6438_v38  ;;  %v6342_v27 = vld [vmem:[%s12854_s5 + $0x8] sm:$0xf]  ;;  %v6750_v38 = vld [vmem:[%s12854_s5 + $0x338] sm:$0xf] }
  0xf9   :  { %v6631_v51 = vor.u32 %v8955_v43, %v6630_v42  ;;  %v8985_v40 = vld [vmem:[%s12854_s5 + $0x34c] sm:$0xf0]  ;;  %v6942_v42 = vld [vmem:[%s12854_s5 + $0x4b8] sm:$0xf] }
  0xfa   :  { %v591_v63 = vpop.f32.mrf.mxu0  ;;  %2491 = vmatpush.bf16.msra.mxu0 %v7155_v50  ;;  %v9057_v50 = vld [vmem:[%s12854_s5 + $0x58c] sm:$0xf0] }
  0xfb   :  { %v10666_v2 = vpack.c.bf16 %v591_v63, %v591_v63  ;;  %v604_v3 = vpop.f32.mrf.mxu1  ;;  %2504 = vmatpush.bf16.msra.mxu1 %v7347_v55  ;;  %2467 = vmatpush.bf16.msrb.mxu2 %v6723_v56  ;;  %v6847_v55 = vor.u32 %v9009_v47, %v6846_v46  ;;  %v6606_v56 = vld [vmem:[%s12854_s5 + $0x218] sm:$0xf]  ;;  %v7039_v58 = vor.u32 %v9057_v50, %v7038_v49  ;;  %v9051_v63 = vld [vmem:[%s12854_s5 + $0x55c] sm:$0xf0]  ;;  %v9033_v43 = vld [vmem:[%s12854_s5 + $0x4cc] sm:$0xf0] }
  0xfc   :  { %v10677_v9 = vpack.c.bf16 %v604_v3, %v604_v3  ;;  %2480 = vmatpush.bf16.msrb.mxu3 %v6915_v60  ;;  %v9003_v60 = vld [vmem:[%s12854_s5 + $0x3dc] sm:$0xf0]  ;;  %v7015_v7 = vor.u32 %v9051_v63, %v7014_v62  ;;  %v7254_v47 = vld [vmem:[%s12854_s5 + $0x728] sm:$0xf]  ;;  %v6751_v49 = vor.u32 %v8985_v40, %v6750_v38  ;;  %v6943_v54 = vor.u32 %v9033_v43, %v6942_v42  ;;  %v8970_v62 = vld [vmem:[%s12854_s5 + $0x2dc] sm:$0xf] }
  0xfd   :  { %2416 = vmatmul.bf16.vlgmr.msra.gmra.mxu2 %v10666_v2  ;;  %v8895_v3 = vld [vmem:[%s12854_s5 + $0x7c] sm:$0xf0]  ;;  %v6704_v63 = vld [vmem:[%s12854_s5 + $0x2f0] sm:$0xf0]  ;;  %v8952_v40 = vld [vmem:[%s12854_s5 + $0x24c] sm:$0xf] }
  0xfe   :  { %2429 = vmatmul.bf16.vlgmr.msra.gmra.mxu3 %v10677_v9  ;;  %2492 = vmatpush.bf16.msra.mxu0 %v7131_v5  ;;  %v6582_v5 = vld [vmem:[%s12854_s5 + $0x1e8] sm:$0xf]  ;;  %v6391_v11 = vor.u32 %v8895_v3, %v6390_v1  ;;  %v9111_v50 = vld [vmem:[%s12854_s5 + $0x73c] sm:$0xf0]  ;;  %v7230_v3 = vld [vmem:[%s12854_s5 + $0x6f8] sm:$0xf] }
  0xff   :  { %2512 = vmatpush.bf16.msra.mxu2 %v6511_v0  ;;  %2505 = vmatpush.bf16.msra.mxu1 %v7323_v10  ;;  %v6607_v0 = vor.u32 %v8949_v57, %v6606_v56  ;;  %v8997_v10 = vld [vmem:[%s12854_s5 + $0x3ac] sm:$0xf0]  ;;  %v6583_v14 = vor.u32 %v8943_v6, %v6582_v5  ;;  %v8979_v56 = vld [vmem:[%s12854_s5 + $0x31c] sm:$0xf0]  ;;  %v6918_v57 = vld [vmem:[%s12854_s5 + $0x488] sm:$0xf] }
 0x100   :  { %2525 = vmatpush.bf16.msra.mxu3 %v6703_v4  ;;  %v6823_v4 = vor.u32 %v9003_v60, %v6822_v59  ;;  %v8922_v59 = vld [vmem:[%s12854_s5 + $0x15c] sm:$0xf]  ;;  %v6512_v60 = vld [vmem:[%s12854_s5 + $0x170] sm:$0xf0]  ;;  %v7158_v43 = vld [vmem:[%s12854_s5 + $0x668] sm:$0xf] }
 0x101   :  { %v6515_v6 = vor.u32 %v8922_v59, %v6512_v60  ;;  %v7326_v60 = vld [vmem:[%s12854_s5 + $0x7b8] sm:$0xf] }
 0x102   :  { %v593_v33 = vpop.f32.mrf.mxu0  ;;  %2493 = vmatpush.bf16.msra.mxu0 %v7107_v21  ;;  %v6774_v21 = vld [vmem:[%s12854_s5 + $0x368] sm:$0xf] }
 0x103   :  { %2513 = vmatpush.bf16.msra.mxu2 %v6487_v17  ;;  %v606_v36 = vpop.f32.mrf.mxu1  ;;  %2506 = vmatpush.bf16.msra.mxu1 %v7299_v24  ;;  %v6799_v17 = vor.u32 %v8997_v10, %v6798_v8  ;;  %v6966_v24 = vld [vmem:[%s12854_s5 + $0x4e8] sm:$0xf]  ;;  %v6775_v33 = vor.u32 %v8991_v22, %v6774_v21  ;;  %v9153_v8 = vld [vmem:[%s12854_s5 + $0x88c] sm:$0xf0]  ;;  %v6707_v10 = vor.u32 %v8970_v62, %v6704_v63  ;;  %v9147_v21 = vld [vmem:[%s12854_s5 + $0x85c] sm:$0xf0] }
 0x104   :  { %2526 = vmatpush.bf16.msra.mxu3 %v6679_v20  ;;  %v6991_v20 = vor.u32 %v9045_v13, %v6990_v12  ;;  %v6488_v12 = vld [vmem:[%s12854_s5 + $0x140] sm:$0xf0]  ;;  %v8892_v63 = vld [vmem:[%s12854_s5 + $0x6c] sm:$0xf] }
 0x105   :  { %2494 = vmatmul.bf16.vlgmr.msra.gmra.mxu0 %v10666_v2 }
 0x106   :  { %2538 = vmatpush.bf16.msrb.mxu0 %v6895_v26  ;;  %2507 = vmatmul.bf16.vlgmr.msra.gmra.mxu1 %v10677_v9  ;;  %v9039_v26 = vld [vmem:[%s12854_s5 + $0x4fc] sm:$0xf0] }
 0x107   :  { %2551 = vmatpush.bf16.msrb.mxu1 %v7087_v29  ;;  %2514 = vmatpush.bf16.msra.mxu2 %v6463_v34  ;;  %v8883_v29 = vld [vmem:[%s12854_s5 + $0x1c] sm:$0xf0]  ;;  %v7278_v34 = vld [vmem:[%s12854_s5 + $0x758] sm:$0xf]  ;;  %v6967_v36 = vor.u32 %v9039_v26, %v6966_v24  ;;  %v6464_v24 = vld [vmem:[%s12854_s5 + $0x110] sm:$0xf0] }
 0x108   :  { %2527 = vmatpush.bf16.msra.mxu3 %v6655_v37  ;;  %v9165_v37 = vld [vmem:[%s12854_s5 + $0x8ec] sm:$0xf0]  ;;  %v7279_v46 = vor.u32 %v9117_v39, %v7278_v34  ;;  %v7374_v34 = vld [vmem:[%s12854_s5 + $0x818] sm:$0xf] }
 0x109   :  { %v9141_v39 = vld [vmem:[%s12854_s5 + $0x82c] sm:$0xf0] }
 0x10a   :  { %2539 = vmatpush.bf16.msrb.mxu0 %v6871_v41  ;;  %v6343_v41 = vor.u32 %v8883_v29, %v6342_v27  ;;  %v8958_v27 = vld [vmem:[%s12854_s5 + $0x27c] sm:$0xf]  ;;  %v7375_v42 = vor.u32 %v9141_v39, %v7374_v34  ;;  %v6344_v34 = vld [vmem:[%s12854_s5 + $0x20] sm:$0xf0]  ;;  %v8928_v39 = vld [vmem:[%s12854_s5 + $0x18c] sm:$0xf] }
 0x10b   :  { %2552 = vmatpush.bf16.msrb.mxu1 %v7063_v44  ;;  %2515 = vmatpush.bf16.msra.mxu2 %v6439_v48  ;;  %v6535_v44 = vor.u32 %v8931_v32, %v6534_v31  ;;  %v7471_v48 = vor.u32 %v9165_v37, %v7470_v35  ;;  %v7182_v31 = vld [vmem:[%s12854_s5 + $0x698] sm:$0xf]  ;;  %v9093_v32 = vld [vmem:[%s12854_s5 + $0x6ac] sm:$0xf0]  ;;  %v6440_v37 = vld [vmem:[%s12854_s5 + $0xe0] sm:$0xf0] }
 0x10c   :  { %2528 = vmatpush.bf16.msra.mxu3 %v6631_v51  ;;  %v7446_v51 = vld [vmem:[%s12854_s5 + $0x8a8] sm:$0xf]  ;;  %v7183_v38 = vor.u32 %v9093_v32, %v7182_v31  ;;  %v7064_v31 = vld [vmem:[%s12854_s5 + $0x5c0] sm:$0xf0] }
 0x10d   :  { %2468 = vmatmul.bf16.vlgmr.msrb.gmra.mxu2 %v10511_v45 }
 0x10e   :  { %2540 = vmatpush.bf16.msrb.mxu0 %v6847_v55  ;;  %2481 = vmatmul.bf16.vlgmr.msrb.gmra.mxu3 %v10522_v53  ;;  %v6726_v55 = vld [vmem:[%s12854_s5 + $0x308] sm:$0xf] }
 0x10f   :  { %2553 = vmatpush.bf16.msrb.mxu1 %v7039_v58  ;;  %2516 = vmatpush.bf16.msra.mxu2 %v6415_v61  ;;  %v9027_v58 = vld [vmem:[%s12854_s5 + $0x49c] sm:$0xf0]  ;;  %v7255_v61 = vor.u32 %v9111_v50, %v7254_v47  ;;  %v6727_v1 = vor.u32 %v8979_v56, %v6726_v55  ;;  %v7350_v47 = vld [vmem:[%s12854_s5 + $0x7e8] sm:$0xf]  ;;  %v8898_v50 = vld [vmem:[%s12854_s5 + $0x9c] sm:$0xf] }
 0x110   :  { %2529 = vmatpush.bf16.msra.mxu3 %v6607_v0  ;;  %v7447_v0 = vor.u32 %v9159_v52, %v7446_v51  ;;  %v6919_v5 = vor.u32 %v9027_v58, %v6918_v57  ;;  %v6416_v51 = vld [vmem:[%s12854_s5 + $0xb0] sm:$0xf0]  ;;  %v7134_v57 = vld [vmem:[%s12854_s5 + $0x638] sm:$0xf]  ;;  %v9081_v58 = vld [vmem:[%s12854_s5 + $0x64c] sm:$0xf0] }
 0x111   :  { %v6608_v55 = vld [vmem:[%s12854_s5 + $0x230] sm:$0xf0]  ;;  %v6419_v59 = vor.u32 %v8898_v50, %v6416_v51 }
 0x112   :  { %2541 = vmatpush.bf16.msrb.mxu0 %v6823_v4  ;;  %v9105_v4 = vld [vmem:[%s12854_s5 + $0x70c] sm:$0xf0]  ;;  %v7040_v50 = vld [vmem:[%s12854_s5 + $0x590] sm:$0xf0] }
 0x113   :  { %2554 = vmatpush.bf16.msrb.mxu1 %v7015_v7  ;;  %2517 = vmatpush.bf16.msra.mxu2 %v6391_v11  ;;  %v7422_v7 = vld [vmem:[%s12854_s5 + $0x878] sm:$0xf]  ;;  %v8916_v11 = vld [vmem:[%s12854_s5 + $0x12c] sm:$0xf]  ;;  %v7231_v13 = vor.u32 %v9105_v4, %v7230_v3  ;;  %v6584_v4 = vld [vmem:[%s12854_s5 + $0x200] sm:$0xf0] }
 0x114   :  { %2530 = vmatpush.bf16.msra.mxu3 %v6583_v14  ;;  %v8964_v14 = vld [vmem:[%s12854_s5 + $0x2ac] sm:$0xf]  ;;  %v7423_v16 = vor.u32 %v9153_v8, %v7422_v7  ;;  %v6491_v19 = vor.u32 %v8916_v11, %v6488_v12  ;;  %v9075_v7 = vld [vmem:[%s12854_s5 + $0x61c] sm:$0xf0]  ;;  %v7302_v8 = vld [vmem:[%s12854_s5 + $0x788] sm:$0xf] }
 0x115   :  { %v6683_v22 = vor.u32 %v8964_v14, %v6680_v15  ;;  %v8940_v3 = vld [vmem:[%s12854_s5 + $0x1ec] sm:$0xf]  ;;  %v9018_v12 = vld [vmem:[%s12854_s5 + $0x45c] sm:$0xf] }
 0x116   :  { %2542 = vmatpush.bf16.msrb.mxu0 %v6799_v17  ;;  %v7206_v17 = vld [vmem:[%s12854_s5 + $0x6c8] sm:$0xf]  ;;  %v9066_v14 = vld [vmem:[%s12854_s5 + $0x5dc] sm:$0xf]  ;;  %v6587_v15 = vor.u32 %v8940_v3, %v6584_v4  ;;  %v7232_v3 = vld [vmem:[%s12854_s5 + $0x710] sm:$0xf0] }
 0x117   :  { %2555 = vmatpush.bf16.msrb.mxu1 %v6991_v20  ;;  %2518 = vmatpush.bf16.msra.mxu2 %v6367_v23  ;;  %v7398_v20 = vld [vmem:[%s12854_s5 + $0x848] sm:$0xf]  ;;  %v8910_v23 = vld [vmem:[%s12854_s5 + $0xfc] sm:$0xf]  ;;  %v7207_v26 = vor.u32 %v9099_v18, %v7206_v17  ;;  %v6368_v18 = vld [vmem:[%s12854_s5 + $0x50] sm:$0xf0] }
 0x118   :  { %2531 = vmatpush.bf16.msra.mxu3 %v6559_v28  ;;  %v6656_v28 = vld [vmem:[%s12854_s5 + $0x290] sm:$0xf0]  ;;  %v7399_v29 = vor.u32 %v9147_v21, %v7398_v20  ;;  %v8886_v17 = vld [vmem:[%s12854_s5 + $0x3c] sm:$0xf] }
 0x119   :  { %v6659_v35 = vor.u32 %v8958_v27, %v6656_v28  ;;  %v8934_v20 = vld [vmem:[%s12854_s5 + $0x1bc] sm:$0xf]  ;;  %v6560_v21 = vld [vmem:[%s12854_s5 + $0x1d0] sm:$0xf0]  ;;  %v6371_v27 = vor.u32 %v8886_v17, %v6368_v18  ;;  %v6872_v28 = vld [vmem:[%s12854_s5 + $0x440] sm:$0xf0] }
 0x11a   :  { %2543 = vmatpush.bf16.msrb.mxu0 %v6775_v33  ;;  %v6467_v33 = vor.u32 %v8910_v23, %v6464_v24  ;;  %v9012_v24 = vld [vmem:[%s12854_s5 + $0x42c] sm:$0xf]  ;;  %v6563_v32 = vor.u32 %v8934_v20, %v6560_v21 }
 0x11b   :  { %2556 = vmatpush.bf16.msrb.mxu1 %v6967_v36  ;;  %2519 = vmatpush.bf16.msra.mxu2 %v6343_v41  ;;  %v8904_v36 = vld [vmem:[%s12854_s5 + $0xcc] sm:$0xf]  ;;  %v6632_v41 = vld [vmem:[%s12854_s5 + $0x260] sm:$0xf0] }
 0x11c   :  { %2532 = vmatpush.bf16.msra.mxu3 %v6535_v44  ;;  %v9087_v44 = vld [vmem:[%s12854_s5 + $0x67c] sm:$0xf0]  ;;  %v9144_v18 = vld [vmem:[%s12854_s5 + $0x84c] sm:$0xf] }
 0x11d   :  { %v7159_v52 = vor.u32 %v9087_v44, %v7158_v43  ;;  %v9006_v44 = vld [vmem:[%s12854_s5 + $0x3fc] sm:$0xf]  ;;  %v8988_v21 = vld [vmem:[%s12854_s5 + $0x36c] sm:$0xf] }
 0x11e   :  { %2544 = vmatpush.bf16.msrb.mxu0 %v6751_v49  ;;  %2520 = vmatmul.bf16.vlgmr.msra.gmra.mxu2 %v10469_v25  ;;  %v6635_v49 = vor.u32 %v8952_v40, %v6632_v41  ;;  %v9162_v40 = vld [vmem:[%s12854_s5 + $0x8dc] sm:$0xf]  ;;  %v7472_v41 = vld [vmem:[%s12854_s5 + $0x8f0] sm:$0xf0] }
 0x11f   :  { %2564 = vmatpush.bf16.msrb.mxu2 %v7279_v46  ;;  %2557 = vmatpush.bf16.msrb.mxu1 %v6943_v54  ;;  %v6443_v46 = vor.u32 %v8904_v36, %v6440_v37  ;;  %v8946_v54 = vld [vmem:[%s12854_s5 + $0x21c] sm:$0xf]  ;;  %v7280_v37 = vld [vmem:[%s12854_s5 + $0x770] sm:$0xf0]  ;;  %v7475_v51 = vor.u32 %v9162_v40, %v7472_v41  ;;  %v9084_v41 = vld [vmem:[%s12854_s5 + $0x66c] sm:$0xf] }
 0x120   :  { %2577 = vmatpush.bf16.msrb.mxu3 %v7471_v48  ;;  %v9135_v48 = vld [vmem:[%s12854_s5 + $0x7fc] sm:$0xf0]  ;;  %v6611_v62 = vor.u32 %v8946_v54, %v6608_v55  ;;  %v9114_v36 = vld [vmem:[%s12854_s5 + $0x75c] sm:$0xf]  ;;  %v7256_v54 = vld [vmem:[%s12854_s5 + $0x740] sm:$0xf0] }
 0x121   :  { %2533 = vmatmul.bf16.vlgmr.msra.gmra.mxu3 %v10477_v30  ;;  %v7351_v56 = vor.u32 %v9135_v48, %v7350_v47  ;;  %v7283_v48 = vor.u32 %v9114_v36, %v7280_v37  ;;  %v9030_v37 = vld [vmem:[%s12854_s5 + $0x4bc] sm:$0xf] }
 0x122   :  { %2545 = vmatpush.bf16.msrb.mxu0 %v6727_v1  ;;  %v7135_v1 = vor.u32 %v9081_v58, %v7134_v57  ;;  %v7448_v57 = vld [vmem:[%s12854_s5 + $0x8c0] sm:$0xf0] }
 0x123   :  { %2565 = vmatpush.bf16.msrb.mxu2 %v7255_v61  ;;  %2558 = vmatpush.bf16.msrb.mxu1 %v6919_v5  ;;  %v9129_v61 = vld [vmem:[%s12854_s5 + $0x7cc] sm:$0xf0]  ;;  %v7110_v5 = vld [vmem:[%s12854_s5 + $0x608] sm:$0xf] }
 0x124   :  { %2578 = vmatpush.bf16.msrb.mxu3 %v7447_v0  ;;  %v6392_v0 = vld [vmem:[%s12854_s5 + $0x80] sm:$0xf0] }
 0x125   :  { %2546 = vmatmul.bf16.vlgmr.msrb.gmra.mxu0 %v10511_v45  ;;  %v6395_v11 = vor.u32 %v8892_v63, %v6392_v0  ;;  %v7016_v63 = vld [vmem:[%s12854_s5 + $0x560] sm:$0xf0] }
 0x126   :  { %2590 = vmatpush.bf16.msra.mxu0 %v6515_v6  ;;  %2559 = vmatmul.bf16.vlgmr.msrb.gmra.mxu1 %v10522_v53  ;;  %v7327_v6 = vor.u32 %v9129_v61, %v7326_v60  ;;  %v6824_v60 = vld [vmem:[%s12854_s5 + $0x3e0] sm:$0xf0] }
 0x127   :  { %2603 = vmatpush.bf16.msra.mxu1 %v6707_v10  ;;  %2566 = vmatpush.bf16.msrb.mxu2 %v7231_v13  ;;  %v9123_v10 = vld [vmem:[%s12854_s5 + $0x79c] sm:$0xf0]  ;;  %v6896_v13 = vld [vmem:[%s12854_s5 + $0x470] sm:$0xf0] }
 0x128   :  { %2579 = vmatpush.bf16.msrb.mxu3 %v7423_v16  ;;  %v7088_v16 = vld [vmem:[%s12854_s5 + $0x5f0] sm:$0xf0]  ;;  %v6899_v23 = vor.u32 %v9018_v12, %v6896_v13  ;;  %v9042_v12 = vld [vmem:[%s12854_s5 + $0x51c] sm:$0xf] }
 0x129   :  { %v6992_v13 = vld [vmem:[%s12854_s5 + $0x530] sm:$0xf0] }
 0x12a   :  { %2591 = vmatpush.bf16.msra.mxu0 %v6491_v19  ;;  %v7111_v19 = vor.u32 %v9075_v7, %v7110_v5  ;;  %v9150_v5 = vld [vmem:[%s12854_s5 + $0x87c] sm:$0xf]  ;;  %v6995_v20 = vor.u32 %v9042_v12, %v6992_v13  ;;  %v7112_v12 = vld [vmem:[%s12854_s5 + $0x620] sm:$0xf0]  ;;  %v9120_v13 = vld [vmem:[%s12854_s5 + $0x78c] sm:$0xf] }
 0x12b   :  { %2604 = vmatpush.bf16.msra.mxu1 %v6683_v22  ;;  %2567 = vmatpush.bf16.msrb.mxu2 %v7207_v26  ;;  %v7303_v22 = vor.u32 %v9123_v10, %v7302_v8  ;;  %v7091_v26 = vor.u32 %v9066_v14, %v7088_v16  ;;  %v8994_v8 = vld [vmem:[%s12854_s5 + $0x39c] sm:$0xf]  ;;  %v6800_v10 = vld [vmem:[%s12854_s5 + $0x3b0] sm:$0xf0]  ;;  %v7208_v16 = vld [vmem:[%s12854_s5 + $0x6e0] sm:$0xf0] }
 0x12c   :  { %2580 = vmatpush.bf16.msrb.mxu3 %v7399_v29  ;;  %v9060_v29 = vld [vmem:[%s12854_s5 + $0x5ac] sm:$0xf]  ;;  %v6803_v17 = vor.u32 %v8994_v8, %v6800_v10  ;;  %v8968_v8 = vld [vmem:[%s12854_s5 + $0x2c4] sm:$0xf0] }
 0x12e   :  { %2592 = vmatpush.bf16.msra.mxu0 %v6467_v33  ;;  %v8880_v33 = vld [vmem:[%s12854_s5 + $0xc] sm:$0xf] }
 0x12f   :  { %2605 = vmatpush.bf16.msra.mxu1 %v6659_v35  ;;  %2568 = vmatpush.bf16.msrb.mxu2 %v7183_v38  ;;  %v6536_v35 = vld [vmem:[%s12854_s5 + $0x1a0] sm:$0xf0]  ;;  %v6875_v38 = vor.u32 %v9012_v24, %v6872_v28  ;;  %v6347_v43 = vor.u32 %v8880_v33, %v6344_v34  ;;  %v9036_v24 = vld [vmem:[%s12854_s5 + $0x4ec] sm:$0xf]  ;;  %v9090_v28 = vld [vmem:[%s12854_s5 + $0x69c] sm:$0xf] }
 0x130   :  { %2581 = vmatpush.bf16.msrb.mxu3 %v7375_v42  ;;  %v7067_v42 = vor.u32 %v9060_v29, %v7064_v31  ;;  %v6539_v47 = vor.u32 %v8928_v39, %v6536_v35  ;;  %v7184_v29 = vld [vmem:[%s12854_s5 + $0x6b0] sm:$0xf0]  ;;  %v8982_v39 = vld [vmem:[%s12854_s5 + $0x33c] sm:$0xf] }
 0x131   :  { %v7376_v33 = vld [vmem:[%s12854_s5 + $0x830] sm:$0xf0]  ;;  %v7187_v36 = vor.u32 %v9090_v28, %v7184_v29  ;;  %v8962_v28 = vld [vmem:[%s12854_s5 + $0x294] sm:$0xf0] }
 0x132   :  { %2593 = vmatpush.bf16.msra.mxu0 %v6443_v46  ;;  %v6848_v46 = vld [vmem:[%s12854_s5 + $0x410] sm:$0xf0] }
 0x133   :  { %2606 = vmatpush.bf16.msra.mxu1 %v6635_v49  ;;  %2569 = vmatpush.bf16.msrb.mxu2 %v7159_v52  ;;  %v9054_v49 = vld [vmem:[%s12854_s5 + $0x57c] sm:$0xf]  ;;  %v9108_v52 = vld [vmem:[%s12854_s5 + $0x72c] sm:$0xf]  ;;  %v6851_v55 = vor.u32 %v9006_v44, %v6848_v46  ;;  %v6752_v35 = vld [vmem:[%s12854_s5 + $0x350] sm:$0xf0] }
 0x134   :  { %2582 = vmatpush.bf16.msrb.mxu3 %v7351_v56  ;;  %v9156_v56 = vld [vmem:[%s12854_s5 + $0x8ac] sm:$0xf]  ;;  %v7043_v58 = vor.u32 %v9054_v49, %v7040_v50  ;;  %v7259_v61 = vor.u32 %v9108_v52, %v7256_v54  ;;  %v7352_v46 = vld [vmem:[%s12854_s5 + $0x800] sm:$0xf0]  ;;  %v6518_v54 = vld [vmem:[%s12854_s5 + $0x160] sm:$0xf] }
 0x135   :  { %v7451_v0 = vor.u32 %v9156_v56, %v7448_v57  ;;  %v9132_v44 = vld [vmem:[%s12854_s5 + $0x7ec] sm:$0xf]  ;;  %v6728_v49 = vld [vmem:[%s12854_s5 + $0x320] sm:$0xf0]  ;;  %v6710_v56 = vld [vmem:[%s12854_s5 + $0x2e0] sm:$0xf] }
 0x136   :  { %2594 = vmatpush.bf16.msra.mxu0 %v6419_v59  ;;  %v9000_v59 = vld [vmem:[%s12854_s5 + $0x3cc] sm:$0xf]  ;;  %v7355_v57 = vor.u32 %v9132_v44, %v7352_v46  ;;  %v9010_v44 = vld [vmem:[%s12854_s5 + $0x414] sm:$0xf0]  ;;  %v11340_v46 = vld [vmem:[%s12855_s3] sm:$0x3f] }
 0x137   :  { %2607 = vmatpush.bf16.msra.mxu1 %v6611_v62  ;;  %2570 = vmatpush.bf16.msrb.mxu2 %v7135_v1  ;;  %v9048_v62 = vld [vmem:[%s12854_s5 + $0x54c] sm:$0xf]  ;;  %v9102_v1 = vld [vmem:[%s12854_s5 + $0x6fc] sm:$0xf]  ;;  %v6827_v4 = vor.u32 %v9000_v59, %v6824_v60  ;;  %v7136_v60 = vld [vmem:[%s12854_s5 + $0x650] sm:$0xf0] }
 0x138   :  { %2583 = vmatpush.bf16.msrb.mxu3 %v7327_v6  ;;  %v7424_v6 = vld [vmem:[%s12854_s5 + $0x890] sm:$0xf0]  ;;  %v7019_v7 = vor.u32 %v9048_v62, %v7016_v63  ;;  %v9024_v50 = vld [vmem:[%s12854_s5 + $0x48c] sm:$0xf]  ;;  %v9078_v59 = vld [vmem:[%s12854_s5 + $0x63c] sm:$0xf] }
 0x139   :  { %v7427_v14 = vor.u32 %v9150_v5, %v7424_v6  ;;  %v9126_v62 = vld [vmem:[%s12854_s5 + $0x7bc] sm:$0xf]  ;;  %v7328_v63 = vld [vmem:[%s12854_s5 + $0x7d0] sm:$0xf0]  ;;  %v7139_v5 = vor.u32 %v9078_v59, %v7136_v60  ;;  %v8920_v6 = vld [vmem:[%s12854_s5 + $0x144] sm:$0xf0] }
 0x13a   :  { %2595 = vmatpush.bf16.msra.mxu0 %v6395_v11  ;;  %v7235_v11 = vor.u32 %v9102_v1, %v7232_v3  ;;  %v6494_v3 = vld [vmem:[%s12854_s5 + $0x130] sm:$0xf]  ;;  %v7331_v10 = vor.u32 %v9126_v62, %v7328_v63  ;;  %v9004_v60 = vld [vmem:[%s12854_s5 + $0x3e4] sm:$0xf0] }
 0x13b   :  { %2608 = vmatpush.bf16.msra.mxu1 %v6587_v15  ;;  %2571 = vmatpush.bf16.msrb.mxu2 %v7111_v19  ;;  %v9096_v15 = vld [vmem:[%s12854_s5 + $0x6cc] sm:$0xf]  ;;  %v7400_v19 = vld [vmem:[%s12854_s5 + $0x860] sm:$0xf0]  ;;  %v6830_v59 = vld [vmem:[%s12854_s5 + $0x3d0] sm:$0xf] }
 0x13c   :  { %2584 = vmatpush.bf16.msrb.mxu3 %v7303_v22  ;;  %v6776_v22 = vld [vmem:[%s12854_s5 + $0x380] sm:$0xf0]  ;;  %v7022_v62 = vld [vmem:[%s12854_s5 + $0x550] sm:$0xf]  ;;  %v9052_v63 = vld [vmem:[%s12854_s5 + $0x564] sm:$0xf0] }
 0x13d   :  { %v6779_v31 = vor.u32 %v8988_v21, %v6776_v22  ;;  %v6470_v22 = vld [vmem:[%s12854_s5 + $0x100] sm:$0xf] }
 0x13e   :  { %2596 = vmatpush.bf16.msra.mxu0 %v6371_v27  ;;  %2572 = vmatmul.bf16.vlgmr.msrb.gmra.mxu2 %v10666_v2  ;;  %v7403_v27 = vor.u32 %v9144_v18, %v7400_v19  ;;  %v7094_v18 = vld [vmem:[%s12854_s5 + $0x5e0] sm:$0xf]  ;;  %v9070_v19 = vld [vmem:[%s12854_s5 + $0x5f4] sm:$0xf0] }
 0x13f   :  { %2616 = vmatpush.bf16.msra.mxu2 %v6899_v23  ;;  %2609 = vmatpush.bf16.msra.mxu1 %v6563_v32  ;;  %v7211_v23 = vor.u32 %v9096_v15, %v7208_v16  ;;  %v9138_v32 = vld [vmem:[%s12854_s5 + $0x81c] sm:$0xf]  ;;  %v6902_v15 = vld [vmem:[%s12854_s5 + $0x460] sm:$0xf]  ;;  %v9022_v16 = vld [vmem:[%s12854_s5 + $0x474] sm:$0xf0]  ;;  %v7095_v29 = vor.u32 %v9070_v19, %v7094_v18 }
 0x140   :  { %2629 = vmatpush.bf16.msra.mxu3 %v7091_v26  ;;  %v6968_v26 = vld [vmem:[%s12854_s5 + $0x500] sm:$0xf0]  ;;  %v7379_v40 = vor.u32 %v9138_v32, %v7376_v33  ;;  %v9016_v32 = vld [vmem:[%s12854_s5 + $0x444] sm:$0xf0]  ;;  %v6998_v18 = vld [vmem:[%s12854_s5 + $0x520] sm:$0xf] }
 0x141   :  { %2585 = vmatmul.bf16.vlgmr.msrb.gmra.mxu3 %v10677_v9  ;;  %v6971_v34 = vor.u32 %v9036_v24, %v6968_v26  ;;  %v6903_v26 = vor.u32 %v9022_v16, %v6902_v15  ;;  %v8998_v15 = vld [vmem:[%s12854_s5 + $0x3b4] sm:$0xf0] }
 0x142   :  { %2597 = vmatpush.bf16.msra.mxu0 %v6347_v43  ;;  %v6755_v43 = vor.u32 %v8982_v39, %v6752_v35  ;;  %v9064_v39 = vld [vmem:[%s12854_s5 + $0x5c4] sm:$0xf0]  ;;  %v9046_v19 = vld [vmem:[%s12854_s5 + $0x534] sm:$0xf0] }
 0x143   :  { %2617 = vmatpush.bf16.msra.mxu2 %v6875_v38  ;;  %2610 = vmatpush.bf16.msra.mxu1 %v6539_v47  ;;  %v6944_v38 = vld [vmem:[%s12854_s5 + $0x4d0] sm:$0xf0]  ;;  %v8976_v47 = vld [vmem:[%s12854_s5 + $0x30c] sm:$0xf] }
 0x144   :  { %2630 = vmatpush.bf16.msra.mxu3 %v7067_v42  ;;  %v7160_v42 = vld [vmem:[%s12854_s5 + $0x680] sm:$0xf0] }
 0x145   :  { %2598 = vmatmul.bf16.vlgmr.msra.gmra.mxu0 %v10469_v25  ;;  %v7163_v52 = vor.u32 %v9084_v41, %v7160_v42  ;;  %v8956_v41 = vld [vmem:[%s12854_s5 + $0x264] sm:$0xf0] }
 0x146   :  { %2642 = vmatpush.bf16.msrb.mxu0 %v7283_v48  ;;  %2611 = vmatmul.bf16.vlgmr.msra.gmra.mxu1 %v10477_v30  ;;  %v6947_v48 = vor.u32 %v9030_v37, %v6944_v38  ;;  %v8908_v37 = vld [vmem:[%s12854_s5 + $0xe4] sm:$0xf0] }
 0x147   :  { %2655 = vmatpush.bf16.msrb.mxu1 %v7475_v51  ;;  %2618 = vmatpush.bf16.msra.mxu2 %v6851_v55  ;;  %v6920_v51 = vld [vmem:[%s12854_s5 + $0x4a0] sm:$0xf0]  ;;  %v8926_v55 = vld [vmem:[%s12854_s5 + $0x174] sm:$0xf0] }
 0x148   :  { %2631 = vmatpush.bf16.msra.mxu3 %v7043_v58  ;;  %v8974_v58 = vld [vmem:[%s12854_s5 + $0x2f4] sm:$0xf0]  ;;  %v6519_v1 = vor.u32 %v8926_v55, %v6518_v54  ;;  %v904_v55 = vperm.slane %v11340_v46, 0 }
 0x14a   :  { %2643 = vmatpush.bf16.msrb.mxu0 %v7259_v61  ;;  %v6731_v61 = vor.u32 %v8976_v47, %v6728_v49  ;;  %v9058_v49 = vld [vmem:[%s12854_s5 + $0x594] sm:$0xf0] }
 0x14b   :  { %2656 = vmatpush.bf16.msrb.mxu1 %v7451_v0  ;;  %2619 = vmatpush.bf16.msra.mxu2 %v6827_v4  ;;  %v6923_v0 = vor.u32 %v9024_v50, %v6920_v51  ;;  %v6711_v4 = vor.u32 %v8974_v58, %v6710_v56  ;;  %v6422_v51 = vld [vmem:[%s12854_s5 + $0xa0] sm:$0xf] }
 0x14c   :  { %2632 = vmatpush.bf16.msra.mxu3 %v7019_v7  ;;  %v6686_v7 = vld [vmem:[%s12854_s5 + $0x2b0] sm:$0xf]  ;;  %v6614_v56 = vld [vmem:[%s12854_s5 + $0x220] sm:$0xf] }
 0x14e   :  { %2644 = vmatpush.bf16.msrb.mxu0 %v7235_v11  ;;  %v9072_v11 = vld [vmem:[%s12854_s5 + $0x60c] sm:$0xf] }
 0x14f   :  { %2657 = vmatpush.bf16.msrb.mxu1 %v7427_v14  ;;  %2620 = vmatpush.bf16.msra.mxu2 %v6803_v17  ;;  %v7304_v14 = vld [vmem:[%s12854_s5 + $0x7a0] sm:$0xf0]  ;;  %v6495_v17 = vor.u32 %v8920_v6, %v6494_v3  ;;  %v7115_v21 = vor.u32 %v9072_v11, %v7112_v12  ;;  %v6398_v3 = vld [vmem:[%s12854_s5 + $0x70] sm:$0xf]  ;;  %v8944_v11 = vld [vmem:[%s12854_s5 + $0x204] sm:$0xf0] }
 0x150   :  { %2633 = vmatpush.bf16.msra.mxu3 %v6995_v20  ;;  %v6687_v20 = vor.u32 %v8968_v8, %v6686_v7  ;;  %v7307_v24 = vor.u32 %v9120_v13, %v7304_v14  ;;  %v6831_v8 = vor.u32 %v9004_v60, %v6830_v59  ;;  %v7023_v13 = vor.u32 %v9052_v63, %v7022_v62  ;;  %v6806_v14 = vld [vmem:[%s12854_s5 + $0x3a0] sm:$0xf]  ;;  %v7262_v59 = vld [vmem:[%s12854_s5 + $0x730] sm:$0xf]  ;;  %v9112_v62 = vld [vmem:[%s12854_s5 + $0x744] sm:$0xf0] }
 0x151   :  { %v7454_v63 = vld [vmem:[%s12854_s5 + $0x8b0] sm:$0xf] }
 0x152   :  { %2645 = vmatpush.bf16.msrb.mxu0 %v7211_v23  ;;  %v8914_v23 = vld [vmem:[%s12854_s5 + $0x114] sm:$0xf0] }
 0x153   :  { %2658 = vmatpush.bf16.msrb.mxu1 %v7403_v27  ;;  %2621 = vmatpush.bf16.msra.mxu2 %v6779_v31  ;;  %v6662_v27 = vld [vmem:[%s12854_s5 + $0x280] sm:$0xf]  ;;  %v6878_v31 = vld [vmem:[%s12854_s5 + $0x430] sm:$0xf]  ;;  %v6471_v33 = vor.u32 %v8914_v23, %v6470_v22  ;;  %v8890_v22 = vld [vmem:[%s12854_s5 + $0x54] sm:$0xf0]  ;;  %v6807_v23 = vor.u32 %v8998_v15, %v6806_v14 }
 0x154   :  { %2634 = vmatpush.bf16.msra.mxu3 %v6971_v34  ;;  %v7070_v34 = vld [vmem:[%s12854_s5 + $0x5b0] sm:$0xf]  ;;  %v6663_v35 = vor.u32 %v8962_v28, %v6662_v27  ;;  %v6879_v38 = vor.u32 %v9016_v32, %v6878_v31  ;;  %v6999_v27 = vor.u32 %v9046_v19, %v6998_v18  ;;  %v6712_v14 = vld [vmem:[%s12854_s5 + $0x2f8] sm:$0xf0]  ;;  %v7238_v19 = vld [vmem:[%s12854_s5 + $0x700] sm:$0xf] }
 0x155   :  { %v7071_v42 = vor.u32 %v9064_v39, %v7070_v34  ;;  %v6782_v28 = vld [vmem:[%s12854_s5 + $0x370] sm:$0xf] }
 0x156   :  { %2646 = vmatpush.bf16.msrb.mxu0 %v7187_v36  ;;  %v6446_v36 = vld [vmem:[%s12854_s5 + $0xd0] sm:$0xf] }
 0x157   :  { %2659 = vmatpush.bf16.msrb.mxu1 %v7379_v40  ;;  %2622 = vmatpush.bf16.msra.mxu2 %v6755_v43  ;;  %v6638_v40 = vld [vmem:[%s12854_s5 + $0x250] sm:$0xf]  ;;  %v6854_v43 = vld [vmem:[%s12854_s5 + $0x400] sm:$0xf]  ;;  %v6447_v47 = vor.u32 %v8908_v37, %v6446_v36  ;;  %v8884_v36 = vld [vmem:[%s12854_s5 + $0x24] sm:$0xf0] }
 0x158   :  { %2635 = vmatpush.bf16.msra.mxu3 %v6947_v48  ;;  %v7046_v48 = vld [vmem:[%s12854_s5 + $0x580] sm:$0xf]  ;;  %v6639_v50 = vor.u32 %v8956_v41, %v6638_v40  ;;  %v6855_v54 = vor.u32 %v9010_v44, %v6854_v43  ;;  %v6974_v32 = vld [vmem:[%s12854_s5 + $0x4f0] sm:$0xf]  ;;  %v9118_v44 = vld [vmem:[%s12854_s5 + $0x774] sm:$0xf0] }
 0x159   :  { %v7047_v58 = vor.u32 %v9058_v49, %v7046_v48  ;;  %v6350_v34 = vld [vmem:[%s12854_s5 + $0x10] sm:$0xf]  ;;  %v7286_v43 = vld [vmem:[%s12854_s5 + $0x760] sm:$0xf] }
 0x15a   :  { %2647 = vmatpush.bf16.msrb.mxu0 %v7163_v52  ;;  %v8902_v52 = vld [vmem:[%s12854_s5 + $0xb4] sm:$0xf0]  ;;  %v6542_v37 = vld [vmem:[%s12854_s5 + $0x190] sm:$0xf] }
 0x15b   :  { %2660 = vmatpush.bf16.msrb.mxu1 %v7355_v57  ;;  %2623 = vmatpush.bf16.msra.mxu2 %v6731_v61  ;;  %v8950_v57 = vld [vmem:[%s12854_s5 + $0x234] sm:$0xf0]  ;;  %v6423_v61 = vor.u32 %v8902_v52, %v6422_v51  ;;  %v6758_v51 = vld [vmem:[%s12854_s5 + $0x340] sm:$0xf] }
 0x15c   :  { %2636 = vmatpush.bf16.msra.mxu3 %v6923_v0  ;;  %v8986_v52 = vld [vmem:[%s12854_s5 + $0x354] sm:$0xf0] }
 0x15e   :  { %2648 = vmatpush.bf16.msrb.mxu0 %v7139_v5  ;;  %2624 = vmatmul.bf16.vlgmr.msra.gmra.mxu2 %v10511_v45 }
 0x15f   :  { %2668 = vmatpush.bf16.msrb.mxu2 %v6519_v1  ;;  %2661 = vmatpush.bf16.msrb.mxu1 %v7331_v10  ;;  %v6615_v1 = vor.u32 %v8950_v57, %v6614_v56  ;;  %v6590_v10 = vld [vmem:[%s12854_s5 + $0x1f0] sm:$0xf]  ;;  %v9034_v56 = vld [vmem:[%s12854_s5 + $0x4d4] sm:$0xf0] }
 0x160   :  { %2681 = vmatpush.bf16.msrb.mxu3 %v6711_v4  ;;  %v2365_v0 = vpop.f32.mrf.mxu2  ;;  %v8896_v4 = vld [vmem:[%s12854_s5 + $0x84] sm:$0xf0] }
 0x161   :  { %2637 = vmatmul.bf16.vlgmr.msra.gmra.mxu3 %v10522_v53  ;;  %v2366_v5 = vadd.f32 %v2365_v0, %v904_v55  ;;  %v2378_v6 = vpop.f32.mrf.mxu3  ;;  %v6950_v55 = vld [vmem:[%s12854_s5 + $0x4c0] sm:$0xf]  ;;  %v9160_v0 = vld [vmem:[%s12854_s5 + $0x8c4] sm:$0xf0] }
 0x162   :  { %2649 = vmatpush.bf16.msrb.mxu0 %v7115_v21  ;;  %v11381_v7 = vpop.f32.mrf.mxu0  ;;  %v6374_v21 = vld [vmem:[%s12854_s5 + $0x40] sm:$0xf] }
 0x163   :  { %2669 = vmatpush.bf16.msrb.mxu2 %v6495_v17  ;;  %2662 = vmatpush.bf16.msrb.mxu1 %v7307_v24  ;;  %v11389_v12 = vpop.f32.mrf.mxu1  ;;  %v11397_v16 = vadd.f32 %v2378_v6, %v2366_v5  ;;  %v6399_v17 = vor.u32 %v8896_v4, %v6398_v3  ;;  %v6566_v24 = vld [vmem:[%s12854_s5 + $0x1c0] sm:$0xf]  ;;  %v6375_v31 = vor.u32 %v8890_v22, %v6374_v21  ;;  %v6734_v3 = vld [vmem:[%s12854_s5 + $0x310] sm:$0xf]  ;;  %v8980_v4 = vld [vmem:[%s12854_s5 + $0x324] sm:$0xf0] }
 0x164   :  { %2682 = vmatpush.bf16.msrb.mxu3 %v6687_v20  ;;  %v6591_v20 = vor.u32 %v8944_v11, %v6590_v10  ;;  %v6926_v5 = vld [vmem:[%s12854_s5 + $0x490] sm:$0xf]  ;;  %v9028_v6 = vld [vmem:[%s12854_s5 + $0x4a4] sm:$0xf0]  ;;  %v6520_v10 = vld [vmem:[%s12854_s5 + $0x178] sm:$0xf0]  ;;  %v7263_v11 = vor.u32 %v9112_v62, %v7262_v59  ;;  %v6735_v18 = vor.u32 %v8980_v4, %v6734_v3 }
 0x165   :  { %2650 = vmatmul.bf16.vlgmr.msrb.gmra.mxu0 %v10666_v2  ;;  %v6927_v22 = vor.u32 %v9028_v6, %v6926_v5  ;;  %v7358_v5 = vld [vmem:[%s12854_s5 + $0x7f0] sm:$0xf] }
 0x166   :  { %2694 = vmatpush.bf16.msra.mxu0 %v6903_v26  ;;  %2663 = vmatmul.bf16.vlgmr.msrb.gmra.mxu1 %v10677_v9  ;;  %v8938_v26 = vld [vmem:[%s12854_s5 + $0x1d4] sm:$0xf0] }
 0x167   :  { %2707 = vmatpush.bf16.msra.mxu1 %v7095_v29  ;;  %2670 = vmatpush.bf16.msrb.mxu2 %v6471_v33  ;;  %v8992_v29 = vld [vmem:[%s12854_s5 + $0x384] sm:$0xf0] }
 0x168   :  { %2683 = vmatpush.bf16.msrb.mxu3 %v6663_v35  ;;  %v9040_v33 = vld [vmem:[%s12854_s5 + $0x504] sm:$0xf0]  ;;  %v2367_v39 = vpop.f32.mrf.mxu2  ;;  %v6567_v35 = vor.u32 %v8938_v26, %v6566_v24  ;;  %v7430_v24 = vld [vmem:[%s12854_s5 + $0x880] sm:$0xf]  ;;  %v9154_v26 = vld [vmem:[%s12854_s5 + $0x894] sm:$0xf0] }
 0x169   :  { %v2380_v40 = vpop.f32.mrf.mxu3  ;;  %v6975_v49 = vor.u32 %v9040_v33, %v6974_v32  ;;  %v8965_v32 = vld [vmem:[%s12854_s5 + $0x2b4] sm:$0xf]  ;;  %v6688_v33 = vld [vmem:[%s12854_s5 + $0x2c8] sm:$0xf0]  ;;  %v7214_v39 = vld [vmem:[%s12854_s5 + $0x6d0] sm:$0xf] }
 0x16a   :  { %2695 = vmatpush.bf16.msra.mxu0 %v6879_v38  ;;  %v8932_v38 = vld [vmem:[%s12854_s5 + $0x1a4] sm:$0xf0]  ;;  %v2393_v41 = vpop.f32.mrf.mxu0  ;;  %v6691_v40 = vor.u32 %v8965_v32, %v6688_v33  ;;  %v8893_v32 = vld [vmem:[%s12854_s5 + $0x74] sm:$0xf]  ;;  %v6400_v33 = vld [vmem:[%s12854_s5 + $0x88] sm:$0xf0] }
 0x16b   :  { %2708 = vmatpush.bf16.msra.mxu1 %v7071_v42  ;;  %2671 = vmatpush.bf16.msrb.mxu2 %v6447_v47  ;;  %v6783_v42 = vor.u32 %v8992_v29, %v6782_v28  ;;  %v7478_v47 = vld [vmem:[%s12854_s5 + $0x8e0] sm:$0xf]  ;;  %v2406_v48 = vpop.f32.mrf.mxu1  ;;  %v6543_v57 = vor.u32 %v8932_v38, %v6542_v37  ;;  %v8917_v28 = vld [vmem:[%s12854_s5 + $0x134] sm:$0xf]  ;;  %v6496_v29 = vld [vmem:[%s12854_s5 + $0x148] sm:$0xf0] }
 0x16c   :  { %2684 = vmatpush.bf16.msrb.mxu3 %v6639_v50  ;;  %v9166_v50 = vld [vmem:[%s12854_s5 + $0x8f4] sm:$0xf0]  ;;  %v7406_v37 = vld [vmem:[%s12854_s5 + $0x850] sm:$0xf]  ;;  %v9148_v38 = vld [vmem:[%s12854_s5 + $0x864] sm:$0xf0]  ;;  %v2392_v48 = vadd.f32 %v11381_v7, %v11397_v16 }
 0x16d   :  { %v7479_v60 = vor.u32 %v9166_v50, %v7478_v47  ;;  %v8911_v41 = vld [vmem:[%s12854_s5 + $0x104] sm:$0xf]  ;;  %v6664_v47 = vld [vmem:[%s12854_s5 + $0x298] sm:$0xf0]  ;;  %v7407_v50 = vor.u32 %v9148_v38, %v7406_v37  ;;  %v7382_v7 = vld [vmem:[%s12854_s5 + $0x820] sm:$0xf] }
 0x16e   :  { %2696 = vmatpush.bf16.msra.mxu0 %v6855_v54  ;;  %v6351_v54 = vor.u32 %v8884_v36, %v6350_v34  ;;  %v7431_v34 = vor.u32 %v9154_v26, %v7430_v24  ;;  %v6499_v36 = vor.u32 %v8917_v28, %v6496_v29  ;;  %v9142_v16 = vld [vmem:[%s12854_s5 + $0x834] sm:$0xf0]  ;;  %v2405_v62 = vadd.f32 %v11389_v12, %v2392_v48  ;;  %v9136_v12 = vld [vmem:[%s12854_s5 + $0x804] sm:$0xf0]  ;;  %v7334_v28 = vld [vmem:[%s12854_s5 + $0x7c0] sm:$0xf] }
 0x16f   :  { %2709 = vmatpush.bf16.msra.mxu1 %v7047_v58  ;;  %2672 = vmatpush.bf16.msrb.mxu2 %v6423_v61  ;;  %v7287_v58 = vor.u32 %v9118_v44, %v7286_v43  ;;  %v6759_v61 = vor.u32 %v8986_v52, %v6758_v51  ;;  %v8959_v44 = vld [vmem:[%s12854_s5 + $0x284] sm:$0xf]  ;;  %v7190_v51 = vld [vmem:[%s12854_s5 + $0x6a0] sm:$0xf]  ;;  %v9094_v52 = vld [vmem:[%s12854_s5 + $0x6b4] sm:$0xf0] }
 0x170   :  { %2685 = vmatpush.bf16.msrb.mxu3 %v6615_v1  ;;  %v6951_v1 = vor.u32 %v9034_v56, %v6950_v55  ;;  %v6667_v56 = vor.u32 %v8959_v44, %v6664_v47  ;;  %v7191_v59 = vor.u32 %v9094_v52, %v7190_v51  ;;  %v9082_v24 = vld [vmem:[%s12854_s5 + $0x654] sm:$0xf0]  ;;  %v9076_v38 = vld [vmem:[%s12854_s5 + $0x624] sm:$0xf0]  ;;  %v9019_v44 = vld [vmem:[%s12854_s5 + $0x464] sm:$0xf] }
 0x171   :  { %v9130_v29 = vld [vmem:[%s12854_s5 + $0x7d4] sm:$0xf0]  ;;  %v6904_v47 = vld [vmem:[%s12854_s5 + $0x478] sm:$0xf0]  ;;  %v9067_v48 = vld [vmem:[%s12854_s5 + $0x5e4] sm:$0xf] }
 0x172   :  { %2697 = vmatpush.bf16.msra.mxu0 %v6831_v8  ;;  %v8923_v8 = vld [vmem:[%s12854_s5 + $0x164] sm:$0xf]  ;;  %v11501_v15 = vpop.f32.mrf.mxu0  ;;  %v7335_v37 = vor.u32 %v9130_v29, %v7334_v28  ;;  %v7096_v51 = vld [vmem:[%s12854_s5 + $0x5f8] sm:$0xf0] }
 0x173   :  { %2710 = vmatpush.bf16.msra.mxu1 %v7023_v13  ;;  %2673 = vmatpush.bf16.msrb.mxu2 %v6399_v17  ;;  %v8971_v13 = vld [vmem:[%s12854_s5 + $0x2e4] sm:$0xf]  ;;  %v7455_v17 = vor.u32 %v9160_v0, %v7454_v63  ;;  %v11509_v21 = vpop.f32.mrf.mxu1  ;;  %v7383_v63 = vor.u32 %v9142_v16, %v7382_v7  ;;  %v7166_v0 = vld [vmem:[%s12854_s5 + $0x670] sm:$0xf]  ;;  %v6568_v16 = vld [vmem:[%s12854_s5 + $0x1d8] sm:$0xf0] }
 0x174   :  { %2686 = vmatpush.bf16.msrb.mxu3 %v6591_v20  ;;  %v9106_v20 = vld [vmem:[%s12854_s5 + $0x714] sm:$0xf0]  ;;  %v8887_v52 = vld [vmem:[%s12854_s5 + $0x44] sm:$0xf] }
 0x175   :  { %v8935_v7 = vld [vmem:[%s12854_s5 + $0x1c4] sm:$0xf] }
 0x176   :  { %2698 = vmatpush.bf16.msra.mxu0 %v6807_v23  ;;  %v6523_v23 = vor.u32 %v8923_v8, %v6520_v10 }
 0x177   :  { %2711 = vmatpush.bf16.msra.mxu1 %v6999_v27  ;;  %2674 = vmatpush.bf16.msrb.mxu2 %v6375_v31  ;;  %v6715_v27 = vor.u32 %v8971_v13, %v6712_v14  ;;  %v7239_v31 = vor.u32 %v9106_v20, %v7238_v19  ;;  %v6424_v13 = vld [vmem:[%s12854_s5 + $0xb8] sm:$0xf0] }
 0x178   :  { %2687 = vmatpush.bf16.msrb.mxu3 %v6567_v35  ;;  %v9100_v35 = vld [vmem:[%s12854_s5 + $0x6e4] sm:$0xf0] }
 0x179   :  { %v7215_v43 = vor.u32 %v9100_v35, %v7214_v39  ;;  %v8941_v39 = vld [vmem:[%s12854_s5 + $0x1f4] sm:$0xf]  ;;  %v6592_v35 = vld [vmem:[%s12854_s5 + $0x208] sm:$0xf0] }
 0x17a   :  { %2699 = vmatpush.bf16.msra.mxu0 %v6783_v42  ;;  %v6472_v42 = vld [vmem:[%s12854_s5 + $0x118] sm:$0xf0] }
 0x17b   :  { %2712 = vmatpush.bf16.msra.mxu1 %v6975_v49  ;;  %2675 = vmatpush.bf16.msrb.mxu2 %v6351_v54  ;;  %v2445_v49 = vpop.f32.mrf.mxu0  ;;  %v2458_v54 = vpop.f32.mrf.mxu1  ;;  %v6475_v55 = vor.u32 %v8911_v41, %v6472_v42  ;;  %v9124_v41 = vld [vmem:[%s12854_s5 + $0x7a4] sm:$0xf0] }
 0x17c   :  { %2688 = vmatpush.bf16.msrb.mxu3 %v6543_v57  ;;  %v8905_v57 = vld [vmem:[%s12854_s5 + $0xd4] sm:$0xf]  ;;  %v6376_v54 = vld [vmem:[%s12854_s5 + $0x58] sm:$0xf0] }
 0x17e   :  { %2700 = vmatpush.bf16.msra.mxu0 %v6759_v61  ;;  %2676 = vmatmul.bf16.vlgmr.msrb.gmra.mxu2 %v10469_v25  ;;  %v6640_v61 = vld [vmem:[%s12854_s5 + $0x268] sm:$0xf0] }
 0x17f   :  { %2720 = vmatpush.bf16.msra.mxu2 %v7287_v58  ;;  %2713 = vmatpush.bf16.msra.mxu1 %v6951_v1  ;;  %v6448_v58 = vld [vmem:[%s12854_s5 + $0xe8] sm:$0xf0]  ;;  %v9088_v1 = vld [vmem:[%s12854_s5 + $0x684] sm:$0xf0] }
 0x180   :  { %2733 = vmatpush.bf16.msra.mxu3 %v7479_v60  ;;  %v8953_v60 = vld [vmem:[%s12854_s5 + $0x254] sm:$0xf]  ;;  %v2417_v3 = vpop.f32.mrf.mxu2  ;;  %v6451_v4 = vor.u32 %v8905_v57, %v6448_v58  ;;  %v7167_v14 = vor.u32 %v9088_v1, %v7166_v0  ;;  %v6907_v58 = vor.u32 %v9019_v44, %v6904_v47  ;;  %v7072_v1 = vld [vmem:[%s12854_s5 + $0x5c8] sm:$0xf0] }
 0x181   :  { %2689 = vmatmul.bf16.vlgmr.msrb.gmra.mxu3 %v10477_v30  ;;  %v2418_v6 = vadd.f32 %v2417_v3, %v2405_v62  ;;  %v2430_v8 = vpop.f32.mrf.mxu3  ;;  %v6643_v10 = vor.u32 %v8953_v60, %v6640_v61  ;;  %v7099_v61 = vor.u32 %v9067_v48, %v7096_v51  ;;  %v6379_v62 = vor.u32 %v8887_v52, %v6376_v54  ;;  %v9061_v0 = vld [vmem:[%s12854_s5 + $0x5b4] sm:$0xf]  ;;  %v7024_v44 = vld [vmem:[%s12854_s5 + $0x568] sm:$0xf0]  ;;  %v9103_v48 = vld [vmem:[%s12854_s5 + $0x704] sm:$0xf] }
 0x182   :  { %2701 = vmatpush.bf16.msra.mxu0 %v6735_v18  ;;  %v6616_v18 = vld [vmem:[%s12854_s5 + $0x238] sm:$0xf0]  ;;  %v6571_v3 = vor.u32 %v8935_v7, %v6568_v16  ;;  %v9151_v51 = vld [vmem:[%s12854_s5 + $0x884] sm:$0xf] }
 0x183   :  { %2721 = vmatpush.bf16.msra.mxu2 %v7263_v11  ;;  %2714 = vmatpush.bf16.msra.mxu1 %v6927_v22  ;;  %v8899_v11 = vld [vmem:[%s12854_s5 + $0xa4] sm:$0xf]  ;;  %v11608_v19 = vadd.f32 %v2430_v8, %v2418_v6  ;;  %v11610_v20 = vpop.f32.mrf.mxu0  ;;  %v7359_v22 = vor.u32 %v9136_v12, %v7358_v5  ;;  %v11618_v26 = vpop.f32.mrf.mxu1  ;;  %v6352_v5 = vld [vmem:[%s12854_s5 + $0x28] sm:$0xf0]  ;;  %v8929_v12 = vld [vmem:[%s12854_s5 + $0x194] sm:$0xf] }
 0x184   :  { %2734 = vmatpush.bf16.msra.mxu3 %v7455_v17  ;;  %v8947_v17 = vld [vmem:[%s12854_s5 + $0x224] sm:$0xf]  ;;  %v6544_v6 = vld [vmem:[%s12854_s5 + $0x1a8] sm:$0xf0]  ;;  %v7432_v52 = vld [vmem:[%s12854_s5 + $0x898] sm:$0xf0] }
 0x185   :  { %2702 = vmatmul.bf16.vlgmr.msra.gmra.mxu0 %v10511_v45  ;;  %v9115_v8 = vld [vmem:[%s12854_s5 + $0x764] sm:$0xf]  ;;  %v6547_v28 = vor.u32 %v8929_v12, %v6544_v6  ;;  %v6976_v12 = vld [vmem:[%s12854_s5 + $0x508] sm:$0xf0]  ;;  %9529 = vtanh.f32 %v11608_v19 }
 0x186   :  { %2746 = vmatpush.bf16.msrb.mxu0 %v6523_v23  ;;  %2715 = vmatmul.bf16.vlgmr.msra.gmra.mxu1 %v10522_v53  ;;  %v7142_v23 = vld [vmem:[%s12854_s5 + $0x640] sm:$0xf]  ;;  %v8995_v7 = vld [vmem:[%s12854_s5 + $0x3a4] sm:$0xf]  ;;  %v2831_v19 = vld [vmem:[%s12856_s26 + $0x8] sm:$0xff] }
 0x187   :  { %2759 = vmatpush.bf16.msrb.mxu1 %v6715_v27  ;;  %2722 = vmatpush.bf16.msra.mxu2 %v7239_v31  ;;  %v6427_v27 = vor.u32 %v8899_v11, %v6424_v13  ;;  %v6619_v31 = vor.u32 %v8947_v17, %v6616_v18  ;;  %v9163_v13 = vld [vmem:[%s12854_s5 + $0x8e4] sm:$0xf]  ;;  %v7075_v18 = vor.u32 %v9061_v0, %v7072_v1  ;;  %v8989_v1 = vld [vmem:[%s12854_s5 + $0x374] sm:$0xf] }
 0x188   :  { %2735 = vmatpush.bf16.msra.mxu3 %v7431_v34  ;;  %v7143_v34 = vor.u32 %v9082_v24, %v7142_v23  ;;  %v2419_v42 = vpop.f32.mrf.mxu2  ;;  %v9007_v23 = vld [vmem:[%s12854_s5 + $0x404] sm:$0xf]  ;;  %v6856_v24 = vld [vmem:[%s12854_s5 + $0x418] sm:$0xf0] }
 0x189   :  { %v2432_v49 = vpop.f32.mrf.mxu3 }
 0x18a   :  { %2747 = vmatpush.bf16.msrb.mxu0 %v6499_v36  ;;  %v7118_v36 = vld [vmem:[%s12854_s5 + $0x610] sm:$0xf]  ;;  %v7240_v49 = vld [vmem:[%s12854_s5 + $0x718] sm:$0xf0] }
 0x18b   :  { %2760 = vmatpush.bf16.msrb.mxu1 %v6691_v40  ;;  %2723 = vmatpush.bf16.msra.mxu2 %v7215_v43  ;;  %v7310_v40 = vld [vmem:[%s12854_s5 + $0x790] sm:$0xf]  ;;  %v6403_v43 = vor.u32 %v8893_v32, %v6400_v33  ;;  %v2510_v60 = vpop.f32.mrf.mxu1  ;;  %v7048_v32 = vld [vmem:[%s12854_s5 + $0x598] sm:$0xf0] }
 0x18c   :  { %2736 = vmatpush.bf16.msra.mxu3 %v7407_v50  ;;  %v6595_v50 = vor.u32 %v8941_v39, %v6592_v35  ;;  %v7311_v57 = vor.u32 %v9124_v41, %v7310_v40  ;;  %v7264_v39 = vld [vmem:[%s12854_s5 + $0x748] sm:$0xf0]  ;;  %v6859_v35 = vor.u32 %v9007_v23, %v6856_v24  ;;  %v9001_v40 = vld [vmem:[%s12854_s5 + $0x3d4] sm:$0xf]  ;;  %v8983_v24 = vld [vmem:[%s12854_s5 + $0x344] sm:$0xf] }
 0x18d   :  { %v6832_v41 = vld [vmem:[%s12854_s5 + $0x3e8] sm:$0xf0] }
 0x18e   :  { %2748 = vmatpush.bf16.msrb.mxu0 %v6475_v55  ;;  %v7119_v55 = vor.u32 %v9076_v38, %v7118_v36  ;;  %v9157_v36 = vld [vmem:[%s12854_s5 + $0x8b4] sm:$0xf]  ;;  %v7216_v60 = vld [vmem:[%s12854_s5 + $0x6e8] sm:$0xf0] }
 0x18f   :  { %2761 = vmatpush.bf16.msrb.mxu1 %v6667_v56  ;;  %2724 = vmatpush.bf16.msra.mxu2 %v7191_v59  ;;  %v2497_v56 = vpop.f32.mrf.mxu0  ;;  %v9013_v59 = vld [vmem:[%s12854_s5 + $0x434] sm:$0xf] }
 0x190   :  { %2737 = vmatpush.bf16.msra.mxu3 %v7383_v63  ;;  %v6880_v63 = vld [vmem:[%s12854_s5 + $0x448] sm:$0xf0]  ;;  %v11710_v17 = vpop.f32.mrf.mxu2  ;;  %v7243_v56 = vor.u32 %v9103_v48, %v7240_v49 }
 0x191   :  { %v6883_v11 = vor.u32 %v9013_v59, %v6880_v63  ;;  %v9097_v59 = vld [vmem:[%s12854_s5 + $0x6d4] sm:$0xf]  ;;  %v7408_v63 = vld [vmem:[%s12854_s5 + $0x868] sm:$0xf0] }
 0x192   :  { %2749 = vmatpush.bf16.msrb.mxu0 %v6451_v4  ;;  %v8881_v4 = vld [vmem:[%s12854_s5 + $0x14] sm:$0xf]  ;;  %v6928_v48 = vld [vmem:[%s12854_s5 + $0x4a8] sm:$0xf0] }
 0x193   :  { %2762 = vmatpush.bf16.msrb.mxu1 %v6643_v10  ;;  %2725 = vmatpush.bf16.msra.mxu2 %v7167_v14  ;;  %v7288_v10 = vld [vmem:[%s12854_s5 + $0x778] sm:$0xf0] }
 0x194   :  { %2738 = vmatpush.bf16.msra.mxu3 %v7359_v22  ;;  %v7480_v14 = vld [vmem:[%s12854_s5 + $0x8f8] sm:$0xf0]  ;;  %v6355_v22 = vor.u32 %v8881_v4, %v6352_v5  ;;  %v7291_v29 = vor.u32 %v9115_v8, %v7288_v10  ;;  %v7219_v4 = vor.u32 %v9097_v59, %v7216_v60  ;;  %v9037_v5 = vld [vmem:[%s12854_s5 + $0x4f4] sm:$0xf]  ;;  %v9091_v8 = vld [vmem:[%s12854_s5 + $0x6a4] sm:$0xf] }
 0x195   :  { %v7483_v33 = vor.u32 %v9163_v13, %v7480_v14  ;;  %v7192_v10 = vld [vmem:[%s12854_s5 + $0x6b8] sm:$0xf0]  ;;  %v9139_v13 = vld [vmem:[%s12854_s5 + $0x824] sm:$0xf]  ;;  %v6979_v23 = vor.u32 %v9037_v5, %v6976_v12  ;;  %v2843_v12 = vld [vmem:[%s12856_s26 + $0x68] sm:$0xff] }
 0x196   :  { %2750 = vmatpush.bf16.msrb.mxu0 %v6427_v27  ;;  %v11718_v27 = vpop.f32.mrf.mxu3  ;;  %v7384_v14 = vld [vmem:[%s12854_s5 + $0x838] sm:$0xf0] }
 0x197   :  { %2763 = vmatpush.bf16.msrb.mxu1 %v6619_v31  ;;  %2726 = vmatpush.bf16.msra.mxu2 %v7143_v34  ;;  %v9055_v31 = vld [vmem:[%s12854_s5 + $0x584] sm:$0xf]  ;;  %v9109_v34 = vld [vmem:[%s12854_s5 + $0x734] sm:$0xf]  ;;  %v2861_v59 = vld [vmem:[%s12856_s26 + $0xf8] sm:$0xff] }
 0x198   :  { %2739 = vmatpush.bf16.msra.mxu3 %v7335_v37  ;;  %v7456_v37 = vld [vmem:[%s12854_s5 + $0x8c8] sm:$0xf0]  ;;  %v7051_v38 = vor.u32 %v9055_v31, %v7048_v32  ;;  %v7267_v42 = vor.u32 %v9109_v34, %v7264_v39  ;;  %v2471_v54 = vpop.f32.mrf.mxu2  ;;  %v7195_v32 = vor.u32 %v9091_v8, %v7192_v10  ;;  %v6952_v34 = vld [vmem:[%s12854_s5 + $0x4d8] sm:$0xf0]  ;;  %v7387_v39 = vor.u32 %v9139_v13, %v7384_v14 }
 0x199   :  { %v7459_v47 = vor.u32 %v9157_v36, %v7456_v37  ;;  %v7168_v36 = vld [vmem:[%s12854_s5 + $0x688] sm:$0xf0]  ;;  %v9127_v54 = vld [vmem:[%s12854_s5 + $0x7c4] sm:$0xf]  ;;  %v906_v13 = vperm.slane %v11340_v46, 2  ;;  %v2857_v14 = vld [vmem:[%s12856_s26 + $0xd8] sm:$0xff] }
 0x19a   :  { %2751 = vmatpush.bf16.msrb.mxu0 %v6403_v43  ;;  %v9049_v43 = vld [vmem:[%s12854_s5 + $0x554] sm:$0xf]  ;;  %v2859_v8 = vld [vmem:[%s12856_s26 + $0xe8] sm:$0xff] }
 0x19b   :  { %2764 = vmatpush.bf16.msrb.mxu1 %v6595_v50  ;;  %2727 = vmatpush.bf16.msra.mxu2 %v7119_v55  ;;  %v6835_v50 = vor.u32 %v9001_v40, %v6832_v41  ;;  %v7027_v55 = vor.u32 %v9049_v43, %v7024_v44  ;;  %v7360_v40 = vld [vmem:[%s12854_s5 + $0x808] sm:$0xf0] }
 0x19c   :  { %2740 = vmatpush.bf16.msra.mxu3 %v7311_v57  ;;  %v9043_v57 = vld [vmem:[%s12854_s5 + $0x524] sm:$0xf]  ;;  %v6736_v43 = vld [vmem:[%s12854_s5 + $0x328] sm:$0xf0] }
 0x19e   :  { %2752 = vmatpush.bf16.msrb.mxu0 %v6379_v62  ;;  %2728 = vmatmul.bf16.vlgmr.msra.gmra.mxu2 %v10666_v2  ;;  %v2484_v16 = vpop.f32.mrf.mxu3  ;;  %v9145_v62 = vld [vmem:[%s12854_s5 + $0x854] sm:$0xf] }
 0x19f   :  { %2772 = vmatpush.bf16.msrb.mxu2 %v6907_v58  ;;  %2765 = vmatpush.bf16.msrb.mxu1 %v6571_v3  ;;  %v7435_v58 = vor.u32 %v9151_v51, %v7432_v52  ;;  %v6784_v3 = vld [vmem:[%s12854_s5 + $0x388] sm:$0xf0]  ;;  %v7411_v6 = vor.u32 %v9145_v62, %v7408_v63  ;;  %v7144_v51 = vld [vmem:[%s12854_s5 + $0x658] sm:$0xf0]  ;;  %v9121_v63 = vld [vmem:[%s12854_s5 + $0x794] sm:$0xf] }
 0x1a0   :  { %2785 = vmatpush.bf16.msrb.mxu3 %v7099_v61  ;;  %v7120_v62 = vld [vmem:[%s12854_s5 + $0x628] sm:$0xf0] }
 0x1a1   :  { %2741 = vmatmul.bf16.vlgmr.msra.gmra.mxu3 %v10677_v9 }
 0x1a2   :  { %2753 = vmatpush.bf16.msrb.mxu0 %v6355_v22  ;;  %v11816_v22 = vpop.f32.mrf.mxu2 }
 0x1a3   :  { %2773 = vmatpush.bf16.msrb.mxu2 %v6883_v11  ;;  %2766 = vmatpush.bf16.msrb.mxu1 %v6547_v28  ;;  %v6787_v11 = vor.u32 %v8989_v1, %v6784_v3  ;;  %v6760_v28 = vld [vmem:[%s12854_s5 + $0x358] sm:$0xf0]  ;;  %v905_v1 = vperm.slane %v11340_v46, 1  ;;  %v2844_v3 = vld [vmem:[%s12856_s26 + $0x70] sm:$0xff] }
 0x1a4   :  { %2786 = vmatpush.bf16.msrb.mxu3 %v7075_v18  ;;  %v11814_v18 = vpop.f32.mrf.mxu0  ;;  %v6763_v37 = vor.u32 %v8983_v24, %v6760_v28  ;;  %v2840_v46 = vld [vmem:[%s12856_s26 + $0x50] sm:$0xff]  ;;  %v2893_v28 = vld [vmem:[%s12856_s26 + $0x1f8] sm:$0xff] }
 0x1a5   :  { %2754 = vmatmul.bf16.vlgmr.msrb.gmra.mxu0 %v10469_v25  ;;  %v6808_v25 = vld [vmem:[%s12854_s5 + $0x3b8] sm:$0xf0]  ;;  %v2444_v10 = vadd.f32 %v11501_v15, %v905_v1 }
 0x1a6   :  { %2798 = vmatpush.bf16.msra.mxu0 %v7291_v29  ;;  %2767 = vmatmul.bf16.vlgmr.msrb.gmra.mxu1 %v10477_v30  ;;  %v7000_v30 = vld [vmem:[%s12854_s5 + $0x538] sm:$0xf0]  ;;  %v6811_v61 = vor.u32 %v8995_v7, %v6808_v25  ;;  %v11824_v29 = vpop.f32.mrf.mxu1  ;;  %v11826_v31 = vpop.f32.mrf.mxu3 }
 0x1a7   :  { %2811 = vmatpush.bf16.msra.mxu1 %v7483_v33  ;;  %2774 = vmatpush.bf16.msrb.mxu2 %v6859_v35  ;;  %v7003_v0 = vor.u32 %v9043_v57, %v7000_v30  ;;  %v9031_v33 = vld [vmem:[%s12854_s5 + $0x4c4] sm:$0xf]  ;;  %v9085_v35 = vld [vmem:[%s12854_s5 + $0x674] sm:$0xf]  ;;  %v2845_v30 = vld [vmem:[%s12856_s26 + $0x78] sm:$0xff]  ;;  %v2457_v24 = vadd.f32 %v11509_v21, %v2444_v10 }
 0x1a8   :  { %2787 = vmatpush.bf16.msrb.mxu3 %v7051_v38  ;;  %v9133_v38 = vld [vmem:[%s12854_s5 + $0x7f4] sm:$0xf]  ;;  %v6955_v41 = vor.u32 %v9031_v33, %v6952_v34  ;;  %v7171_v44 = vor.u32 %v9085_v35, %v7168_v36  ;;  %v2841_v15 = vld [vmem:[%s12856_s26 + $0x58] sm:$0xff]  ;;  %v2875_v21 = vld [vmem:[%s12856_s26 + $0x168] sm:$0xff]  ;;  %v2522_v33 = vadd.f32 %v11816_v22, %v906_v13 }
 0x1a9   :  { %v7363_v49 = vor.u32 %v9133_v38, %v7360_v40  ;;  %v2839_v34 = vld [vmem:[%s12856_s26 + $0x48] sm:$0xff]  ;;  %v2838_v22 = vld [vmem:[%s12856_s26 + $0x40] sm:$0xff] }
 0x1aa   :  { %2799 = vmatpush.bf16.msra.mxu0 %v7267_v42  ;;  %v8977_v42 = vld [vmem:[%s12854_s5 + $0x314] sm:$0xf]  ;;  %v2523_v25 = vpop.f32.mrf.mxu2  ;;  %v2891_v35 = vld [vmem:[%s12856_s26 + $0x1e8] sm:$0xff]  ;;  %v2854_v36 = vld [vmem:[%s12856_s26 + $0xc0] sm:$0xff]  ;;  %v2535_v40 = vadd.f32 %v11826_v31, %v2522_v33 }
 0x1ab   :  { %2812 = vmatpush.bf16.msra.mxu1 %v7459_v47  ;;  %2775 = vmatpush.bf16.msrb.mxu2 %v6835_v50  ;;  %v9025_v47 = vld [vmem:[%s12854_s5 + $0x494] sm:$0xf]  ;;  %v9079_v50 = vld [vmem:[%s12854_s5 + $0x644] sm:$0xf]  ;;  %v6739_v52 = vor.u32 %v8977_v42, %v6736_v43  ;;  %v2853_v43 = vld [vmem:[%s12856_s26 + $0xb8] sm:$0xff] }
 0x1ac   :  { %2788 = vmatpush.bf16.msrb.mxu3 %v7027_v55  ;;  %v7336_v55 = vld [vmem:[%s12854_s5 + $0x7d8] sm:$0xf0]  ;;  %v2549_v7 = vpop.f32.mrf.mxu0  ;;  %v6931_v16 = vor.u32 %v9025_v47, %v6928_v48  ;;  %v2890_v42 = vld [vmem:[%s12856_s26 + $0x1e0] sm:$0xff]  ;;  %v2836_v31 = vld [vmem:[%s12856_s26 + $0x30] sm:$0xff] }
 0x1ad   :  { %v7339_v60 = vor.u32 %v9127_v54, %v7336_v55  ;;  %v2835_v7 = vld [vmem:[%s12856_s26 + $0x28] sm:$0xff]  ;;  %v2888_v25 = vld [vmem:[%s12856_s26 + $0x1d0] sm:$0xff] }
 0x1ae   :  { %2800 = vmatpush.bf16.msra.mxu0 %v7243_v56  ;;  %v2562_v56 = vpop.f32.mrf.mxu1  ;;  %v2536_v57 = vpop.f32.mrf.mxu3  ;;  %v2847_v10 = vld [vmem:[%s12856_s26 + $0x88] sm:$0xff] }
 0x1af   :  { %2813 = vmatpush.bf16.msra.mxu1 %v7435_v58  ;;  %2776 = vmatpush.bf16.msrb.mxu2 %v6811_v61  ;;  %v7147_v58 = vor.u32 %v9079_v50, %v7144_v51  ;;  %v9073_v61 = vld [vmem:[%s12854_s5 + $0x614] sm:$0xf]  ;;  %v2871_v50 = vld [vmem:[%s12856_s26 + $0x148] sm:$0xff]  ;;  %v2850_v57 = vld [vmem:[%s12856_s26 + $0xa0] sm:$0xff] }
 0x1b0   :  { %2789 = vmatpush.bf16.msrb.mxu3 %v7003_v0  ;;  %v7312_v0 = vld [vmem:[%s12854_s5 + $0x7a8] sm:$0xf0]  ;;  %v7123_v5 = vor.u32 %v9073_v61, %v7120_v62  ;;  %v2886_v61 = vld [vmem:[%s12856_s26 + $0x1c0] sm:$0xff]  ;;  %v2849_v62 = vld [vmem:[%s12856_s26 + $0x98] sm:$0xff] }
 0x1b1   :  { %v2887_v56 = vld [vmem:[%s12856_s26 + $0x1c8] sm:$0xff] }
 0x1b2   :  { %2801 = vmatpush.bf16.msra.mxu0 %v7219_v4  ;;  %v2860_v4 = vld [vmem:[%s12856_s26 + $0xf0] sm:$0xff]  ;;  %v2883_v13 = vld [vmem:[%s12856_s26 + $0x1a8] sm:$0xff] }
 0x1b3   :  { %2814 = vmatpush.bf16.msra.mxu1 %v7411_v6  ;;  %2777 = vmatpush.bf16.msrb.mxu2 %v6787_v11  ;;  %v7315_v6 = vor.u32 %v9121_v63, %v7312_v0  ;;  %v2842_v11 = vld [vmem:[%s12856_s26 + $0x60] sm:$0xff]  ;;  %v2832_v63 = vld [vmem:[%s12856_s26 + $0x10] sm:$0xff]  ;;  %v2885_v0 = vld [vmem:[%s12856_s26 + $0x1b8] sm:$0xff] }
 0x1b4   :  { %2790 = vmatpush.bf16.msrb.mxu3 %v6979_v23  ;;  %v2876_v23 = vld [vmem:[%s12856_s26 + $0x170] sm:$0xff]  ;;  %v9212_v33 = vld [vmem:[#allocation5 + $0x164] sm:$0xf0] }
 0x1b6   :  { %2802 = vmatpush.bf16.msra.mxu0 %v7195_v32  ;;  %v2856_v32 = vld [vmem:[%s12856_s26 + $0xd0] sm:$0xff] }
 0x1b7   :  { %2815 = vmatpush.bf16.msra.mxu1 %v7387_v39  ;;  %2778 = vmatpush.bf16.msrb.mxu2 %v6763_v37  ;;  %v2855_v39 = vld [vmem:[%s12856_s26 + $0xc8] sm:$0xff]  ;;  %v2873_v37 = vld [vmem:[%s12856_s26 + $0x158] sm:$0xff] }
 0x1b8   :  { %2791 = vmatpush.bf16.msrb.mxu3 %v6955_v41  ;;  %v2837_v41 = vld [vmem:[%s12856_s26 + $0x38] sm:$0xff] }
 0x1ba   :  { %2803 = vmatpush.bf16.msra.mxu0 %v7171_v44  ;;  %v2889_v44 = vld [vmem:[%s12856_s26 + $0x1d8] sm:$0xff] }
 0x1bb   :  { %2816 = vmatpush.bf16.msra.mxu1 %v7363_v49  ;;  %2779 = vmatpush.bf16.msrb.mxu2 %v6739_v52  ;;  %v2852_v49 = vld [vmem:[%s12856_s26 + $0xb0] sm:$0xff]  ;;  %v2548_v52 = vadd.f32 %v11814_v18, %v2535_v40  ;;  %v2870_v18 = vld [vmem:[%s12856_s26 + $0x140] sm:$0xff]  ;;  %v9206_v40 = vld [vmem:[#allocation5 + $0x134] sm:$0xf0] }
 0x1bc   :  { %2792 = vmatpush.bf16.msrb.mxu3 %v6931_v16  ;;  %v2834_v16 = vld [vmem:[%s12856_s26 + $0x20] sm:$0xff] }
 0x1be   :  { %2804 = vmatpush.bf16.msra.mxu0 %v7147_v58  ;;  %2780 = vmatmul.bf16.vlgmr.msrb.gmra.mxu2 %v10511_v45  ;;  %v2877_v45 = vld [vmem:[%s12856_s26 + $0x178] sm:$0xff] }
 0x1bf   :  { %2930 = vmatpush.msra.mxu2 %v2845_v30  ;;  %2817 = vmatpush.bf16.msra.mxu1 %v7339_v60  ;;  %v2869_v30 = vld [vmem:[%s12856_s26 + $0x138] sm:$0xff] }
 0x1c0   :  { %2950 = vmatpush.msra.mxu3 %v2861_v59  ;;  %v2561_v59 = vadd.f32 %v11824_v29, %v2548_v52  ;;  %v2833_v60 = vld [vmem:[%s12856_s26 + $0x18] sm:$0xff]  ;;  %v7606_v52 = vld [vmem:[#allocation5 + $0xf0] sm:$0xf] }
 0x1c1   :  { %2793 = vmatmul.bf16.vlgmr.msrb.gmra.mxu3 %v10522_v53  ;;  %2931 = vmatpush.msra.mxu2 %v2844_v3  ;;  %v2858_v53 = vld [vmem:[%s12856_s26 + $0xe0] sm:$0xff]  ;;  %v2573_v47 = vpop.f32.mrf.mxu2 }
 0x1c2   :  { %2951 = vmatpush.msra.mxu3 %v2860_v4  ;;  %2805 = vmatpush.bf16.msra.mxu0 %v7123_v5  ;;  %v11984_v48 = vpop.f32.mrf.mxu0  ;;  %v2574_v29 = vadd.f32 %v2573_v47, %v2561_v59  ;;  %v2848_v4 = vld [vmem:[%s12856_s26 + $0x90] sm:$0xff]  ;;  %v2867_v5 = vld [vmem:[%s12856_s26 + $0x128] sm:$0xff]  ;;  %v2902_v59 = vld [vmem:[%s12856_s26 + $0x240] sm:$0xff] }
 0x1c3   :  { %2932 = vmatpush.msra.mxu2 %v2843_v12  ;;  %2818 = vmatpush.bf16.msra.mxu1 %v7315_v6  ;;  %v11994_v55 = vpop.f32.mrf.mxu1 }
 0x1c4   :  { %2952 = vmatpush.msra.mxu3 %v2859_v8  ;;  %v2586_v54 = vpop.f32.mrf.mxu3  ;;  %v2884_v8 = vld [vmem:[%s12856_s26 + $0x1b0] sm:$0xff] }
 0x1c5   :  { %2933 = vmatpush.msra.mxu2 %v2842_v11  ;;  %2806 = vmatmul.bf16.vlgmr.msra.gmra.mxu0 %v10666_v2  ;;  %v2470_v2 = vadd.f32 %v11710_v17, %v2457_v24  ;;  %v2874_v17 = vld [vmem:[%s12856_s26 + $0x160] sm:$0xff]  ;;  %v2864_v24 = vld [vmem:[%s12856_s26 + $0x110] sm:$0xff] }
 0x1c6   :  { %2970 = vmatpush.msrb.mxu0 %v2877_v45  ;;  %2953 = vmatpush.msra.mxu3 %v2858_v53  ;;  %v2866_v11 = vld [vmem:[%s12856_s26 + $0x120] sm:$0xff]  ;;  %v2587_v45 = vadd.f32 %v2586_v54, %v2574_v29  ;;  %v9200_v54 = vld [vmem:[#allocation5 + $0x104] sm:$0xf0] }
 0x1c7   :  { %2819 = vmatmul.bf16.vlgmr.msra.gmra.mxu1 %v10677_v9  ;;  %2934 = vmatpush.msra.mxu2 %v2841_v15  ;;  %v2892_v9 = vld [vmem:[%s12856_s26 + $0x1f0] sm:$0xff]  ;;  %v2483_v38 = vadd.f32 %v11718_v27, %v2470_v2  ;;  %v2830_v53 = vld [vmem:[%s12856_s26] sm:$0xff] }
 0x1c8   :  { %2954 = vmatpush.msra.mxu3 %v2857_v14  ;;  %2971 = vmatpush.msrb.mxu0 %v2876_v23  ;;  %v2872_v27 = vld [vmem:[%s12856_s26 + $0x150] sm:$0xff]  ;;  %v2846_v15 = vld [vmem:[%s12856_s26 + $0x80] sm:$0xff]  ;;  %v2865_v14 = vld [vmem:[%s12856_s26 + $0x118] sm:$0xff]  ;;  %v9530_v23 = vpop.eup %9529 }
 0x1c9   :  { %2935 = vmatpush.msra.mxu2 %v2840_v46  ;;  %2990 = vmatpush.msrb.mxu1 %v2893_v28  ;;  %v2496_v51 = vadd.f32 %v11610_v20, %v2483_v38  ;;  %v2851_v20 = vld [vmem:[%s12856_s26 + $0xa8] sm:$0xff]  ;;  %v2575_v1 = vpop.f32.mrf.mxu2  ;;  %v2882_v46 = vld [vmem:[%s12856_s26 + $0x1a0] sm:$0xff]  ;;  %v7654_v2 = vld [vmem:[#allocation5 + $0x150] sm:$0xf] }
 0x1ca   :  { %2955 = vmatpush.msra.mxu3 %v2856_v32  ;;  %2972 = vmatpush.msrb.mxu0 %v2875_v21  ;;  %v2601_v3 = vpop.f32.mrf.mxu0  ;;  %v2863_v32 = vld [vmem:[%s12856_s26 + $0x108] sm:$0xff]  ;;  %v2909_v21 = vld [vmem:[%s12856_s26 + $0x278] sm:$0xff]  ;;  %v7630_v38 = vld [vmem:[#allocation5 + $0x120] sm:$0xf] }
 0x1cb   :  { %2936 = vmatpush.msra.mxu2 %v2839_v34  ;;  %2991 = vmatpush.msrb.mxu1 %v2892_v9  ;;  %v2509_v58 = vadd.f32 %v11618_v26, %v2496_v51  ;;  %v2868_v26 = vld [vmem:[%s12856_s26 + $0x130] sm:$0xff]  ;;  %v2614_v6 = vpop.f32.mrf.mxu1  ;;  %v2881_v34 = vld [vmem:[%s12856_s26 + $0x198] sm:$0xff]  ;;  %v7631_v47 = vor.u32 %v9206_v40, %v7630_v38  ;;  %v9188_v1 = vld [vmem:[#allocation5 + $0xa4] sm:$0xf0] }
 0x1cc   :  { %2956 = vmatpush.msra.mxu3 %v2855_v39  ;;  %2973 = vmatpush.msrb.mxu0 %v2874_v17  ;;  %v2588_v12 = vpop.f32.mrf.mxu3  ;;  %v2908_v9 = vld [vmem:[%s12856_s26 + $0x270] sm:$0xff]  ;;  %v2862_v39 = vld [vmem:[%s12856_s26 + $0x100] sm:$0xff]  ;;  %v7662_v38 = vld [vmem:[#allocation5 + $0x158] sm:$0xf] }
 0x1cd   :  { %2937 = vmatpush.msra.mxu2 %v2838_v22  ;;  %2992 = vmatpush.msrb.mxu1 %v2891_v35  ;;  %9531 = vtanh.f32 %v2509_v58  ;;  %v2880_v17 = vld [vmem:[%s12856_s26 + $0x190] sm:$0xff]  ;;  %v7655_v22 = vor.u32 %v9212_v33, %v7654_v2  ;;  %v2907_v35 = vld [vmem:[%s12856_s26 + $0x268] sm:$0xff]  ;;  %v2897_v33 = vld [vmem:[%s12856_s26 + $0x218] sm:$0xff] }
 0x1ce   :  { %2957 = vmatpush.msra.mxu3 %v2854_v36  ;;  %2974 = vmatpush.msrb.mxu0 %v2873_v37  ;;  %9533 = vtanh.f32 %v2587_v45  ;;  %v12101_v36 = vld [vmem:[%s12855_s3] sm:$0x3f]  ;;  %v9197_v3 = vld [vmem:[#allocation5 + $0xf4] sm:$0xf]  ;;  %v9213_v40 = vld [vmem:[#allocation5 + $0x16c] sm:$0xf0] }
 0x1cf   :  { %2938 = vmatpush.msra.mxu2 %v2837_v41  ;;  %2993 = vmatpush.msrb.mxu1 %v2890_v42  ;;  %v907_v37 = vperm.slane %v12101_v36, 3  ;;  %v2879_v41 = vld [vmem:[%s12856_s26 + $0x188] sm:$0xff]  ;;  %v7534_v45 = vld [vmem:[#allocation5 + $0x60] sm:$0xf] }
 0x1d0   :  { %2958 = vmatpush.msra.mxu3 %v2853_v43  ;;  %2975 = vmatpush.msrb.mxu0 %v2872_v27  ;;  %v2906_v43 = vld [vmem:[%s12856_s26 + $0x260] sm:$0xff] }
 0x1d1   :  { %2939 = vmatpush.msra.mxu2 %v2836_v31  ;;  %2994 = vmatpush.msrb.mxu1 %v2889_v44  ;;  %v2878_v27 = vld [vmem:[%s12856_s26 + $0x180] sm:$0xff]  ;;  %v9209_v31 = vld [vmem:[#allocation5 + $0x154] sm:$0xf]  ;;  %v7656_v44 = vld [vmem:[#allocation5 + $0x168] sm:$0xf0]  ;;  %v2600_v51 = vadd.f32 %v11984_v48, %v907_v37 }
 0x1d2   :  { %2959 = vmatpush.msra.mxu3 %v2852_v49  ;;  %2976 = vmatpush.msrb.mxu0 %v2871_v50  ;;  %v2905_v49 = vld [vmem:[%s12856_s26 + $0x258] sm:$0xff]  ;;  %v7659_v50 = vor.u32 %v9209_v31, %v7656_v44  ;;  %v7486_v37 = vld [vmem:[#allocation5] sm:$0xf] }
 0x1d3   :  { %2940 = vmatpush.msra.mxu2 %v2835_v7  ;;  %2995 = vmatpush.msrb.mxu1 %v2888_v25  ;;  %v9532_v28 = vpop.eup %9531  ;;  %v2904_v7 = vld [vmem:[%s12856_s26 + $0x250] sm:$0xff]  ;;  %v7607_v25 = vor.u32 %v9200_v54, %v7606_v52  ;;  %v9194_v48 = vld [vmem:[#allocation5 + $0xd4] sm:$0xf0] }
 0x1d4   :  { %2960 = vmatpush.msra.mxu3 %v2851_v20  ;;  %2977 = vmatpush.msrb.mxu0 %v2870_v18  ;;  %v9534_v42 = vpop.eup %9533  ;;  %v7582_v20 = vld [vmem:[#allocation5 + $0xc0] sm:$0xf]  ;;  %v2903_v18 = vld [vmem:[%s12856_s26 + $0x248] sm:$0xff]  ;;  %v2924_v52 = vld [vmem:[%s12856_s26 + $0x2f0] sm:$0xff] }
 0x1d5   :  { %2941 = vmatpush.msra.mxu2 %v2834_v16  ;;  %2996 = vmatpush.msrb.mxu1 %v2887_v56  ;;  %v2613_v16 = vadd.f32 %v11994_v55, %v2600_v51  ;;  %v9203_v56 = vld [vmem:[#allocation5 + $0x124] sm:$0xf]  ;;  %v7583_v29 = vor.u32 %v9194_v48, %v7582_v20  ;;  %v2901_v55 = vld [vmem:[%s12856_s26 + $0x238] sm:$0xff]  ;;  %v7663_v51 = vor.u32 %v9213_v40, %v7662_v38  ;;  %v9173_v54 = vld [vmem:[#allocation5 + $0x34] sm:$0xf] }
 0x1d6   :  { %2961 = vmatpush.msra.mxu3 %v2850_v57  ;;  %2978 = vmatpush.msrb.mxu0 %v2869_v30  ;;  %v7632_v57 = vld [vmem:[#allocation5 + $0x138] sm:$0xf0]  ;;  %v9207_v20 = vld [vmem:[#allocation5 + $0x13c] sm:$0xf0] }
 0x1d7   :  { %2942 = vmatpush.msra.mxu2 %v2833_v60  ;;  %2997 = vmatpush.msrb.mxu1 %v2886_v61  ;;  %v7635_v60 = vor.u32 %v9203_v56, %v7632_v57  ;;  %v2923_v57 = vld [vmem:[%s12856_s26 + $0x2e8] sm:$0xff]  ;;  %v2917_v38 = vld [vmem:[%s12856_s26 + $0x2b8] sm:$0xff] }
 0x1d8   :  { %2962 = vmatpush.msra.mxu3 %v2849_v62  ;;  %2979 = vmatpush.msrb.mxu0 %v2868_v26  ;;  %v7624_v40 = vld [vmem:[#allocation5 + $0x118] sm:$0xf0] }
 0x1d9   :  { %2943 = vmatpush.msra.mxu2 %v2832_v63  ;;  %2998 = vmatpush.msrb.mxu1 %v2885_v0  ;;  %v7558_v63 = vld [vmem:[#allocation5 + $0x90] sm:$0xf] }
 0x1da   :  { %2963 = vmatpush.msra.mxu3 %v2848_v4  ;;  %2980 = vmatpush.msrb.mxu0 %v2867_v5  ;;  %v7608_v4 = vld [vmem:[#allocation5 + $0x108] sm:$0xf0]  ;;  %v2900_v5 = vld [vmem:[%s12856_s26 + $0x230] sm:$0xff] }
 0x1db   :  { %2944 = vmatpush.msra.mxu2 %v2831_v19  ;;  %2999 = vmatpush.msrb.mxu1 %v2884_v8  ;;  %v7611_v12 = vor.u32 %v9197_v3, %v7608_v4  ;;  %v7559_v19 = vor.u32 %v9188_v1, %v7558_v63  ;;  %v2899_v8 = vld [vmem:[%s12856_s26 + $0x228] sm:$0xff]  ;;  %v7488_v63 = vld [vmem:[#allocation5 + $0x18] sm:$0xf0]  ;;  %v9211_v3 = vld [vmem:[#allocation5 + $0x164] sm:$0xf] }
 0x1dc   :  { %2964 = vmatpush.msra.mxu3 %v2847_v10  ;;  %2981 = vmatpush.msrb.mxu0 %v2866_v11  ;;  %v9191_v10 = vld [vmem:[#allocation5 + $0xc4] sm:$0xf]  ;;  %v7672_v4 = vld [vmem:[#allocation5 + $0x178] sm:$0xf0] }
 0x1dd   :  { %2945 = vmatpush.msra.mxu2 %v2830_v53  ;;  %3000 = vmatpush.msrb.mxu1 %v2883_v13  ;;  %v9182_v53 = vld [vmem:[#allocation5 + $0x74] sm:$0xf0]  ;;  %v7584_v13 = vld [vmem:[#allocation5 + $0xd8] sm:$0xf0] }
 0x1de   :  { %2965 = vmatpush.msra.mxu3 %v2846_v15  ;;  %2982 = vmatpush.msrb.mxu0 %v2865_v14  ;;  %v7535_v2 = vor.u32 %v9182_v53, %v7534_v45  ;;  %v7598_v45 = vld [vmem:[#allocation5 + $0xd0] sm:$0xf]  ;;  %v9196_v53 = vld [vmem:[#allocation5 + $0xe4] sm:$0xf0] }
 0x1df   :  { %2946 = vmatmul.f32.vlgmr.msra.gmra.mxu2 %v9530_v23  ;;  %2966 = vmatmul.f32.vlgmr.msra.gmra.mxu3 %v9532_v28  ;;  %v2898_v23 = vld [vmem:[%s12856_s26 + $0x220] sm:$0xff] }
 0x1e0   :  { %2983 = vmatpush.msrb.mxu0 %v2864_v24  ;;  %3001 = vmatpush.msrb.mxu1 %v2882_v46  ;;  %v7587_v24 = vor.u32 %v9191_v10, %v7584_v13  ;;  %v9185_v46 = vld [vmem:[#allocation5 + $0x94] sm:$0xf]  ;;  %v9195_v10 = vld [vmem:[#allocation5 + $0xdc] sm:$0xf0] }
 0x1e1   :  { %3010 = vmatpush.msrb.mxu2 %v2909_v21  ;;  %v2625_v30 = vpop.f32.mrf.mxu2  ;;  %v7560_v21 = vld [vmem:[#allocation5 + $0xa8] sm:$0xf0]  ;;  %v2920_v13 = vld [vmem:[%s12856_s26 + $0x2d0] sm:$0xff] }
 0x1e2   :  { %2984 = vmatpush.msrb.mxu0 %v2863_v32  ;;  %3002 = vmatpush.msrb.mxu1 %v2881_v34  ;;  %v2651_v58 = vpop.f32.mrf.mxu0  ;;  %v2626_v61 = vadd.f32 %v2625_v30, %v2613_v16  ;;  %v7563_v34 = vor.u32 %v9185_v46, %v7560_v21  ;;  %v3091_v16 = vld [vmem:[%s12857_s27] sm:$0x3]  ;;  %v7646_v30 = vld [vmem:[#allocation5 + $0x130] sm:$0xf] }
 0x1e3   :  { %3011 = vmatpush.msrb.mxu2 %v2908_v9  ;;  %v2664_v26 = vpop.f32.mrf.mxu1  ;;  %v7510_v9 = vld [vmem:[#allocation5 + $0x30] sm:$0xf] }
 0x1e4   :  { %2985 = vmatpush.msrb.mxu0 %v2862_v39  ;;  %3003 = vmatpush.msrb.mxu1 %v2880_v17  ;;  %v2638_v62 = vpop.f32.mrf.mxu3  ;;  %v9176_v39 = vld [vmem:[#allocation5 + $0x44] sm:$0xf0]  ;;  %v2896_v17 = vld [vmem:[%s12856_s26 + $0x210] sm:$0xff] }
 0x1e5   :  { %2986 = vmatmul.f32.vlgmr.msrb.gmra.mxu0 %v9534_v42  ;;  %3012 = vmatpush.msrb.mxu2 %v2907_v35  ;;  %v2639_v0 = vadd.f32 %v2638_v62, %v2626_v61  ;;  %v7536_v35 = vld [vmem:[#allocation5 + $0x78] sm:$0xf0]  ;;  %v9170_v42 = vld [vmem:[#allocation5 + $0x14] sm:$0xf0]  ;;  %v12166_v61 = vpack.c.bf16 %v3091_v16, %v3091_v16  ;;  %v2914_v16 = vld [vmem:[%s12856_s26 + $0x2a0] sm:$0xff] }
 0x1e6   :  { %3381 = vmatpush.bf16.msra.mxu0 %v7655_v22  ;;  %3004 = vmatpush.msrb.mxu1 %v2879_v41  ;;  %v9179_v22 = vld [vmem:[#allocation5 + $0x64] sm:$0xf]  ;;  %v7511_v41 = vor.u32 %v9176_v39, %v7510_v9  ;;  %v7614_v62 = vld [vmem:[#allocation5 + $0xf8] sm:$0xf]  ;;  %v7599_v9 = vor.u32 %v9196_v53, %v7598_v45  ;;  %v7574_v39 = vld [vmem:[#allocation5 + $0xa0] sm:$0xf] }
 0x1e7   :  { %3013 = vmatpush.msrb.mxu2 %v2906_v43  ;;  %v2652_v6 = vadd.f32 %v2651_v58, %v2639_v0  ;;  %v7670_v43 = vld [vmem:[#allocation5 + $0x160] sm:$0xf]  ;;  %v7539_v31 = vor.u32 %v9179_v22, %v7536_v35  ;;  %v9208_v58 = vld [vmem:[#allocation5 + $0x144] sm:$0xf0]  ;;  %v9199_v22 = vld [vmem:[#allocation5 + $0x104] sm:$0xf] }
 0x1e8   :  { %3005 = vmatpush.msrb.mxu1 %v2878_v27  ;;  %v2895_v27 = vld [vmem:[%s12856_s26 + $0x208] sm:$0xff]  ;;  %v7647_v0 = vor.u32 %v9208_v58, %v7646_v30  ;;  %v9190_v35 = vld [vmem:[#allocation5 + $0xb4] sm:$0xf0]  ;;  %v7526_v30 = vld [vmem:[#allocation5 + $0x40] sm:$0xf] }
 0x1e9   :  { %3014 = vmatpush.msrb.mxu2 %v2905_v49  ;;  %v2665_v11 = vadd.f32 %v2664_v26, %v2652_v6  ;;  %v2627_v15 = vpop.f32.mrf.mxu2  ;;  %v2894_v49 = vld [vmem:[%s12856_s26 + $0x200] sm:$0xff]  ;;  %v9201_v26 = vld [vmem:[#allocation5 + $0x10c] sm:$0xf0]  ;;  %v9210_v53 = vld [vmem:[#allocation5 + $0x15c] sm:$0xf] }
 0x1ea   :  { %3394 = vmatpush.bf16.msra.mxu1 %v7659_v50  ;;  %3382 = vmatpush.bf16.msra.mxu0 %v7631_v47  ;;  %v2653_v14 = vpop.f32.mrf.mxu0  ;;  %v9214_v47 = vld [vmem:[#allocation5 + $0x174] sm:$0xf0]  ;;  %v7615_v6 = vor.u32 %v9201_v26, %v7614_v62  ;;  %v9187_v58 = vld [vmem:[#allocation5 + $0xa4] sm:$0xf] }
 0x1eb   :  { %3015 = vmatpush.msrb.mxu2 %v2904_v7  ;;  %9535 = vtanh.f32 %v2665_v11  ;;  %v2666_v32 = vpop.f32.mrf.mxu1  ;;  %v2925_v50 = vld [vmem:[%s12856_s26 + $0x2f8] sm:$0xff]  ;;  %v7512_v7 = vld [vmem:[#allocation5 + $0x48] sm:$0xf0]  ;;  %v7671_v56 = vor.u32 %v9214_v47, %v7670_v43  ;;  %v9205_v14 = vld [vmem:[#allocation5 + $0x134] sm:$0xf] }
 0x1ec   :  { %v2640_v28 = vpop.f32.mrf.mxu3  ;;  %3030 = vmatpush.msrb.mxu3 %v2925_v50  ;;  %v7515_v48 = vor.u32 %v9173_v54, %v7512_v7  ;;  %v9183_v43 = vld [vmem:[#allocation5 + $0x7c] sm:$0xf0]  ;;  %v9193_v47 = vld [vmem:[#allocation5 + $0xd4] sm:$0xf]  ;;  %v9178_v62 = vld [vmem:[#allocation5 + $0x54] sm:$0xf0] }
 0x1ed   :  { %3016 = vmatpush.msrb.mxu2 %v2903_v18  ;;  %v7487_v18 = vor.u32 %v9170_v42, %v7486_v37  ;;  %v7542_v42 = vld [vmem:[#allocation5 + $0x68] sm:$0xf]  ;;  %v2910_v45 = vld [vmem:[%s12856_s26 + $0x280] sm:$0xff] }
 0x1ee   :  { %3383 = vmatpush.bf16.msra.mxu0 %v7607_v25  ;;  %3395 = vmatpush.bf16.msra.mxu1 %v7635_v60  ;;  %v7638_v25 = vld [vmem:[#allocation5 + $0x128] sm:$0xf]  ;;  %v2922_v60 = vld [vmem:[%s12856_s26 + $0x2e0] sm:$0xff]  ;;  %v7543_v50 = vor.u32 %v9183_v43, %v7542_v42 }
 0x1ef   :  { %3017 = vmatpush.msrb.mxu2 %v2902_v59  ;;  %3031 = vmatpush.msrb.mxu3 %v2924_v52  ;;  %v7639_v59 = vor.u32 %v9207_v20, %v7638_v25  ;;  %v7600_v52 = vld [vmem:[#allocation5 + $0xe8] sm:$0xf0] }
 0x1f0   :  { %v7603_v25 = vor.u32 %v9193_v47, %v7600_v52  ;;  %v7592_v47 = vld [vmem:[#allocation5 + $0xe0] sm:$0xf0]  ;;  %v7846_v52 = vld [vmem:[#allocation8 + $0x150] sm:$0xf] }
 0x1f1   :  { %3018 = vmatpush.msrb.mxu2 %v2901_v55  ;;  %v9536_v44 = vpop.eup %9535  ;;  %3032 = vmatpush.msrb.mxu3 %v2923_v57  ;;  %v2921_v55 = vld [vmem:[%s12856_s26 + $0x2d8] sm:$0xff] }
 0x1f2   :  { %3384 = vmatpush.bf16.msra.mxu0 %v7583_v29  ;;  %3396 = vmatpush.bf16.msra.mxu1 %v7611_v12  ;;  %v9167_v29 = vld [vmem:[#allocation5 + $0x4] sm:$0xf]  ;;  %v9202_v12 = vld [vmem:[#allocation5 + $0x114] sm:$0xf0] }
 0x1f3   :  { %3019 = vmatpush.msrb.mxu2 %v2900_v5  ;;  %3006 = vmatmul.f32.vlgmr.msrb.gmra.mxu1 %v9536_v44  ;;  %v7491_v1 = vor.u32 %v9167_v29, %v7488_v63  ;;  %v7622_v5 = vld [vmem:[#allocation5 + $0x100] sm:$0xf]  ;;  %v2916_v44 = vld [vmem:[%s12856_s26 + $0x2b0] sm:$0xff]  ;;  %v2913_v29 = vld [vmem:[%s12856_s26 + $0x298] sm:$0xff] }
 0x1f4   :  { %3033 = vmatpush.msrb.mxu3 %v2922_v60  ;;  %v7623_v11 = vor.u32 %v9202_v12, %v7622_v5  ;;  %v908_v60 = vperm.slane %v12101_v36, 4  ;;  %v7527_v5 = vor.u32 %v9178_v62, %v7526_v30  ;;  %v7502_v12 = vld [vmem:[#allocation5 + $0x10] sm:$0xf]  ;;  %v7822_v30 = vld [vmem:[#allocation8 + $0x120] sm:$0xf] }
 0x1f5   :  { %3020 = vmatpush.msrb.mxu2 %v2899_v8  ;;  %v7590_v8 = vld [vmem:[#allocation5 + $0xc8] sm:$0xf]  ;;  %v9174_v62 = vld [vmem:[#allocation5 + $0x3c] sm:$0xf] }
 0x1f6   :  { %3385 = vmatpush.bf16.msra.mxu0 %v7559_v19  ;;  %3397 = vmatpush.bf16.msra.mxu1 %v7587_v24  ;;  %v7675_v19 = vor.u32 %v9211_v3, %v7672_v4  ;;  %v7591_v15 = vor.u32 %v9195_v10, %v7590_v8  ;;  %v7552_v3 = vld [vmem:[#allocation5 + $0x88] sm:$0xf0]  ;;  %v2912_v4 = vld [vmem:[%s12856_s26 + $0x290] sm:$0xff] }
 0x1f7   :  { %3021 = vmatpush.msrb.mxu2 %v2898_v23  ;;  %3034 = vmatpush.msrb.mxu3 %v2921_v55  ;;  %v7648_v23 = vld [vmem:[#allocation5 + $0x148] sm:$0xf0]  ;;  %v7494_v55 = vld [vmem:[#allocation5 + $0x8] sm:$0xf] }
 0x1f8   :  { %v7651_v28 = vor.u32 %v9205_v14, %v7648_v23  ;;  %v2911_v8 = vld [vmem:[%s12856_s26 + $0x288] sm:$0xff]  ;;  %v9175_v23 = vld [vmem:[#allocation5 + $0x44] sm:$0xf] }
 0x1f9   :  { %3022 = vmatpush.msrb.mxu2 %v2897_v33  ;;  %3035 = vmatpush.msrb.mxu3 %v2920_v13  ;;  %v7566_v33 = vld [vmem:[#allocation5 + $0x98] sm:$0xf]  ;;  %v7664_v13 = vld [vmem:[#allocation5 + $0x170] sm:$0xf0] }
 0x1fa   :  { %3386 = vmatpush.bf16.msra.mxu0 %v7535_v2  ;;  %3398 = vmatpush.bf16.msra.mxu1 %v7563_v34  ;;  %v2919_v2 = vld [vmem:[%s12856_s26 + $0x2c8] sm:$0xff]  ;;  %v9189_v34 = vld [vmem:[#allocation5 + $0xac] sm:$0xf0]  ;;  %v7667_v14 = vor.u32 %v9210_v53, %v7664_v13  ;;  %v7726_v53 = vld [vmem:[#allocation8 + $0x60] sm:$0xf] }
 0x1fb   :  { %3023 = vmatpush.msrb.mxu2 %v2896_v17  ;;  %3036 = vmatpush.msrb.mxu3 %v2919_v2  ;;  %v2918_v17 = vld [vmem:[%s12856_s26 + $0x2c0] sm:$0xff]  ;;  %v7567_v37 = vor.u32 %v9189_v34, %v7566_v33  ;;  %v9204_v2 = vld [vmem:[#allocation5 + $0x12c] sm:$0xf]  ;;  %v9230_v13 = vld [vmem:[#allocation8 + $0x74] sm:$0xf0] }
 0x1fc   :  { %v7640_v34 = vld [vmem:[#allocation5 + $0x140] sm:$0xf0] }
 0x1fd   :  { %3024 = vmatpush.msrb.mxu2 %v2895_v27  ;;  %3037 = vmatpush.msrb.mxu3 %v2918_v17  ;;  %v7575_v27 = vor.u32 %v9190_v35, %v7574_v39  ;;  %v7504_v39 = vld [vmem:[#allocation5 + $0x28] sm:$0xf0]  ;;  %v7643_v17 = vor.u32 %v9204_v2, %v7640_v34  ;;  %v7702_v34 = vld [vmem:[#allocation8 + $0x30] sm:$0xf] }
 0x1fe   :  { %3387 = vmatpush.bf16.msra.mxu0 %v7511_v41  ;;  %3399 = vmatpush.bf16.msra.mxu1 %v7539_v31  ;;  %v7627_v41 = vor.u32 %v9199_v22, %v7624_v40  ;;  %v7550_v31 = vld [vmem:[#allocation5 + $0x70] sm:$0xf] }
 0x1ff   :  { %3025 = vmatpush.msrb.mxu2 %v2894_v49  ;;  %3038 = vmatpush.msrb.mxu3 %v2917_v38  ;;  %v9184_v49 = vld [vmem:[#allocation5 + $0x84] sm:$0xf0]  ;;  %v7616_v38 = vld [vmem:[#allocation5 + $0x110] sm:$0xf0] }
 0x200   :  { %v7551_v57 = vor.u32 %v9184_v49, %v7550_v31 }
 0x201   :  { %3407 = vmatpush.bf16.msra.mxu2 %v7663_v51  ;;  %v12175_v24 = vpop.f32.mrf.mxu2  ;;  %v2915_v51 = vld [vmem:[%s12856_s26 + $0x2a8] sm:$0xff]  ;;  %3039 = vmatpush.msrb.mxu3 %v2916_v44 }
 0x202   :  { %3388 = vmatpush.bf16.msra.mxu0 %v7487_v18  ;;  %3400 = vmatpush.bf16.msra.mxu1 %v7515_v48  ;;  %v12177_v46 = vpop.f32.mrf.mxu0  ;;  %v7518_v48 = vld [vmem:[#allocation5 + $0x38] sm:$0xf]  ;;  %v9192_v44 = vld [vmem:[#allocation5 + $0xcc] sm:$0xf] }
 0x203   :  { %v12182_v21 = vpop.f32.mrf.mxu1  ;;  %3040 = vmatpush.msrb.mxu3 %v2915_v51  ;;  %v7568_v51 = vld [vmem:[#allocation5 + $0xb0] sm:$0xf0] }
 0x204   :  { %v12180_v32 = vpop.f32.mrf.mxu3 }
 0x205   :  { %3408 = vmatpush.bf16.msra.mxu2 %v7639_v59  ;;  %3389 = vmatmul.bf16.vlgmr.msra.gmra.mxu0 %v12166_v61  ;;  %v7576_v59 = vld [vmem:[#allocation5 + $0xb8] sm:$0xf0] }
 0x206   :  { %3433 = vmatpush.bf16.msrb.mxu0 %v7671_v56  ;;  %3401 = vmatpush.bf16.msra.mxu1 %v7491_v1  ;;  %v9177_v56 = vld [vmem:[#allocation5 + $0x4c] sm:$0xf0]  ;;  %v7579_v63 = vor.u32 %v9187_v58, %v7576_v59  ;;  %v9181_v1 = vld [vmem:[#allocation5 + $0x74] sm:$0xf]  ;;  %v9254_v58 = vld [vmem:[#allocation8 + $0x134] sm:$0xf0] }
 0x207   :  { %v7519_v26 = vor.u32 %v9177_v56, %v7518_v48  ;;  %3041 = vmatpush.msrb.mxu3 %v2914_v16  ;;  %v7555_v10 = vor.u32 %v9181_v1, %v7552_v3  ;;  %v7496_v1 = vld [vmem:[#allocation5 + $0x20] sm:$0xf0] }
 0x209   :  { %3409 = vmatpush.bf16.msra.mxu2 %v7615_v6  ;;  %3402 = vmatmul.bf16.vlgmr.msra.gmra.mxu1 %v12166_v61  ;;  %v2679_v54 = vpop.f32.mrf.mxu2  ;;  %v9172_v6 = vld [vmem:[#allocation5 + $0x24] sm:$0xf0] }
 0x20a   :  { %3434 = vmatpush.bf16.msrb.mxu0 %v7647_v0  ;;  %3446 = vmatpush.bf16.msrb.mxu1 %v7675_v19  ;;  %v2705_v7 = vpop.f32.mrf.mxu0  ;;  %v9171_v0 = vld [vmem:[#allocation5 + $0x1c] sm:$0xf0] }
 0x20b   :  { %v2718_v18 = vpop.f32.mrf.mxu1  ;;  %3042 = vmatpush.msrb.mxu3 %v2913_v29  ;;  %v7495_v19 = vor.u32 %v9171_v0, %v7494_v55  ;;  %v9260_v7 = vld [vmem:[#allocation8 + $0x164] sm:$0xf0]  ;;  %v7798_v29 = vld [vmem:[#allocation8 + $0xf0] sm:$0xf] }
 0x20c   :  { %v2692_v20 = vpop.f32.mrf.mxu3  ;;  %v9248_v55 = vld [vmem:[#allocation8 + $0x104] sm:$0xf0] }
 0x20d   :  { %3410 = vmatpush.bf16.msra.mxu2 %v7591_v15  ;;  %3043 = vmatpush.msrb.mxu3 %v2912_v4  ;;  %v7503_v15 = vor.u32 %v9172_v6, %v7502_v12  ;;  %v9168_v0 = vld [vmem:[#allocation5 + $0xc] sm:$0xf]  ;;  %v7799_v4 = vor.u32 %v9248_v55, %v7798_v29  ;;  %v9242_v12 = vld [vmem:[#allocation8 + $0xd4] sm:$0xf0]  ;;  %v909_v6 = vperm.slane %v12101_v36, 5 }
 0x20e   :  { %3435 = vmatpush.bf16.msrb.mxu0 %v7623_v11  ;;  %3447 = vmatpush.bf16.msrb.mxu1 %v7651_v28  ;;  %v2678_v11 = vadd.f32 %v12175_v24, %v908_v60  ;;  %v7528_v28 = vld [vmem:[#allocation5 + $0x58] sm:$0xf0]  ;;  %v7823_v60 = vor.u32 %v9254_v58, %v7822_v30  ;;  %v7499_v3 = vor.u32 %v9168_v0, %v7496_v1  ;;  %v7942_v55 = vld [vmem:[#allocation8 + $0x210] sm:$0xf]  ;;  %v9284_v0 = vld [vmem:[#allocation8 + $0x224] sm:$0xf0] }
 0x20f   :  { %3044 = vmatpush.msrb.mxu3 %v2911_v8  ;;  %v7531_v33 = vor.u32 %v9175_v23, %v7528_v28  ;;  %v7750_v8 = vld [vmem:[#allocation8 + $0x90] sm:$0xf]  ;;  %v7727_v28 = vor.u32 %v9230_v13, %v7726_v53  ;;  %v8494_v1 = vld [vmem:[#allocation8 + $0x660] sm:$0xf]  ;;  %v9410_v13 = vld [vmem:[#allocation8 + $0x614] sm:$0xf0] }
 0x210   :  { %v2691_v24 = vadd.f32 %v12180_v32, %v2678_v11  ;;  %v8446_v53 = vld [vmem:[#allocation8 + $0x600] sm:$0xf] }
 0x211   :  { %3411 = vmatpush.bf16.msra.mxu2 %v7567_v37  ;;  %3045 = vmatpush.msrb.mxu3 %v2910_v45  ;;  %v9198_v37 = vld [vmem:[#allocation5 + $0xfc] sm:$0xf] }
 0x212   :  { %3436 = vmatpush.bf16.msrb.mxu0 %v7599_v9  ;;  %3448 = vmatpush.bf16.msrb.mxu1 %v7627_v41  ;;  %v9169_v9 = vld [vmem:[#allocation5 + $0x14] sm:$0xf]  ;;  %v2704_v35 = vadd.f32 %v12177_v46, %v2691_v24  ;;  %v7619_v40 = vor.u32 %v9198_v37, %v7616_v38  ;;  %v7595_v46 = vor.u32 %v9192_v44, %v7592_v47  ;;  %v9224_v24 = vld [vmem:[#allocation8 + $0x44] sm:$0xf0] }
 0x213   :  { %3420 = vmatpush.bf16.msra.mxu3 %v7667_v14  ;;  %v7507_v22 = vor.u32 %v9169_v9, %v7504_v39  ;;  %v7703_v39 = vor.u32 %v9224_v24, %v7702_v34  ;;  %v8614_v37 = vld [vmem:[#allocation8 + $0x750] sm:$0xf]  ;;  %v9452_v38 = vld [vmem:[#allocation8 + $0x764] sm:$0xf0]  ;;  %v7870_v34 = vld [vmem:[#allocation8 + $0x180] sm:$0xf] }
 0x214   :  { %v2717_v41 = vadd.f32 %v12182_v21, %v2704_v35  ;;  %v9180_v21 = vld [vmem:[#allocation5 + $0x6c] sm:$0xf]  ;;  %v9218_v35 = vld [vmem:[#allocation8 + $0x14] sm:$0xf0]  ;;  %v8038_v44 = vld [vmem:[#allocation8 + $0x2d0] sm:$0xf] }
 0x215   :  { %3412 = vmatpush.bf16.msra.mxu2 %v7543_v50  ;;  %v9186_v50 = vld [vmem:[#allocation5 + $0x9c] sm:$0xf]  ;;  %v9308_v47 = vld [vmem:[#allocation8 + $0x2e4] sm:$0xf0] }
 0x216   :  { %3437 = vmatpush.bf16.msrb.mxu0 %v7575_v27  ;;  %3449 = vmatpush.bf16.msrb.mxu1 %v7603_v25  ;;  %v7571_v54 = vor.u32 %v9186_v50, %v7568_v51  ;;  %v7544_v25 = vld [vmem:[#allocation5 + $0x80] sm:$0xf0]  ;;  %v8039_v50 = vor.u32 %v9308_v47, %v8038_v44  ;;  %v9266_v24 = vld [vmem:[#allocation8 + $0x194] sm:$0xf0]  ;;  %v8758_v44 = vld [vmem:[#allocation8 + $0x870] sm:$0xf] }
 0x217   :  { %3421 = vmatpush.bf16.msra.mxu3 %v7643_v17  ;;  %v7547_v16 = vor.u32 %v9180_v21, %v7544_v25  ;;  %v9440_v21 = vld [vmem:[#allocation8 + $0x704] sm:$0xf0] }
 0x218   :  { %v9488_v47 = vld [vmem:[#allocation8 + $0x884] sm:$0xf0] }
 0x219   :  { %3413 = vmatpush.bf16.msra.mxu2 %v7519_v26  ;;  %v7520_v26 = vld [vmem:[#allocation5 + $0x50] sm:$0xf0] }
 0x21a   :  { %3438 = vmatpush.bf16.msrb.mxu0 %v7551_v57  ;;  %3450 = vmatpush.bf16.msrb.mxu1 %v7579_v63  ;;  %v7847_v57 = vor.u32 %v9260_v7, %v7846_v52  ;;  %v7523_v63 = vor.u32 %v9174_v62, %v7520_v26  ;;  %v8014_v52 = vld [vmem:[#allocation8 + $0x2a0] sm:$0xf]  ;;  %v8566_v7 = vld [vmem:[#allocation8 + $0x6f0] sm:$0xf]  ;;  %v9428_v26 = vld [vmem:[#allocation8 + $0x6a4] sm:$0xf0] }
 0x21b   :  { %3422 = vmatpush.bf16.msra.mxu3 %v7619_v40  ;;  %v8518_v62 = vld [vmem:[#allocation8 + $0x690] sm:$0xf] }
 0x21d   :  { %3414 = vmatpush.bf16.msra.mxu2 %v7495_v19 }
 0x21e   :  { %3439 = vmatpush.bf16.msrb.mxu0 %v7527_v5  ;;  %3451 = vmatpush.bf16.msrb.mxu1 %v7555_v10  ;;  %v7774_v5 = vld [vmem:[#allocation8 + $0xc0] sm:$0xf]  ;;  %v9236_v10 = vld [vmem:[#allocation8 + $0xa4] sm:$0xf0] }
 0x21f   :  { %3423 = vmatpush.bf16.msra.mxu3 %v7595_v46  ;;  %v7775_v19 = vor.u32 %v9242_v12, %v7774_v5  ;;  %v7751_v45 = vor.u32 %v9236_v10, %v7750_v8  ;;  %v8590_v46 = vld [vmem:[#allocation8 + $0x720] sm:$0xf]  ;;  %v9416_v8 = vld [vmem:[#allocation8 + $0x644] sm:$0xf0] }
 0x220   :  { %v7918_v12 = vld [vmem:[#allocation8 + $0x1e0] sm:$0xf] }
 0x221   :  { %v2729_v32 = vpop.f32.mrf.mxu2 }
 0x222   :  { %3440 = vmatpush.bf16.msrb.mxu0 %v7503_v15  ;;  %3452 = vmatpush.bf16.msrb.mxu1 %v7531_v33  ;;  %v2755_v42 = vpop.f32.mrf.mxu0  ;;  %v2730_v43 = vadd.f32 %v2729_v32, %v2717_v41 }
 0x223   :  { %v2768_v31 = vpop.f32.mrf.mxu1  ;;  %3424 = vmatpush.bf16.msra.mxu3 %v7571_v54  ;;  %v2756_v11 = vadd.f32 %v2755_v42, %v909_v6  ;;  %v9302_v54 = vld [vmem:[#allocation8 + $0x2b4] sm:$0xf0] }
 0x224   :  { %v2742_v27 = vpop.f32.mrf.mxu3  ;;  %v9278_v6 = vld [vmem:[#allocation8 + $0x1f4] sm:$0xf0] }
 0x225   :  { %3441 = vmatmul.bf16.vlgmr.msrb.gmra.mxu0 %v12166_v61  ;;  %v2743_v49 = vadd.f32 %v2742_v27, %v2730_v43  ;;  %v2769_v15 = vadd.f32 %v2768_v31, %v2756_v11  ;;  %v8615_v31 = vor.u32 %v9452_v38, %v8614_v37  ;;  %v7919_v10 = vor.u32 %v9278_v6, %v7918_v12  ;;  %v7894_v11 = vld [vmem:[#allocation8 + $0x1b0] sm:$0xf]  ;;  %v9464_v6 = vld [vmem:[#allocation8 + $0x7c4] sm:$0xf0] }
 0x226   :  { %3453 = vmatpush.bf16.msrb.mxu1 %v7507_v22  ;;  %v7678_v22 = vld [vmem:[#allocation8] sm:$0xf]  ;;  %v7871_v37 = vor.u32 %v9266_v24, %v7870_v34  ;;  %v8662_v12 = vld [vmem:[#allocation8 + $0x7b0] sm:$0xf]  ;;  %v7824_v34 = vld [vmem:[#allocation8 + $0x138] sm:$0xf0] }
 0x227   :  { %9537 = vtanh.f32 %v2743_v49  ;;  %3425 = vmatpush.bf16.msra.mxu3 %v7547_v16  ;;  %v7679_v42 = vor.u32 %v9218_v35, %v7678_v22  ;;  %v9446_v49 = vld [vmem:[#allocation8 + $0x734] sm:$0xf0]  ;;  %v7990_v16 = vld [vmem:[#allocation8 + $0x270] sm:$0xf]  ;;  %v9344_v35 = vld [vmem:[#allocation8 + $0x404] sm:$0xf0] }
 0x228   :  { %v8591_v51 = vor.u32 %v9446_v49, %v8590_v46  ;;  %v8182_v22 = vld [vmem:[#allocation8 + $0x3f0] sm:$0xf]  ;;  %v9332_v49 = vld [vmem:[#allocation8 + $0x3a4] sm:$0xf0]  ;;  %v8184_v24 = vld [vmem:[#allocation8 + $0x408] sm:$0xf0] }
 0x229   :  { %3454 = vmatmul.bf16.vlgmr.msrb.gmra.mxu1 %v12166_v61  ;;  %v2731_v20 = vpop.f32.mrf.mxu2  ;;  %v8134_v46 = vld [vmem:[#allocation8 + $0x390] sm:$0xf] }
 0x22a   :  { %v2757_v18 = vpop.f32.mrf.mxu0  ;;  %v8015_v20 = vor.u32 %v9302_v54, %v8014_v52  ;;  %v8734_v52 = vld [vmem:[#allocation8 + $0x840] sm:$0xf]  ;;  %v9482_v54 = vld [vmem:[#allocation8 + $0x854] sm:$0xf0] }
 0x22b   :  { %v2770_v56 = vpop.f32.mrf.mxu1  ;;  %3426 = vmatpush.bf16.msra.mxu3 %v7523_v63  ;;  %v8567_v18 = vor.u32 %v9440_v21, %v8566_v7  ;;  %v8519_v63 = vor.u32 %v9428_v26, %v8518_v62  ;;  %v8110_v7 = vld [vmem:[#allocation8 + $0x360] sm:$0xf]  ;;  %v9326_v21 = vld [vmem:[#allocation8 + $0x374] sm:$0xf0]  ;;  %v9353_v26 = vld [vmem:[#allocation8 + $0x454] sm:$0xf] }
 0x22c   :  { %v2744_v48 = vpop.f32.mrf.mxu3  ;;  %v8542_v56 = vld [vmem:[#allocation8 + $0x6c0] sm:$0xf]  ;;  %v9470_v62 = vld [vmem:[#allocation8 + $0x7f4] sm:$0xf0] }
 0x22d   :  { %v9538_v59 = vpop.eup %9537  ;;  %v9296_v48 = vld [vmem:[#allocation8 + $0x284] sm:$0xf0] }
 0x22e   :  { %3026 = vmatmul.f32.vlgmr.msrb.gmra.mxu2 %v9538_v59  ;;  %v7991_v30 = vor.u32 %v9296_v48, %v7990_v16  ;;  %v7966_v59 = vld [vmem:[#allocation8 + $0x240] sm:$0xf]  ;;  %v9476_v48 = vld [vmem:[#allocation8 + $0x824] sm:$0xf0] }
 0x22f   :  { %5207 = vmatpush.bf16.msrb.mxu2 %v7847_v57  ;;  %3427 = vmatpush.bf16.msra.mxu3 %v7499_v3  ;;  %v9434_v57 = vld [vmem:[#allocation8 + $0x6d4] sm:$0xf0] }
 0x230   :  { %v8543_v58 = vor.u32 %v9434_v57, %v8542_v56  ;;  %v9422_v3 = vld [vmem:[#allocation8 + $0x674] sm:$0xf0]  ;;  %v8086_v56 = vld [vmem:[#allocation8 + $0x330] sm:$0xf]  ;;  %v9320_v57 = vld [vmem:[#allocation8 + $0x344] sm:$0xf0] }
 0x231   :  { %v8495_v5 = vor.u32 %v9422_v3, %v8494_v1 }
 0x233   :  { %5208 = vmatpush.bf16.msrb.mxu2 %v7823_v60  ;;  %v9290_v60 = vld [vmem:[#allocation8 + $0x254] sm:$0xf0] }
 0x234   :  { %v7967_v29 = vor.u32 %v9290_v60, %v7966_v59  ;;  %v8686_v60 = vld [vmem:[#allocation8 + $0x7e0] sm:$0xf] }
 0x236   :  { %3415 = vmatmul.bf16.vlgmr.msra.gmra.mxu2 %v12166_v61 }
 0x237   :  { %5209 = vmatpush.bf16.msrb.mxu2 %v7799_v4  ;;  %v7943_v4 = vor.u32 %v9284_v0, %v7942_v55  ;;  %v9314_v55 = vld [vmem:[#allocation8 + $0x314] sm:$0xf0]  ;;  %v8687_v0 = vor.u32 %v9470_v62, %v8686_v60  ;;  %v9233_v62 = vld [vmem:[#allocation8 + $0x94] sm:$0xf] }
 0x238   :  { %v9386_v60 = vld [vmem:[#allocation8 + $0x554] sm:$0xf0] }
 0x23b   :  { %5210 = vmatpush.bf16.msrb.mxu2 %v7775_v19  ;;  %v8470_v19 = vld [vmem:[#allocation8 + $0x630] sm:$0xf] }
 0x23f   :  { %5211 = vmatpush.bf16.msrb.mxu2 %v7751_v45  ;;  %v9272_v45 = vld [vmem:[#allocation8 + $0x1c4] sm:$0xf0] }
 0x241   :  { %v2781_v14 = vpop.f32.mrf.mxu2 }
 0x242   :  { %v2807_v23 = vpop.f32.mrf.mxu0  ;;  %v2782_v2 = vadd.f32 %v2781_v14, %v2769_v15  ;;  %v8230_v15 = vld [vmem:[#allocation8 + $0x450] sm:$0xf]  ;;  %v9356_v14 = vld [vmem:[#allocation8 + $0x464] sm:$0xf0] }
 0x243   :  { %5212 = vmatpush.bf16.msrb.mxu2 %v7727_v28  ;;  %v8206_v28 = vld [vmem:[#allocation8 + $0x420] sm:$0xf] }
 0x244   :  { %v2794_v33 = vpop.f32.mrf.mxu3  ;;  %v2820_v36 = vpop.f32.mrf.mxu1 }
 0x245   :  { %v2795_v9 = vadd.f32 %v2794_v33, %v2782_v2  ;;  %v9350_v2 = vld [vmem:[#allocation8 + $0x434] sm:$0xf0]  ;;  %v7895_v33 = vor.u32 %v9272_v45, %v7894_v11  ;;  %v9341_v45 = vld [vmem:[#allocation8 + $0x3f4] sm:$0xf] }
 0x247   :  { %v2808_v17 = vadd.f32 %v2807_v23, %v2795_v9  ;;  %5213 = vmatpush.bf16.msrb.mxu2 %v7703_v39  ;;  %v8231_v23 = vor.u32 %v9356_v14, %v8230_v15  ;;  %v8207_v9 = vor.u32 %v9350_v2, %v8206_v28  ;;  %v8806_v39 = vld [vmem:[#allocation8 + $0x8d0] sm:$0xf]  ;;  %v9404_v15 = vld [vmem:[#allocation8 + $0x5e4] sm:$0xf0]  ;;  %v9251_v14 = vld [vmem:[#allocation8 + $0x124] sm:$0xf] }
 0x248   :  { %v8638_v2 = vld [vmem:[#allocation8 + $0x780] sm:$0xf] }
 0x249   :  { %v2821_v40 = vadd.f32 %v2820_v36, %v2808_v17  ;;  %v2783_v41 = vpop.f32.mrf.mxu2  ;;  %v8447_v36 = vor.u32 %v9410_v13, %v8446_v53  ;;  %5233 = vmatpush.bf16.msra.mxu0 %v8231_v23  ;;  %v9500_v17 = vld [vmem:[#allocation8 + $0x8e4] sm:$0xf0]  ;;  %v8663_v53 = vor.u32 %v9464_v6, %v8662_v12  ;;  %v8422_v13 = vld [vmem:[#allocation8 + $0x5d0] sm:$0xf]  ;;  %v9317_v12 = vld [vmem:[#allocation8 + $0x334] sm:$0xf] }
 0x24a   :  { %v2809_v32 = vpop.f32.mrf.mxu0  ;;  %v8807_v38 = vor.u32 %v9500_v17, %v8806_v39  ;;  %v8782_v41 = vld [vmem:[#allocation8 + $0x8a0] sm:$0xf]  ;;  %v7827_v39 = vor.u32 %v9251_v14, %v7824_v34  ;;  %v9401_v17 = vld [vmem:[#allocation8 + $0x5d4] sm:$0xf]  ;;  %v8088_v6 = vld [vmem:[#allocation8 + $0x348] sm:$0xf0] }
 0x24b   :  { %9539 = vtanh.f32 %v2821_v40  ;;  %5214 = vmatpush.bf16.msrb.mxu2 %v7679_v42  ;;  %v8183_v40 = vor.u32 %v9344_v35, %v8182_v22  ;;  %v9494_v32 = vld [vmem:[#allocation8 + $0x8b4] sm:$0xf0]  ;;  %v8158_v42 = vld [vmem:[#allocation8 + $0x3c0] sm:$0xf]  ;;  %v8424_v22 = vld [vmem:[#allocation8 + $0x5e8] sm:$0xf0]  ;;  %v8091_v34 = vor.u32 %v9317_v12, %v8088_v6 }
 0x24c   :  { %v2796_v43 = vpop.f32.mrf.mxu3  ;;  %v2822_v27 = vpop.f32.mrf.mxu1  ;;  %v8398_v35 = vld [vmem:[#allocation8 + $0x5a0] sm:$0xf]  ;;  %v8328_v14 = vld [vmem:[#allocation8 + $0x528] sm:$0xf0] }
 0x24d   :  { %5234 = vmatpush.bf16.msra.mxu0 %v8207_v9  ;;  %v9338_v43 = vld [vmem:[#allocation8 + $0x3d4] sm:$0xf0]  ;;  %v8783_v27 = vor.u32 %v9494_v32, %v8782_v41  ;;  %v7800_v32 = vld [vmem:[#allocation8 + $0x108] sm:$0xf0] }
 0x24f   :  { %5259 = vmatpush.bf16.msra.mxu2 %v8615_v31  ;;  %v8159_v31 = vor.u32 %v9338_v43, %v8158_v42  ;;  %v8187_v42 = vor.u32 %v9341_v45, %v8184_v24  ;;  %v9335_v43 = vld [vmem:[#allocation8 + $0x3c4] sm:$0xf] }
 0x250   :  { %v9227_v45 = vld [vmem:[#allocation8 + $0x64] sm:$0xf] }
 0x251   :  { %v9540_v25 = vpop.eup %9539  ;;  %5235 = vmatpush.bf16.msra.mxu0 %v8183_v40  ;;  %v9311_v24 = vld [vmem:[#allocation8 + $0x304] sm:$0xf] }
 0x252   :  { %3046 = vmatmul.f32.vlgmr.msrb.gmra.mxu3 %v9540_v25  ;;  %v8735_v25 = vor.u32 %v9482_v54, %v8734_v52  ;;  %v9239_v52 = vld [vmem:[#allocation8 + $0xc4] sm:$0xf] }
 0x253   :  { %5220 = vmatpush.bf16.msrb.mxu3 %v8039_v50  ;;  %5260 = vmatpush.bf16.msra.mxu2 %v8591_v51  ;;  %v8759_v50 = vor.u32 %v9488_v47, %v8758_v44  ;;  %v8135_v51 = vor.u32 %v9332_v49, %v8134_v46  ;;  %v8160_v44 = vld [vmem:[#allocation8 + $0x3d8] sm:$0xf0]  ;;  %v9395_v46 = vld [vmem:[#allocation8 + $0x5a4] sm:$0xf] }
 0x254   :  { %v8400_v49 = vld [vmem:[#allocation8 + $0x5b8] sm:$0xf0] }
 0x255   :  { %5236 = vmatpush.bf16.msra.mxu0 %v8159_v31  ;;  %v8427_v31 = vor.u32 %v9401_v17, %v8424_v22  ;;  %v8064_v22 = vld [vmem:[#allocation8 + $0x318] sm:$0xf0] }
 0x257   :  { %5221 = vmatpush.bf16.msrb.mxu3 %v8015_v20  ;;  %5261 = vmatpush.bf16.msra.mxu2 %v8567_v18  ;;  %v8111_v20 = vor.u32 %v9326_v21, %v8110_v7  ;;  %v8710_v18 = vld [vmem:[#allocation8 + $0x810] sm:$0xf]  ;;  %v7776_v7 = vld [vmem:[#allocation8 + $0xd8] sm:$0xf0]  ;;  %v8163_v21 = vor.u32 %v9335_v43, %v8160_v44 }
 0x258   :  { %v8278_v43 = vld [vmem:[#allocation8 + $0x4b0] sm:$0xf] }
 0x259   :  { %5237 = vmatpush.bf16.msra.mxu0 %v8135_v51  ;;  %v9392_v51 = vld [vmem:[#allocation8 + $0x584] sm:$0xf0] }
 0x25a   :  { %3428 = vmatmul.bf16.vlgmr.msra.gmra.mxu3 %v12166_v61  ;;  %v8471_v61 = vor.u32 %v9416_v8, %v8470_v19  ;;  %v8208_v8 = vld [vmem:[#allocation8 + $0x438] sm:$0xf0] }
 0x25b   :  { %5222 = vmatpush.bf16.msrb.mxu3 %v7991_v30  ;;  %5262 = vmatpush.bf16.msra.mxu2 %v8543_v58  ;;  %v8711_v30 = vor.u32 %v9476_v48, %v8710_v18  ;;  %v8087_v58 = vor.u32 %v9320_v57, %v8086_v56  ;;  %v8136_v48 = vld [vmem:[#allocation8 + $0x3a8] sm:$0xf0]  ;;  %v7779_v56 = vor.u32 %v9239_v52, %v7776_v7  ;;  %v9389_v57 = vld [vmem:[#allocation8 + $0x574] sm:$0xf]  ;;  %v7830_v7 = vld [vmem:[#allocation8 + $0x128] sm:$0xf] }
 0x25d   :  { %5238 = vmatpush.bf16.msra.mxu0 %v8111_v20  ;;  %v8403_v20 = vor.u32 %v9395_v46, %v8400_v49  ;;  %v7680_v46 = vld [vmem:[#allocation8 + $0x18] sm:$0xf0]  ;;  %v9365_v49 = vld [vmem:[#allocation8 + $0x4b4] sm:$0xf] }
 0x25f   :  { %5223 = vmatpush.bf16.msrb.mxu3 %v7967_v29  ;;  %5263 = vmatpush.bf16.msra.mxu2 %v8519_v63  ;;  %v8232_v29 = vld [vmem:[#allocation8 + $0x468] sm:$0xf0]  ;;  %v8062_v63 = vld [vmem:[#allocation8 + $0x300] sm:$0xf] }
 0x260   :  { %v8235_v3 = vor.u32 %v9353_v26, %v8232_v29  ;;  %v7752_v29 = vld [vmem:[#allocation8 + $0xa8] sm:$0xf0] }
 0x261   :  { %5239 = vmatpush.bf16.msra.mxu0 %v8087_v58  ;;  %v8350_v58 = vld [vmem:[#allocation8 + $0x540] sm:$0xf] }
 0x262   :  { %v12224_v16 = vpop.f32.mrf.mxu0  ;;  %v8351_v26 = vor.u32 %v9386_v60, %v8350_v58  ;;  %v8040_v58 = vld [vmem:[#allocation8 + $0x2e8] sm:$0xf0] }
 0x263   :  { %5224 = vmatpush.bf16.msrb.mxu3 %v7943_v4  ;;  %5264 = vmatpush.bf16.msra.mxu2 %v8495_v5  ;;  %v9347_v4 = vld [vmem:[#allocation8 + $0x424] sm:$0xf]  ;;  %v8063_v5 = vor.u32 %v9314_v55, %v8062_v63 }
 0x264   :  { %v8211_v23 = vor.u32 %v9347_v4, %v8208_v8  ;;  %v9323_v55 = vld [vmem:[#allocation8 + $0x364] sm:$0xf] }
 0x265   :  { %5240 = vmatpush.bf16.msra.mxu0 %v8063_v5  ;;  %v9383_v4 = vld [vmem:[#allocation8 + $0x544] sm:$0xf]  ;;  %v8352_v5 = vld [vmem:[#allocation8 + $0x558] sm:$0xf0] }
 0x267   :  { %5225 = vmatpush.bf16.msrb.mxu3 %v7919_v10  ;;  %5265 = vmatpush.bf16.msra.mxu2 %v8471_v61  ;;  %v9257_v10 = vld [vmem:[#allocation8 + $0x154] sm:$0xf]  ;;  %v7848_v61 = vld [vmem:[#allocation8 + $0x168] sm:$0xf0] }
 0x268   :  { %v7851_v11 = vor.u32 %v9257_v10, %v7848_v61  ;;  %v8355_v10 = vor.u32 %v9383_v4, %v8352_v5  ;;  %v8326_v61 = vld [vmem:[#allocation8 + $0x510] sm:$0xf]  ;;  %v9299_v4 = vld [vmem:[#allocation8 + $0x2a4] sm:$0xf]  ;;  %v8016_v5 = vld [vmem:[#allocation8 + $0x2b8] sm:$0xf0] }
 0x269   :  { %v8019_v6 = vor.u32 %v9299_v4, %v8016_v5  ;;  %v7902_v4 = vld [vmem:[#allocation8 + $0x1b8] sm:$0xf]  ;;  %v9273_v5 = vld [vmem:[#allocation8 + $0x1cc] sm:$0xf0] }
 0x26a   :  { %5285 = vmatpush.bf16.msrb.mxu0 %v7851_v11  ;;  %v9380_v11 = vld [vmem:[#allocation8 + $0x524] sm:$0xf0] }
 0x26b   :  { %5226 = vmatpush.bf16.msrb.mxu3 %v7895_v33  ;;  %5266 = vmatpush.bf16.msra.mxu2 %v8447_v36  ;;  %v9458_v33 = vld [vmem:[#allocation8 + $0x794] sm:$0xf0]  ;;  %v8423_v36 = vor.u32 %v9404_v15, %v8422_v13  ;;  %v7728_v13 = vld [vmem:[#allocation8 + $0x78] sm:$0xf0]  ;;  %v9377_v15 = vld [vmem:[#allocation8 + $0x514] sm:$0xf] }
 0x26c   :  { %v8639_v40 = vor.u32 %v9458_v33, %v8638_v2  ;;  %v9374_v2 = vld [vmem:[#allocation8 + $0x4f4] sm:$0xf0]  ;;  %v9221_v33 = vld [vmem:[#allocation8 + $0x34] sm:$0xf] }
 0x26d   :  { %5246 = vmatpush.bf16.msra.mxu1 %v8423_v36  ;;  %v7704_v36 = vld [vmem:[#allocation8 + $0x48] sm:$0xf0] }
 0x26e   :  { %5286 = vmatpush.bf16.msrb.mxu0 %v7827_v39  ;;  %v8331_v39 = vor.u32 %v9377_v15, %v8328_v14  ;;  %v7992_v15 = vld [vmem:[#allocation8 + $0x288] sm:$0xf0] }
 0x26f   :  { %5227 = vmatpush.bf16.msrb.mxu3 %v7871_v37  ;;  %v9398_v37 = vld [vmem:[#allocation8 + $0x5b4] sm:$0xf0] }
 0x270   :  { %v12226_v59 = vpop.f32.mrf.mxu1  ;;  %v8399_v41 = vor.u32 %v9398_v37, %v8398_v35  ;;  %v7707_v35 = vor.u32 %v9221_v33, %v7704_v36  ;;  %v9371_v37 = vld [vmem:[#allocation8 + $0x4e4] sm:$0xf]  ;;  %v9297_v33 = vld [vmem:[#allocation8 + $0x28c] sm:$0xf0] }
 0x272   :  { %5247 = vmatpush.bf16.msra.mxu1 %v8399_v41  ;;  %v9261_v41 = vld [vmem:[#allocation8 + $0x16c] sm:$0xf0] }
 0x273   :  { %5272 = vmatpush.bf16.msra.mxu3 %v8807_v38  ;;  %v9245_v38 = vld [vmem:[#allocation8 + $0xf4] sm:$0xf] }
 0x274   :  { %v7803_v47 = vor.u32 %v9245_v38, %v7800_v32  ;;  %v8304_v38 = vld [vmem:[#allocation8 + $0x4f8] sm:$0xf0]  ;;  %v8067_v32 = vor.u32 %v9311_v24, %v8064_v22  ;;  %v7758_v24 = vld [vmem:[#allocation8 + $0x98] sm:$0xf] }
 0x276   :  { %5287 = vmatpush.bf16.msrb.mxu0 %v7803_v47 }
 0x277   :  { %5273 = vmatpush.bf16.msra.mxu3 %v8783_v27 }
 0x27a   :  { %5288 = vmatpush.bf16.msrb.mxu0 %v7779_v56 }
 0x27b   :  { %5274 = vmatpush.bf16.msra.mxu3 %v8759_v50  ;;  %v8374_v50 = vld [vmem:[#allocation8 + $0x570] sm:$0xf] }
 0x27c   :  { %v8375_v54 = vor.u32 %v9392_v51, %v8374_v50  ;;  %v8280_v50 = vld [vmem:[#allocation8 + $0x4c8] sm:$0xf0] }
 0x27e   :  { %5248 = vmatpush.bf16.msra.mxu1 %v8375_v54 }
 0x27f   :  { %5275 = vmatpush.bf16.msra.mxu3 %v8735_v25  ;;  %v9329_v25 = vld [vmem:[#allocation8 + $0x394] sm:$0xf] }
 0x280   :  { %v8139_v63 = vor.u32 %v9329_v25, %v8136_v48  ;;  %v8283_v25 = vor.u32 %v9365_v49, %v8280_v50  ;;  %v9359_v48 = vld [vmem:[#allocation8 + $0x484] sm:$0xf]  ;;  %v9285_v49 = vld [vmem:[#allocation8 + $0x22c] sm:$0xf0] }
 0x282   :  { %v3390_v1 = vpop.f32.mrf.mxu0  ;;  %5249 = vmatpush.bf16.msra.mxu1 %v8351_v26 }
 0x283   :  { %5276 = vmatpush.bf16.msra.mxu3 %v8711_v30  ;;  %v12228_v19 = vpack.c.bf16 %v3390_v1, %v3390_v1  ;;  %v8376_v30 = vld [vmem:[#allocation8 + $0x588] sm:$0xf0]  ;;  %v8112_v1 = vld [vmem:[#allocation8 + $0x378] sm:$0xf0] }
 0x284   :  { %v8115_v8 = vor.u32 %v9323_v55, %v8112_v1  ;;  %v9249_v55 = vld [vmem:[#allocation8 + $0x10c] sm:$0xf0] }
 0x285   :  { %5215 = vmatmul.bf16.vlgmr.msrb.gmra.mxu2 %v12228_v19  ;;  %v9309_v1 = vld [vmem:[#allocation8 + $0x2ec] sm:$0xf0] }
 0x286   :  { %5311 = vmatpush.bf16.msrb.mxu2 %v8235_v3  ;;  %v3403_v28 = vpop.f32.mrf.mxu1  ;;  %v7755_v3 = vor.u32 %v9233_v62, %v7752_v29  ;;  %v8046_v29 = vld [vmem:[#allocation8 + $0x2d8] sm:$0xf] }
 0x287   :  { %5277 = vmatpush.bf16.msra.mxu3 %v8687_v0  ;;  %v12231_v9 = vpack.c.bf16 %v3403_v28, %v3403_v28  ;;  %v8379_v0 = vor.u32 %v9389_v57, %v8376_v30  ;;  %v8302_v28 = vld [vmem:[#allocation8 + $0x4e0] sm:$0xf]  ;;  %v8256_v57 = vld [vmem:[#allocation8 + $0x498] sm:$0xf0]  ;;  %v9305_v30 = vld [vmem:[#allocation8 + $0x2d4] sm:$0xf]  ;;  %v8047_v12 = vor.u32 %v9309_v1, %v8046_v29 }
 0x288   :  { %5289 = vmatpush.bf16.msrb.mxu0 %v7755_v3  ;;  %v8303_v17 = vor.u32 %v9374_v2, %v8302_v28  ;;  %v8043_v26 = vor.u32 %v9305_v30, %v8040_v58  ;;  %v8259_v3 = vor.u32 %v9359_v48, %v8256_v57  ;;  %v7998_v2 = vld [vmem:[#allocation8 + $0x278] sm:$0xf]  ;;  %v7926_v48 = vld [vmem:[#allocation8 + $0x1e8] sm:$0xf]  ;;  %v9219_v30 = vld [vmem:[#allocation8 + $0x1c] sm:$0xf0] }
 0x289   :  { %5228 = vmatmul.bf16.vlgmr.msrb.gmra.mxu3 %v12231_v9  ;;  %v7686_v57 = vld [vmem:[#allocation8 + $0x8] sm:$0xf]  ;;  %v9449_v58 = vld [vmem:[#allocation8 + $0x754] sm:$0xf]  ;;  %v8622_v29 = vld [vmem:[#allocation8 + $0x758] sm:$0xf] }
 0x28a   :  { %5312 = vmatpush.bf16.msrb.mxu2 %v8211_v23  ;;  %v3392_v27 = vpop.f32.mrf.mxu0  ;;  %v7731_v23 = vor.u32 %v9227_v45, %v7728_v13  ;;  %v7782_v45 = vld [vmem:[#allocation8 + $0xc8] sm:$0xf]  ;;  %v9293_v13 = vld [vmem:[#allocation8 + $0x274] sm:$0xf] }
 0x28b   :  { %5278 = vmatpush.bf16.msra.mxu3 %v8663_v53  ;;  %v8327_v53 = vor.u32 %v9380_v11, %v8326_v61  ;;  %v9368_v27 = vld [vmem:[#allocation8 + $0x4c4] sm:$0xf0]  ;;  %v9303_v11 = vld [vmem:[#allocation8 + $0x2bc] sm:$0xf0] }
 0x28c   :  { %5290 = vmatpush.bf16.msrb.mxu0 %v7731_v23  ;;  %v8279_v47 = vor.u32 %v9368_v27, %v8278_v43  ;;  %v8022_v61 = vld [vmem:[#allocation8 + $0x2a8] sm:$0xf]  ;;  %v7995_v23 = vor.u32 %v9293_v13, %v7992_v15  ;;  %v9281_v43 = vld [vmem:[#allocation8 + $0x214] sm:$0xf]  ;;  %v7903_v13 = vor.u32 %v9273_v5, %v7902_v4  ;;  %v9263_v15 = vld [vmem:[#allocation8 + $0x184] sm:$0xf] }
 0x28d   :  { %5250 = vmatpush.bf16.msra.mxu1 %v8327_v53  ;;  %v9243_v53 = vld [vmem:[#allocation8 + $0xdc] sm:$0xf0]  ;;  %v8023_v14 = vor.u32 %v9303_v11, %v8022_v61  ;;  %v9443_v61 = vld [vmem:[#allocation8 + $0x724] sm:$0xf]  ;;  %v8592_v11 = vld [vmem:[#allocation8 + $0x738] sm:$0xf0] }
 0x28e   :  { %5313 = vmatpush.bf16.msrb.mxu2 %v8187_v42  ;;  %v3405_v18 = vpop.f32.mrf.mxu1  ;;  %v8307_v42 = vor.u32 %v9371_v37, %v8304_v38  ;;  %v7783_v28 = vor.u32 %v9243_v53, %v7782_v45  ;;  %v9287_v37 = vld [vmem:[#allocation8 + $0x244] sm:$0xf]  ;;  %v7968_v38 = vld [vmem:[#allocation8 + $0x258] sm:$0xf0]  ;;  %v8598_v45 = vld [vmem:[#allocation8 + $0x728] sm:$0xf] }
 0x28f   :  { %5279 = vmatpush.bf16.msra.mxu3 %v8639_v40  ;;  %v7854_v40 = vld [vmem:[#allocation8 + $0x158] sm:$0xf]  ;;  %v9447_v53 = vld [vmem:[#allocation8 + $0x73c] sm:$0xf0]  ;;  %v9357_v5 = vld [vmem:[#allocation8 + $0x46c] sm:$0xf0] }
 0x290   :  { %5291 = vmatpush.bf16.msrb.mxu0 %v7707_v35  ;;  %v7855_v52 = vor.u32 %v9261_v41, %v7854_v40  ;;  %v9362_v18 = vld [vmem:[#allocation8 + $0x494] sm:$0xf0]  ;;  %v7734_v35 = vld [vmem:[#allocation8 + $0x68] sm:$0xf]  ;;  %v9231_v40 = vld [vmem:[#allocation8 + $0x7c] sm:$0xf0]  ;;  %v7971_v41 = vor.u32 %v9287_v37, %v7968_v38 }
 0x291   :  { %5251 = vmatpush.bf16.msra.mxu1 %v8303_v17  ;;  %v7999_v17 = vor.u32 %v9297_v33, %v7998_v2  ;;  %v9267_v2 = vld [vmem:[#allocation8 + $0x19c] sm:$0xf0]  ;;  %v8595_v33 = vor.u32 %v9443_v61, %v8592_v11  ;;  %v8238_v4 = vld [vmem:[#allocation8 + $0x458] sm:$0xf] }
 0x292   :  { %5314 = vmatpush.bf16.msrb.mxu2 %v8163_v21  ;;  %v9255_v21 = vld [vmem:[#allocation8 + $0x13c] sm:$0xf0]  ;;  %v8239_v11 = vor.u32 %v9357_v5, %v8238_v4  ;;  %v9330_v4 = vld [vmem:[#allocation8 + $0x39c] sm:$0xf]  ;;  %v8144_v5 = vld [vmem:[#allocation8 + $0x3b0] sm:$0xf0] }
 0x293   :  { %5324 = vmatpush.bf16.msrb.mxu3 %v8427_v31  ;;  %v9215_v31 = vld [vmem:[#allocation8 + $0x4] sm:$0xf]  ;;  %v7831_v60 = vor.u32 %v9255_v21, %v7830_v7 }
 0x294   :  { %v7683_v54 = vor.u32 %v9215_v31, %v7680_v46  ;;  %v7944_v31 = vld [vmem:[#allocation8 + $0x228] sm:$0xf0]  ;;  %v7950_v46 = vld [vmem:[#allocation8 + $0x218] sm:$0xf]  ;;  %v9275_v21 = vld [vmem:[#allocation8 + $0x1e4] sm:$0xf] }
 0x295   :  { %5252 = vmatpush.bf16.msra.mxu1 %v8279_v47  ;;  %v7947_v47 = vor.u32 %v9281_v43, %v7944_v31  ;;  %v7951_v7 = vor.u32 %v9285_v49, %v7950_v46  ;;  %v9435_v43 = vld [vmem:[#allocation8 + $0x6dc] sm:$0xf0]  ;;  %v8526_v46 = vld [vmem:[#allocation8 + $0x698] sm:$0xf]  ;;  %v9429_v49 = vld [vmem:[#allocation8 + $0x6ac] sm:$0xf0] }
 0x296   :  { %5315 = vmatpush.bf16.msrb.mxu2 %v8139_v63  ;;  %5292 = vmatpush.bf16.msrb.mxu0 %v7683_v54  ;;  %v7806_v63 = vld [vmem:[#allocation8 + $0xf8] sm:$0xf]  ;;  %v9225_v54 = vld [vmem:[#allocation8 + $0x4c] sm:$0xf0] }
 0x297   :  { %5325 = vmatpush.bf16.msrb.mxu3 %v8403_v20  ;;  %v8254_v20 = vld [vmem:[#allocation8 + $0x480] sm:$0xf] }
 0x298   :  { %v8255_v56 = vor.u32 %v9362_v18, %v8254_v20 }
 0x29a   :  { %5316 = vmatpush.bf16.msrb.mxu2 %v8115_v8  ;;  %5253 = vmatpush.bf16.msra.mxu1 %v8255_v56  ;;  %v9279_v56 = vld [vmem:[#allocation8 + $0x1fc] sm:$0xf0] }
 0x29b   :  { %5326 = vmatpush.bf16.msrb.mxu3 %v8379_v0 }
 0x29e   :  { %5317 = vmatpush.bf16.msrb.mxu2 %v8091_v34  ;;  %5298 = vmatpush.bf16.msrb.mxu1 %v8043_v26  ;;  %v12240_v34 = vpop.f32.mrf.mxu2  ;;  %v7896_v26 = vld [vmem:[#allocation8 + $0x1c8] sm:$0xf0] }
 0x29f   :  { %5327 = vmatpush.bf16.msrb.mxu3 %v8355_v10  ;;  %v7807_v10 = vor.u32 %v9249_v55, %v7806_v63  ;;  %v9453_v63 = vld [vmem:[#allocation8 + $0x76c] sm:$0xf0]  ;;  %v7927_v55 = vor.u32 %v9279_v56, %v7926_v48 }
 0x2a2   :  { %v3442_v44 = vpop.f32.mrf.mxu0  ;;  %5318 = vmatpush.bf16.msrb.mxu2 %v8067_v32  ;;  %5299 = vmatpush.bf16.msrb.mxu1 %v8019_v6  ;;  %v7974_v32 = vld [vmem:[#allocation8 + $0x248] sm:$0xf] }
 0x2a3   :  { %5328 = vmatpush.bf16.msrb.mxu3 %v8331_v39  ;;  %v12234_v51 = vpack.c.bf16 %v3442_v44, %v3442_v44  ;;  %v9237_v39 = vld [vmem:[#allocation8 + $0xac] sm:$0xf0]  ;;  %v7735_v44 = vor.u32 %v9231_v40, %v7734_v35 }
 0x2a4   :  { %v7759_v22 = vor.u32 %v9237_v39, %v7758_v24  ;;  %v9437_v24 = vld [vmem:[#allocation8 + $0x6f4] sm:$0xf]  ;;  %v8568_v39 = vld [vmem:[#allocation8 + $0x708] sm:$0xf0] }
 0x2a5   :  { %5267 = vmatmul.bf16.vlgmr.msra.gmra.mxu2 %v12234_v51  ;;  %v8571_v37 = vor.u32 %v9437_v24, %v8568_v39 }
 0x2a6   :  { %5363 = vmatpush.bf16.msra.mxu2 %v7855_v52  ;;  %v3455_v62 = vpop.f32.mrf.mxu1  ;;  %5300 = vmatpush.bf16.msrb.mxu1 %v7995_v23  ;;  %v7710_v52 = vld [vmem:[#allocation8 + $0x38] sm:$0xf] }
 0x2a7   :  { %5329 = vmatpush.bf16.msrb.mxu3 %v8307_v42  ;;  %v12237_v0 = vpack.c.bf16 %v3455_v62, %v3455_v62  ;;  %v9291_v42 = vld [vmem:[#allocation8 + $0x25c] sm:$0xf0]  ;;  %v7711_v20 = vor.u32 %v9225_v54, %v7710_v52  ;;  %v9269_v62 = vld [vmem:[#allocation8 + $0x1b4] sm:$0xf]  ;;  %v12248_v54 = vpop.f32.mrf.mxu3 }
 0x2a8   :  { %v7975_v27 = vor.u32 %v9291_v42, %v7974_v32  ;;  %v7899_v1 = vor.u32 %v9269_v62, %v7896_v26  ;;  %v8544_v32 = vld [vmem:[#allocation8 + $0x6d8] sm:$0xf0]  ;;  %v8550_v42 = vld [vmem:[#allocation8 + $0x6c8] sm:$0xf] }
 0x2a9   :  { %5280 = vmatmul.bf16.vlgmr.msra.gmra.mxu3 %v12237_v0  ;;  %v8551_v31 = vor.u32 %v9435_v43, %v8550_v42  ;;  %v9495_v42 = vld [vmem:[#allocation8 + $0x8bc] sm:$0xf0]  ;;  %v9342_v43 = vld [vmem:[#allocation8 + $0x3fc] sm:$0xf] }
 0x2aa   :  { %v3444_v8 = vpop.f32.mrf.mxu0  ;;  %5364 = vmatpush.bf16.msra.mxu2 %v7831_v60  ;;  %5301 = vmatpush.bf16.msrb.mxu1 %v7971_v41  ;;  %v8616_v60 = vld [vmem:[#allocation8 + $0x768] sm:$0xf0]  ;;  %v9431_v41 = vld [vmem:[#allocation8 + $0x6c4] sm:$0xf] }
 0x2ab   :  { %5330 = vmatpush.bf16.msrb.mxu3 %v8283_v25  ;;  %v7920_v25 = vld [vmem:[#allocation8 + $0x1f8] sm:$0xf0]  ;;  %v8619_v6 = vor.u32 %v9449_v58, %v8616_v60  ;;  %v8478_v58 = vld [vmem:[#allocation8 + $0x638] sm:$0xf]  ;;  %v9417_v60 = vld [vmem:[#allocation8 + $0x64c] sm:$0xf0] }
 0x2ac   :  { %v7923_v18 = vor.u32 %v9275_v21, %v7920_v25  ;;  %v9419_v21 = vld [vmem:[#allocation8 + $0x664] sm:$0xf]  ;;  %v8496_v25 = vld [vmem:[#allocation8 + $0x678] sm:$0xf0] }
 0x2ad   :  { %v8499_v48 = vor.u32 %v9419_v21, %v8496_v25  ;;  %v9339_v21 = vld [vmem:[#allocation8 + $0x3dc] sm:$0xf0]  ;;  %v8766_v25 = vld [vmem:[#allocation8 + $0x878] sm:$0xf] }
 0x2ae   :  { %5365 = vmatpush.bf16.msra.mxu2 %v7807_v10  ;;  %v3457_v36 = vpop.f32.mrf.mxu1  ;;  %5302 = vmatpush.bf16.msrb.mxu1 %v7947_v47  ;;  %v8623_v10 = vor.u32 %v9453_v63, %v8622_v29  ;;  %v8520_v47 = vld [vmem:[#allocation8 + $0x6a8] sm:$0xf0]  ;;  %v8479_v29 = vor.u32 %v9417_v60, %v8478_v58  ;;  %v9407_v63 = vld [vmem:[#allocation8 + $0x604] sm:$0xf]  ;;  %v8736_v60 = vld [vmem:[#allocation8 + $0x858] sm:$0xf0] }
 0x2af   :  { %5331 = vmatpush.bf16.msrb.mxu3 %v8259_v3  ;;  %v7687_v3 = vor.u32 %v9219_v30, %v7686_v57  ;;  %v8599_v36 = vor.u32 %v9447_v53, %v8598_v45  ;;  %v9413_v57 = vld [vmem:[#allocation8 + $0x634] sm:$0xf]  ;;  %v8472_v30 = vld [vmem:[#allocation8 + $0x648] sm:$0xf0]  ;;  %v9479_v58 = vld [vmem:[#allocation8 + $0x844] sm:$0xf] }
 0x2b0   :  { %v8475_v62 = vor.u32 %v9413_v57, %v8472_v30  ;;  %v9497_v45 = vld [vmem:[#allocation8 + $0x8d4] sm:$0xf]  ;;  %v8808_v53 = vld [vmem:[#allocation8 + $0x8e8] sm:$0xf0] }
 0x2b1   :  { %v12242_v50 = vpop.f32.mrf.mxu2  ;;  %v8811_v24 = vor.u32 %v9497_v45, %v8808_v53  ;;  %v8147_v45 = vor.u32 %v9330_v4, %v8144_v5  ;;  %v8118_v53 = vld [vmem:[#allocation8 + $0x368] sm:$0xf]  ;;  %v8430_v4 = vld [vmem:[#allocation8 + $0x5d8] sm:$0xf]  ;;  %v9405_v5 = vld [vmem:[#allocation8 + $0x5ec] sm:$0xf0] }
 0x2b2   :  { %5366 = vmatpush.bf16.msra.mxu2 %v7783_v28  ;;  %5303 = vmatpush.bf16.msrb.mxu1 %v7923_v18  ;;  %v7878_v28 = vld [vmem:[#allocation8 + $0x188] sm:$0xf]  ;;  %v9423_v18 = vld [vmem:[#allocation8 + $0x67c] sm:$0xf0] }
 0x2b3   :  { %5376 = vmatpush.bf16.msra.mxu3 %v8047_v12  ;;  %v7879_v35 = vor.u32 %v9267_v2, %v7878_v28  ;;  %v9501_v28 = vld [vmem:[#allocation8 + $0x8ec] sm:$0xf0]  ;;  %v9348_v2 = vld [vmem:[#allocation8 + $0x42c] sm:$0xf] }
 0x2b6   :  { %5367 = vmatpush.bf16.msra.mxu2 %v7759_v22  ;;  %5304 = vmatpush.bf16.msrb.mxu1 %v7899_v1  ;;  %v9441_v22 = vld [vmem:[#allocation8 + $0x70c] sm:$0xf0]  ;;  %v8454_v1 = vld [vmem:[#allocation8 + $0x608] sm:$0xf] }
 0x2b7   :  { %5377 = vmatpush.bf16.msra.mxu3 %v8023_v14  ;;  %v7872_v14 = vld [vmem:[#allocation8 + $0x198] sm:$0xf0] }
 0x2b8   :  { %v7875_v23 = vor.u32 %v9263_v15, %v7872_v14  ;;  %v8214_v15 = vld [vmem:[#allocation8 + $0x428] sm:$0xf]  ;;  %v9351_v14 = vld [vmem:[#allocation8 + $0x43c] sm:$0xf0] }
 0x2b9   :  { %v3416_v12 = vpop.f32.mrf.mxu2  ;;  %v8215_v39 = vor.u32 %v9351_v14, %v8214_v15  ;;  %v8718_v15 = vld [vmem:[#allocation8 + $0x818] sm:$0xf]  ;;  %v9477_v14 = vld [vmem:[#allocation8 + $0x82c] sm:$0xf0] }
 0x2ba   :  { %5368 = vmatpush.bf16.msra.mxu2 %v7735_v44  ;;  %v12244_v8 = vpack.c.bf16 %v3416_v12, %v3416_v12  ;;  %5305 = vmatpush.bf16.msrb.mxu1 %v7875_v23  ;;  %v9425_v44 = vld [vmem:[#allocation8 + $0x694] sm:$0xf]  ;;  %v9354_v12 = vld [vmem:[#allocation8 + $0x45c] sm:$0xf]  ;;  %v8814_v23 = vld [vmem:[#allocation8 + $0x8d8] sm:$0xf] }
 0x2bb   :  { %5378 = vmatpush.bf16.msra.mxu3 %v7999_v17  ;;  %v8574_v17 = vld [vmem:[#allocation8 + $0x6f8] sm:$0xf]  ;;  %v8523_v52 = vor.u32 %v9425_v44, %v8520_v47  ;;  %v9485_v47 = vld [vmem:[#allocation8 + $0x874] sm:$0xf] }
 0x2bc   :  { %5241 = vmatmul.bf16.vlgmr.msra.gmra.mxu0 %v12244_v8  ;;  %5319 = vmatmul.bf16.vlgmr.msrb.gmra.mxu2 %v12244_v8  ;;  %v8575_v40 = vor.u32 %v9441_v22, %v8574_v17  ;;  %v9491_v17 = vld [vmem:[#allocation8 + $0x8a4] sm:$0xf]  ;;  %v8784_v22 = vld [vmem:[#allocation8 + $0x8b8] sm:$0xf0] }
 0x2bd   :  { %5337 = vmatpush.bf16.msra.mxu0 %v8619_v6  ;;  %v8240_v6 = vld [vmem:[#allocation8 + $0x470] sm:$0xf0] }
 0x2be   :  { %5369 = vmatpush.bf16.msra.mxu2 %v7711_v20  ;;  %v8502_v20 = vld [vmem:[#allocation8 + $0x668] sm:$0xf] }
 0x2bf   :  { %5379 = vmatpush.bf16.msra.mxu3 %v7975_v27  ;;  %v8547_v27 = vor.u32 %v9431_v41, %v8544_v32  ;;  %v8503_v56 = vor.u32 %v9423_v18, %v8502_v20  ;;  %v9345_v41 = vld [vmem:[#allocation8 + $0x40c] sm:$0xf0]  ;;  %v8790_v32 = vld [vmem:[#allocation8 + $0x8a8] sm:$0xf]  ;;  %v9336_v18 = vld [vmem:[#allocation8 + $0x3cc] sm:$0xf] }
 0x2c0   :  { %v9489_v20 = vld [vmem:[#allocation8 + $0x88c] sm:$0xf0] }
 0x2c1   :  { %5338 = vmatpush.bf16.msra.mxu0 %v8595_v33  ;;  %v3418_v38 = vpop.f32.mrf.mxu2  ;;  %v8216_v33 = vld [vmem:[#allocation8 + $0x440] sm:$0xf0] }
 0x2c2   :  { %5370 = vmatpush.bf16.msra.mxu2 %v7687_v3  ;;  %v9411_v3 = vld [vmem:[#allocation8 + $0x61c] sm:$0xf0]  ;;  %v8219_v38 = vor.u32 %v9348_v2, %v8216_v33 }
 0x2c3   :  { %5380 = vmatpush.bf16.msra.mxu3 %v7951_v7  ;;  %v8527_v7 = vor.u32 %v9429_v49, %v8526_v46  ;;  %v8455_v61 = vor.u32 %v9411_v3, %v8454_v1  ;;  %v8760_v46 = vld [vmem:[#allocation8 + $0x888] sm:$0xf0]  ;;  %v8791_v49 = vor.u32 %v9495_v42, %v8790_v32  ;;  %v8742_v1 = vld [vmem:[#allocation8 + $0x848] sm:$0xf]  ;;  %v9483_v3 = vld [vmem:[#allocation8 + $0x85c] sm:$0xf0] }
 0x2c4   :  { %v8763_v57 = vor.u32 %v9485_v47, %v8760_v46  ;;  %v8096_v32 = vld [vmem:[#allocation8 + $0x350] sm:$0xf0] }
 0x2c5   :  { %5339 = vmatpush.bf16.msra.mxu0 %v8571_v37  ;;  %v8815_v37 = vor.u32 %v9501_v28, %v8814_v23  ;;  %v9324_v23 = vld [vmem:[#allocation8 + $0x36c] sm:$0xf]  ;;  %v8120_v28 = vld [vmem:[#allocation8 + $0x380] sm:$0xf0] }
 0x2c6   :  { %5415 = vmatpush.bf16.msrb.mxu2 %v8623_v10 }
 0x2c7   :  { %5381 = vmatpush.bf16.msra.mxu3 %v7927_v55  ;;  %v8448_v55 = vld [vmem:[#allocation8 + $0x618] sm:$0xf0] }
 0x2c8   :  { %v8451_v10 = vor.u32 %v9407_v63, %v8448_v55  ;;  %v8142_v63 = vld [vmem:[#allocation8 + $0x398] sm:$0xf]  ;;  %v9333_v55 = vld [vmem:[#allocation8 + $0x3ac] sm:$0xf0] }
 0x2c9   :  { %5340 = vmatpush.bf16.msra.mxu0 %v8547_v27  ;;  %v8192_v27 = vld [vmem:[#allocation8 + $0x410] sm:$0xf0] }
 0x2ca   :  { %5416 = vmatpush.bf16.msrb.mxu2 %v8599_v36 }
 0x2cb   :  { %5382 = vmatpush.bf16.msra.mxu3 %v7903_v13  ;;  %v8243_v13 = vor.u32 %v9354_v12, %v8240_v6  ;;  %v8739_v12 = vor.u32 %v9479_v58, %v8736_v60  ;;  %v8143_v6 = vor.u32 %v9333_v55, %v8142_v63  ;;  %v9455_v58 = vld [vmem:[#allocation8 + $0x784] sm:$0xf]  ;;  %v8646_v63 = vld [vmem:[#allocation8 + $0x788] sm:$0xf]  ;;  %v9459_v55 = vld [vmem:[#allocation8 + $0x79c] sm:$0xf0] }
 0x2cc   :  { %5293 = vmatmul.bf16.vlgmr.msrb.gmra.mxu0 %v12228_v19  ;;  %5371 = vmatmul.bf16.vlgmr.msra.gmra.mxu2 %v12228_v19 }
 0x2cd   :  { %5341 = vmatpush.bf16.msra.mxu0 %v8523_v52  ;;  %v8195_v52 = vor.u32 %v9342_v43, %v8192_v27  ;;  %v9461_v27 = vld [vmem:[#allocation8 + $0x7b4] sm:$0xf] }
 0x2ce   :  { %5417 = vmatpush.bf16.msrb.mxu2 %v8575_v40  ;;  %v8190_v40 = vld [vmem:[#allocation8 + $0x3f8] sm:$0xf] }
 0x2cf   :  { %5383 = vmatpush.bf16.msra.mxu3 %v7879_v35  ;;  %v8191_v44 = vor.u32 %v9345_v41, %v8190_v40  ;;  %v9471_v40 = vld [vmem:[#allocation8 + $0x7fc] sm:$0xf0]  ;;  %v9318_v41 = vld [vmem:[#allocation8 + $0x33c] sm:$0xf] }
 0x2d0   :  { %v8099_v46 = vor.u32 %v9318_v41, %v8096_v32  ;;  %v8382_v32 = vld [vmem:[#allocation8 + $0x578] sm:$0xf] }
 0x2d1   :  { %5342 = vmatpush.bf16.msra.mxu0 %v8499_v48  ;;  %v8168_v48 = vld [vmem:[#allocation8 + $0x3e0] sm:$0xf0] }
 0x2d2   :  { %5418 = vmatpush.bf16.msrb.mxu2 %v8551_v31  ;;  %v8787_v31 = vor.u32 %v9491_v17, %v8784_v22  ;;  %v8123_v17 = vor.u32 %v9324_v23, %v8120_v28  ;;  %v8094_v22 = vld [vmem:[#allocation8 + $0x338] sm:$0xf]  ;;  %v8406_v28 = vld [vmem:[#allocation8 + $0x5a8] sm:$0xf] }
 0x2d5   :  { %v12252_v26 = vpop.f32.mrf.mxu3  ;;  %5343 = vmatpush.bf16.msra.mxu0 %v8475_v62  ;;  %v8767_v62 = vor.u32 %v9489_v20, %v8766_v25  ;;  %v8072_v25 = vld [vmem:[#allocation8 + $0x320] sm:$0xf0]  ;;  %v9258_v20 = vld [vmem:[#allocation8 + $0x15c] sm:$0xf] }
 0x2d6   :  { %5419 = vmatpush.bf16.msrb.mxu2 %v8527_v7  ;;  %v8166_v7 = vld [vmem:[#allocation8 + $0x3c8] sm:$0xf] }
 0x2d7   :  { %v8167_v30 = vor.u32 %v9339_v21, %v8166_v7  ;;  %v9465_v7 = vld [vmem:[#allocation8 + $0x7cc] sm:$0xf0]  ;;  %v9312_v21 = vld [vmem:[#allocation8 + $0x30c] sm:$0xf] }
 0x2d9   :  { %5344 = vmatpush.bf16.msra.mxu0 %v8451_v10  ;;  %v9473_v10 = vld [vmem:[#allocation8 + $0x814] sm:$0xf] }
 0x2da   :  { %5420 = vmatpush.bf16.msrb.mxu2 %v8503_v56 }
 0x2dc   :  { %5345 = vmatmul.bf16.vlgmr.msra.gmra.mxu0 %v12234_v51 }
 0x2dd   :  { %5389 = vmatpush.bf16.msrb.mxu0 %v8239_v11  ;;  %v3429_v36 = vpop.f32.mrf.mxu3  ;;  %v8743_v11 = vor.u32 %v9483_v3, %v8742_v1 }
 0x2de   :  { %5421 = vmatpush.bf16.msrb.mxu2 %v8479_v29  ;;  %v12254_v35 = vpack.c.bf16 %v3429_v36, %v3429_v36  ;;  %v8171_v29 = vor.u32 %v9336_v18, %v8168_v48  ;;  %v9467_v36 = vld [vmem:[#allocation8 + $0x7e4] sm:$0xf]  ;;  %v7856_v18 = vld [vmem:[#allocation8 + $0x170] sm:$0xf0]  ;;  %v7862_v48 = vld [vmem:[#allocation8 + $0x160] sm:$0xf] }
 0x2df   :  { %v7859_v1 = vor.u32 %v9258_v20, %v7856_v18  ;;  %v9387_v20 = vld [vmem:[#allocation8 + $0x55c] sm:$0xf0]  ;;  %v9234_v18 = vld [vmem:[#allocation8 + $0x9c] sm:$0xf] }
 0x2e0   :  { %5254 = vmatmul.bf16.vlgmr.msra.gmra.mxu1 %v12254_v35  ;;  %5332 = vmatmul.bf16.vlgmr.msrb.gmra.mxu3 %v12254_v35 }
 0x2e1   :  { %5350 = vmatpush.bf16.msra.mxu1 %v8811_v24  ;;  %5390 = vmatpush.bf16.msrb.mxu0 %v8215_v39  ;;  %v8688_v24 = vld [vmem:[#allocation8 + $0x7f8] sm:$0xf0]  ;;  %v8719_v39 = vor.u32 %v9477_v14, %v8718_v15  ;;  %v8431_v15 = vor.u32 %v9405_v5, %v8430_v4 }
 0x2e2   :  { %5422 = vmatpush.bf16.msrb.mxu2 %v8455_v61  ;;  %5428 = vmatpush.bf16.msrb.mxu3 %v8815_v37  ;;  %v8712_v61 = vld [vmem:[#allocation8 + $0x828] sm:$0xf0]  ;;  %v9321_v37 = vld [vmem:[#allocation8 + $0x34c] sm:$0xf0]  ;;  %v8691_v42 = vor.u32 %v9467_v36, %v8688_v24  ;;  %v7808_v24 = vld [vmem:[#allocation8 + $0x110] sm:$0xf0] }
 0x2e3   :  { %v8715_v2 = vor.u32 %v9473_v10, %v8712_v61  ;;  %v8095_v43 = vor.u32 %v9321_v37, %v8094_v22  ;;  %v9402_v10 = vld [vmem:[#allocation8 + $0x5dc] sm:$0xf]  ;;  %v8432_v61 = vld [vmem:[#allocation8 + $0x5f0] sm:$0xf0]  ;;  %v7814_v22 = vld [vmem:[#allocation8 + $0x100] sm:$0xf] }
 0x2e4   :  { %v8435_v23 = vor.u32 %v9402_v10, %v8432_v61  ;;  %v9250_v37 = vld [vmem:[#allocation8 + $0x114] sm:$0xf0]  ;;  %v8336_v10 = vld [vmem:[#allocation8 + $0x530] sm:$0xf0]  ;;  %v7742_v61 = vld [vmem:[#allocation8 + $0x70] sm:$0xf] }
 0x2e5   :  { %5423 = vmatmul.bf16.vlgmr.msrb.gmra.mxu2 %v12234_v51  ;;  %5351 = vmatpush.bf16.msra.mxu1 %v8787_v31  ;;  %v3431_v56 = vpop.f32.mrf.mxu3  ;;  %v8664_v31 = vld [vmem:[#allocation8 + $0x7c8] sm:$0xf0] }
 0x2e6   :  { %5467 = vmatpush.bf16.msra.mxu2 %v8243_v13  ;;  %5391 = vmatpush.bf16.msrb.mxu0 %v8191_v44  ;;  %v9327_v13 = vld [vmem:[#allocation8 + $0x37c] sm:$0xf0]  ;;  %v8070_v44 = vld [vmem:[#allocation8 + $0x308] sm:$0xf]  ;;  %v9262_v56 = vld [vmem:[#allocation8 + $0x174] sm:$0xf0] }
 0x2e7   :  { %5429 = vmatpush.bf16.msrb.mxu3 %v8791_v49  ;;  %v8119_v33 = vor.u32 %v9327_v13, %v8118_v53  ;;  %v9315_v49 = vld [vmem:[#allocation8 + $0x31c] sm:$0xf0]  ;;  %v7863_v3 = vor.u32 %v9262_v56, %v7862_v48  ;;  %v9256_v53 = vld [vmem:[#allocation8 + $0x144] sm:$0xf0]  ;;  %v8647_v13 = vor.u32 %v9459_v55, %v8646_v63  ;;  %v7760_v56 = vld [vmem:[#allocation8 + $0xb0] sm:$0xf0] }
 0x2e8   :  { %v8334_v55 = vld [vmem:[#allocation8 + $0x518] sm:$0xf] }
 0x2e9   :  { %5352 = vmatpush.bf16.msra.mxu1 %v8763_v57  ;;  %v8667_v57 = vor.u32 %v9461_v27, %v8664_v31  ;;  %v7815_v27 = vor.u32 %v9250_v37, %v7814_v22  ;;  %v7784_v31 = vld [vmem:[#allocation8 + $0xe0] sm:$0xf0]  ;;  %v8286_v22 = vld [vmem:[#allocation8 + $0x4b8] sm:$0xf] }
 0x2ea   :  { %5468 = vmatpush.bf16.msra.mxu2 %v8219_v38  ;;  %5392 = vmatpush.bf16.msrb.mxu0 %v8167_v30  ;;  %v8694_v38 = vld [vmem:[#allocation8 + $0x7e8] sm:$0xf]  ;;  %v8071_v30 = vor.u32 %v9315_v49, %v8070_v44  ;;  %v9390_v44 = vld [vmem:[#allocation8 + $0x57c] sm:$0xf] }
 0x2eb   :  { %5430 = vmatpush.bf16.msrb.mxu3 %v8767_v62  ;;  %v8695_v47 = vor.u32 %v9471_v40, %v8694_v38  ;;  %v8075_v62 = vor.u32 %v9312_v21, %v8072_v25  ;;  %v9244_v49 = vld [vmem:[#allocation8 + $0xe4] sm:$0xf0] }
 0x2ec   :  { %v8358_v25 = vld [vmem:[#allocation8 + $0x548] sm:$0xf] }
 0x2ed   :  { %5353 = vmatpush.bf16.msra.mxu1 %v8739_v12  ;;  %v9252_v12 = vld [vmem:[#allocation8 + $0x12c] sm:$0xf] }
 0x2ee   :  { %5469 = vmatpush.bf16.msra.mxu2 %v8195_v52  ;;  %5393 = vmatpush.bf16.msrb.mxu0 %v8143_v6  ;;  %v8670_v52 = vld [vmem:[#allocation8 + $0x7b8] sm:$0xf]  ;;  %v7832_v6 = vld [vmem:[#allocation8 + $0x140] sm:$0xf0] }
 0x2ef   :  { %5431 = vmatpush.bf16.msrb.mxu3 %v8743_v11  ;;  %v8671_v60 = vor.u32 %v9465_v7, %v8670_v52  ;;  %v7835_v14 = vor.u32 %v9252_v12, %v7832_v6  ;;  %v7736_v12 = vld [vmem:[#allocation8 + $0x80] sm:$0xf0]  ;;  %v9378_v6 = vld [vmem:[#allocation8 + $0x51c] sm:$0xf] }
 0x2f0   :  { %5306 = vmatmul.bf16.vlgmr.msrb.gmra.mxu1 %v12231_v9  ;;  %5384 = vmatmul.bf16.vlgmr.msra.gmra.mxu3 %v12231_v9 }
 0x2f1   :  { %5354 = vmatpush.bf16.msra.mxu1 %v8715_v2  ;;  %v9399_v2 = vld [vmem:[#allocation8 + $0x5bc] sm:$0xf0] }
 0x2f2   :  { %5470 = vmatpush.bf16.msra.mxu2 %v8171_v29  ;;  %5394 = vmatpush.bf16.msrb.mxu0 %v8119_v33  ;;  %v8640_v29 = vld [vmem:[#allocation8 + $0x798] sm:$0xf0]  ;;  %v8407_v38 = vor.u32 %v9399_v2, %v8406_v28  ;;  %v7712_v2 = vld [vmem:[#allocation8 + $0x50] sm:$0xf0] }
 0x2f3   :  { %5432 = vmatpush.bf16.msrb.mxu3 %v8719_v39  ;;  %v8643_v11 = vor.u32 %v9455_v58, %v8640_v29  ;;  %v9246_v33 = vld [vmem:[#allocation8 + $0xfc] sm:$0xf]  ;;  %v9396_v39 = vld [vmem:[#allocation8 + $0x5ac] sm:$0xf]  ;;  %v7766_v58 = vld [vmem:[#allocation8 + $0xa0] sm:$0xf]  ;;  %v7763_v29 = vor.u32 %v9234_v18, %v7760_v56 }
 0x2f4   :  { %v7811_v40 = vor.u32 %v9246_v33, %v7808_v24  ;;  %v9372_v33 = vld [vmem:[#allocation8 + $0x4ec] sm:$0xf]  ;;  %v7718_v24 = vld [vmem:[#allocation8 + $0x40] sm:$0xf]  ;;  %v8262_v18 = vld [vmem:[#allocation8 + $0x488] sm:$0xf] }
 0x2f5   :  { %5355 = vmatpush.bf16.msra.mxu1 %v8691_v42  ;;  %v9393_v42 = vld [vmem:[#allocation8 + $0x58c] sm:$0xf0]  ;;  %v9360_v56 = vld [vmem:[#allocation8 + $0x48c] sm:$0xf] }
 0x2f6   :  { %5471 = vmatpush.bf16.msra.mxu2 %v8147_v45  ;;  %5395 = vmatpush.bf16.msrb.mxu0 %v8095_v43  ;;  %v7838_v45 = vld [vmem:[#allocation8 + $0x130] sm:$0xf]  ;;  %v9240_v43 = vld [vmem:[#allocation8 + $0xcc] sm:$0xf]  ;;  %v8383_v52 = vor.u32 %v9393_v42, %v8382_v32  ;;  %v7688_v32 = vld [vmem:[#allocation8 + $0x20] sm:$0xf0] }
 0x2f7   :  { %5433 = vmatpush.bf16.msrb.mxu3 %v8695_v47  ;;  %v7839_v36 = vor.u32 %v9256_v53, %v7838_v45  ;;  %v8384_v47 = vld [vmem:[#allocation8 + $0x590] sm:$0xf0]  ;;  %v7787_v7 = vor.u32 %v9240_v43, %v7784_v31 }
 0x2f8   :  { %v8387_v21 = vor.u32 %v9390_v44, %v8384_v47  ;;  %v8288_v31 = vld [vmem:[#allocation8 + $0x4d0] sm:$0xf0]  ;;  %v7694_v44 = vld [vmem:[#allocation8 + $0x10] sm:$0xf]  ;;  %v9220_v47 = vld [vmem:[#allocation8 + $0x24] sm:$0xf0] }
 0x2f9   :  { %5356 = vmatpush.bf16.msra.mxu1 %v8667_v57  ;;  %v9384_v57 = vld [vmem:[#allocation8 + $0x54c] sm:$0xf] }
 0x2fa   :  { %5472 = vmatpush.bf16.msra.mxu2 %v8123_v17  ;;  %5396 = vmatpush.bf16.msrb.mxu0 %v8071_v30  ;;  %v8408_v17 = vld [vmem:[#allocation8 + $0x5c0] sm:$0xf0] }
 0x2fb   :  { %5434 = vmatpush.bf16.msrb.mxu3 %v8671_v60  ;;  %v8411_v41 = vor.u32 %v9396_v39, %v8408_v17  ;;  %v8360_v30 = vld [vmem:[#allocation8 + $0x560] sm:$0xf0]  ;;  %v9238_v60 = vld [vmem:[#allocation8 + $0xb4] sm:$0xf0] }
 0x2fc   :  { %v8363_v63 = vor.u32 %v9384_v57, %v8360_v30  ;;  %v7767_v5 = vor.u32 %v9238_v60, %v7766_v58  ;;  %v9226_v39 = vld [vmem:[#allocation8 + $0x54] sm:$0xf0]  ;;  %v7695_v57 = vor.u32 %v9220_v47, %v7694_v44  ;;  %v8264_v58 = vld [vmem:[#allocation8 + $0x4a0] sm:$0xf0]  ;;  %v9306_v60 = vld [vmem:[#allocation8 + $0x2dc] sm:$0xf] }
 0x2fd   :  { %5397 = vmatmul.bf16.vlgmr.msrb.gmra.mxu0 %v12244_v8  ;;  %5357 = vmatpush.bf16.msra.mxu1 %v8643_v11  ;;  %v9232_v11 = vld [vmem:[#allocation8 + $0x84] sm:$0xf0]  ;;  %v7719_v43 = vor.u32 %v9226_v39, %v7718_v24  ;;  %v9288_v47 = vld [vmem:[#allocation8 + $0x24c] sm:$0xf] }
 0x2fe   :  { %5473 = vmatpush.bf16.msra.mxu2 %v8099_v46  ;;  %5441 = vmatpush.bf16.msra.mxu0 %v7859_v1  ;;  %v7790_v46 = vld [vmem:[#allocation8 + $0xd0] sm:$0xf]  ;;  %v7743_v28 = vor.u32 %v9232_v11, %v7742_v61 }
 0x2ff   :  { %5435 = vmatpush.bf16.msrb.mxu3 %v8647_v13  ;;  %v7791_v48 = vor.u32 %v9244_v49, %v7790_v46  ;;  %v9381_v1 = vld [vmem:[#allocation8 + $0x52c] sm:$0xf0]  ;;  %v8339_v13 = vor.u32 %v9378_v6, %v8336_v10  ;;  %v9450_v46 = vld [vmem:[#allocation8 + $0x75c] sm:$0xf]  ;;  %v8624_v49 = vld [vmem:[#allocation8 + $0x770] sm:$0xf0]  ;;  %v8267_v10 = vor.u32 %v9360_v56, %v8264_v58 }
 0x300   :  { %5358 = vmatmul.bf16.vlgmr.msra.gmra.mxu1 %v12237_v0  ;;  %v8335_v45 = vor.u32 %v9381_v1, %v8334_v55  ;;  %v8627_v30 = vor.u32 %v9450_v46, %v8624_v49  ;;  %v8600_v55 = vld [vmem:[#allocation8 + $0x740] sm:$0xf0]  ;;  %v8054_v1 = vld [vmem:[#allocation8 + $0x2e0] sm:$0xf]  ;;  %v9448_v6 = vld [vmem:[#allocation8 + $0x744] sm:$0xf0] }
 0x301   :  { %5402 = vmatpush.bf16.msrb.mxu1 %v8431_v15  ;;  %v8310_v15 = vld [vmem:[#allocation8 + $0x4e8] sm:$0xf]  ;;  %v7976_v46 = vld [vmem:[#allocation8 + $0x260] sm:$0xf0]  ;;  %v9282_v58 = vld [vmem:[#allocation8 + $0x21c] sm:$0xf] }
 0x302   :  { %5474 = vmatpush.bf16.msra.mxu2 %v8075_v62  ;;  %5442 = vmatpush.bf16.msra.mxu0 %v7835_v14  ;;  %v8359_v62 = vor.u32 %v9387_v20, %v8358_v25  ;;  %v9375_v14 = vld [vmem:[#allocation8 + $0x4fc] sm:$0xf0] }
 0x303   :  { %5480 = vmatpush.bf16.msra.mxu3 %v8435_v23  ;;  %v9222_v23 = vld [vmem:[#allocation8 + $0x3c] sm:$0xf]  ;;  %v8311_v17 = vor.u32 %v9375_v14, %v8310_v15 }
 0x304   :  { %5436 = vmatmul.bf16.vlgmr.msrb.gmra.mxu3 %v12237_v0  ;;  %v7715_v37 = vor.u32 %v9222_v23, %v7712_v2  ;;  %v9438_v14 = vld [vmem:[#allocation8 + $0x6fc] sm:$0xf]  ;;  %v8576_v23 = vld [vmem:[#allocation8 + $0x710] sm:$0xf0]  ;;  %v9304_v2 = vld [vmem:[#allocation8 + $0x2c4] sm:$0xf0] }
 0x305   :  { %5475 = vmatmul.bf16.vlgmr.msra.gmra.mxu2 %v12244_v8  ;;  %5403 = vmatpush.bf16.msrb.mxu1 %v8407_v38  ;;  %v8579_v39 = vor.u32 %v9438_v14, %v8576_v23  ;;  %v8480_v14 = vld [vmem:[#allocation8 + $0x650] sm:$0xf0]  ;;  %v7934_v23 = vld [vmem:[#allocation8 + $0x1f0] sm:$0xf] }
 0x306   :  { %5519 = vmatpush.bf16.msrb.mxu2 %v7863_v3  ;;  %5443 = vmatpush.bf16.msra.mxu0 %v7811_v40  ;;  %v9228_v3 = vld [vmem:[#allocation8 + $0x6c] sm:$0xf]  ;;  %v9369_v40 = vld [vmem:[#allocation8 + $0x4cc] sm:$0xf0] }
 0x307   :  { %5481 = vmatpush.bf16.msra.mxu3 %v8411_v41  ;;  %v7739_v53 = vor.u32 %v9228_v3, %v7736_v12  ;;  %v9216_v41 = vld [vmem:[#allocation8 + $0xc] sm:$0xf]  ;;  %v8606_v12 = vld [vmem:[#allocation8 + $0x730] sm:$0xf] }
 0x308   :  { %v12266_v4 = vpop.f32.mrf.mxu2  ;;  %v7691_v25 = vor.u32 %v9216_v41, %v7688_v32  ;;  %v8607_v15 = vor.u32 %v9448_v6, %v8606_v12  ;;  %v8552_v41 = vld [vmem:[#allocation8 + $0x6e0] sm:$0xf0]  ;;  %v8006_v32 = vld [vmem:[#allocation8 + $0x280] sm:$0xf]  ;;  %v8510_v12 = vld [vmem:[#allocation8 + $0x670] sm:$0xf] }
 0x309   :  { %5404 = vmatpush.bf16.msrb.mxu1 %v8383_v52  ;;  %v8287_v52 = vor.u32 %v9369_v40, %v8286_v22  ;;  %v8000_v22 = vld [vmem:[#allocation8 + $0x290] sm:$0xf0]  ;;  %v9432_v40 = vld [vmem:[#allocation8 + $0x6cc] sm:$0xf]  ;;  %v9424_v6 = vld [vmem:[#allocation8 + $0x684] sm:$0xf0] }
 0x30a   :  { %5520 = vmatpush.bf16.msrb.mxu2 %v7839_v36  ;;  %5444 = vmatpush.bf16.msra.mxu0 %v7787_v7  ;;  %v8312_v36 = vld [vmem:[#allocation8 + $0x500] sm:$0xf0]  ;;  %v8630_v7 = vld [vmem:[#allocation8 + $0x760] sm:$0xf]  ;;  %v8555_v44 = vor.u32 %v9432_v40, %v8552_v41 }
 0x30b   :  { %5482 = vmatpush.bf16.msra.mxu3 %v8387_v21  ;;  %v8315_v38 = vor.u32 %v9372_v33, %v8312_v36  ;;  %v9454_v21 = vld [vmem:[#allocation8 + $0x774] sm:$0xf0]  ;;  %v8582_v33 = vld [vmem:[#allocation8 + $0x700] sm:$0xf]  ;;  %v8456_v41 = vld [vmem:[#allocation8 + $0x620] sm:$0xf0] }
 0x30c   :  { %v9442_v36 = vld [vmem:[#allocation8 + $0x714] sm:$0xf0]  ;;  %v12272_v56 = vpop.f32.mrf.mxu3 }
 0x30d   :  { %5405 = vmatpush.bf16.msrb.mxu1 %v8359_v62  ;;  %v8048_v62 = vld [vmem:[#allocation8 + $0x2f0] sm:$0xf0] }
 0x30e   :  { %5521 = vmatpush.bf16.msrb.mxu2 %v7815_v27  ;;  %5445 = vmatpush.bf16.msra.mxu0 %v7763_v29  ;;  %v9366_v27 = vld [vmem:[#allocation8 + $0x4bc] sm:$0xf]  ;;  %v8631_v29 = vor.u32 %v9454_v21, %v8630_v7  ;;  %v8051_v61 = vor.u32 %v9306_v60, %v8048_v62  ;;  %v8528_v21 = vld [vmem:[#allocation8 + $0x6b0] sm:$0xf0] }
 0x30f   :  { %5483 = vmatpush.bf16.msra.mxu3 %v8363_v63  ;;  %v8291_v20 = vor.u32 %v9366_v27, %v8288_v31  ;;  %v9444_v63 = vld [vmem:[#allocation8 + $0x72c] sm:$0xf]  ;;  %v9436_v27 = vld [vmem:[#allocation8 + $0x6e4] sm:$0xf0]  ;;  %v9426_v7 = vld [vmem:[#allocation8 + $0x69c] sm:$0xf] }
 0x310   :  { %v5218_v42 = vpop.f32.mrf.mxu2  ;;  %v8603_v11 = vor.u32 %v9444_v63, %v8600_v55  ;;  %v7952_v60 = vld [vmem:[#allocation8 + $0x230] sm:$0xf0]  ;;  %v9420_v63 = vld [vmem:[#allocation8 + $0x66c] sm:$0xf]  ;;  %v8504_v55 = vld [vmem:[#allocation8 + $0x680] sm:$0xf0] }
 0x311   :  { %5406 = vmatpush.bf16.msrb.mxu1 %v8335_v45  ;;  %v9300_v45 = vld [vmem:[#allocation8 + $0x2ac] sm:$0xf]  ;;  %v9298_v42 = vld [vmem:[#allocation8 + $0x294] sm:$0xf0] }
 0x312   :  { %5522 = vmatpush.bf16.msrb.mxu2 %v7791_v48  ;;  %5446 = vmatpush.bf16.msra.mxu0 %v7739_v53  ;;  %v9363_v48 = vld [vmem:[#allocation8 + $0x49c] sm:$0xf0]  ;;  %v8024_v53 = vld [vmem:[#allocation8 + $0x2c0] sm:$0xf0]  ;;  %v8007_v49 = vor.u32 %v9298_v42, %v8006_v32  ;;  %v9274_v42 = vld [vmem:[#allocation8 + $0x1d4] sm:$0xf0] }
 0x313   :  { %5484 = vmatpush.bf16.msra.mxu3 %v8339_v13  ;;  %v8263_v3 = vor.u32 %v9363_v48, %v8262_v18  ;;  %v8027_v24 = vor.u32 %v9300_v45, %v8024_v53  ;;  %v8534_v18 = vld [vmem:[#allocation8 + $0x6a0] sm:$0xf]  ;;  %v9430_v48 = vld [vmem:[#allocation8 + $0x6b4] sm:$0xf0]  ;;  %v7928_v45 = vld [vmem:[#allocation8 + $0x200] sm:$0xf0] }
 0x314   :  { %v7910_v32 = vld [vmem:[#allocation8 + $0x1c0] sm:$0xf] }
 0x315   :  { %5407 = vmatpush.bf16.msrb.mxu1 %v8311_v17  ;;  %v9294_v17 = vld [vmem:[#allocation8 + $0x27c] sm:$0xf] }
 0x316   :  { %5523 = vmatpush.bf16.msrb.mxu2 %v7767_v5  ;;  %5447 = vmatpush.bf16.msra.mxu0 %v7715_v37  ;;  %v9310_v5 = vld [vmem:[#allocation8 + $0x2f4] sm:$0xf0]  ;;  %v8003_v31 = vor.u32 %v9294_v17, %v8000_v22  ;;  %v9270_v17 = vld [vmem:[#allocation8 + $0x1bc] sm:$0xf]  ;;  %v7904_v22 = vld [vmem:[#allocation8 + $0x1d0] sm:$0xf0] }
 0x317   :  { %5485 = vmatpush.bf16.msra.mxu3 %v8315_v38  ;;  %v8055_v13 = vor.u32 %v9310_v5, %v8054_v1  ;;  %v8583_v38 = vor.u32 %v9442_v36, %v8582_v33  ;;  %v7958_v1 = vld [vmem:[#allocation8 + $0x220] sm:$0xf]  ;;  %v9286_v5 = vld [vmem:[#allocation8 + $0x234] sm:$0xf0]  ;;  %v5231_v36 = vpop.f32.mrf.mxu3 }
 0x318   :  { %v7959_v53 = vor.u32 %v9286_v5, %v7958_v1  ;;  %v9418_v33 = vld [vmem:[#allocation8 + $0x654] sm:$0xf0]  ;;  %v9343_v36 = vld [vmem:[#allocation8 + $0x404] sm:$0xf] }
 0x319   :  { %5408 = vmatpush.bf16.msrb.mxu1 %v8287_v52  ;;  %v9502_v1 = vld [vmem:[#allocation8 + $0x8f4] sm:$0xf0] }
 0x31a   :  { %5524 = vmatpush.bf16.msrb.mxu2 %v7743_v28  ;;  %5448 = vmatpush.bf16.msra.mxu0 %v7691_v25  ;;  %v8030_v28 = vld [vmem:[#allocation8 + $0x2b0] sm:$0xf] }
 0x31b   :  { %5486 = vmatpush.bf16.msra.mxu3 %v8291_v20  ;;  %v8031_v37 = vor.u32 %v9304_v2, %v8030_v28  ;;  %v7982_v25 = vld [vmem:[#allocation8 + $0x250] sm:$0xf]  ;;  %v9292_v20 = vld [vmem:[#allocation8 + $0x264] sm:$0xf0]  ;;  %v8486_v2 = vld [vmem:[#allocation8 + $0x640] sm:$0xf] }
 0x31c   :  { %v7983_v62 = vor.u32 %v9292_v20, %v7982_v25  ;;  %v9280_v28 = vld [vmem:[#allocation8 + $0x204] sm:$0xf0]  ;;  %v8487_v40 = vor.u32 %v9418_v33, %v8486_v2  ;;  %v7911_v25 = vor.u32 %v9274_v42, %v7910_v32  ;;  %v8774_v42 = vld [vmem:[#allocation8 + $0x880] sm:$0xf] }
 0x31d   :  { %5449 = vmatmul.bf16.vlgmr.msra.gmra.mxu0 %v12228_v19  ;;  %5409 = vmatpush.bf16.msrb.mxu1 %v8263_v3  ;;  %v9496_v2 = vld [vmem:[#allocation8 + $0x8c4] sm:$0xf0] }
 0x31e   :  { %5525 = vmatpush.bf16.msrb.mxu2 %v7719_v43  ;;  %5493 = vmatpush.bf16.msrb.mxu0 %v8627_v30  ;;  %v8558_v43 = vld [vmem:[#allocation8 + $0x6d0] sm:$0xf]  ;;  %v8531_v30 = vor.u32 %v9426_v7, %v8528_v21  ;;  %v9264_v21 = vld [vmem:[#allocation8 + $0x18c] sm:$0xf]  ;;  %v9340_v32 = vld [vmem:[#allocation8 + $0x3e4] sm:$0xf0] }
 0x31f   :  { %5487 = vmatpush.bf16.msra.mxu3 %v8267_v10  ;;  %v8559_v52 = vor.u32 %v9436_v27, %v8558_v43  ;;  %v7955_v10 = vor.u32 %v9282_v58, %v7952_v60  ;;  %v8462_v27 = vld [vmem:[#allocation8 + $0x610] sm:$0xf]  ;;  %v9498_v60 = vld [vmem:[#allocation8 + $0x8dc] sm:$0xf] }
 0x320   :  { %5410 = vmatmul.bf16.vlgmr.msrb.gmra.mxu1 %v12254_v35 }
 0x321   :  { %5454 = vmatpush.bf16.msra.mxu1 %v8051_v61  ;;  %v8507_v61 = vor.u32 %v9420_v63, %v8504_v55  ;;  %v9352_v63 = vld [vmem:[#allocation8 + $0x444] sm:$0xf0]  ;;  %v8822_v55 = vld [vmem:[#allocation8 + $0x8e0] sm:$0xf] }
 0x322   :  { %5526 = vmatpush.bf16.msrb.mxu2 %v7695_v57  ;;  %5494 = vmatpush.bf16.msrb.mxu0 %v8603_v11  ;;  %v7979_v57 = vor.u32 %v9288_v47, %v7976_v46  ;;  %v9276_v11 = vld [vmem:[#allocation8 + $0x1ec] sm:$0xf]  ;;  %v9358_v47 = vld [vmem:[#allocation8 + $0x474] sm:$0xf0]  ;;  %v9355_v46 = vld [vmem:[#allocation8 + $0x464] sm:$0xf] }
 0x323   :  { %5532 = vmatpush.bf16.msrb.mxu3 %v8055_v13  ;;  %v8511_v13 = vor.u32 %v9424_v6, %v8510_v12  ;;  %v9349_v12 = vld [vmem:[#allocation8 + $0x434] sm:$0xf]  ;;  %v8224_v6 = vld [vmem:[#allocation8 + $0x448] sm:$0xf0] }
 0x324   :  { %5488 = vmatmul.bf16.vlgmr.msra.gmra.mxu3 %v12254_v35 }
 0x325   :  { %5527 = vmatmul.bf16.vlgmr.msrb.gmra.mxu2 %v12228_v19  ;;  %5455 = vmatpush.bf16.msra.mxu1 %v8027_v24  ;;  %v7931_v24 = vor.u32 %v9276_v11, %v7928_v45  ;;  %v8823_v45 = vor.u32 %v9502_v1, %v8822_v55  ;;  %v8720_v55 = vld [vmem:[#allocation8 + $0x830] sm:$0xf0]  ;;  %v8126_v1 = vld [vmem:[#allocation8 + $0x370] sm:$0xf] }
 0x326   :  { %5571 = vmatpush.bf16.msra.mxu2 %v8631_v29  ;;  %5495 = vmatpush.bf16.msrb.mxu0 %v8579_v39  ;;  %v8535_v29 = vor.u32 %v9430_v48, %v8534_v18  ;;  %v7880_v18 = vld [vmem:[#allocation8 + $0x1a0] sm:$0xf0]  ;;  %v7886_v48 = vld [vmem:[#allocation8 + $0x190] sm:$0xf] }
 0x327   :  { %5533 = vmatpush.bf16.msrb.mxu3 %v8031_v37  ;;  %v9408_v37 = vld [vmem:[#allocation8 + $0x60c] sm:$0xf]  ;;  %v7883_v5 = vor.u32 %v9264_v21, %v7880_v18  ;;  %v8150_v21 = vld [vmem:[#allocation8 + $0x3a0] sm:$0xf]  ;;  %v8750_v18 = vld [vmem:[#allocation8 + $0x850] sm:$0xf] }
 0x328   :  { %v12274_v3 = vpop.f32.mrf.mxu2  ;;  %v8459_v7 = vor.u32 %v9408_v37, %v8456_v41  ;;  %v9486_v37 = vld [vmem:[#allocation8 + $0x87c] sm:$0xf] }
 0x329   :  { %5456 = vmatpush.bf16.msra.mxu1 %v8003_v31  ;;  %v9412_v31 = vld [vmem:[#allocation8 + $0x624] sm:$0xf0] }
 0x32a   :  { %5572 = vmatpush.bf16.msra.mxu2 %v8607_v15  ;;  %5496 = vmatpush.bf16.msrb.mxu0 %v8555_v44  ;;  %v9414_v15 = vld [vmem:[#allocation8 + $0x63c] sm:$0xf]  ;;  %v8246_v44 = vld [vmem:[#allocation8 + $0x460] sm:$0xf]  ;;  %v8463_v20 = vor.u32 %v9412_v31, %v8462_v27  ;;  %v9337_v31 = vld [vmem:[#allocation8 + $0x3d4] sm:$0xf] }
 0x32b   :  { %5534 = vmatpush.bf16.msrb.mxu3 %v8007_v49  ;;  %v8483_v39 = vor.u32 %v9414_v15, %v8480_v14  ;;  %v8248_v49 = vld [vmem:[#allocation8 + $0x478] sm:$0xf0]  ;;  %v8198_v15 = vld [vmem:[#allocation8 + $0x400] sm:$0xf]  ;;  %v8227_v14 = vor.u32 %v9349_v12, %v8224_v6  ;;  %v9328_v6 = vld [vmem:[#allocation8 + $0x384] sm:$0xf0] }
 0x32c   :  { %v8251_v58 = vor.u32 %v9355_v46, %v8248_v49  ;;  %v12277_v33 = vpop.f32.mrf.mxu3 }
 0x32d   :  { %5457 = vmatpush.bf16.msra.mxu1 %v7979_v57  ;;  %v9268_v57 = vld [vmem:[#allocation8 + $0x1a4] sm:$0xf0] }
 0x32e   :  { %5573 = vmatpush.bf16.msra.mxu2 %v8583_v38  ;;  %5497 = vmatpush.bf16.msrb.mxu0 %v8531_v30  ;;  %v7935_v38 = vor.u32 %v9280_v28, %v7934_v23  ;;  %v8247_v30 = vor.u32 %v9358_v47, %v8246_v44  ;;  %v9346_v23 = vld [vmem:[#allocation8 + $0x414] sm:$0xf0]  ;;  %v8798_v28 = vld [vmem:[#allocation8 + $0x8b0] sm:$0xf]  ;;  %v8176_v44 = vld [vmem:[#allocation8 + $0x3e8] sm:$0xf0] }
 0x32f   :  { %5535 = vmatpush.bf16.msrb.mxu3 %v7983_v62  ;;  %v8816_v62 = vld [vmem:[#allocation8 + $0x8f0] sm:$0xf0] }
 0x330   :  { %v5270_v43 = vpop.f32.mrf.mxu2 }
 0x331   :  { %5458 = vmatpush.bf16.msra.mxu1 %v7955_v10  ;;  %v7887_v10 = vor.u32 %v9268_v57, %v7886_v48  ;;  %v9490_v43 = vld [vmem:[#allocation8 + $0x894] sm:$0xf0]  ;;  %v9484_v48 = vld [vmem:[#allocation8 + $0x864] sm:$0xf0] }
 0x332   :  { %5574 = vmatpush.bf16.msra.mxu2 %v8559_v52  ;;  %5498 = vmatpush.bf16.msrb.mxu0 %v8507_v61  ;;  %v7907_v52 = vor.u32 %v9270_v17, %v7904_v22  ;;  %v8819_v61 = vor.u32 %v9498_v60, %v8816_v62  ;;  %v8199_v17 = vor.u32 %v9346_v23, %v8198_v15  ;;  %v9468_v23 = vld [vmem:[#allocation8 + $0x7ec] sm:$0xf] }
 0x333   :  { %5536 = vmatpush.bf16.msrb.mxu3 %v7959_v53  ;;  %v9492_v53 = vld [vmem:[#allocation8 + $0x8ac] sm:$0xf]  ;;  %v8799_v22 = vor.u32 %v9496_v2, %v8798_v28  ;;  %v8775_v49 = vor.u32 %v9490_v43, %v8774_v42  ;;  %v8127_v15 = vor.u32 %v9328_v6, %v8126_v1  ;;  %v8696_v28 = vld [vmem:[#allocation8 + $0x800] sm:$0xf0]  ;;  %v8102_v2 = vld [vmem:[#allocation8 + $0x340] sm:$0xf] }
 0x334   :  { %v5283_v57 = vpop.f32.mrf.mxu3  ;;  %v8672_v42 = vld [vmem:[#allocation8 + $0x7d0] sm:$0xf0]  ;;  %v8078_v43 = vld [vmem:[#allocation8 + $0x310] sm:$0xf]  ;;  %v8438_v6 = vld [vmem:[#allocation8 + $0x5e0] sm:$0xf] }
 0x335   :  { %5459 = vmatpush.bf16.msra.mxu1 %v7931_v24  ;;  %v8200_v24 = vld [vmem:[#allocation8 + $0x418] sm:$0xf0]  ;;  %v8654_v1 = vld [vmem:[#allocation8 + $0x790] sm:$0xf] }
 0x336   :  { %5575 = vmatpush.bf16.msra.mxu2 %v8535_v29  ;;  %5499 = vmatpush.bf16.msrb.mxu0 %v8483_v39  ;;  %v8222_v29 = vld [vmem:[#allocation8 + $0x430] sm:$0xf]  ;;  %v8203_v41 = vor.u32 %v9343_v36, %v8200_v24  ;;  %v9322_v24 = vld [vmem:[#allocation8 + $0x354] sm:$0xf0] }
 0x337   :  { %5537 = vmatpush.bf16.msrb.mxu3 %v7935_v38  ;;  %v8223_v11 = vor.u32 %v9352_v63, %v8222_v29  ;;  %v8768_v38 = vld [vmem:[#allocation8 + $0x890] sm:$0xf0]  ;;  %v8751_v29 = vor.u32 %v9484_v48, %v8750_v18  ;;  %v9474_v63 = vld [vmem:[#allocation8 + $0x81c] sm:$0xf] }
 0x338   :  { %v8771_v47 = vor.u32 %v9486_v37, %v8768_v38  ;;  %v8104_v37 = vld [vmem:[#allocation8 + $0x358] sm:$0xf0]  ;;  %v8699_v38 = vor.u32 %v9468_v23, %v8696_v28  ;;  %v5695_v28 = vld [vmem:[%s12825_s13 + $0x70] sm:$0xff] }
 0x339   :  { %5460 = vmatpush.bf16.msra.mxu1 %v7907_v52  ;;  %v12282_v27 = vpop.f32.mrf.mxu0  ;;  %v9480_v52 = vld [vmem:[#allocation8 + $0x84c] sm:$0xf]  ;;  %v12291_v18 = vld [vmem:[%s12824_s12] sm:$0x3f] }
 0x33a   :  { %5576 = vmatpush.bf16.msra.mxu2 %v8511_v13  ;;  %5500 = vmatpush.bf16.msrb.mxu0 %v8459_v7  ;;  %v8792_v13 = vld [vmem:[#allocation8 + $0x8c0] sm:$0xf0]  ;;  %v3755_v57 = vperm.slane %v12291_v18, 0 }
 0x33b   :  { %5538 = vmatpush.bf16.msrb.mxu3 %v7911_v25  ;;  %v8795_v39 = vor.u32 %v9492_v53, %v8792_v13  ;;  %v8744_v7 = vld [vmem:[#allocation8 + $0x860] sm:$0xf0]  ;;  %v8179_v25 = vor.u32 %v9337_v31, %v8176_v44  ;;  %v8128_v53 = vld [vmem:[#allocation8 + $0x388] sm:$0xf0]  ;;  %v8723_v13 = vor.u32 %v9474_v63, %v8720_v55  ;;  %v9316_v31 = vld [vmem:[#allocation8 + $0x324] sm:$0xf0] }
 0x33c   :  { %v8747_v60 = vor.u32 %v9480_v52, %v8744_v7  ;;  %v9313_v52 = vld [vmem:[#allocation8 + $0x314] sm:$0xf] }
 0x33d   :  { %5501 = vmatmul.bf16.vlgmr.msrb.gmra.mxu0 %v12234_v51  ;;  %5461 = vmatpush.bf16.msra.mxu1 %v7883_v5  ;;  %v5696_v55 = vld [vmem:[%s12825_s13 + $0x78] sm:$0xff] }
 0x33e   :  { %5577 = vmatpush.bf16.msra.mxu2 %v8487_v40  ;;  %5545 = vmatpush.bf16.msra.mxu0 %v8247_v30  ;;  %v8174_v40 = vld [vmem:[#allocation8 + $0x3d0] sm:$0xf]  ;;  %v9331_v30 = vld [vmem:[#allocation8 + $0x3a4] sm:$0xf] }
 0x33f   :  { %5539 = vmatpush.bf16.msrb.mxu3 %v7887_v10  ;;  %v8175_v46 = vor.u32 %v9340_v32, %v8174_v40  ;;  %v12284_v5 = vpop.f32.mrf.mxu2  ;;  %v8726_v10 = vld [vmem:[#allocation8 + $0x820] sm:$0xf]  ;;  %v9462_v40 = vld [vmem:[#allocation8 + $0x7bc] sm:$0xf] }
 0x340   :  { %5462 = vmatmul.bf16.vlgmr.msra.gmra.mxu1 %v12231_v9  ;;  %v8675_v48 = vor.u32 %v9462_v40, %v8672_v42  ;;  %v8416_v40 = vld [vmem:[#allocation8 + $0x5c8] sm:$0xf0]  ;;  %v5693_v42 = vld [vmem:[%s12825_s13 + $0x60] sm:$0xff] }
 0x341   :  { %5506 = vmatpush.bf16.msrb.mxu1 %v8819_v61  ;;  %v9478_v61 = vld [vmem:[#allocation8 + $0x834] sm:$0xf0] }
 0x342   :  { %5578 = vmatpush.bf16.msra.mxu2 %v8463_v20  ;;  %5546 = vmatpush.bf16.msra.mxu0 %v8223_v11  ;;  %v9334_v20 = vld [vmem:[#allocation8 + $0x3b4] sm:$0xf0]  ;;  %v5244_v11 = vpop.f32.mrf.mxu0 }
 0x343   :  { %5584 = vmatpush.bf16.msra.mxu3 %v8823_v45  ;;  %v8151_v62 = vor.u32 %v9334_v20, %v8150_v21  ;;  %v9325_v45 = vld [vmem:[#allocation8 + $0x374] sm:$0xf]  ;;  %v8080_v21 = vld [vmem:[#allocation8 + $0x328] sm:$0xf0]  ;;  %v7864_v20 = vld [vmem:[#allocation8 + $0x178] sm:$0xf0] }
 0x344   :  { %5540 = vmatmul.bf16.vlgmr.msrb.gmra.mxu3 %v12231_v9  ;;  %v8131_v36 = vor.u32 %v9325_v45, %v8128_v53  ;;  %v7840_v45 = vld [vmem:[#allocation8 + $0x148] sm:$0xf0]  ;;  %v9403_v53 = vld [vmem:[#allocation8 + $0x5e4] sm:$0xf] }
 0x345   :  { %5579 = vmatmul.bf16.vlgmr.msra.gmra.mxu2 %v12234_v51  ;;  %5507 = vmatpush.bf16.msrb.mxu1 %v8795_v39  ;;  %v8702_v39 = vld [vmem:[#allocation8 + $0x7f0] sm:$0xf] }
 0x346   :  { %5623 = vmatpush.bf16.msrb.mxu2 %v8251_v58  ;;  %5547 = vmatpush.bf16.msra.mxu0 %v8199_v17  ;;  %v8152_v58 = vld [vmem:[#allocation8 + $0x3b8] sm:$0xf0]  ;;  %v9472_v17 = vld [vmem:[#allocation8 + $0x804] sm:$0xf0] }
 0x347   :  { %5585 = vmatpush.bf16.msra.mxu3 %v8799_v22  ;;  %v8155_v12 = vor.u32 %v9331_v30, %v8152_v58  ;;  %v9319_v22 = vld [vmem:[#allocation8 + $0x344] sm:$0xf]  ;;  %v8703_v32 = vor.u32 %v9472_v17, %v8702_v39  ;;  %v5322_v44 = vpop.f32.mrf.mxu2  ;;  %v8079_v30 = vor.u32 %v9316_v31, %v8078_v43  ;;  %v8414_v17 = vld [vmem:[#allocation8 + $0x5b0] sm:$0xf] }
 0x349   :  { %5508 = vmatpush.bf16.msrb.mxu1 %v8771_v47  ;;  %v8107_v47 = vor.u32 %v9319_v22, %v8104_v37  ;;  %v9400_v22 = vld [vmem:[#allocation8 + $0x5c4] sm:$0xf0]  ;;  %v9247_v37 = vld [vmem:[#allocation8 + $0x104] sm:$0xf] }
 0x34a   :  { %5624 = vmatpush.bf16.msrb.mxu2 %v8227_v14  ;;  %5548 = vmatpush.bf16.msra.mxu0 %v8175_v46  ;;  %v8727_v14 = vor.u32 %v9478_v61, %v8726_v10  ;;  %v8678_v46 = vld [vmem:[#allocation8 + $0x7c0] sm:$0xf]  ;;  %v12286_v7 = vpop.f32.mrf.mxu0  ;;  %v9406_v10 = vld [vmem:[#allocation8 + $0x5f4] sm:$0xf0]  ;;  %v9253_v61 = vld [vmem:[#allocation8 + $0x134] sm:$0xf]  ;;  %v8415_v43 = vor.u32 %v9400_v22, %v8414_v17 }
 0x34b   :  { %5586 = vmatpush.bf16.msra.mxu3 %v8775_v49  ;;  %v9466_v49 = vld [vmem:[#allocation8 + $0x7d4] sm:$0xf0]  ;;  %v5687_v17 = vld [vmem:[%s12825_s13 + $0x30] sm:$0xff] }
 0x34c   :  { %v8679_v58 = vor.u32 %v9466_v49, %v8678_v46  ;;  %v9241_v46 = vld [vmem:[#allocation8 + $0xd4] sm:$0xf]  ;;  %v9391_v49 = vld [vmem:[#allocation8 + $0x584] sm:$0xf] }
 0x34d   :  { %5509 = vmatpush.bf16.msrb.mxu1 %v8747_v60  ;;  %v9456_v60 = vld [vmem:[#allocation8 + $0x78c] sm:$0xf] }
 0x34e   :  { %5625 = vmatpush.bf16.msrb.mxu2 %v8203_v41  ;;  %5549 = vmatpush.bf16.msra.mxu0 %v8151_v62  ;;  %v8103_v41 = vor.u32 %v9322_v24, %v8102_v2  ;;  %v8648_v62 = vld [vmem:[#allocation8 + $0x7a0] sm:$0xf0]  ;;  %v8439_v2 = vor.u32 %v9406_v10, %v8438_v6  ;;  %v7843_v24 = vor.u32 %v9253_v61, %v7840_v45 }
 0x34f   :  { %5587 = vmatpush.bf16.msra.mxu3 %v8751_v29  ;;  %v8083_v29 = vor.u32 %v9313_v52, %v8080_v21  ;;  %v8651_v11 = vor.u32 %v9456_v60, %v8648_v62  ;;  %v12298_v23 = vpop.f32.mrf.mxu2  ;;  %v8392_v52 = vld [vmem:[#allocation8 + $0x598] sm:$0xf0]  ;;  %v8366_v60 = vld [vmem:[#allocation8 + $0x550] sm:$0xf]  ;;  %v9388_v62 = vld [vmem:[#allocation8 + $0x564] sm:$0xf0] }
 0x350   :  { %v5692_v21 = vld [vmem:[%s12825_s13 + $0x58] sm:$0xff]  ;;  %v5690_v6 = vld [vmem:[%s12825_s13 + $0x48] sm:$0xff]  ;;  %v5689_v61 = vld [vmem:[%s12825_s13 + $0x40] sm:$0xff] }
 0x351   :  { %5510 = vmatpush.bf16.msrb.mxu1 %v8723_v13  ;;  %v8440_v13 = vld [vmem:[#allocation8 + $0x5f8] sm:$0xf0] }
 0x352   :  { %5626 = vmatpush.bf16.msrb.mxu2 %v8179_v25  ;;  %5550 = vmatpush.bf16.msra.mxu0 %v8127_v15  ;;  %v9259_v25 = vld [vmem:[#allocation8 + $0x164] sm:$0xf]  ;;  %v5217_v15 = vadd.f32 %v12266_v4, %v3755_v57  ;;  %v8443_v39 = vor.u32 %v9403_v53, %v8440_v13  ;;  %v7816_v4 = vld [vmem:[#allocation8 + $0x118] sm:$0xf0] }
 0x353   :  { %5588 = vmatpush.bf16.msra.mxu3 %v8727_v14  ;;  %v7867_v63 = vor.u32 %v9259_v25, %v7864_v20  ;;  %v7819_v31 = vor.u32 %v9247_v37, %v7816_v4 }
 0x355   :  { %5511 = vmatpush.bf16.msrb.mxu1 %v8699_v38  ;;  %v9397_v38 = vld [vmem:[#allocation8 + $0x5b4] sm:$0xf] }
 0x356   :  { %5627 = vmatpush.bf16.msrb.mxu2 %v8155_v12  ;;  %5551 = vmatpush.bf16.msra.mxu0 %v8103_v41  ;;  %v9460_v12 = vld [vmem:[#allocation8 + $0x7a4] sm:$0xf0]  ;;  %v5230_v41 = vadd.f32 %v12272_v56, %v5217_v15  ;;  %v8419_v44 = vor.u32 %v9397_v38, %v8416_v40  ;;  %v9394_v56 = vld [vmem:[#allocation8 + $0x594] sm:$0xf0]  ;;  %v8342_v15 = vld [vmem:[#allocation8 + $0x520] sm:$0xf] }
 0x357   :  { %5589 = vmatpush.bf16.msra.mxu3 %v8703_v32  ;;  %v8655_v14 = vor.u32 %v9460_v12, %v8654_v1  ;;  %v5694_v32 = vld [vmem:[%s12825_s13 + $0x68] sm:$0xff]  ;;  %v5374_v20 = vpop.f32.mrf.mxu2  ;;  %v9385_v1 = vld [vmem:[#allocation8 + $0x554] sm:$0xf]  ;;  %v8318_v38 = vld [vmem:[#allocation8 + $0x4f0] sm:$0xf] }
 0x358   :  { %v5243_v25 = vadd.f32 %v12282_v27, %v5230_v41  ;;  %v7768_v27 = vld [vmem:[#allocation8 + $0xb8] sm:$0xf0]  ;;  %v8368_v12 = vld [vmem:[#allocation8 + $0x568] sm:$0xf0]  ;;  %v9376_v40 = vld [vmem:[#allocation8 + $0x504] sm:$0xf0] }
 0x359   :  { %5512 = vmatpush.bf16.msrb.mxu1 %v8675_v48  ;;  %v5691_v48 = vld [vmem:[%s12825_s13 + $0x50] sm:$0xff]  ;;  %v8371_v13 = vor.u32 %v9385_v1, %v8368_v12  ;;  %v9223_v41 = vld [vmem:[#allocation8 + $0x44] sm:$0xf] }
 0x35a   :  { %5628 = vmatpush.bf16.msrb.mxu2 %v8131_v36  ;;  %5552 = vmatpush.bf16.msra.mxu0 %v8079_v30  ;;  %v5296_v36 = vpop.f32.mrf.mxu0  ;;  %v9217_v20 = vld [vmem:[#allocation8 + $0x14] sm:$0xf] }
 0x35b   :  { %5590 = vmatpush.bf16.msra.mxu3 %v8679_v58  ;;  %v8395_v58 = vor.u32 %v9391_v49, %v8392_v52  ;;  %v9379_v36 = vld [vmem:[#allocation8 + $0x524] sm:$0xf] }
 0x35d   :  { %5553 = vmatmul.bf16.vlgmr.msra.gmra.mxu0 %v12244_v8  ;;  %5513 = vmatpush.bf16.msrb.mxu1 %v8651_v11  ;;  %v8367_v11 = vor.u32 %v9388_v62, %v8366_v60  ;;  %v5684_v60 = vld [vmem:[%s12825_s13 + $0x18] sm:$0xff]  ;;  %v9451_v62 = vld [vmem:[#allocation8 + $0x764] sm:$0xf] }
 0x35e   :  { %5629 = vmatpush.bf16.msrb.mxu2 %v8107_v47  ;;  %5597 = vmatpush.bf16.msrb.mxu0 %v7867_v63  ;;  %v8390_v47 = vld [vmem:[#allocation8 + $0x580] sm:$0xf] }
 0x35f   :  { %5591 = vmatpush.bf16.msra.mxu3 %v8655_v14  ;;  %v8391_v57 = vor.u32 %v9394_v56, %v8390_v47  ;;  %v9382_v14 = vld [vmem:[#allocation8 + $0x534] sm:$0xf0]  ;;  %v5686_v47 = vld [vmem:[%s12825_s13 + $0x28] sm:$0xff] }
 0x360   :  { %5514 = vmatmul.bf16.vlgmr.msrb.gmra.mxu1 %v12237_v0  ;;  %v8343_v22 = vor.u32 %v9382_v14, %v8342_v15  ;;  %v9307_v15 = vld [vmem:[#allocation8 + $0x2e4] sm:$0xf]  ;;  %v8056_v14 = vld [vmem:[#allocation8 + $0x2f8] sm:$0xf0] }
 0x361   :  { %5558 = vmatpush.bf16.msra.mxu1 %v8439_v2  ;;  %v7744_v2 = vld [vmem:[#allocation8 + $0x88] sm:$0xf0] }
 0x362   :  { %5630 = vmatpush.bf16.msrb.mxu2 %v8083_v29  ;;  %5598 = vmatpush.bf16.msrb.mxu0 %v7843_v24  ;;  %v9235_v29 = vld [vmem:[#allocation8 + $0xa4] sm:$0xf]  ;;  %v12321_v63 = vpop.f32.mrf.mxu0  ;;  %v8344_v24 = vld [vmem:[#allocation8 + $0x538] sm:$0xf0] }
 0x363   :  { %5636 = vmatpush.bf16.msrb.mxu3 %v8443_v39  ;;  %v7771_v53 = vor.u32 %v9235_v29, %v7768_v27  ;;  %v5688_v39 = vld [vmem:[%s12825_s13 + $0x38] sm:$0xff]  ;;  %v8347_v4 = vor.u32 %v9379_v36, %v8344_v24  ;;  %v8608_v36 = vld [vmem:[#allocation8 + $0x748] sm:$0xf0]  ;;  %v5681_v24 = vld [vmem:[%s12825_s13] sm:$0xff] }
 0x364   :  { %5592 = vmatmul.bf16.vlgmr.msra.gmra.mxu3 %v12237_v0  ;;  %v8632_v29 = vld [vmem:[#allocation8 + $0x778] sm:$0xf0] }
 0x365   :  { %5631 = vmatmul.bf16.vlgmr.msrb.gmra.mxu2 %v12244_v8  ;;  %v7792_v8 = vld [vmem:[#allocation8 + $0xe8] sm:$0xf0]  ;;  %5559 = vmatpush.bf16.msra.mxu1 %v8415_v43  ;;  %v7720_v43 = vld [vmem:[#allocation8 + $0x58] sm:$0xf0] }
 0x366   :  { %5781 = vmatpush.msra.mxu2 %v5696_v55  ;;  %5599 = vmatpush.bf16.msrb.mxu0 %v7819_v31  ;;  %v7795_v30 = vor.u32 %v9241_v46, %v7792_v8  ;;  %v5255_v55 = vpop.f32.mrf.mxu1  ;;  %v9373_v31 = vld [vmem:[#allocation8 + $0x4f4] sm:$0xf]  ;;  %v5685_v46 = vld [vmem:[%s12825_s13 + $0x20] sm:$0xff]  ;;  %v8319_v8 = vor.u32 %v9376_v40, %v8318_v38  ;;  %v7723_v49 = vor.u32 %v9223_v41, %v7720_v43  ;;  %v8032_v38 = vld [vmem:[#allocation8 + $0x2c8] sm:$0xf0] }
 0x367   :  { %5637 = vmatpush.bf16.msrb.mxu3 %v8419_v44  ;;  %v5256_v10 = vadd.f32 %v5255_v55, %v5243_v25  ;;  %v8320_v44 = vld [vmem:[#allocation8 + $0x508] sm:$0xf0]  ;;  %v9370_v25 = vld [vmem:[#allocation8 + $0x4d4] sm:$0xf0]  ;;  %v8584_v43 = vld [vmem:[#allocation8 + $0x718] sm:$0xf0] }
 0x368   :  { %5782 = vmatpush.msra.mxu2 %v5695_v28  ;;  %v9229_v28 = vld [vmem:[#allocation8 + $0x74] sm:$0xf]  ;;  %v12341_v56 = vpop.f32.mrf.mxu2  ;;  %v8323_v52 = vor.u32 %v9373_v31, %v8320_v44 }
 0x369   :  { %5560 = vmatpush.bf16.msra.mxu1 %v8391_v57  ;;  %v5269_v45 = vadd.f32 %v12274_v3, %v5256_v10  ;;  %v12336_v3 = vpop.f32.mrf.mxu3  ;;  %v7747_v37 = vor.u32 %v9229_v28, %v7744_v2  ;;  %v7696_v57 = vld [vmem:[#allocation8 + $0x28] sm:$0xf0]  ;;  %v9445_v2 = vld [vmem:[#allocation8 + $0x734] sm:$0xf] }
 0x36a   :  { %5783 = vmatpush.msra.mxu2 %v5694_v32  ;;  %5600 = vmatpush.bf16.msrb.mxu0 %v7795_v30  ;;  %v5348_v32 = vpop.f32.mrf.mxu0  ;;  %v9367_v30 = vld [vmem:[#allocation8 + $0x4c4] sm:$0xf]  ;;  %v7699_v1 = vor.u32 %v9217_v20, %v7696_v57  ;;  %v5712_v41 = vld [vmem:[%s12825_s13 + $0xf8] sm:$0xff] }
 0x36b   :  { %5638 = vmatpush.bf16.msrb.mxu3 %v8395_v58  ;;  %v8296_v58 = vld [vmem:[#allocation8 + $0x4d8] sm:$0xf0] }
 0x36c   :  { %5784 = vmatpush.msra.mxu2 %v5693_v42  ;;  %v8299_v12 = vor.u32 %v9367_v30, %v8296_v58  ;;  %v5709_v57 = vld [vmem:[%s12825_s13 + $0xe0] sm:$0xff]  ;;  %v9289_v58 = vld [vmem:[#allocation8 + $0x254] sm:$0xf] }
 0x36d   :  { %5561 = vmatpush.bf16.msra.mxu1 %v8367_v11  ;;  %v8270_v11 = vld [vmem:[#allocation8 + $0x490] sm:$0xf] }
 0x36e   :  { %5785 = vmatpush.msra.mxu2 %v5692_v21  ;;  %5601 = vmatpush.bf16.msrb.mxu0 %v7771_v53  ;;  %v5257_v42 = vpop.f32.mrf.mxu1  ;;  %v8294_v21 = vld [vmem:[#allocation8 + $0x4c0] sm:$0xf]  ;;  %v9361_v53 = vld [vmem:[#allocation8 + $0x494] sm:$0xf] }
 0x36f   :  { %5639 = vmatpush.bf16.msrb.mxu3 %v8371_v13  ;;  %v8295_v27 = vor.u32 %v9370_v25, %v8294_v21  ;;  %v8272_v13 = vld [vmem:[#allocation8 + $0x4a8] sm:$0xf0]  ;;  %v9439_v42 = vld [vmem:[#allocation8 + $0x704] sm:$0xf] }
 0x370   :  { %5786 = vmatpush.msra.mxu2 %v5691_v48  ;;  %v5282_v48 = vadd.f32 %v12277_v33, %v5269_v45  ;;  %v5683_v33 = vld [vmem:[%s12825_s13 + $0x10] sm:$0xff]  ;;  %v9364_v45 = vld [vmem:[#allocation8 + $0x4a4] sm:$0xf0]  ;;  %v5426_v28 = vpop.f32.mrf.mxu2 }
 0x371   :  { %5562 = vmatpush.bf16.msra.mxu1 %v8343_v22  ;;  %v5335_v55 = vpop.f32.mrf.mxu3  ;;  %v8059_v22 = vor.u32 %v9307_v15, %v8056_v14  ;;  %v8560_v21 = vld [vmem:[#allocation8 + $0x6e8] sm:$0xf0] }
 0x372   :  { %5787 = vmatpush.msra.mxu2 %v5690_v6  ;;  %5602 = vmatpush.bf16.msrb.mxu0 %v7747_v37  ;;  %v5682_v6 = vld [vmem:[%s12825_s13 + $0x8] sm:$0xff]  ;;  %9541 = vtanh.f32 %v5282_v48  ;;  %v8611_v37 = vor.u32 %v9445_v2, %v8608_v36  ;;  %v8536_v55 = vld [vmem:[#allocation8 + $0x6b8] sm:$0xf0] }
 0x373   :  { %5640 = vmatpush.bf16.msrb.mxu3 %v8347_v4  ;;  %v9301_v4 = vld [vmem:[#allocation8 + $0x2b4] sm:$0xf]  ;;  %v5710_v25 = vld [vmem:[%s12825_s13 + $0xe8] sm:$0xff]  ;;  %v5705_v2 = vld [vmem:[%s12825_s13 + $0xc0] sm:$0xff] }
 0x374   :  { %5788 = vmatpush.msra.mxu2 %v5689_v61  ;;  %v8635_v61 = vor.u32 %v9451_v62, %v8632_v29  ;;  %v8035_v44 = vor.u32 %v9301_v4, %v8032_v38  ;;  %v9427_v29 = vld [vmem:[#allocation8 + $0x6a4] sm:$0xf] }
 0x375   :  { %5563 = vmatpush.bf16.msra.mxu1 %v8319_v8  ;;  %v8008_v8 = vld [vmem:[#allocation8 + $0x298] sm:$0xf0] }
 0x376   :  { %5789 = vmatpush.msra.mxu2 %v5688_v39  ;;  %5603 = vmatpush.bf16.msrb.mxu0 %v7723_v49  ;;  %v12356_v10 = vpop.f32.mrf.mxu1  ;;  %v8271_v39 = vor.u32 %v9364_v45, %v8270_v11  ;;  %v3756_v49 = vperm.slane %v12291_v18, 1  ;;  %v7960_v11 = vld [vmem:[#allocation8 + $0x238] sm:$0xf0]  ;;  %v9421_v45 = vld [vmem:[#allocation8 + $0x674] sm:$0xf] }
 0x377   :  { %5641 = vmatpush.bf16.msrb.mxu3 %v8323_v52  ;;  %v9433_v52 = vld [vmem:[#allocation8 + $0x6d4] sm:$0xf] }
 0x378   :  { %5790 = vmatpush.msra.mxu2 %v5687_v17  ;;  %v8275_v17 = vor.u32 %v9361_v53, %v8272_v13  ;;  %v9542_v40 = vpop.eup %9541  ;;  %v8563_v30 = vor.u32 %v9433_v52, %v8560_v21  ;;  %v5295_v62 = vadd.f32 %v12286_v7, %v3756_v49  ;;  %v8539_v7 = vor.u32 %v9427_v29, %v8536_v55  ;;  %v8512_v53 = vld [vmem:[#allocation8 + $0x688] sm:$0xf0]  ;;  %v5701_v49 = vld [vmem:[%s12825_s13 + $0xa0] sm:$0xff] }
 0x379   :  { %5564 = vmatpush.bf16.msra.mxu1 %v8295_v27  ;;  %v12365_v32 = vpop.f32.mrf.mxu3  ;;  %v5708_v27 = vld [vmem:[%s12825_s13 + $0xd8] sm:$0xff]  ;;  %v5706_v13 = vld [vmem:[%s12825_s13 + $0xc8] sm:$0xff]  ;;  %v8515_v36 = vor.u32 %v9421_v45, %v8512_v53  ;;  %v5727_v29 = vld [vmem:[%s12825_s13 + $0x170] sm:$0xff] }
 0x37a   :  { %5791 = vmatpush.msra.mxu2 %v5686_v47  ;;  %5604 = vmatpush.bf16.msrb.mxu0 %v7699_v1  ;;  %v8587_v47 = vor.u32 %v9439_v42, %v8584_v43  ;;  %v12376_v20 = vpop.f32.mrf.mxu0  ;;  %v9271_v43 = vld [vmem:[#allocation8 + $0x1c4] sm:$0xf]  ;;  %v8776_v45 = vld [vmem:[#allocation8 + $0x898] sm:$0xf0] }
 0x37b   :  { %5642 = vmatpush.bf16.msrb.mxu3 %v8299_v12 }
 0x37c   :  { %5792 = vmatpush.msra.mxu2 %v5685_v46  ;;  %v9295_v46 = vld [vmem:[#allocation8 + $0x284] sm:$0xf] }
 0x37d   :  { %5605 = vmatmul.bf16.vlgmr.msrb.gmra.mxu0 %v12228_v19  ;;  %5565 = vmatpush.bf16.msra.mxu1 %v8271_v39  ;;  %v5711_v19 = vld [vmem:[%s12825_s13 + $0xf0] sm:$0xff]  ;;  %v8011_v48 = vor.u32 %v9295_v46, %v8008_v8 }
 0x37e   :  { %5793 = vmatpush.msra.mxu2 %v5684_v60  ;;  %5649 = vmatpush.bf16.msra.mxu0 %v8635_v61  ;;  %v5309_v31 = vpop.f32.mrf.mxu1  ;;  %v7984_v60 = vld [vmem:[#allocation8 + $0x268] sm:$0xf0]  ;;  %v9283_v61 = vld [vmem:[#allocation8 + $0x224] sm:$0xf] }
 0x37f   :  { %5643 = vmatpush.bf16.msrb.mxu3 %v8275_v17  ;;  %v7987_v12 = vor.u32 %v9289_v58, %v7984_v60  ;;  %v7963_v28 = vor.u32 %v9283_v61, %v7960_v11  ;;  %v7936_v39 = vld [vmem:[#allocation8 + $0x208] sm:$0xf0]  ;;  %v9415_v17 = vld [vmem:[#allocation8 + $0x644] sm:$0xf]  ;;  %v7912_v31 = vld [vmem:[#allocation8 + $0x1d8] sm:$0xf0] }
 0x380   :  { %5794 = vmatpush.msra.mxu2 %v5683_v33  ;;  %5566 = vmatmul.bf16.vlgmr.msra.gmra.mxu1 %v12254_v35  ;;  %v5308_v33 = vadd.f32 %v12356_v10, %v5295_v62  ;;  %v7915_v8 = vor.u32 %v9271_v43, %v7912_v31  ;;  %v9499_v58 = vld [vmem:[#allocation8 + $0x8e4] sm:$0xf]  ;;  %v8824_v60 = vld [vmem:[#allocation8 + $0x8f8] sm:$0xf0]  ;;  %v5699_v62 = vld [vmem:[%s12825_s13 + $0x90] sm:$0xff] }
 0x381   :  { %5610 = vmatpush.bf16.msrb.mxu1 %v8059_v22  ;;  %v8488_v22 = vld [vmem:[#allocation8 + $0x658] sm:$0xf0]  ;;  %v8827_v55 = vor.u32 %v9499_v58, %v8824_v60  ;;  %v8656_v58 = vld [vmem:[#allocation8 + $0x7a8] sm:$0xf0] }
 0x382   :  { %5795 = vmatpush.msra.mxu2 %v5682_v6  ;;  %5650 = vmatpush.bf16.msra.mxu0 %v8611_v37  ;;  %v5707_v6 = vld [vmem:[%s12825_s13 + $0xd0] sm:$0xff]  ;;  %v5321_v15 = vadd.f32 %v12284_v5, %v5308_v33  ;;  %v5400_v14 = vpop.f32.mrf.mxu0  ;;  %v5704_v37 = vld [vmem:[%s12825_s13 + $0xb8] sm:$0xff]  ;;  %v8491_v42 = vor.u32 %v9415_v17, %v8488_v22  ;;  %v5725_v61 = vld [vmem:[%s12825_s13 + $0x160] sm:$0xff] }
 0x383   :  { %5801 = vmatpush.msra.mxu3 %v5712_v41  ;;  %v5703_v41 = vld [vmem:[%s12825_s13 + $0xb0] sm:$0xff]  ;;  %v5721_v17 = vld [vmem:[%s12825_s13 + $0x140] sm:$0xff] }
 0x384   :  { %5796 = vmatpush.msra.mxu2 %v5681_v24  ;;  %5644 = vmatmul.bf16.vlgmr.msrb.gmra.mxu3 %v12254_v35  ;;  %v5387_v35 = vpop.f32.mrf.mxu3  ;;  %v9277_v24 = vld [vmem:[#allocation8 + $0x1f4] sm:$0xf]  ;;  %v5334_v4 = vadd.f32 %v12336_v3, %v5321_v15 }
 0x385   :  { %5797 = vmatmul.f32.vlgmr.msra.gmra.mxu2 %v9542_v40  ;;  %5802 = vmatpush.msra.mxu3 %v5711_v19  ;;  %v7939_v40 = vor.u32 %v9277_v24, %v7936_v39  ;;  %v8464_v19 = vld [vmem:[#allocation8 + $0x628] sm:$0xf0]  ;;  %v9493_v33 = vld [vmem:[#allocation8 + $0x8b4] sm:$0xf] }
 0x386   :  { %5611 = vmatpush.bf16.msrb.mxu1 %v8035_v44  ;;  %5651 = vmatpush.bf16.msra.mxu0 %v8587_v47  ;;  %v5359_v1 = vpop.f32.mrf.mxu1  ;;  %v9409_v44 = vld [vmem:[#allocation8 + $0x614] sm:$0xf]  ;;  %v5702_v47 = vld [vmem:[%s12825_s13 + $0xa8] sm:$0xff]  ;;  %v5347_v46 = vadd.f32 %v12321_v63, %v5334_v4 }
 0x387   :  { %5803 = vmatpush.msra.mxu3 %v5710_v25  ;;  %v8467_v52 = vor.u32 %v9409_v44, %v8464_v19  ;;  %v5700_v25 = vld [vmem:[%s12825_s13 + $0x98] sm:$0xff]  ;;  %v5723_v14 = vld [vmem:[%s12825_s13 + $0x150] sm:$0xff]  ;;  %v5722_v39 = vld [vmem:[%s12825_s13 + $0x148] sm:$0xff] }
 0x388   :  { %v12392_v10 = vpop.f32.mrf.mxu2  ;;  %v5360_v21 = vadd.f32 %v5359_v1, %v5347_v46  ;;  %v5728_v63 = vld [vmem:[%s12825_s13 + $0x178] sm:$0xff]  ;;  %v8800_v1 = vld [vmem:[#allocation8 + $0x8c8] sm:$0xf0]  ;;  %v5717_v46 = vld [vmem:[%s12825_s13 + $0x120] sm:$0xff] }
 0x389   :  { %5804 = vmatpush.msra.mxu3 %v5709_v57  ;;  %v7888_v57 = vld [vmem:[#allocation8 + $0x1a8] sm:$0xf0]  ;;  %v8803_v11 = vor.u32 %v9493_v33, %v8800_v1  ;;  %v9469_v44 = vld [vmem:[#allocation8 + $0x7f4] sm:$0xf] }
 0x38a   :  { %5612 = vmatpush.bf16.msrb.mxu1 %v8011_v48  ;;  %5652 = vmatpush.bf16.msra.mxu0 %v8563_v30  ;;  %v9265_v48 = vld [vmem:[#allocation8 + $0x194] sm:$0xf]  ;;  %9543 = vtanh.f32 %v5360_v21  ;;  %v8752_v24 = vld [vmem:[#allocation8 + $0x868] sm:$0xf0]  ;;  %v8680_v21 = vld [vmem:[#allocation8 + $0x7d8] sm:$0xf0] }
 0x38b   :  { %5805 = vmatpush.msra.mxu3 %v5708_v27  ;;  %v7891_v35 = vor.u32 %v9265_v48, %v7888_v57  ;;  %v5698_v27 = vld [vmem:[%s12825_s13 + $0x88] sm:$0xff]  ;;  %v5715_v57 = vld [vmem:[%s12825_s13 + $0x110] sm:$0xff] }
 0x38c   :  { %v12401_v5 = vpop.f32.mrf.mxu3  ;;  %v8704_v19 = vld [vmem:[#allocation8 + $0x808] sm:$0xf0] }
 0x38d   :  { %5806 = vmatpush.msra.mxu3 %v5707_v6  ;;  %v3757_v6 = vperm.slane %v12291_v18, 2  ;;  %v5742_v33 = vld [vmem:[%s12825_s13 + $0x1e8] sm:$0xff] }
 0x38e   :  { %5613 = vmatpush.bf16.msrb.mxu1 %v7987_v12  ;;  %5653 = vmatpush.bf16.msra.mxu0 %v8539_v7  ;;  %v5361_v38 = vpop.f32.mrf.mxu1  ;;  %v5726_v12 = vld [vmem:[%s12825_s13 + $0x168] sm:$0xff]  ;;  %v5697_v7 = vld [vmem:[%s12825_s13 + $0x80] sm:$0xff] }
 0x38f   :  { %5807 = vmatpush.msra.mxu3 %v5706_v13  ;;  %v5724_v13 = vld [vmem:[%s12825_s13 + $0x158] sm:$0xff]  ;;  %v5373_v15 = vadd.f32 %v12298_v23, %v3757_v6 }
 0x390   :  { %v5478_v3 = vpop.f32.mrf.mxu2  ;;  %v9544_v53 = vpop.eup %9543  ;;  %v8728_v38 = vld [vmem:[#allocation8 + $0x838] sm:$0xf0] }
 0x391   :  { %5808 = vmatpush.msra.mxu3 %v5705_v2  ;;  %v5740_v6 = vld [vmem:[%s12825_s13 + $0x1d8] sm:$0xff] }
 0x392   :  { %5614 = vmatpush.bf16.msrb.mxu1 %v7963_v28  ;;  %5654 = vmatpush.bf16.msra.mxu0 %v8515_v36  ;;  %v5386_v36 = vadd.f32 %v12365_v32, %v5373_v15  ;;  %v9475_v32 = vld [vmem:[#allocation8 + $0x824] sm:$0xf] }
 0x393   :  { %5809 = vmatpush.msra.mxu3 %v5704_v37  ;;  %v8731_v43 = vor.u32 %v9475_v32, %v8728_v38  ;;  %v5757_v32 = vld [vmem:[%s12825_s13 + $0x260] sm:$0xff]  ;;  %v5731_v38 = vld [vmem:[%s12825_s13 + $0x190] sm:$0xff] }
 0x394   :  { %v5439_v30 = vpop.f32.mrf.mxu3  ;;  %v5399_v23 = vadd.f32 %v12376_v20, %v5386_v36  ;;  %v5719_v20 = vld [vmem:[%s12825_s13 + $0x130] sm:$0xff]  ;;  %v5734_v36 = vld [vmem:[%s12825_s13 + $0x1a8] sm:$0xff] }
 0x395   :  { %5810 = vmatpush.msra.mxu3 %v5703_v41  ;;  %v9457_v30 = vld [vmem:[#allocation8 + $0x794] sm:$0xf] }
 0x396   :  { %5615 = vmatpush.bf16.msrb.mxu1 %v7939_v40  ;;  %5655 = vmatpush.bf16.msra.mxu0 %v8491_v42  ;;  %v5720_v40 = vld [vmem:[%s12825_s13 + $0x138] sm:$0xff] }
 0x397   :  { %5811 = vmatpush.msra.mxu3 %v5702_v47  ;;  %v5718_v47 = vld [vmem:[%s12825_s13 + $0x128] sm:$0xff] }
 0x399   :  { %5812 = vmatpush.msra.mxu3 %v5701_v49  ;;  %v8707_v49 = vor.u32 %v9469_v44, %v8704_v19  ;;  %v5754_v44 = vld [vmem:[%s12825_s13 + $0x248] sm:$0xff] }
 0x39a   :  { %5616 = vmatpush.bf16.msrb.mxu1 %v7915_v8  ;;  %5656 = vmatpush.bf16.msra.mxu0 %v8467_v52  ;;  %v12448_v28 = vpop.f32.mrf.mxu0 }
 0x39b   :  { %5813 = vmatpush.msra.mxu3 %v5700_v25  ;;  %v5716_v25 = vld [vmem:[%s12825_s13 + $0x118] sm:$0xff] }
 0x39d   :  { %5814 = vmatpush.msra.mxu3 %v5699_v62  ;;  %5657 = vmatmul.bf16.vlgmr.msra.gmra.mxu0 %v12234_v51  ;;  %v9487_v51 = vld [vmem:[#allocation8 + $0x884] sm:$0xf]  ;;  %v5411_v22 = vpop.f32.mrf.mxu1 }
 0x39e   :  { %5821 = vmatpush.msrb.mxu0 %v5728_v63  ;;  %5617 = vmatpush.bf16.msrb.mxu1 %v7891_v35  ;;  %v8779_v2 = vor.u32 %v9487_v51, %v8776_v45  ;;  %v5412_v4 = vadd.f32 %v5411_v22, %v5399_v23  ;;  %v5713_v62 = vld [vmem:[%s12825_s13 + $0x100] sm:$0xff]  ;;  %v8659_v35 = vor.u32 %v9457_v30, %v8656_v58  ;;  %v5759_v23 = vld [vmem:[%s12825_s13 + $0x270] sm:$0xff]  ;;  %v5732_v22 = vld [vmem:[%s12825_s13 + $0x198] sm:$0xff] }
 0x39f   :  { %5815 = vmatpush.msra.mxu3 %v5698_v27  ;;  %v5743_v27 = vld [vmem:[%s12825_s13 + $0x1f0] sm:$0xff]  ;;  %v5737_v45 = vld [vmem:[%s12825_s13 + $0x1c0] sm:$0xff] }
 0x3a0   :  { %5822 = vmatpush.msrb.mxu0 %v5727_v29  ;;  %v5425_v31 = vadd.f32 %v12341_v56, %v5412_v4  ;;  %v9463_v56 = vld [vmem:[#allocation8 + $0x7c4] sm:$0xf]  ;;  %v5744_v29 = vld [vmem:[%s12825_s13 + $0x1f8] sm:$0xff] }
 0x3a1   :  { %5816 = vmatpush.msra.mxu3 %v5697_v7  ;;  %5618 = vmatmul.bf16.vlgmr.msrb.gmra.mxu1 %v12231_v9  ;;  %v9481_v9 = vld [vmem:[#allocation8 + $0x854] sm:$0xf]  ;;  %v8683_v63 = vor.u32 %v9463_v56, %v8680_v21 }
 0x3a2   :  { %5662 = vmatpush.bf16.msra.mxu1 %v8827_v55  ;;  %5823 = vmatpush.msrb.mxu0 %v5726_v12  ;;  %v8755_v37 = vor.u32 %v9481_v9, %v8752_v24  ;;  %v5452_v42 = vpop.f32.mrf.mxu0  ;;  %v5438_v52 = vadd.f32 %v12401_v5, %v5425_v31  ;;  %v5714_v5 = vld [vmem:[%s12825_s13 + $0x108] sm:$0xff]  ;;  %v5741_v12 = vld [vmem:[%s12825_s13 + $0x1e0] sm:$0xff]  ;;  %v3758_v9 = vperm.slane %v12291_v18, 3 }
 0x3a3   :  { %5817 = vmatmul.f32.vlgmr.msra.gmra.mxu3 %v9544_v53  ;;  %v5736_v53 = vld [vmem:[%s12825_s13 + $0x1b8] sm:$0xff]  ;;  %v5755_v42 = vld [vmem:[%s12825_s13 + $0x250] sm:$0xff] }
 0x3a4   :  { %5824 = vmatpush.msrb.mxu0 %v5725_v61  ;;  %9545 = vtanh.f32 %v5438_v52  ;;  %v5738_v61 = vld [vmem:[%s12825_s13 + $0x1c8] sm:$0xff]  ;;  %v5751_v52 = vld [vmem:[%s12825_s13 + $0x230] sm:$0xff] }
 0x3a5   :  { %v5413_v8 = vpop.f32.mrf.mxu1 }
 0x3a6   :  { %5663 = vmatpush.bf16.msra.mxu1 %v8803_v11  ;;  %5825 = vmatpush.msrb.mxu0 %v5724_v13 }
 0x3a7   :  { %v12470_v3 = vpop.f32.mrf.mxu3 }
 0x3a8   :  { %5826 = vmatpush.msrb.mxu0 %v5723_v14  ;;  %v12461_v41 = vpop.f32.mrf.mxu2  ;;  %v5735_v14 = vld [vmem:[%s12825_s13 + $0x1b0] sm:$0xff] }
 0x3aa   :  { %5664 = vmatpush.bf16.msra.mxu1 %v8779_v2  ;;  %5827 = vmatpush.msrb.mxu0 %v5722_v39  ;;  %v9546_v55 = vpop.eup %9545  ;;  %v5760_v2 = vld [vmem:[%s12825_s13 + $0x278] sm:$0xff]  ;;  %v5733_v39 = vld [vmem:[%s12825_s13 + $0x1a0] sm:$0xff] }
 0x3ab   :  { %5861 = vmatpush.msrb.mxu2 %v5760_v2  ;;  %v5771_v2 = vld [vmem:[%s12825_s13 + $0x2d0] sm:$0xff] }
 0x3ac   :  { %5828 = vmatpush.msrb.mxu0 %v5721_v17  ;;  %v5758_v17 = vld [vmem:[%s12825_s13 + $0x268] sm:$0xff] }
 0x3ad   :  { %5862 = vmatpush.msrb.mxu2 %v5759_v23  ;;  %v5767_v23 = vld [vmem:[%s12825_s13 + $0x2b0] sm:$0xff] }
 0x3ae   :  { %5665 = vmatpush.bf16.msra.mxu1 %v8755_v37  ;;  %5829 = vmatpush.msrb.mxu0 %v5720_v40  ;;  %v5451_v37 = vadd.f32 %v12448_v28, %v3758_v9  ;;  %v5730_v28 = vld [vmem:[%s12825_s13 + $0x188] sm:$0xff] }
 0x3af   :  { %v5491_v60 = vpop.f32.mrf.mxu3  ;;  %5863 = vmatpush.msrb.mxu2 %v5758_v17  ;;  %v5770_v9 = vld [vmem:[%s12825_s13 + $0x2c8] sm:$0xff] }
 0x3b0   :  { %5830 = vmatpush.msrb.mxu0 %v5719_v20  ;;  %v5530_v48 = vpop.f32.mrf.mxu2  ;;  %v5756_v20 = vld [vmem:[%s12825_s13 + $0x258] sm:$0xff]  ;;  %v5766_v17 = vld [vmem:[%s12825_s13 + $0x2a8] sm:$0xff] }
 0x3b1   :  { %5864 = vmatpush.msrb.mxu2 %v5757_v32  ;;  %v5749_v48 = vld [vmem:[%s12825_s13 + $0x220] sm:$0xff]  ;;  %v5764_v32 = vld [vmem:[%s12825_s13 + $0x298] sm:$0xff] }
 0x3b2   :  { %5666 = vmatpush.bf16.msra.mxu1 %v8731_v43  ;;  %5831 = vmatpush.msrb.mxu0 %v5718_v47  ;;  %v5729_v43 = vld [vmem:[%s12825_s13 + $0x180] sm:$0xff] }
 0x3b3   :  { %5865 = vmatpush.msrb.mxu2 %v5756_v20  ;;  %v5753_v47 = vld [vmem:[%s12825_s13 + $0x240] sm:$0xff] }
 0x3b4   :  { %5832 = vmatpush.msrb.mxu0 %v5717_v46  ;;  %v5752_v46 = vld [vmem:[%s12825_s13 + $0x238] sm:$0xff] }
 0x3b5   :  { %5866 = vmatpush.msrb.mxu2 %v5755_v42 }
 0x3b6   :  { %5667 = vmatpush.bf16.msra.mxu1 %v8707_v49  ;;  %5833 = vmatpush.msrb.mxu0 %v5716_v25 }
 0x3b7   :  { %5867 = vmatpush.msrb.mxu2 %v5754_v44 }
 0x3b8   :  { %5834 = vmatpush.msrb.mxu0 %v5715_v57  ;;  %v5748_v57 = vld [vmem:[%s12825_s13 + $0x218] sm:$0xff] }
 0x3b9   :  { %5868 = vmatpush.msrb.mxu2 %v5753_v47 }
 0x3ba   :  { %5668 = vmatpush.bf16.msra.mxu1 %v8683_v63  ;;  %5835 = vmatpush.msrb.mxu0 %v5714_v5  ;;  %v5502_v1 = vpop.f32.mrf.mxu0  ;;  %v5747_v63 = vld [vmem:[%s12825_s13 + $0x210] sm:$0xff]  ;;  %v5746_v5 = vld [vmem:[%s12825_s13 + $0x208] sm:$0xff] }
 0x3bb   :  { %5869 = vmatpush.msrb.mxu2 %v5752_v46 }
 0x3bc   :  { %5836 = vmatpush.msrb.mxu0 %v5713_v62  ;;  %v5745_v62 = vld [vmem:[%s12825_s13 + $0x200] sm:$0xff] }
 0x3bd   :  { %5837 = vmatmul.f32.vlgmr.msrb.gmra.mxu0 %v9546_v55  ;;  %v5463_v7 = vpop.f32.mrf.mxu1  ;;  %5870 = vmatpush.msrb.mxu2 %v5751_v52  ;;  %v3759_v55 = vperm.slane %v12291_v18, 4  ;;  %v5775_v18 = vld [vmem:[%s12825_s13 + $0x2f0] sm:$0xff] }
 0x3be   :  { %5669 = vmatpush.bf16.msra.mxu1 %v8659_v35  ;;  %v5464_v40 = vadd.f32 %v5463_v7, %v5451_v37  ;;  %v5765_v37 = vld [vmem:[%s12825_s13 + $0x2a0] sm:$0xff] }
 0x3c0   :  { %v5477_v31 = vadd.f32 %v12392_v10, %v5464_v40  ;;  %v5762_v40 = vld [vmem:[%s12825_s13 + $0x288] sm:$0xff] }
 0x3c1   :  { %5670 = vmatmul.bf16.vlgmr.msra.gmra.mxu1 %v12237_v0  ;;  %v5739_v0 = vld [vmem:[%s12825_s13 + $0x1d0] sm:$0xff] }
 0x3c2   :  { %5841 = vmatpush.msrb.mxu1 %v5744_v29  ;;  %v5504_v51 = vpop.f32.mrf.mxu0  ;;  %v5490_v19 = vadd.f32 %v12470_v3, %v5477_v31  ;;  %v5750_v3 = vld [vmem:[%s12825_s13 + $0x228] sm:$0xff] }
 0x3c3   :  { %5871 = vmatpush.msrb.mxu2 %v5750_v3  ;;  %v5950_v3 = vld [vmem:[%s12829_s17 + $0x78] sm:$0xff] }
 0x3c4   :  { %5842 = vmatpush.msrb.mxu1 %v5743_v27  ;;  %v5503_v10 = vadd.f32 %v5502_v1, %v5490_v19  ;;  %v5529_v27 = vadd.f32 %v12461_v41, %v3759_v55  ;;  %5955 = vmatpush.msra.mxu0 %v5950_v3  ;;  %v5938_v55 = vld [vmem:[%s12829_s17 + $0x18] sm:$0xff] }
 0x3c5   :  { %v5465_v15 = vpop.f32.mrf.mxu1  ;;  %5872 = vmatpush.msrb.mxu2 %v5749_v48  ;;  %v5947_v48 = vld [vmem:[%s12829_s17 + $0x60] sm:$0xff] }
 0x3c6   :  { %5843 = vmatpush.msrb.mxu1 %v5742_v33  ;;  %v5772_v15 = vld [vmem:[%s12825_s13 + $0x2d8] sm:$0xff] }
 0x3c7   :  { %v12518_v13 = vpop.f32.mrf.mxu3  ;;  %5873 = vmatpush.msrb.mxu2 %v5748_v57  ;;  %v5946_v57 = vld [vmem:[%s12829_s17 + $0x58] sm:$0xff] }
 0x3c8   :  { %5844 = vmatpush.msrb.mxu1 %v5741_v12  ;;  %v12510_v11 = vpop.f32.mrf.mxu2  ;;  %v5542_v1 = vadd.f32 %v12518_v13, %v5529_v27  ;;  %v5774_v13 = vld [vmem:[%s12825_s13 + $0x2e8] sm:$0xff] }
 0x3c9   :  { %5874 = vmatpush.msrb.mxu2 %v5747_v63  ;;  %v5945_v63 = vld [vmem:[%s12829_s17 + $0x50] sm:$0xff] }
 0x3ca   :  { %5845 = vmatpush.msrb.mxu1 %v5740_v6 }
 0x3cb   :  { %5875 = vmatpush.msrb.mxu2 %v5746_v5  ;;  %v5942_v5 = vld [vmem:[%s12829_s17 + $0x38] sm:$0xff] }
 0x3cc   :  { %5846 = vmatpush.msrb.mxu1 %v5739_v0 }
 0x3cd   :  { %5876 = vmatpush.msrb.mxu2 %v5745_v62  ;;  %v5940_v62 = vld [vmem:[%s12829_s17 + $0x28] sm:$0xff] }
 0x3ce   :  { %5847 = vmatpush.msrb.mxu1 %v5738_v61 }
 0x3cf   :  { %v5543_v4 = vpop.f32.mrf.mxu3 }
 0x3d0   :  { %5848 = vmatpush.msrb.mxu1 %v5737_v45  ;;  %v5582_v24 = vpop.f32.mrf.mxu2  ;;  %v5776_v45 = vld [vmem:[%s12825_s13 + $0x2f8] sm:$0xff] }
 0x3d1   :  { %5881 = vmatpush.msrb.mxu3 %v5776_v45  ;;  %v5769_v24 = vld [vmem:[%s12825_s13 + $0x2c0] sm:$0xff] }
 0x3d2   :  { %5849 = vmatpush.msrb.mxu1 %v5736_v53  ;;  %v5935_v45 = vld [vmem:[%s12829_s17] sm:$0xff] }
 0x3d3   :  { %5882 = vmatpush.msrb.mxu3 %v5775_v18 }
 0x3d4   :  { %5850 = vmatpush.msrb.mxu1 %v5735_v14 }
 0x3d5   :  { %5883 = vmatpush.msrb.mxu3 %v5774_v13 }
 0x3d6   :  { %5851 = vmatpush.msrb.mxu1 %v5734_v36 }
 0x3d8   :  { %5852 = vmatpush.msrb.mxu1 %v5733_v39  ;;  %v5768_v39 = vld [vmem:[%s12825_s13 + $0x2b8] sm:$0xff] }
 0x3da   :  { %5853 = vmatpush.msrb.mxu1 %v5732_v22  ;;  %v5554_v8 = vpop.f32.mrf.mxu0 }
 0x3db   :  { %v5555_v12 = vadd.f32 %v5554_v8, %v5542_v1  ;;  %v5937_v1 = vld [vmem:[%s12829_s17 + $0x10] sm:$0xff] }
 0x3dc   :  { %5854 = vmatpush.msrb.mxu1 %v5731_v38  ;;  %v5763_v38 = vld [vmem:[%s12825_s13 + $0x290] sm:$0xff] }
 0x3dd   :  { %v5515_v49 = vpop.f32.mrf.mxu1 }
 0x3de   :  { %5855 = vmatpush.msrb.mxu1 %v5730_v28  ;;  %v5516_v56 = vadd.f32 %v5515_v49, %v5503_v10  ;;  %v5761_v28 = vld [vmem:[%s12825_s13 + $0x280] sm:$0xff] }
 0x3e0   :  { %5856 = vmatpush.msrb.mxu1 %v5729_v43  ;;  %9547 = vtanh.f32 %v5516_v56  ;;  %v9564_v43 = vld [vmem:[%s12824_s12] sm:$0x3f] }
 0x3e1   :  { %v3760_v31 = vperm.slane %v9564_v43, 5  ;;  %v5982_v43 = vld [vmem:[%s12831_s19 + $0x30] sm:$0xff] }
 0x3e2   :  { %v5556_v25 = vpop.f32.mrf.mxu0 }
 0x3e3   :  { %v5949_v25 = vld [vmem:[%s12829_s17 + $0x70] sm:$0xff] }
 0x3e4   :  { %5956 = vmatpush.msra.mxu0 %v5949_v25 }
 0x3e5   :  { %v5517_v58 = vpop.f32.mrf.mxu1 }
 0x3e6   :  { %v9548_v60 = vpop.eup %9547  ;;  %v5943_v58 = vld [vmem:[%s12829_s17 + $0x40] sm:$0xff] }
 0x3e7   :  { %v5593_v30 = vpop.f32.mrf.mxu3  ;;  %5857 = vmatmul.f32.vlgmr.msrb.gmra.mxu1 %v9548_v60  ;;  %v5941_v60 = vld [vmem:[%s12829_s17 + $0x30] sm:$0xff] }
 0x3e8   :  { %v12578_v21 = vpop.f32.mrf.mxu2 }
 0x3ef   :  { %v5595_v29 = vpop.f32.mrf.mxu3 }
 0x3f0   :  { %v5634_v35 = vpop.f32.mrf.mxu2  ;;  %v9521_v29 = vld [vmem:[#allocation10] ss:$0 sm:$0xff] }
 0x3f1   :  { %v5939_v35 = vld [vmem:[%s12829_s17 + $0x20] sm:$0xff] }
 0x3fa   :  { %v5606_v33 = vpop.f32.mrf.mxu0 }
 0x3fb   :  { %v5607_v44 = vadd.f32 %v5606_v33, %v3760_v31  ;;  %v9520_v33 = vld [vmem:[%s12858_s23] ss:$0 sm:$0xff] }
 0x3fd   :  { %v5567_v6 = vpop.f32.mrf.mxu1 }
 0x3fe   :  { %v5568_v7 = vadd.f32 %v5567_v6, %v5555_v12 }
 0x400   :  { %v5581_v0 = vadd.f32 %v12510_v11, %v5568_v7  ;;  %v5773_v11 = vld [vmem:[%s12825_s13 + $0x2e0] sm:$0xff]  ;;  %v5936_v7 = vld [vmem:[%s12829_s17 + $0x8] sm:$0xff] }
 0x401   :  { %5884 = vmatpush.msrb.mxu3 %v5773_v11 }
 0x402   :  { %v5608_v61 = vpop.f32.mrf.mxu0  ;;  %v5594_v51 = vadd.f32 %v5593_v30, %v5581_v0  ;;  %v5944_v30 = vld [vmem:[%s12829_s17 + $0x48] sm:$0xff] }
 0x403   :  { %5885 = vmatpush.msrb.mxu3 %v5772_v15  ;;  %v2948_v61 = vadd.f32 %v9520_v33, %v12240_v34  ;;  %v6029_v33 = vld [vmem:[#allocation17 + $0x20] sm:$0xff] }
 0x404   :  { %9549 = vtanh.f32 %v5594_v51 }
 0x405   :  { %v5569_v53 = vpop.f32.mrf.mxu1  ;;  %5886 = vmatpush.msrb.mxu3 %v5771_v2  ;;  %v2968_v11 = vadd.f32 %v12248_v54, %v2948_v61  ;;  %v5991_v54 = vld [vmem:[%s12831_s19 + $0x78] sm:$0xff]  ;;  %v6023_v61 = vld [vmem:[%s12833_s21 + $0x30] sm:$0xff] }
 0x406   :  { %5996 = vmatpush.msra.mxu1 %v5991_v54  ;;  %v6081_v54 = vld [vmem:[#allocation19 + $0x8] sm:$0xff] }
 0x407   :  { %v5645_v41 = vpop.f32.mrf.mxu3  ;;  %5887 = vmatpush.msrb.mxu3 %v5770_v9  ;;  %v2988_v2 = vadd.f32 %v12224_v16, %v2968_v11  ;;  %v9882_v16 = vmov 64.0   ;;  %v6021_v11 = vld [vmem:[%s12833_s21 + $0x20] sm:$0xff] }
 0x408   :  { %v5798_v27 = vpop.f32.mrf.mxu2 }
 0x409   :  { %5888 = vmatpush.msrb.mxu3 %v5769_v24  ;;  %v5799_v6 = vadd.f32 %v9521_v29, %v5798_v27  ;;  %v3008_v9 = vadd.f32 %v12226_v59, %v2988_v2  ;;  %v5990_v59 = vld [vmem:[%s12831_s19 + $0x70] sm:$0xff]  ;;  %v6032_v29 = vld [vmem:[#allocation17 + $0x38] sm:$0xff] }
 0x40a   :  { %v9550_v14 = vpop.eup %9549  ;;  %5997 = vmatpush.msra.mxu1 %v5990_v59  ;;  %6045 = vmatpush.msra.mxu2 %v6032_v29  ;;  %v6030_v27 = vld [vmem:[#allocation17 + $0x28] sm:$0xff] }
 0x40b   :  { %5877 = vmatmul.f32.vlgmr.msrb.gmra.mxu2 %v9550_v14  ;;  %5889 = vmatpush.msrb.mxu3 %v5768_v39  ;;  %v3028_v39 = vadd.f32 %v12242_v50, %v3008_v9  ;;  %v5989_v50 = vld [vmem:[%s12831_s19 + $0x68] sm:$0xff]  ;;  %v6019_v2 = vld [vmem:[%s12833_s21 + $0x10] sm:$0xff] }
 0x40c   :  { %5998 = vmatpush.msra.mxu1 %v5989_v50  ;;  %v6018_v9 = vld [vmem:[%s12833_s21 + $0x8] sm:$0xff] }
 0x40d   :  { %5890 = vmatpush.msrb.mxu3 %v5767_v23  ;;  %v3048_v23 = vadd.f32 %v12252_v26, %v3028_v39  ;;  %v5988_v26 = vld [vmem:[%s12831_s19 + $0x60] sm:$0xff]  ;;  %v6080_v50 = vld [vmem:[#allocation19] sm:$0xff] }
 0x40e   :  { %5999 = vmatpush.msra.mxu1 %v5988_v26 }
 0x40f   :  { %v5647_v36 = vpop.f32.mrf.mxu3  ;;  %5891 = vmatpush.msrb.mxu3 %v5766_v17  ;;  %v3053_v17 = vsel %vm3052_vm0, %v3048_v23, 0.0 }
 0x411   :  { %5892 = vmatpush.msrb.mxu3 %v5765_v37 }
 0x413   :  { %5893 = vmatpush.msrb.mxu3 %v5764_v32  ;;  %v5986_v32 = vld [vmem:[%s12831_s19 + $0x50] sm:$0xff] }
 0x415   :  { %5894 = vmatpush.msrb.mxu3 %v5763_v38 }
 0x417   :  { %5895 = vmatpush.msrb.mxu3 %v5762_v40  ;;  %v5985_v40 = vld [vmem:[%s12831_s19 + $0x48] sm:$0xff] }
 0x419   :  { %5896 = vmatpush.msrb.mxu3 %v5761_v28 }
 0x41a   :  { %v5658_v22 = vpop.f32.mrf.mxu0 }
 0x41e   :  { %v5619_v4 = vpop.f32.mrf.mxu1 }
 0x41f   :  { %v5620_v19 = vadd.f32 %v5619_v4, %v5607_v44  ;;  %v5987_v4 = vld [vmem:[%s12831_s19 + $0x58] sm:$0xff]  ;;  %v5981_v44 = vld [vmem:[%s12831_s19 + $0x28] sm:$0xff] }
 0x420   :  { %6000 = vmatpush.msra.mxu1 %v5987_v4 }
 0x421   :  { %v5633_v47 = vadd.f32 %v12578_v21, %v5620_v19  ;;  %v5948_v21 = vld [vmem:[%s12829_s17 + $0x68] sm:$0xff]  ;;  %v5980_v19 = vld [vmem:[%s12831_s19 + $0x20] sm:$0xff] }
 0x422   :  { %v5660_v20 = vpop.f32.mrf.mxu0  ;;  %5957 = vmatpush.msra.mxu0 %v5948_v21  ;;  %6001 = vmatpush.msra.mxu1 %v5986_v32 }
 0x423   :  { %v5646_v46 = vadd.f32 %v5645_v41, %v5633_v47  ;;  %v5934_v41 = vld [vmem:[%s12859_s0] sm:$0x3] }
 0x424   :  { %5958 = vmatpush.msra.mxu0 %v5947_v48  ;;  %v5984_v20 = vld [vmem:[%s12831_s19 + $0x40] sm:$0xff]  ;;  %6002 = vmatpush.msra.mxu1 %v5985_v40 }
 0x425   :  { %v5659_v8 = vadd.f32 %v5658_v22, %v5646_v46  ;;  %v5979_v46 = vld [vmem:[%s12831_s19 + $0x18] sm:$0xff]  ;;  %v5976_v48 = vld [vmem:[%s12831_s19] sm:$0xff] }
 0x426   :  { %v5621_v42 = vpop.f32.mrf.mxu1  ;;  %5959 = vmatpush.msra.mxu0 %v5946_v57  ;;  %v5818_v12 = vpop.f32.mrf.mxu3  ;;  %6003 = vmatpush.msra.mxu1 %v5984_v20  ;;  %v9523_v20 = vld [vmem:[#allocation11] ss:$0 sm:$0xff] }
 0x427   :  { %v5819_v51 = vadd.f32 %v5818_v12, %v5799_v6  ;;  %v5983_v42 = vld [vmem:[%s12831_s19 + $0x38] sm:$0xff] }
 0x428   :  { %5960 = vmatpush.msra.mxu0 %v5945_v63  ;;  %6004 = vmatpush.msra.mxu1 %v5983_v42  ;;  %v6027_v12 = vld [vmem:[#allocation17 + $0x10] sm:$0xff]  ;;  %v6026_v6 = vld [vmem:[#allocation17 + $0x8] sm:$0xff] }
 0x42a   :  { %5961 = vmatpush.msra.mxu0 %v5944_v30  ;;  %6005 = vmatpush.msra.mxu1 %v5982_v43  ;;  %v9524_v43 = vld [vmem:[#allocation13] ss:$0 sm:$0xff] }
 0x42c   :  { %5962 = vmatpush.msra.mxu0 %v5943_v58  ;;  %6006 = vmatpush.msra.mxu1 %v5981_v44 }
 0x42e   :  { %5963 = vmatpush.msra.mxu0 %v5942_v5  ;;  %6007 = vmatpush.msra.mxu1 %v5980_v19 }
 0x430   :  { %5964 = vmatpush.msra.mxu0 %v5941_v60  ;;  %6008 = vmatpush.msra.mxu1 %v5979_v46 }
 0x432   :  { %5965 = vmatpush.msra.mxu0 %v5940_v62 }
 0x434   :  { %5966 = vmatpush.msra.mxu0 %v5939_v35 }
 0x436   :  { %5967 = vmatpush.msra.mxu0 %v5938_v55  ;;  %v6031_v55 = vld [vmem:[#allocation17 + $0x30] sm:$0xff] }
 0x437   :  { %6046 = vmatpush.msra.mxu2 %v6031_v55 }
 0x438   :  { %5968 = vmatpush.msra.mxu0 %v5937_v1  ;;  %v6028_v1 = vld [vmem:[#allocation17 + $0x18] sm:$0xff] }
 0x439   :  { %6047 = vmatpush.msra.mxu2 %v6030_v27 }
 0x43a   :  { %v5838_v0 = vpop.f32.mrf.mxu0  ;;  %5969 = vmatpush.msra.mxu0 %v5936_v7  ;;  %v6024_v7 = vld [vmem:[%s12833_s21 + $0x38] sm:$0xff] }
 0x43b   :  { %v5839_v53 = vadd.f32 %v5838_v0, %v5819_v51  ;;  %6048 = vmatpush.msra.mxu2 %v6029_v33  ;;  %6068 = vmatpush.msra.mxu3 %v6024_v7  ;;  %v6025_v0 = vld [vmem:[#allocation17] sm:$0xff]  ;;  %v6087_v51 = vld [vmem:[#allocation19 + $0x38] sm:$0xff] }
 0x43c   :  { %5970 = vmatpush.msra.mxu0 %v5935_v45 }
 0x43d   :  { %5971 = vmatmul.f32.vlgmr.msra.gmra.mxu0 %v5934_v41  ;;  %6049 = vmatpush.msra.mxu2 %v6028_v1  ;;  %v6022_v41 = vld [vmem:[%s12833_s21 + $0x28] sm:$0xff] }
 0x43e   :  { %v5671_v10 = vpop.f32.mrf.mxu1  ;;  %6069 = vmatpush.msra.mxu3 %v6023_v61 }
 0x43f   :  { %v5672_v49 = vadd.f32 %v5671_v10, %v5659_v8  ;;  %v9522_v10 = vld [vmem:[#allocation14] ss:$0 sm:$0xff]  ;;  %6050 = vmatpush.msra.mxu2 %v6027_v12 }
 0x440   :  { %6070 = vmatpush.msra.mxu3 %v6022_v41 }
 0x441   :  { %9551 = vtanh.f32 %v5672_v49  ;;  %v5978_v49 = vld [vmem:[%s12831_s19 + $0x10] sm:$0xff]  ;;  %6051 = vmatpush.msra.mxu2 %v6026_v6 }
 0x442   :  { %9553 = vrcp.f32 %v9882_v16  ;;  %6009 = vmatpush.msra.mxu1 %v5978_v49  ;;  %6071 = vmatpush.msra.mxu3 %v6021_v11 }
 0x443   :  { %6052 = vmatpush.msra.mxu2 %v6025_v0 }
 0x445   :  { %6099 = vmatpush.msrb.mxu2 %v6087_v51 }
 0x446   :  { %v5673_v52 = vpop.f32.mrf.mxu1 }
 0x447   :  { %v9552_v56 = vpop.eup %9551 }
 0x448   :  { %5897 = vmatmul.f32.vlgmr.msrb.gmra.mxu3 %v9552_v56  ;;  %v9554_v22 = vpop.eup %9553  ;;  %v5977_v56 = vld [vmem:[%s12831_s19 + $0x8] sm:$0xff] }
 0x449   :  { %v3057_v37 = vmul.f32 64.0, %v9554_v22  ;;  %vm3061_vm1 = vweird.f32 %v9554_v22  ;;  %6010 = vmatpush.msra.mxu1 %v5977_v56 }
 0x44b   :  { %v3058_v38 = vsub.f32 1.0, %v3057_v37  ;;  %6011 = vmatpush.msra.mxu1 %v5976_v48 }
 0x44d   :  { %v3059_v28 = vmul.f32 %v9554_v22, %v3058_v38 }
 0x44f   :  { %v3060_v31 = vadd.f32 %v9554_v22, %v3059_v28 }
 0x451   :  { %v12749_v47 = vsel %vm3061_vm1, %v9554_v22, %v3060_v31 }
 0x464   :  { %v5858_v18 = vpop.f32.mrf.mxu1 }
 0x465   :  { %v5859_v15 = vadd.f32 %v5858_v18, %v5839_v53  ;;  %v6086_v53 = vld [vmem:[#allocation19 + $0x30] sm:$0xff] }
 0x466   :  { %6100 = vmatpush.msrb.mxu2 %v6086_v53 }
 0x48e   :  { %v5878_v13 = vpop.f32.mrf.mxu2 }
 0x48f   :  { %v5879_v14 = vadd.f32 %v5878_v13, %v5859_v15  ;;  %v6085_v15 = vld [vmem:[#allocation19 + $0x28] sm:$0xff] }
 0x490   :  { %6101 = vmatpush.msrb.mxu2 %v6085_v15 }
 0x4ba   :  { %v5972_v25 = vpop.f32.mrf.mxu0 }
 0x4bb   :  { %v5973_v21 = vadd.f32 %v9522_v10, %v5972_v25  ;;  %v9525_v10 = vld [vmem:[%s12860_s28] ss:$0 sm:$0xff]  ;;  %v9527_v25 = vld [vmem:[#allocation16] ss:$0 sm:$0xff] }
 0x4bd   :  { %v5975_v63 = vmax.f32 %v5973_v21, 0.0 }
 0x4bf   :  { %6012 = vmatmul.f32.vlgmr.msra.gmra.mxu1 %v5975_v63 }
 0x4cb   :  { %v5898_v34 = vpop.f32.mrf.mxu3 }
 0x4cc   :  { %v5899_v36 = vadd.f32 %v5898_v34, %v5879_v14  ;;  %v6020_v14 = vld [vmem:[%s12833_s21 + $0x18] sm:$0xff]  ;;  %v6084_v34 = vld [vmem:[#allocation19 + $0x20] sm:$0xff] }
 0x4cd   :  { %6072 = vmatpush.msra.mxu3 %v6020_v14  ;;  %6102 = vmatpush.msrb.mxu2 %v6084_v34 }
 0x4ce   :  { %v5903_v24 = vsel %vm3052_vm0, %v5899_v36, 0.0 }
 0x4cf   :  { %5904 = vadd.xlane.f32.xlu0 %v5903_v24  ;;  %v6082_v24 = vld [vmem:[#allocation19 + $0x10] sm:$0xff]  ;;  %6073 = vmatpush.msra.mxu3 %v6019_v2 }
 0x4d1   :  { %6074 = vmatpush.msra.mxu3 %v6018_v9 }
 0x4d7   :  { %3054 = vadd.xlane.f32.xlu0 %v3053_v17  ;;  %v6017_v17 = vld [vmem:[%s12833_s21] sm:$0xff] }
 0x4d8   :  { %6075 = vmatpush.msra.mxu3 %v6017_v17 }
 0x542   :  { %v5905_v8 = vpop.xlane.xlu0 %5904 }
 0x543   :  { %v5906_v52 = vmul.f32 %v5905_v8, %v12749_v47 }
 0x545   :  { %v12761_v3 = vsub.f32 %v5899_v36, %v5906_v52  ;;  %v6083_v36 = vld [vmem:[#allocation19 + $0x18] sm:$0xff]  ;;  %v9526_v52 = vld [vmem:[#allocation7] ss:$0 sm:$0xff] }
 0x546   :  { %6103 = vmatpush.msrb.mxu2 %v6083_v36 }
 0x547   :  { %v5908_v57 = vmul.f32 %v12761_v3, %v12761_v3 }
 0x548   :  { %6104 = vmatpush.msrb.mxu2 %v6082_v24 }
 0x549   :  { %v5909_v30 = vsel %vm3052_vm0, %v5908_v57, 0.0 }
 0x54a   :  { %5910 = vadd.xlane.f32.xlu1 %v5909_v30  ;;  %v3055_v58 = vpop.xlane.xlu0 %3054  ;;  %6105 = vmatpush.msrb.mxu2 %v6081_v54 }
 0x54b   :  { %v3063_v5 = vmul.f32 %v12749_v47, %v3055_v58 }
 0x54c   :  { %6106 = vmatpush.msrb.mxu2 %v6080_v50 }
 0x54d   :  { %v12770_v60 = vsub.f32 %v3048_v23, %v3063_v5 }
 0x54f   :  { %v3065_v62 = vmul.f32 %v12770_v60, %v12770_v60 }
 0x551   :  { %v3066_v35 = vsel %vm3052_vm0, %v3065_v62, 0.0 }
 0x552   :  { %3067 = vadd.xlane.f32.xlu1 %v3066_v35 }
 0x5bd   :  { %v5911_v45 = vpop.xlane.xlu1 %5910 }
 0x5be   :  { %v5912_v18 = vmul.f32 %v5911_v45, %v12749_v47 }
 0x5c0   :  { %v5913_v13 = vadd.f32 1e-05, %v5912_v18 }
 0x5c2   :  { %9555 = vrsqrt.f32 %v5913_v13  ;;  %vm5920_vm3 = vweird.f32 %v5913_v13 }
 0x5c5   :  { %v3068_v39 = vpop.xlane.xlu1 %3067 }
 0x5c6   :  { %v3069_v23 = vmul.f32 %v3068_v39, %v12749_v47 }
 0x5c8   :  { %v9556_v16 = vpop.eup %9555  ;;  %v3070_v59 = vadd.f32 1e-05, %v3069_v23 }
 0x5c9   :  { %v5915_v22 = vmul.f32 %v9556_v16, %v5913_v13  ;;  %vm5921_vm2 = vweird.f32 %v9556_v16 }
 0x5ca   :  { %9557 = vrsqrt.f32 %v3070_v59  ;;  %vm5922_vm4 = vmor %vm5920_vm3, %vm5921_vm2  ;;  %vm3077_vm6 = vweird.f32 %v3070_v59 }
 0x5cb   :  { %v5916_v26 = vmul.f32 %v9556_v16, %v5915_v22 }
 0x5cd   :  { %v5917_v37 = vmul.f32 0.5, %v5916_v26 }
 0x5cf   :  { %v5918_v4 = vsub.f32 1.5, %v5917_v37 }
 0x5d0   :  { %v9558_v32 = vpop.eup %9557 }
 0x5d1   :  { %v5919_v38 = vmul.f32 %v9556_v16, %v5918_v4  ;;  %v3072_v40 = vmul.f32 %v9558_v32, %v3070_v59  ;;  %vm3078_vm5 = vweird.f32 %v9558_v32 }
 0x5d2   :  { %vm3079_vm7 = vmor %vm3077_vm6, %vm3078_vm5 }
 0x5d3   :  { %v5923_v28 = vsel %vm5922_vm4, %v9556_v16, %v5919_v38  ;;  %v3073_v42 = vmul.f32 %v9558_v32, %v3072_v40 }
 0x5d4   :  { %v5924_v31 = vmul.f32 %v5923_v28, %v12761_v3  ;;  %v6013_v3 = vpop.f32.mrf.mxu1 }
 0x5d5   :  { %v3074_v44 = vmul.f32 0.5, %v3073_v42  ;;  %v6014_v63 = vadd.f32 %v9527_v25, %v6013_v3 }
 0x5d6   :  { %v5928_v19 = vmul.f32 %v9523_v20, %v5924_v31 }
 0x5d7   :  { %v3075_v47 = vsub.f32 1.5, %v3074_v44  ;;  %v6016_v30 = vmax.f32 %v6014_v63, 0.0 }
 0x5d8   :  { %v5932_v46 = vadd.f32 %v9524_v43, %v5928_v19 }
 0x5d9   :  { %v3076_v8 = vmul.f32 %v9558_v32, %v3075_v47 }
 0x5da   :  { %9559 = vtanh.f32 %v5932_v46 }
 0x5db   :  { %v3080_v49 = vsel %vm3079_vm7, %v9558_v32, %v3076_v8 }
 0x5dc   :  { %v3081_v56 = vmul.f32 %v3080_v49, %v12770_v60  ;;  %v9528_v60 = vld [vmem:[%s12836_s24] ss:$0 sm:$0xff] }
 0x5de   :  { %v3085_v21 = vmul.f32 %v9525_v10, %v3081_v56 }
 0x5e0   :  { %v9560_v48 = vpop.eup %9559  ;;  %v3089_v57 = vadd.f32 %v9526_v52, %v3085_v21 }
 0x5e1   :  { %8828 = vmatmul.msk.f32.vlgmr.msra.gmra.mxu2 %vm6033_vm8, %v9560_v48 }
 0x5e2   :  { %9561 = vtanh.f32 %v3089_v57 }
 0x5e8   :  { %v9562_v58 = vpop.eup %9561 }
 0x5e9   :  { %8829 = vmatmul.msk.f32.vlgmr.msra.gmra.mxu3 %vm6033_vm8, %v9562_v58  ;;  %8830 = vmatmul.msk.f32.vlgmr.msrb.gmra.mxu2 %vm6033_vm8, %v6016_v30 }
 0x664   :  { %v6054_v5 = vpop.f32.mrf.mxu2 }
 0x66c   :  { %v6077_v62 = vpop.f32.mrf.mxu3  ;;  %v6108_v35 = vpop.f32.mrf.mxu2 }
 0x66d   :  { %v6078_v29 = vadd.f32 %v6077_v62, %v6054_v5 }
 0x66f   :  { %v6111_v55 = vadd.f32 %v6108_v35, %v6078_v29 }
 0x671   :  { %v6116_v27 = vadd.f32 %v9528_v60, %v6111_v55 }
 0x673   :  { %6117 = vst [vmem:[#allocation20] sm:$0x3] %v6116_v27 }
 0x674   :  { %6128 = dma.vmem_to_hbm [thread:$0]  %s6124_s8, 32, %s6126_s18, [#allocation4]  }
 0x675   :  { %9865 = dma.done.wait [#allocation4], 32  }
 0x676   :  { %9866 = vsyncadd [#allocation4], 4294967264 }
 0x677   :  { %6133 = vsyncpa [#allocation3], 1 }
 0x678   :  { %6134 = vsyncpa [#allocation6], 1 }
 0x679   :  { %6135 = vsyncpa [#allocation9], 1 }
 0x67a   :  { %6136 = vsyncpa [#allocation12], 1 }
 0x67b   :  { %6137 = vsyncpa [#allocation15], 1 }
 0x67c   :  { %6138 = vsyncpa [#allocation18], 1 }
 0x67d   :  { %6139 = vsyncpa [#allocation4], 1 }

</bundles_post_ra>
